<compile_context>
chip_gen: v7x
topology: tpu7x:2x2x1
jax: 0.10.0
libtpu: 0.0.40
codegen_flags: <defaults>
</compile_context>

<pallas_src>
import math
from functools import partial

import jax
import jax.numpy as jnp
from jax import lax
from jax.experimental import pallas as pl
from jax.experimental.pallas import tpu as pltpu


def _round_up(v, m):
    return ((v + m - 1) // m) * m


# ----------------------------------------------------------------------------
# Pallas kernel 1: fused ReLU + Linear  (y = relu(x) @ W + b)
# ----------------------------------------------------------------------------
def _relu_linear_kernel(x_ref, w_ref, b_ref, o_ref, *, relu_in):
    tm = x_ref.shape[0]
    K = w_ref.shape[0]
    Cp = w_ref.shape[1]
    xv = x_ref[...]
    if relu_in:
        xv = jnp.maximum(xv, 0.0)
    wv = w_ref[...]
    acc = jnp.zeros((tm, Cp), jnp.float32)
    # K is tiny (c*k^2 = 9) and static -> fully unrolled VPU broadcast-mul-add;
    # this path is memory-bound, the MXU would be idle anyway.
    for kk in range(K):
        acc = acc + xv[:, kk:kk + 1] * wv[kk:kk + 1, :]
    o_ref[...] = (acc + b_ref[...]).astype(o_ref.dtype)


def pallas_relu_linear(x2d, w_pad, b_pad, c_out, *, relu_in=True, tm=512):
    """x2d: (N, K) f32; w_pad: (K, Cp) f32 (Cp = 128-multiple, zero-padded cols);
    b_pad: (1, Cp) f32.  Returns (N, c_out)."""
    N, K = x2d.shape
    Kw, Cp = w_pad.shape
    assert Kw == K and Cp % 128 == 0

    if N < tm:
        tm = _round_up(max(N, 8), 8)
    Np = _round_up(N, tm)
    if Np != N:                      # only a ragged last tile ever gets padded
        x2d = jnp.pad(x2d, ((0, Np - N), (0, 0)))
    grid = (Np // tm,)

    cost = pl.CostEstimate(
        flops=2 * Np * K * Cp,
        transcendentals=0,
        bytes_accessed=4 * (Np * K + K * Cp + Cp + Np * Cp),
    )

    yp = pl.pallas_call(
        partial(_relu_linear_kernel, relu_in=relu_in),
        out_shape=jax.ShapeDtypeStruct((Np, Cp), jnp.float32),
        grid=grid,
        in_specs=[
            pl.BlockSpec((tm, K), lambda i: (i, 0)),     # K = full dim (no pad)
            pl.BlockSpec((K, Cp), lambda i: (0, 0)),     # weight resident
            pl.BlockSpec((1, Cp), lambda i: (0, 0)),     # bias resident
        ],
        out_specs=pl.BlockSpec((tm, Cp), lambda i: (i, 0)),   # lane-dense (128)
        compiler_params=pltpu.CompilerParams(
            dimension_semantics=("parallel",),           # shard rows over TCs (v7x)
            vmem_limit_bytes=32 * 1024 * 1024,
        ),
        cost_estimate=cost,
    )(x2d, w_pad, b_pad)
    return yp[:N, :c_out]


# ----------------------------------------------------------------------------
# Pallas kernel 2: spectral mixing for the 4 low-mode corner blocks
#   out[b,o,p] = sum_i x[b,i,p] * w[i,o,p]   (complex, split into real MACs)
# ----------------------------------------------------------------------------
def _spectral_kernel(xr_ref, xi_ref, wr_ref, wi_ref, or_ref, oi_ref):
    _, B, Cin, P = xr_ref.shape
    Cout = wr_ref.shape[2]
    xr = xr_ref[0]          # (B, Cin, P)
    xi = xi_ref[0]
    wr = wr_ref[0]          # (Cin, Cout, P)
    wi = wi_ref[0]
    acc_r = jnp.zeros((B, Cout, P), jnp.float32)
    acc_i = jnp.zeros((B, Cout, P), jnp.float32)
    for i in range(Cin):                       # Cin small & static -> unrolled
        xre = xr[:, i:i + 1, :]                # (B, 1, P)
        xim = xi[:, i:i + 1, :]
        wre = wr[i:i + 1]                      # (1, Cout, P)
        wim = wi[i:i + 1]
        acc_r = acc_r + xre * wre - xim * wim
        acc_i = acc_i + xre * wim + xim * wre
    or_ref[0] = acc_r
    oi_ref[0] = acc_i


def pallas_spectral_mix(xr, xi, wr, wi):
    """xr/xi: (4, B, Cin, P) f32; wr/wi: (4, Cin, Cout, P) f32 -> re,im (4,B,Cout,P)."""
    nblk, B, Cin, P = xr.shape
    Cout = wr.shape[2]
    cost = pl.CostEstimate(
        flops=8 * nblk * B * Cin * Cout * P,
        transcendentals=0,
        bytes_accessed=4 * (2 * nblk * B * Cin * P + 2 * nblk * Cin * Cout * P
                            + 2 * nblk * B * Cout * P),
    )
    o_re, o_im = pl.pallas_call(
        _spectral_kernel,
        out_shape=(jax.ShapeDtypeStruct((nblk, B, Cout, P), jnp.float32),
                   jax.ShapeDtypeStruct((nblk, B, Cout, P), jnp.float32)),
        grid=(nblk,),
        in_specs=[
            pl.BlockSpec((1, B, Cin, P), lambda i: (i, 0, 0, 0)),
            pl.BlockSpec((1, B, Cin, P), lambda i: (i, 0, 0, 0)),
            pl.BlockSpec((1, Cin, Cout, P), lambda i: (i, 0, 0, 0)),
            pl.BlockSpec((1, Cin, Cout, P), lambda i: (i, 0, 0, 0)),
        ],
        out_specs=(
            pl.BlockSpec((1, B, Cout, P), lambda i: (i, 0, 0, 0)),
            pl.BlockSpec((1, B, Cout, P), lambda i: (i, 0, 0, 0)),
        ),
        compiler_params=pltpu.CompilerParams(
            dimension_semantics=("parallel",),
            vmem_limit_bytes=32 * 1024 * 1024,
        ),
        cost_estimate=cost,
    )(xr, xi, wr, wi)
    return o_re, o_im


# ----------------------------------------------------------------------------
# Forward pass of sparseKernelFT3d
# ----------------------------------------------------------------------------
def sparse_kernel_ft_3d_forward(x, params, modes):
    B, Nx, Ny, T, c, ich = x.shape
    C = c * ich
    xf = x.reshape(B, Nx, Ny, T, C)
    xc = jnp.transpose(xf, (0, 4, 1, 2, 3))                  # (B, C, Nx, Ny, T)

    # TODO(synk): rfftn / irfftn have no Pallas TPU equivalent; kept in plain JAX.
    x_fft = jnp.fft.rfftn(xc, axes=(-3, -2, -1))             # (B, C, Nx, Ny, T//2+1)
    Tf = T // 2 + 1
    l1 = min(modes, Nx // 2 + 1)
    l2 = min(modes, Ny // 2 + 1)
    m = modes
    P = l1 * l2 * m

    corners = [
        x_fft[:, :, :l1, :l2, :m],
        x_fft[:, :, -l1:, :l2, :m],
        x_fft[:, :, :l1, -l2:, :m],
        x_fft[:, :, -l1:, -l2:, :m],
    ]
    xs = jnp.stack(corners, axis=0).reshape(4, B, C, P)
    xr = jnp.real(xs).astype(jnp.float32)
    xi = jnp.imag(xs).astype(jnp.float32)

    w_re = params["w_re"][:, :, :, :l1, :l2, :].reshape(4, C, C, P)
    w_im = params["w_im"][:, :, :, :l1, :l2, :].reshape(4, C, C, P)

    o_re, o_im = pallas_spectral_mix(xr, xi, w_re, w_im)
    o_c = lax.complex(o_re, o_im).reshape(4, B, C, l1, l2, m)

    out_ft = jnp.zeros((B, C, Nx, Ny, Tf), jnp.complex64)
    # same write order as the torch module (last write wins on any overlap)
    out_ft = out_ft.at[:, :, :l1, :l2, :m].set(o_c[0])
    out_ft = out_ft.at[:, :, -l1:, :l2, :m].set(o_c[1])
    out_ft = out_ft.at[:, :, :l1, -l2:, :m].set(o_c[2])
    out_ft = out_ft.at[:, :, -l1:, -l2:, :m].set(o_c[3])

    xs_sp = jnp.fft.irfftn(out_ft, s=(Nx, Ny, T), axes=(-3, -2, -1))
    xs_sp = jnp.transpose(xs_sp, (0, 2, 3, 4, 1)).astype(jnp.float32)   # (B,Nx,Ny,T,C)

    y = pallas_relu_linear(xs_sp.reshape(-1, C), params["lo_w_pad"],
                           params["lo_b_pad"], C, relu_in=True)
    return y.reshape(B, Nx, Ny, T, c, ich)


# ----------------------------------------------------------------------------
# Parameters (deterministic; weights pre-padded / pre-stacked at init)
# ----------------------------------------------------------------------------
def init_params(key, k=3, alpha=5, c=1):
    C = c * k * k
    m = alpha
    kw, kb, kr, ki = jax.random.split(key, 4)

    # torch xavier_normal_ on complex (C, C, m, m, m):
    std = math.sqrt(2.0 / (2.0 * C * m ** 3))
    shape = (4, C, C, m, m, m)                 # weights1..4 stacked once at init
    w_re = jax.random.normal(kr, shape, jnp.float32) * std
    w_im = jax.random.normal(ki, shape, jnp.float32) * std

    # Lo = nn.Linear(C, C), stored as (in, out); columns padded to 128 once here
    # so the Pallas kernel does full-lane (unmasked) output stores.
    Cp = _round_up(C, 128)
    bound = 1.0 / math.sqrt(C)
    lo_w = jax.random.uniform(kw, (C, C), jnp.float32, -bound, bound)
    lo_b = jax.random.uniform(kb, (C,), jnp.float32, -bound, bound)
    lo_w_pad = jnp.zeros((C, Cp), jnp.float32).at[:, :C].set(lo_w)
    lo_b_pad = jnp.zeros((1, Cp), jnp.float32).at[0, :C].set(lo_b)
    return dict(w_re=w_re, w_im=w_im, lo_w=lo_w, lo_b=lo_b,
                lo_w_pad=lo_w_pad, lo_b_pad=lo_b_pad)


# ----------------------------------------------------------------------------
# Pure-JAX reference (for a numerical sanity check)
# ----------------------------------------------------------------------------
def reference_forward(x, params, modes):
    B, Nx, Ny, T, c, ich = x.shape
    C = c * ich
    xc = jnp.transpose(x.reshape(B, Nx, Ny, T, C), (0, 4, 1, 2, 3))
    x_fft = jnp.fft.rfftn(xc, axes=(-3, -2, -1))
    l1 = min(modes, Nx // 2 + 1)
    l2 = min(modes, Ny // 2 + 1)
    m = modes
    w = lax.complex(params["w_re"], params["w_im"])

    def cmul(a, b):
        return jnp.einsum("bixyz,ioxyz->boxyz", a, b, precision=lax.Precision.HIGHEST)

    out_ft = jnp.zeros((B, C, Nx, Ny, T // 2 + 1), jnp.complex64)
    out_ft = out_ft.at[:, :, :l1, :l2, :m].set(cmul(x_fft[:, :, :l1, :l2, :m], w[0][:, :, :l1, :l2, :]))
    out_ft = out_ft.at[:, :, -l1:, :l2, :m].set(cmul(x_fft[:, :, -l1:, :l2, :m], w[1][:, :, :l1, :l2, :]))
    out_ft = out_ft.at[:, :, :l1, -l2:, :m].set(cmul(x_fft[:, :, :l1, -l2:, :m], w[2][:, :, :l1, :l2, :]))
    out_ft = out_ft.at[:, :, -l1:, -l2:, :m].set(cmul(x_fft[:, :, -l1:, -l2:, :m], w[3][:, :, :l1, :l2, :]))

    xs = jnp.fft.irfftn(out_ft, s=(Nx, Ny, T), axes=(-3, -2, -1))
    xs = jnp.transpose(xs, (0, 2, 3, 4, 1))
    y = jnp.dot(jnp.maximum(xs, 0.0), params["lo_w"],
                precision=lax.Precision.HIGHEST) + params["lo_b"]
    return y.reshape(B, Nx, Ny, T, c, ich)


# ----------------------------------------------------------------------------
if __name__ == "__main__":
    k, alpha, c = 3, 5, 1
    modes = alpha
    B, Nx, Ny, T = 2, 16, 16, 8        # T//2+1 == modes, as the torch module requires
    ich = k * k                        # input layout (B, Nx, Ny, T, c, k^2)

    key = jax.random.PRNGKey(0)
    kx, kp = jax.random.split(key)
    x = jax.random.normal(kx, (B, Nx, Ny, T, c, ich), jnp.float32)
    params = init_params(kp, k=k, alpha=alpha, c=c)

    fwd = jax.jit(partial(sparse_kernel_ft_3d_forward, modes=modes))
    out = jax.block_until_ready(fwd(x, params))

    assert out.shape == (B, Nx, Ny, T, c, ich), out.shape
    assert bool(jnp.all(jnp.isfinite(out)))

    ref = jax.block_until_ready(jax.jit(partial(reference_forward, modes=modes))(x, params))
    err = float(jnp.max(jnp.abs(out - ref)))
    scale = float(jnp.max(jnp.abs(ref)))
    assert err <= 1e-3 * max(scale, 1.0), (err, scale)

    print("KERNEL_OK")
</pallas_src>

<mosaic_0001>
module attributes {stable_mosaic.version = 11 : i64} {
  func.func @_spectral_kernel(%arg0: i32, %arg1: memref<1x2x9x125xf32, #tpu.memory_space<vmem>>, %arg2: memref<1x2x9x125xf32, #tpu.memory_space<vmem>>, %arg3: memref<1x9x9x125xf32, #tpu.memory_space<vmem>>, %arg4: memref<1x9x9x125xf32, #tpu.memory_space<vmem>>, %arg5: memref<1x2x9x125xf32, #tpu.memory_space<vmem>>, %arg6: memref<1x2x9x125xf32, #tpu.memory_space<vmem>>) attributes {dimension_semantics = [#tpu.dimension_semantics<parallel>], iteration_bounds = array<i64: 4>, scalar_prefetch = 0 : i64, scratch_operands = 0 : i64, tpu.core_type = #tpu.core_type<tc>, window_params = [{transform_indices = @transform_0, window_bounds = array<i64: 1, 2, 9, 125>}, {transform_indices = @transform_1, window_bounds = array<i64: 1, 2, 9, 125>}, {transform_indices = @transform_2, window_bounds = array<i64: 1, 9, 9, 125>}, {transform_indices = @transform_3, window_bounds = array<i64: 1, 9, 9, 125>}, {transform_indices = @transform_4, window_bounds = array<i64: 1, 2, 9, 125>}, {transform_indices = @transform_5, window_bounds = array<i64: 1, 2, 9, 125>}]} {
    %c0 = arith.constant 0 : index
    %c0_0 = arith.constant 0 : index
    %c0_1 = arith.constant 0 : index
    %c0_2 = arith.constant 0 : index
    %0 = vector.load %arg1[%c0, %c0_0, %c0_1, %c0_2] : memref<1x2x9x125xf32, #tpu.memory_space<vmem>>, vector<1x2x9x125xf32>
    %1 = vector.shape_cast %0 : vector<1x2x9x125xf32> to vector<2x9x125xf32>
    %c0_3 = arith.constant 0 : index
    %c0_4 = arith.constant 0 : index
    %c0_5 = arith.constant 0 : index
    %c0_6 = arith.constant 0 : index
    %2 = vector.load %arg2[%c0_3, %c0_4, %c0_5, %c0_6] : memref<1x2x9x125xf32, #tpu.memory_space<vmem>>, vector<1x2x9x125xf32>
    %3 = vector.shape_cast %2 : vector<1x2x9x125xf32> to vector<2x9x125xf32>
    %c0_7 = arith.constant 0 : index
    %c0_8 = arith.constant 0 : index
    %c0_9 = arith.constant 0 : index
    %c0_10 = arith.constant 0 : index
    %4 = vector.load %arg3[%c0_7, %c0_8, %c0_9, %c0_10] : memref<1x9x9x125xf32, #tpu.memory_space<vmem>>, vector<1x9x9x125xf32>
    %5 = vector.shape_cast %4 : vector<1x9x9x125xf32> to vector<9x9x125xf32>
    %c0_11 = arith.constant 0 : index
    %c0_12 = arith.constant 0 : index
    %c0_13 = arith.constant 0 : index
    %c0_14 = arith.constant 0 : index
    %6 = vector.load %arg4[%c0_11, %c0_12, %c0_13, %c0_14] : memref<1x9x9x125xf32, #tpu.memory_space<vmem>>, vector<1x9x9x125xf32>
    %7 = vector.shape_cast %6 : vector<1x9x9x125xf32> to vector<9x9x125xf32>
    %cst = arith.constant 0.000000e+00 : f32
    %8 = vector.broadcast %cst : f32 to vector<2x9x125xf32>
    %cst_15 = arith.constant 0.000000e+00 : f32
    %9 = vector.broadcast %cst_15 : f32 to vector<2x9x125xf32>
    %10 = vector.extract_strided_slice %1 {offsets = [0, 0, 0], sizes = [2, 1, 125], strides = [1, 1, 1]} : vector<2x9x125xf32> to vector<2x1x125xf32>
    %11 = vector.extract_strided_slice %3 {offsets = [0, 0, 0], sizes = [2, 1, 125], strides = [1, 1, 1]} : vector<2x9x125xf32> to vector<2x1x125xf32>
    %12 = vector.extract_strided_slice %5 {offsets = [0, 0, 0], sizes = [1, 9, 125], strides = [1, 1, 1]} : vector<9x9x125xf32> to vector<1x9x125xf32>
    %13 = vector.extract_strided_slice %7 {offsets = [0, 0, 0], sizes = [1, 9, 125], strides = [1, 1, 1]} : vector<9x9x125xf32> to vector<1x9x125xf32>
    %14 = vector.broadcast %10 : vector<2x1x125xf32> to vector<2x9x125xf32>
    %15 = vector.broadcast %12 : vector<1x9x125xf32> to vector<2x9x125xf32>
    %16 = arith.mulf %14, %15 : vector<2x9x125xf32>
    %17 = arith.addf %8, %16 : vector<2x9x125xf32>
    %18 = vector.broadcast %11 : vector<2x1x125xf32> to vector<2x9x125xf32>
    %19 = vector.broadcast %13 : vector<1x9x125xf32> to vector<2x9x125xf32>
    %20 = arith.mulf %18, %19 : vector<2x9x125xf32>
    %21 = arith.subf %17, %20 : vector<2x9x125xf32>
    %22 = vector.broadcast %10 : vector<2x1x125xf32> to vector<2x9x125xf32>
    %23 = vector.broadcast %13 : vector<1x9x125xf32> to vector<2x9x125xf32>
    %24 = arith.mulf %22, %23 : vector<2x9x125xf32>
    %25 = arith.addf %9, %24 : vector<2x9x125xf32>
    %26 = vector.broadcast %11 : vector<2x1x125xf32> to vector<2x9x125xf32>
    %27 = vector.broadcast %12 : vector<1x9x125xf32> to vector<2x9x125xf32>
    %28 = arith.mulf %26, %27 : vector<2x9x125xf32>
    %29 = arith.addf %25, %28 : vector<2x9x125xf32>
    %30 = vector.extract_strided_slice %1 {offsets = [0, 1, 0], sizes = [2, 1, 125], strides = [1, 1, 1]} : vector<2x9x125xf32> to vector<2x1x125xf32>
    %31 = vector.extract_strided_slice %3 {offsets = [0, 1, 0], sizes = [2, 1, 125], strides = [1, 1, 1]} : vector<2x9x125xf32> to vector<2x1x125xf32>
    %32 = vector.extract_strided_slice %5 {offsets = [1, 0, 0], sizes = [1, 9, 125], strides = [1, 1, 1]} : vector<9x9x125xf32> to vector<1x9x125xf32>
    %33 = vector.extract_strided_slice %7 {offsets = [1, 0, 0], sizes = [1, 9, 125], strides = [1, 1, 1]} : vector<9x9x125xf32> to vector<1x9x125xf32>
    %34 = vector.broadcast %30 : vector<2x1x125xf32> to vector<2x9x125xf32>
    %35 = vector.broadcast %32 : vector<1x9x125xf32> to vector<2x9x125xf32>
    %36 = arith.mulf %34, %35 : vector<2x9x125xf32>
    %37 = arith.addf %21, %36 : vector<2x9x125xf32>
    %38 = vector.broadcast %31 : vector<2x1x125xf32> to vector<2x9x125xf32>
    %39 = vector.broadcast %33 : vector<1x9x125xf32> to vector<2x9x125xf32>
    %40 = arith.mulf %38, %39 : vector<2x9x125xf32>
    %41 = arith.subf %37, %40 : vector<2x9x125xf32>
    %42 = vector.broadcast %30 : vector<2x1x125xf32> to vector<2x9x125xf32>
    %43 = vector.broadcast %33 : vector<1x9x125xf32> to vector<2x9x125xf32>
    %44 = arith.mulf %42, %43 : vector<2x9x125xf32>
    %45 = arith.addf %29, %44 : vector<2x9x125xf32>
    %46 = vector.broadcast %31 : vector<2x1x125xf32> to vector<2x9x125xf32>
    %47 = vector.broadcast %32 : vector<1x9x125xf32> to vector<2x9x125xf32>
    %48 = arith.mulf %46, %47 : vector<2x9x125xf32>
    %49 = arith.addf %45, %48 : vector<2x9x125xf32>
    %50 = vector.extract_strided_slice %1 {offsets = [0, 2, 0], sizes = [2, 1, 125], strides = [1, 1, 1]} : vector<2x9x125xf32> to vector<2x1x125xf32>
    %51 = vector.extract_strided_slice %3 {offsets = [0, 2, 0], sizes = [2, 1, 125], strides = [1, 1, 1]} : vector<2x9x125xf32> to vector<2x1x125xf32>
    %52 = vector.extract_strided_slice %5 {offsets = [2, 0, 0], sizes = [1, 9, 125], strides = [1, 1, 1]} : vector<9x9x125xf32> to vector<1x9x125xf32>
    %53 = vector.extract_strided_slice %7 {offsets = [2, 0, 0], sizes = [1, 9, 125], strides = [1, 1, 1]} : vector<9x9x125xf32> to vector<1x9x125xf32>
    %54 = vector.broadcast %50 : vector<2x1x125xf32> to vector<2x9x125xf32>
    %55 = vector.broadcast %52 : vector<1x9x125xf32> to vector<2x9x125xf32>
    %56 = arith.mulf %54, %55 : vector<2x9x125xf32>
    %57 = arith.addf %41, %56 : vector<2x9x125xf32>
    %58 = vector.broadcast %51 : vector<2x1x125xf32> to vector<2x9x125xf32>
    %59 = vector.broadcast %53 : vector<1x9x125xf32> to vector<2x9x125xf32>
    %60 = arith.mulf %58, %59 : vector<2x9x125xf32>
    %61 = arith.subf %57, %60 : vector<2x9x125xf32>
    %62 = vector.broadcast %50 : vector<2x1x125xf32> to vector<2x9x125xf32>
    %63 = vector.broadcast %53 : vector<1x9x125xf32> to vector<2x9x125xf32>
    %64 = arith.mulf %62, %63 : vector<2x9x125xf32>
    %65 = arith.addf %49, %64 : vector<2x9x125xf32>
    %66 = vector.broadcast %51 : vector<2x1x125xf32> to vector<2x9x125xf32>
    %67 = vector.broadcast %52 : vector<1x9x125xf32> to vector<2x9x125xf32>
    %68 = arith.mulf %66, %67 : vector<2x9x125xf32>
    %69 = arith.addf %65, %68 : vector<2x9x125xf32>
    %70 = vector.extract_strided_slice %1 {offsets = [0, 3, 0], sizes = [2, 1, 125], strides = [1, 1, 1]} : vector<2x9x125xf32> to vector<2x1x125xf32>
    %71 = vector.extract_strided_slice %3 {offsets = [0, 3, 0], sizes = [2, 1, 125], strides = [1, 1, 1]} : vector<2x9x125xf32> to vector<2x1x125xf32>
    %72 = vector.extract_strided_slice %5 {offsets = [3, 0, 0], sizes = [1, 9, 125], strides = [1, 1, 1]} : vector<9x9x125xf32> to vector<1x9x125xf32>
    %73 = vector.extract_strided_slice %7 {offsets = [3, 0, 0], sizes = [1, 9, 125], strides = [1, 1, 1]} : vector<9x9x125xf32> to vector<1x9x125xf32>
    %74 = vector.broadcast %70 : vector<2x1x125xf32> to vector<2x9x125xf32>
    %75 = vector.broadcast %72 : vector<1x9x125xf32> to vector<2x9x125xf32>
    %76 = arith.mulf %74, %75 : vector<2x9x125xf32>
    %77 = arith.addf %61, %76 : vector<2x9x125xf32>
    %78 = vector.broadcast %71 : vector<2x1x125xf32> to vector<2x9x125xf32>
    %79 = vector.broadcast %73 : vector<1x9x125xf32> to vector<2x9x125xf32>
    %80 = arith.mulf %78, %79 : vector<2x9x125xf32>
    %81 = arith.subf %77, %80 : vector<2x9x125xf32>
    %82 = vector.broadcast %70 : vector<2x1x125xf32> to vector<2x9x125xf32>
    %83 = vector.broadcast %73 : vector<1x9x125xf32> to vector<2x9x125xf32>
    %84 = arith.mulf %82, %83 : vector<2x9x125xf32>
    %85 = arith.addf %69, %84 : vector<2x9x125xf32>
    %86 = vector.broadcast %71 : vector<2x1x125xf32> to vector<2x9x125xf32>
    %87 = vector.broadcast %72 : vector<1x9x125xf32> to vector<2x9x125xf32>
    %88 = arith.mulf %86, %87 : vector<2x9x125xf32>
    %89 = arith.addf %85, %88 : vector<2x9x125xf32>
    %90 = vector.extract_strided_slice %1 {offsets = [0, 4, 0], sizes = [2, 1, 125], strides = [1, 1, 1]} : vector<2x9x125xf32> to vector<2x1x125xf32>
    %91 = vector.extract_strided_slice %3 {offsets = [0, 4, 0], sizes = [2, 1, 125], strides = [1, 1, 1]} : vector<2x9x125xf32> to vector<2x1x125xf32>
    %92 = vector.extract_strided_slice %5 {offsets = [4, 0, 0], sizes = [1, 9, 125], strides = [1, 1, 1]} : vector<9x9x125xf32> to vector<1x9x125xf32>
    %93 = vector.extract_strided_slice %7 {offsets = [4, 0, 0], sizes = [1, 9, 125], strides = [1, 1, 1]} : vector<9x9x125xf32> to vector<1x9x125xf32>
    %94 = vector.broadcast %90 : vector<2x1x125xf32> to vector<2x9x125xf32>
    %95 = vector.broadcast %92 : vector<1x9x125xf32> to vector<2x9x125xf32>
    %96 = arith.mulf %94, %95 : vector<2x9x125xf32>
    %97 = arith.addf %81, %96 : vector<2x9x125xf32>
    %98 = vector.broadcast %91 : vector<2x1x125xf32> to vector<2x9x125xf32>
    %99 = vector.broadcast %93 : vector<1x9x125xf32> to vector<2x9x125xf32>
    %100 = arith.mulf %98, %99 : vector<2x9x125xf32>
    %101 = arith.subf %97, %100 : vector<2x9x125xf32>
    %102 = vector.broadcast %90 : vector<2x1x125xf32> to vector<2x9x125xf32>
    %103 = vector.broadcast %93 : vector<1x9x125xf32> to vector<2x9x125xf32>
    %104 = arith.mulf %102, %103 : vector<2x9x125xf32>
    %105 = arith.addf %89, %104 : vector<2x9x125xf32>
    %106 = vector.broadcast %91 : vector<2x1x125xf32> to vector<2x9x125xf32>
    %107 = vector.broadcast %92 : vector<1x9x125xf32> to vector<2x9x125xf32>
    %108 = arith.mulf %106, %107 : vector<2x9x125xf32>
    %109 = arith.addf %105, %108 : vector<2x9x125xf32>
    %110 = vector.extract_strided_slice %1 {offsets = [0, 5, 0], sizes = [2, 1, 125], strides = [1, 1, 1]} : vector<2x9x125xf32> to vector<2x1x125xf32>
    %111 = vector.extract_strided_slice %3 {offsets = [0, 5, 0], sizes = [2, 1, 125], strides = [1, 1, 1]} : vector<2x9x125xf32> to vector<2x1x125xf32>
    %112 = vector.extract_strided_slice %5 {offsets = [5, 0, 0], sizes = [1, 9, 125], strides = [1, 1, 1]} : vector<9x9x125xf32> to vector<1x9x125xf32>
    %113 = vector.extract_strided_slice %7 {offsets = [5, 0, 0], sizes = [1, 9, 125], strides = [1, 1, 1]} : vector<9x9x125xf32> to vector<1x9x125xf32>
    %114 = vector.broadcast %110 : vector<2x1x125xf32> to vector<2x9x125xf32>
    %115 = vector.broadcast %112 : vector<1x9x125xf32> to vector<2x9x125xf32>
    %116 = arith.mulf %114, %115 : vector<2x9x125xf32>
    %117 = arith.addf %101, %116 : vector<2x9x125xf32>
    %118 = vector.broadcast %111 : vector<2x1x125xf32> to vector<2x9x125xf32>
    %119 = vector.broadcast %113 : vector<1x9x125xf32> to vector<2x9x125xf32>
    %120 = arith.mulf %118, %119 : vector<2x9x125xf32>
    %121 = arith.subf %117, %120 : vector<2x9x125xf32>
    %122 = vector.broadcast %110 : vector<2x1x125xf32> to vector<2x9x125xf32>
    %123 = vector.broadcast %113 : vector<1x9x125xf32> to vector<2x9x125xf32>
    %124 = arith.mulf %122, %123 : vector<2x9x125xf32>
    %125 = arith.addf %109, %124 : vector<2x9x125xf32>
    %126 = vector.broadcast %111 : vector<2x1x125xf32> to vector<2x9x125xf32>
    %127 = vector.broadcast %112 : vector<1x9x125xf32> to vector<2x9x125xf32>
    %128 = arith.mulf %126, %127 : vector<2x9x125xf32>
    %129 = arith.addf %125, %128 : vector<2x9x125xf32>
    %130 = vector.extract_strided_slice %1 {offsets = [0, 6, 0], sizes = [2, 1, 125], strides = [1, 1, 1]} : vector<2x9x125xf32> to vector<2x1x125xf32>
    %131 = vector.extract_strided_slice %3 {offsets = [0, 6, 0], sizes = [2, 1, 125], strides = [1, 1, 1]} : vector<2x9x125xf32> to vector<2x1x125xf32>
    %132 = vector.extract_strided_slice %5 {offsets = [6, 0, 0], sizes = [1, 9, 125], strides = [1, 1, 1]} : vector<9x9x125xf32> to vector<1x9x125xf32>
    %133 = vector.extract_strided_slice %7 {offsets = [6, 0, 0], sizes = [1, 9, 125], strides = [1, 1, 1]} : vector<9x9x125xf32> to vector<1x9x125xf32>
    %134 = vector.broadcast %130 : vector<2x1x125xf32> to vector<2x9x125xf32>
    %135 = vector.broadcast %132 : vector<1x9x125xf32> to vector<2x9x125xf32>
    %136 = arith.mulf %134, %135 : vector<2x9x125xf32>
    %137 = arith.addf %121, %136 : vector<2x9x125xf32>
    %138 = vector.broadcast %131 : vector<2x1x125xf32> to vector<2x9x125xf32>
    %139 = vector.broadcast %133 : vector<1x9x125xf32> to vector<2x9x125xf32>
    %140 = arith.mulf %138, %139 : vector<2x9x125xf32>
    %141 = arith.subf %137, %140 : vector<2x9x125xf32>
    %142 = vector.broadcast %130 : vector<2x1x125xf32> to vector<2x9x125xf32>
    %143 = vector.broadcast %133 : vector<1x9x125xf32> to vector<2x9x125xf32>
    %144 = arith.mulf %142, %143 : vector<2x9x125xf32>
    %145 = arith.addf %129, %144 : vector<2x9x125xf32>
    %146 = vector.broadcast %131 : vector<2x1x125xf32> to vector<2x9x125xf32>
    %147 = vector.broadcast %132 : vector<1x9x125xf32> to vector<2x9x125xf32>
    %148 = arith.mulf %146, %147 : vector<2x9x125xf32>
    %149 = arith.addf %145, %148 : vector<2x9x125xf32>
    %150 = vector.extract_strided_slice %1 {offsets = [0, 7, 0], sizes = [2, 1, 125], strides = [1, 1, 1]} : vector<2x9x125xf32> to vector<2x1x125xf32>
    %151 = vector.extract_strided_slice %3 {offsets = [0, 7, 0], sizes = [2, 1, 125], strides = [1, 1, 1]} : vector<2x9x125xf32> to vector<2x1x125xf32>
    %152 = vector.extract_strided_slice %5 {offsets = [7, 0, 0], sizes = [1, 9, 125], strides = [1, 1, 1]} : vector<9x9x125xf32> to vector<1x9x125xf32>
    %153 = vector.extract_strided_slice %7 {offsets = [7, 0, 0], sizes = [1, 9, 125], strides = [1, 1, 1]} : vector<9x9x125xf32> to vector<1x9x125xf32>
    %154 = vector.broadcast %150 : vector<2x1x125xf32> to vector<2x9x125xf32>
    %155 = vector.broadcast %152 : vector<1x9x125xf32> to vector<2x9x125xf32>
    %156 = arith.mulf %154, %155 : vector<2x9x125xf32>
    %157 = arith.addf %141, %156 : vector<2x9x125xf32>
    %158 = vector.broadcast %151 : vector<2x1x125xf32> to vector<2x9x125xf32>
    %159 = vector.broadcast %153 : vector<1x9x125xf32> to vector<2x9x125xf32>
    %160 = arith.mulf %158, %159 : vector<2x9x125xf32>
    %161 = arith.subf %157, %160 : vector<2x9x125xf32>
    %162 = vector.broadcast %150 : vector<2x1x125xf32> to vector<2x9x125xf32>
    %163 = vector.broadcast %153 : vector<1x9x125xf32> to vector<2x9x125xf32>
    %164 = arith.mulf %162, %163 : vector<2x9x125xf32>
    %165 = arith.addf %149, %164 : vector<2x9x125xf32>
    %166 = vector.broadcast %151 : vector<2x1x125xf32> to vector<2x9x125xf32>
    %167 = vector.broadcast %152 : vector<1x9x125xf32> to vector<2x9x125xf32>
    %168 = arith.mulf %166, %167 : vector<2x9x125xf32>
    %169 = arith.addf %165, %168 : vector<2x9x125xf32>
    %170 = vector.extract_strided_slice %1 {offsets = [0, 8, 0], sizes = [2, 1, 125], strides = [1, 1, 1]} : vector<2x9x125xf32> to vector<2x1x125xf32>
    %171 = vector.extract_strided_slice %3 {offsets = [0, 8, 0], sizes = [2, 1, 125], strides = [1, 1, 1]} : vector<2x9x125xf32> to vector<2x1x125xf32>
    %172 = vector.extract_strided_slice %5 {offsets = [8, 0, 0], sizes = [1, 9, 125], strides = [1, 1, 1]} : vector<9x9x125xf32> to vector<1x9x125xf32>
    %173 = vector.extract_strided_slice %7 {offsets = [8, 0, 0], sizes = [1, 9, 125], strides = [1, 1, 1]} : vector<9x9x125xf32> to vector<1x9x125xf32>
    %174 = vector.broadcast %170 : vector<2x1x125xf32> to vector<2x9x125xf32>
    %175 = vector.broadcast %172 : vector<1x9x125xf32> to vector<2x9x125xf32>
    %176 = arith.mulf %174, %175 : vector<2x9x125xf32>
    %177 = arith.addf %161, %176 : vector<2x9x125xf32>
    %178 = vector.broadcast %171 : vector<2x1x125xf32> to vector<2x9x125xf32>
    %179 = vector.broadcast %173 : vector<1x9x125xf32> to vector<2x9x125xf32>
    %180 = arith.mulf %178, %179 : vector<2x9x125xf32>
    %181 = arith.subf %177, %180 : vector<2x9x125xf32>
    %182 = vector.broadcast %170 : vector<2x1x125xf32> to vector<2x9x125xf32>
    %183 = vector.broadcast %173 : vector<1x9x125xf32> to vector<2x9x125xf32>
    %184 = arith.mulf %182, %183 : vector<2x9x125xf32>
    %185 = arith.addf %169, %184 : vector<2x9x125xf32>
    %186 = vector.broadcast %171 : vector<2x1x125xf32> to vector<2x9x125xf32>
    %187 = vector.broadcast %172 : vector<1x9x125xf32> to vector<2x9x125xf32>
    %188 = arith.mulf %186, %187 : vector<2x9x125xf32>
    %189 = arith.addf %185, %188 : vector<2x9x125xf32>
    %c0_16 = arith.constant 0 : index
    %c0_17 = arith.constant 0 : index
    %c0_18 = arith.constant 0 : index
    %c0_19 = arith.constant 0 : index
    %190 = vector.load %arg5[%c0_16, %c0_17, %c0_18, %c0_19] : memref<1x2x9x125xf32, #tpu.memory_space<vmem>>, vector<1x2x9x125xf32>
    %191 = vector.shape_cast %190 : vector<1x2x9x125xf32> to vector<2x9x125xf32>
    %192 = vector.shape_cast %181 : vector<2x9x125xf32> to vector<1x2x9x125xf32>
    tpu.vector_store %arg5[%c0_16, %c0_17, %c0_18, %c0_19], %192 {strides = array<i32>} : memref<1x2x9x125xf32, #tpu.memory_space<vmem>>, vector<1x2x9x125xf32>,
    %c0_20 = arith.constant 0 : index
    %c0_21 = arith.constant 0 : index
    %c0_22 = arith.constant 0 : index
    %c0_23 = arith.constant 0 : index
    %193 = vector.load %arg6[%c0_20, %c0_21, %c0_22, %c0_23] : memref<1x2x9x125xf32, #tpu.memory_space<vmem>>, vector<1x2x9x125xf32>
    %194 = vector.shape_cast %193 : vector<1x2x9x125xf32> to vector<2x9x125xf32>
    %195 = vector.shape_cast %189 : vector<2x9x125xf32> to vector<1x2x9x125xf32>
    tpu.vector_store %arg6[%c0_20, %c0_21, %c0_22, %c0_23], %195 {strides = array<i32>} : memref<1x2x9x125xf32, #tpu.memory_space<vmem>>, vector<1x2x9x125xf32>,
    return
  }
  func.func @transform_0(%arg0: i32) -> (i32, i32, i32, i32) {
    %c0_i32 = arith.constant 0 : i32
    %c0_i32_0 = arith.constant 0 : i32
    %c0_i32_1 = arith.constant 0 : i32
    %c0_i32_2 = arith.constant 0 : i32
    return %arg0, %c0_i32, %c0_i32_0, %c0_i32_1 : i32, i32, i32, i32
  }
  func.func @transform_1(%arg0: i32) -> (i32, i32, i32, i32) {
    %c0_i32 = arith.constant 0 : i32
    %c0_i32_0 = arith.constant 0 : i32
    %c0_i32_1 = arith.constant 0 : i32
    %c0_i32_2 = arith.constant 0 : i32
    return %arg0, %c0_i32, %c0_i32_0, %c0_i32_1 : i32, i32, i32, i32
  }
  func.func @transform_2(%arg0: i32) -> (i32, i32, i32, i32) {
    %c0_i32 = arith.constant 0 : i32
    %c0_i32_0 = arith.constant 0 : i32
    %c0_i32_1 = arith.constant 0 : i32
    %c0_i32_2 = arith.constant 0 : i32
    return %arg0, %c0_i32, %c0_i32_0, %c0_i32_1 : i32, i32, i32, i32
  }
  func.func @transform_3(%arg0: i32) -> (i32, i32, i32, i32) {
    %c0_i32 = arith.constant 0 : i32
    %c0_i32_0 = arith.constant 0 : i32
    %c0_i32_1 = arith.constant 0 : i32
    %c0_i32_2 = arith.constant 0 : i32
    return %arg0, %c0_i32, %c0_i32_0, %c0_i32_1 : i32, i32, i32, i32
  }
  func.func @transform_4(%arg0: i32) -> (i32, i32, i32, i32) {
    %c0_i32 = arith.constant 0 : i32
    %c0_i32_0 = arith.constant 0 : i32
    %c0_i32_1 = arith.constant 0 : i32
    %c0_i32_2 = arith.constant 0 : i32
    return %arg0, %c0_i32, %c0_i32_0, %c0_i32_1 : i32, i32, i32, i32
  }
  func.func @transform_5(%arg0: i32) -> (i32, i32, i32, i32) {
    %c0_i32 = arith.constant 0 : i32
    %c0_i32_0 = arith.constant 0 : i32
    %c0_i32_1 = arith.constant 0 : i32
    %c0_i32_2 = arith.constant 0 : i32
    return %arg0, %c0_i32, %c0_i32_0, %c0_i32_1 : i32, i32, i32, i32
  }
}

module attributes {stable_mosaic.version = 11 : i64} {
  func.func @_relu_linear_kernel(%arg0: i32, %arg1: memref<512x9xf32, #tpu.memory_space<vmem>>, %arg2: memref<9x128xf32, #tpu.memory_space<vmem>>, %arg3: memref<1x128xf32, #tpu.memory_space<vmem>>, %arg4: memref<512x128xf32, #tpu.memory_space<vmem>>) attributes {dimension_semantics = [#tpu.dimension_semantics<parallel>], iteration_bounds = array<i64: 8>, scalar_prefetch = 0 : i64, scratch_operands = 0 : i64, tpu.core_type = #tpu.core_type<tc>, window_params = [{transform_indices = @transform_0, window_bounds = array<i64: 512, 9>}, {pipeline_mode = #tpu.pipeline_mode<synchronous>, transform_indices = @transform_1, window_bounds = array<i64: 9, 128>}, {pipeline_mode = #tpu.pipeline_mode<synchronous>, transform_indices = @transform_2, window_bounds = array<i64: 1, 128>}, {transform_indices = @transform_3, window_bounds = array<i64: 512, 128>}]} {
    %c0 = arith.constant 0 : index
    %c0_0 = arith.constant 0 : index
    %0 = vector.load %arg1[%c0, %c0_0] : memref<512x9xf32, #tpu.memory_space<vmem>>, vector<512x9xf32>
    %cst = arith.constant 0.000000e+00 : f32
    %1 = vector.broadcast %cst : f32 to vector<512x9xf32>
    %2 = arith.maximumf %0, %1 : vector<512x9xf32>
    %c0_1 = arith.constant 0 : index
    %c0_2 = arith.constant 0 : index
    %3 = vector.load %arg2[%c0_1, %c0_2] : memref<9x128xf32, #tpu.memory_space<vmem>>, vector<9x128xf32>
    %cst_3 = arith.constant 0.000000e+00 : f32
    %4 = vector.broadcast %cst_3 : f32 to vector<512x128xf32>
    %5 = vector.extract_strided_slice %2 {offsets = [0, 0], sizes = [512, 1], strides = [1, 1]} : vector<512x9xf32> to vector<512x1xf32>
    %6 = vector.extract_strided_slice %3 {offsets = [0, 0], sizes = [1, 128], strides = [1, 1]} : vector<9x128xf32> to vector<1x128xf32>
    %7 = vector.broadcast %5 : vector<512x1xf32> to vector<512x128xf32>
    %8 = vector.broadcast %6 : vector<1x128xf32> to vector<512x128xf32>
    %9 = arith.mulf %7, %8 : vector<512x128xf32>
    %10 = arith.addf %4, %9 : vector<512x128xf32>
    %11 = vector.extract_strided_slice %2 {offsets = [0, 1], sizes = [512, 1], strides = [1, 1]} : vector<512x9xf32> to vector<512x1xf32>
    %12 = vector.extract_strided_slice %3 {offsets = [1, 0], sizes = [1, 128], strides = [1, 1]} : vector<9x128xf32> to vector<1x128xf32>
    %13 = vector.broadcast %11 : vector<512x1xf32> to vector<512x128xf32>
    %14 = vector.broadcast %12 : vector<1x128xf32> to vector<512x128xf32>
    %15 = arith.mulf %13, %14 : vector<512x128xf32>
    %16 = arith.addf %10, %15 : vector<512x128xf32>
    %17 = vector.extract_strided_slice %2 {offsets = [0, 2], sizes = [512, 1], strides = [1, 1]} : vector<512x9xf32> to vector<512x1xf32>
    %18 = vector.extract_strided_slice %3 {offsets = [2, 0], sizes = [1, 128], strides = [1, 1]} : vector<9x128xf32> to vector<1x128xf32>
    %19 = vector.broadcast %17 : vector<512x1xf32> to vector<512x128xf32>
    %20 = vector.broadcast %18 : vector<1x128xf32> to vector<512x128xf32>
    %21 = arith.mulf %19, %20 : vector<512x128xf32>
    %22 = arith.addf %16, %21 : vector<512x128xf32>
    %23 = vector.extract_strided_slice %2 {offsets = [0, 3], sizes = [512, 1], strides = [1, 1]} : vector<512x9xf32> to vector<512x1xf32>
    %24 = vector.extract_strided_slice %3 {offsets = [3, 0], sizes = [1, 128], strides = [1, 1]} : vector<9x128xf32> to vector<1x128xf32>
    %25 = vector.broadcast %23 : vector<512x1xf32> to vector<512x128xf32>
    %26 = vector.broadcast %24 : vector<1x128xf32> to vector<512x128xf32>
    %27 = arith.mulf %25, %26 : vector<512x128xf32>
    %28 = arith.addf %22, %27 : vector<512x128xf32>
    %29 = vector.extract_strided_slice %2 {offsets = [0, 4], sizes = [512, 1], strides = [1, 1]} : vector<512x9xf32> to vector<512x1xf32>
    %30 = vector.extract_strided_slice %3 {offsets = [4, 0], sizes = [1, 128], strides = [1, 1]} : vector<9x128xf32> to vector<1x128xf32>
    %31 = vector.broadcast %29 : vector<512x1xf32> to vector<512x128xf32>
    %32 = vector.broadcast %30 : vector<1x128xf32> to vector<512x128xf32>
    %33 = arith.mulf %31, %32 : vector<512x128xf32>
    %34 = arith.addf %28, %33 : vector<512x128xf32>
    %35 = vector.extract_strided_slice %2 {offsets = [0, 5], sizes = [512, 1], strides = [1, 1]} : vector<512x9xf32> to vector<512x1xf32>
    %36 = vector.extract_strided_slice %3 {offsets = [5, 0], sizes = [1, 128], strides = [1, 1]} : vector<9x128xf32> to vector<1x128xf32>
    %37 = vector.broadcast %35 : vector<512x1xf32> to vector<512x128xf32>
    %38 = vector.broadcast %36 : vector<1x128xf32> to vector<512x128xf32>
    %39 = arith.mulf %37, %38 : vector<512x128xf32>
    %40 = arith.addf %34, %39 : vector<512x128xf32>
    %41 = vector.extract_strided_slice %2 {offsets = [0, 6], sizes = [512, 1], strides = [1, 1]} : vector<512x9xf32> to vector<512x1xf32>
    %42 = vector.extract_strided_slice %3 {offsets = [6, 0], sizes = [1, 128], strides = [1, 1]} : vector<9x128xf32> to vector<1x128xf32>
    %43 = vector.broadcast %41 : vector<512x1xf32> to vector<512x128xf32>
    %44 = vector.broadcast %42 : vector<1x128xf32> to vector<512x128xf32>
    %45 = arith.mulf %43, %44 : vector<512x128xf32>
    %46 = arith.addf %40, %45 : vector<512x128xf32>
    %47 = vector.extract_strided_slice %2 {offsets = [0, 7], sizes = [512, 1], strides = [1, 1]} : vector<512x9xf32> to vector<512x1xf32>
    %48 = vector.extract_strided_slice %3 {offsets = [7, 0], sizes = [1, 128], strides = [1, 1]} : vector<9x128xf32> to vector<1x128xf32>
    %49 = vector.broadcast %47 : vector<512x1xf32> to vector<512x128xf32>
    %50 = vector.broadcast %48 : vector<1x128xf32> to vector<512x128xf32>
    %51 = arith.mulf %49, %50 : vector<512x128xf32>
    %52 = arith.addf %46, %51 : vector<512x128xf32>
    %53 = vector.extract_strided_slice %2 {offsets = [0, 8], sizes = [512, 1], strides = [1, 1]} : vector<512x9xf32> to vector<512x1xf32>
    %54 = vector.extract_strided_slice %3 {offsets = [8, 0], sizes = [1, 128], strides = [1, 1]} : vector<9x128xf32> to vector<1x128xf32>
    %55 = vector.broadcast %53 : vector<512x1xf32> to vector<512x128xf32>
    %56 = vector.broadcast %54 : vector<1x128xf32> to vector<512x128xf32>
    %57 = arith.mulf %55, %56 : vector<512x128xf32>
    %58 = arith.addf %52, %57 : vector<512x128xf32>
    %c0_4 = arith.constant 0 : index
    %c0_5 = arith.constant 0 : index
    %59 = vector.load %arg3[%c0_4, %c0_5] : memref<1x128xf32, #tpu.memory_space<vmem>>, vector<1x128xf32>
    %60 = vector.broadcast %59 : vector<1x128xf32> to vector<512x128xf32>
    %61 = arith.addf %58, %60 : vector<512x128xf32>
    %c0_6 = arith.constant 0 : index
    %c0_7 = arith.constant 0 : index
    %62 = vector.load %arg4[%c0_6, %c0_7] : memref<512x128xf32, #tpu.memory_space<vmem>>, vector<512x128xf32>
    tpu.vector_store %arg4[%c0_6, %c0_7], %61 {strides = array<i32>} : memref<512x128xf32, #tpu.memory_space<vmem>>, vector<512x128xf32>,
    return
  }
  func.func @transform_0(%arg0: i32) -> (i32, i32) {
    %c0_i32 = arith.constant 0 : i32
    %c0_i32_0 = arith.constant 0 : i32
    return %arg0, %c0_i32 : i32, i32
  }
  func.func @transform_1(%arg0: i32) -> (i32, i32) {
    %c0_i32 = arith.constant 0 : i32
    %c0_i32_0 = arith.constant 0 : i32
    %c0_i32_1 = arith.constant 0 : i32
    return %c0_i32, %c0_i32_0 : i32, i32
  }
  func.func @transform_2(%arg0: i32) -> (i32, i32) {
    %c0_i32 = arith.constant 0 : i32
    %c0_i32_0 = arith.constant 0 : i32
    %c0_i32_1 = arith.constant 0 : i32
    return %c0_i32, %c0_i32_0 : i32, i32
  }
  func.func @transform_3(%arg0: i32) -> (i32, i32) {
    %c0_i32 = arith.constant 0 : i32
    %c0_i32_0 = arith.constant 0 : i32
    return %arg0, %c0_i32 : i32, i32
  }
}

</mosaic_0001>

<bundles_post_ra>
// kernel: sparse_kernel_ft_3d_forward.2
= control target key start
LH: loop header
LB: loop body
LE: loop exit
PB: predicated region body
PF: predicated region fallthrough
CT: control target
= control target key end

     0   :  { %s980_s18 = smov 0   ;;  %s1613_s0 = inlined_call_operand.vmem [shape: f32[4,2,9,125], index: 0, kind: input, shape index: {}]   ;;  %s1614_s1 = inlined_call_operand.vmem [shape: f32[4,2,9,125], index: 1, kind: input, shape index: {}]   ;;  %s1615_s2 = inlined_call_operand.vmem [shape: f32[4,9,9,125], index: 2, kind: input, shape index: {}]   ;;  %s1616_s3 = inlined_call_operand.vmem [shape: f32[4,9,9,125], index: 3, kind: input, shape index: {}]   ;;  %s1617_s4 = inlined_call_operand.vmem [shape: f32[4,2,9,125], index: 4, kind: output, shape index: {0}]   ;;  %s1618_s5 = inlined_call_operand.vmem [shape: f32[4,2,9,125], index: 5, kind: output, shape index: {1}]  }
   0x1 LB: > { %s908_s19 = sadd.s32 4294967295, %s948_s18   ;;  %p912_p0 = scmp.ge.s32.totalorder %s948_s18, 1  ;;  %s948_s18 = sphi %s980_s18, %s16_s18  }
   0x2   : > { %p220_p1 = scmp.lt.s32.totalorder %s948_s18, 5 }
   0x4   : > { %p221_p2 = pnand %p912_p0, %p220_p1 }
   0x6   : > { %224 = sbr.rel (%p221_p2) target bundleno = 121 (0x79), region = 36 }
   0xd   : > { %p268_p3 = scmp.lt.s32.totalorder %s908_s19, 3  ;;  %v342_v0 = vlaneseq  ;;  %vm774_vm0 = vcmask 1022976   ;;  %vm776_vm1 = vcmask 1015808  }
   0xf   : > { %s1856_s19 = smov (!%p268_p3, %s908_s19), 3  ;;  %v343_v1 = vshrl.u32 %v342_v0, 7 }
  0x10   : > { %s988_s20 = sshll.u32 %s1856_s19, 5  ;;  %s933_s21 = smul.u32 144, %s1856_s19 }
  0x11   : > { %v344_v2 = vsub.s32 0, %v343_v1  ;;  %v392_v3 = vsub.s32 1, %v343_v1  ;;  %s994_s24 = scalar_lea.vmem %s1613_s0, %s988_s20  ;;  %s1000_s27 = scalar_lea.vmem %s1614_s1, %s988_s20  ;;  %v440_v10 = vsub.s32 2, %v343_v1  ;;  %v488_v12 = vsub.s32 3, %v343_v1 }
  0x12   : > { %s1005_s30 = scalar_lea.vmem %s1615_s2, %s933_s21  ;;  %v1008_v4 = vld [vmem:[%s994_s24] sm:$0xff]  ;;  %s1019_s8 = scalar_lea.vmem %s1616_s3, %s933_s21  ;;  %v1034_v13 = vld [vmem:[%s994_s24 + $0x10] sm:$0xff]  ;;  %v1044_v17 = vsub.s32 4, %v343_v1  ;;  %v1046_v18 = vsub.s32 5, %v343_v1  ;;  %v1058_v23 = vsub.s32 6, %v343_v1  ;;  %v1075_v29 = vsub.s32 7, %v343_v1 }
  0x13   : > { %v1011_v5 = vld [vmem:[%s1000_s27] sm:$0xff]  ;;  %v1014_v6 = vrot.slane %v1008_v4, %v344_v2  ;;  %v1028_v9 = vrot.slane %v1008_v4, %v392_v3  ;;  %v1031_v11 = vld [vmem:[%s1005_s30 + $0x10] sm:$0xff]  ;;  %v1056_v22 = vrot.slane %v1008_v4, %v440_v10  ;;  %v1067_v26 = vrot.slane %v1034_v13, %v344_v2  ;;  %v1101_v39 = vld [vmem:[%s1005_s30 + $0x8] sm:$0x1]  ;;  %s1402_s11 = scalar_lea.vmem %s1617_s4, %s988_s20  ;;  %s1550_s14 = scalar_lea.vmem %s1618_s5, %s988_s20 }
  0x14   : > { %v1022_v7 = vld [vmem:[%s1005_s30] sm:$0xff]  ;;  %v1025_v8 = vrot.slane %v1011_v5, %v344_v2  ;;  %1733 = vst [vmem:[#allocation6_spill] sm:$0xff] %v1031_v11  ;;  %v1039_v15 = vrot.slane %v1011_v5, %v392_v3  ;;  %v1049_v19 = vld [vmem:[%s1000_s27 + $0x10] sm:$0xff]  ;;  %v1070_v27 = vrot.slane %v1011_v5, %v440_v10  ;;  %v1073_v28 = vrot.slane %v1008_v4, %v488_v12  ;;  %v1115_v45 = vld [vmem:[%s1005_s30 + $0x18] sm:$0x1] }
  0x15   : > { %1729 = vst [vmem:[#allocation2_spill] sm:$0xff] %v1014_v6  ;;  %1730 = vst [vmem:[#allocation3_spill] sm:$0xff] %v1022_v7  ;;  %v350_v14 = vmul.f32 %v1014_v6, %v1022_v7  ;;  %v1042_v16 = vld [vmem:[%s1019_s8] sm:$0xff]  ;;  %v398_v21 = vmul.f32 %v1028_v9, %v1031_v11  ;;  %v1064_v25 = vld [vmem:[%s1019_s8 + $0x10] sm:$0xff]  ;;  %v1081_v32 = vrot.slane %v1034_v13, %v392_v3 }
  0x16   : > { %1731 = vst [vmem:[#allocation4_spill] sm:$0xff] %v1025_v8  ;;  %1732 = vst [vmem:[#allocation5_spill] sm:$0xff] %v1028_v9  ;;  %v366_v20 = vmul.f32 %v1025_v8, %v1042_v16  ;;  %v1061_v24 = vld [vmem:[%s1005_s30 + $0x20] sm:$0xff]  ;;  %v1078_v30 = vld [vmem:[%s1005_s30 + $0x30] sm:$0xff]  ;;  %v414_v33 = vmul.f32 %v1039_v15, %v1064_v25  ;;  %v1086_v34 = vrot.slane %v1011_v5, %v488_v12 }
  0x17   : > { %1734 = vst [vmem:[#allocation7_spill] sm:$0xff] %v1039_v15  ;;  %1735 = vst [vmem:[#allocation8_spill] sm:$0xff] %v1042_v16  ;;  %v1089_v35 = vrot.slane %v1049_v19, %v344_v2  ;;  %v1092_v36 = vrot.slane %v1049_v19, %v392_v3  ;;  %v1095_v37 = vrot.slane %v1034_v13, %v440_v10  ;;  %v1104_v40 = vld [vmem:[%s1019_s8 + $0x20] sm:$0xff]  ;;  %v1118_v46 = vld [vmem:[%s1019_s8 + $0x30] sm:$0xff] }
  0x18   : > { %1736 = vst [vmem:[#allocation9_spill] sm:$0xff] %v1056_v22  ;;  %1737 = vst [vmem:[#allocation10_spill] sm:$0xff] %v1064_v25  ;;  %v370_v31 = vsub.f32 %v350_v14, %v366_v20  ;;  %v1098_v38 = vrot.slane %v1049_v19, %v440_v10  ;;  %v446_v42 = vmul.f32 %v1056_v22, %v1061_v24  ;;  %v1133_v51 = vld [vmem:[%s1019_s8 + $0x8] sm:$0x1]  ;;  %v1136_v52 = vld [vmem:[%s1005_s30 + $0x40] sm:$0xff] }
  0x19   : > { %1738 = vst [vmem:[#allocation11_spill] sm:$0xff] %v1067_v26  ;;  %1739 = vst [vmem:[#allocation12_spill] sm:$0xff] %v1070_v27  ;;  %v1109_v43 = vrot.slane %v1034_v13, %v488_v12  ;;  %v1112_v44 = vrot.slane %v1049_v19, %v488_v12  ;;  %v462_v47 = vmul.f32 %v1070_v27, %v1104_v40  ;;  %v1157_v60 = vld [vmem:[%s1005_s30 + $0x28] sm:$0x1]  ;;  %v1160_v61 = vld [vmem:[%s1019_s8 + $0x18] sm:$0x1] }
  0x1a   : > { %1740 = vst [vmem:[#allocation13_spill] sm:$0xff] %v1073_v28  ;;  %1741 = vst [vmem:[#allocation14_spill] sm:$0xff] %v1075_v29  ;;  %v402_v41 = vadd.f32 %v398_v21, %v370_v31  ;;  %v494_v48 = vmul.f32 %v1073_v28, %v1078_v30  ;;  %v1126_v49 = vrot.slane %v1008_v4, %v1044_v17  ;;  %v1165_v63 = vld [vmem:[%s1005_s30 + $0x50] sm:$0xff]  ;;  %v1168_v0 = vld [vmem:[%s1005_s30 + $0x60] sm:$0xff] }
  0x1b   : > { %1742 = vst [vmem:[#allocation15_spill] sm:$0xff] %v1081_v32  ;;  %1743 = vst [vmem:[#allocation16_spill] sm:$0xff] %v1086_v34  ;;  %v1130_v50 = vrot.slane %v1011_v5, %v1044_v17  ;;  %v510_v54 = vmul.f32 %v1086_v34, %v1118_v46  ;;  %v351_v55 = vmul.f32 %v1014_v6, %v1101_v39  ;;  %v1171_v1 = vld [vmem:[%s1019_s8 + $0x40] sm:$0xff]  ;;  %v1180_v14 = vld [vmem:[%s1005_s30 + $0x70] sm:$0xff] }
  0x1c   : > { %1744 = vst [vmem:[#allocation17_spill] sm:$0xff] %v1089_v35  ;;  %1745 = vst [vmem:[#allocation18_spill] sm:$0xff] %v1092_v36  ;;  %v418_v53 = vsub.f32 %v402_v41, %v414_v33  ;;  %v367_v56 = vmul.f32 %v1025_v8, %v1133_v51  ;;  %v1146_v57 = vrot.slane %v1008_v4, %v1046_v18  ;;  %v1195_v41 = vld [vmem:[%s1019_s8 + $0x50] sm:$0xff]  ;;  %v1210_v8 = vld [vmem:[%s994_s24 + $0x8] ss:$0 sm:$0xff] }
  0x1d   : > { %1746 = vst [vmem:[#allocation19_spill] sm:$0xff] %v1095_v37  ;;  %1747 = vst [vmem:[#allocation20_spill] sm:$0xff] %v1098_v38  ;;  %v1150_v58 = vrot.slane %v1011_v5, %v1046_v18  ;;  %v1154_v59 = vrot.slane %v1008_v4, %v1058_v23  ;;  %v399_v62 = vmul.f32 %v1028_v9, %v1115_v45 }
  0x1e   : > { %1748 = vst [vmem:[#allocation21_spill] sm:$0xff] %v1109_v43  ;;  %1749 = vst [vmem:[#allocation22_spill] sm:$0xff] %v1112_v44  ;;  %v450_v2 = vadd.f32 %v446_v42, %v418_v53  ;;  %v1175_v3 = vrot.slane %v1034_v13, %v1044_v17  ;;  %v371_v10 = vsub.f32 %v351_v55, %v367_v56  ;;  %v1202_v55 = vld [vmem:[%s1005_s30 + $0x38] sm:$0x1]  ;;  %v1205_v56 = vld [vmem:[%s1019_s8 + $0x28] sm:$0x1] }
  0x1f   : > { %1750 = vst [vmem:[#allocation23_spill] sm:$0xff] %v1126_v49  ;;  %1751 = vst [vmem:[#allocation24_spill] sm:$0xff] %v1130_v50  ;;  %v415_v12 = vmul.f32 %v1039_v15, %v1160_v61  ;;  %v542_v20 = vmul.f32 %v1126_v49, %v1136_v52  ;;  %v558_v21 = vmul.f32 %v1130_v50, %v1171_v1 }
  0x20   : > { %1752 = vst [vmem:[#allocation25_spill] sm:$0xff] %v1146_v57  ;;  %1753 = vst [vmem:[#allocation26_spill] sm:$0xff] %v1150_v58  ;;  %v1188_v31 = vrot.slane %v1011_v5, %v1058_v23  ;;  %v1192_v33 = vrot.slane %v1008_v4, %v1075_v29  ;;  %v466_v42 = vsub.f32 %v450_v2, %v462_v47  ;;  %v1225_v2 = vld [vmem:[%s1000_s27 + $0x8] ss:$0 sm:$0xff] }
  0x21   : > { %1754 = vst [vmem:[#allocation27_spill] sm:$0xff] %v1154_v59  ;;  %1755 = vst [vmem:[#allocation28_spill] sm:$0xff] %v1157_v60  ;;  %v1199_v53 = vrot.slane %v1011_v5, %v1075_v29  ;;  %v403_v15 = vadd.f32 %v399_v62, %v371_v10  ;;  %v447_v9 = vmul.f32 %v1056_v22, %v1157_v60  ;;  %v1228_v10 = vld [vmem:[%s1005_s30 + $0x80] sm:$0xff] }
  0x22   : > { %1756 = vst [vmem:[#allocation29_spill] sm:$0xff] %v1165_v63  ;;  %1757 = vst [vmem:[#allocation30_spill] sm:$0xff] %v1168_v0  ;;  %v590_v4 = vmul.f32 %v1146_v57, %v1165_v63  ;;  %v1216_v47 = vmul.f32 %v1150_v58, %v1195_v41  ;;  %v1220_v5 = vmul.f32 %v1154_v59, %v1168_v0  ;;  %v1231_v22 = vld [vmem:[%s1019_s8 + $0x60] sm:$0xff]  ;;  %v1238_v63 = vld [vmem:[%s1019_s8 + $0x70] sm:$0xff] }
  0x23   : > { %1758 = vst [vmem:[#allocation31_spill] sm:$0xff] %v1175_v3  ;;  %1759 = vst [vmem:[#allocation32_spill] sm:$0xff] %v1180_v14  ;;  %v463_v62 = vmul.f32 %v1070_v27, %v1205_v56  ;;  %v498_v6 = vadd.f32 %v494_v48, %v466_v42  ;;  %v419_v29 = vsub.f32 %v403_v15, %v415_v12  ;;  %v1241_v27 = vld [vmem:[%s1019_s8 + $0x80] sm:$0xff]  ;;  %v1256_v42 = vld [vmem:[%s1005_s30 + $0x48] sm:$0x1] }
  0x24   : > { %1760 = vst [vmem:[#allocation33_spill] sm:$0xff] %v1188_v31  ;;  %1761 = vst [vmem:[#allocation34_spill] sm:$0xff] %v1192_v33  ;;  %v368_v0 = vmul.f32 %v1089_v35, %v1042_v16  ;;  %v1249_v60 = vmul.f32 %v1192_v33, %v1180_v14  ;;  %v495_v15 = vmul.f32 %v1073_v28, %v1202_v55  ;;  %v1262_v16 = vld [vmem:[%s1019_s8 + $0x38] sm:$0x1] }
  0x25   : > { %1762 = vst [vmem:[#allocation35_spill] sm:$0xff] %v1195_v41  ;;  %1763 = vst [vmem:[#allocation36_spill] sm:$0xff] %v1199_v53  ;;  %v352_v41 = vmul.f32 %v1067_v26, %v1022_v7  ;;  %v400_v48 = vmul.f32 %v1081_v32, %v1031_v11  ;;  %v514_v12 = vsub.f32 %v498_v6, %v510_v54  ;;  %v1259_v7 = vld [vmem:[%s1005_s30 + $0x58] sm:$0x1]  ;;  %v1279_v54 = vld [vmem:[%s1005_s30 + $0x68] sm:$0x1] }
  0x26   : > { %1764 = vst [vmem:[#allocation37_spill] sm:$0xff] %v1202_v55  ;;  %1765 = vst [vmem:[#allocation38_spill] sm:$0xff] %v1205_v56  ;;  %v1245_v56 = vmul.f32 %v1188_v31, %v1231_v22  ;;  %v416_v14 = vmul.f32 %v1092_v36, %v1064_v25  ;;  %v1268_v28 = vmul.f32 %v1199_v53, %v1238_v63 }
  0x27   : > { %1766 = vst [vmem:[#allocation39_spill] sm:$0xff] %v1210_v8  ;;  %1767 = vst [vmem:[#allocation40_spill] sm:$0xff] %v1225_v2  ;;  %v1272_v11 = vmul.f32 %v1210_v8, %v1228_v10  ;;  %v1276_v6 = vmul.f32 %v1225_v2, %v1241_v27  ;;  %v448_v25 = vmul.f32 %v1095_v37, %v1061_v24 }
  0x28   : > { %1768 = vst [vmem:[#allocation41_spill] sm:$0xff] %v1228_v10  ;;  %1769 = vst [vmem:[#allocation42_spill] sm:$0xff] %v1231_v22  ;;  %v451_v22 = vadd.f32 %v447_v9, %v419_v29  ;;  %v511_v9 = vmul.f32 %v1086_v34, %v1262_v16  ;;  %v546_v29 = vadd.f32 %v542_v20, %v514_v12 }
  0x29   : > { %1770 = vst [vmem:[#allocation43_spill] sm:$0xff] %v1238_v63  ;;  %1771 = vst [vmem:[#allocation44_spill] sm:$0xff] %v1241_v27  ;;  %v1290_v63 = vld [vmem:[%s1019_s8 + $0x58] sm:$0x1]  ;;  %v543_v27 = vmul.f32 %v1126_v49, %v1256_v42  ;;  %v591_v20 = vmul.f32 %v1146_v57, %v1259_v7  ;;  %v639_v49 = vmul.f32 %v1154_v59, %v1279_v54 }
  0x2a   : > { %1772 = vst [vmem:[#allocation45_spill] sm:$0xff] %v1245_v56  ;;  %1773 = vst [vmem:[#allocation46_spill] sm:$0xff] %v1262_v16  ;;  %v372_v56 = vsub.f32 %v352_v41, %v368_v0  ;;  %v1284_v0 = vld [vmem:[%s1005_s30 + $0x78] sm:$0x1]  ;;  %v1287_v41 = vld [vmem:[%s1019_s8 + $0x48] sm:$0x1]  ;;  %v467_v10 = vsub.f32 %v451_v22, %v463_v62  ;;  %v607_v12 = vmul.f32 %v1150_v58, %v1290_v63 }
  0x2b   : > { %1774 = vst [vmem:[#allocation47_spill] sm:$0xff] %v1272_v11  ;;  %1775 = vst [vmem:[#allocation48_spill] sm:$0xff] %v1276_v6  ;;  %v559_v2 = vmul.f32 %v1130_v50, %v1287_v41  ;;  %v562_v34 = vsub.f32 %v546_v29, %v558_v21  ;;  %v1303_v6 = vld [vmem:[%s1019_s8 + $0x68] sm:$0x1]  ;;  %v1306_v22 = vld [vmem:[%s1019_s8 + $0x78] sm:$0x1]  ;;  %v1318_v58 = vmul.f32 %v1192_v33, %v1284_v0 }
  0x2c   : > { %1776 = vst [vmem:[#allocation49_spill] sm:$0xff] %v1284_v0  ;;  %v404_v11 = vadd.f32 %v400_v48, %v372_v56  ;;  %1777 = vst [vmem:[#allocation50_spill] sm:$0xff] %v1306_v22  ;;  %v499_v56 = vadd.f32 %v495_v15, %v467_v10  ;;  %v464_v48 = vmul.f32 %v1098_v38, %v1104_v40 }
  0x2d   : > { %v1314_v50 = vmul.f32 %v1188_v31, %v1303_v6  ;;  %v1322_v21 = vmul.f32 %v1199_v53, %v1306_v22  ;;  %v594_v10 = vadd.f32 %v590_v4, %v562_v34  ;;  %v496_v15 = vmul.f32 %v1109_v43, %v1078_v30  ;;  %v1788_v22 = vld [vmem:[#allocation38_spill] sm:$0xff] }
  0x2e   : > { %v420_v62 = vsub.f32 %v404_v11, %v416_v14  ;;  %v515_v11 = vsub.f32 %v499_v56, %v511_v9  ;;  %v512_v29 = vmul.f32 %v1112_v44, %v1118_v46  ;;  %v544_v31 = vmul.f32 %v1175_v3, %v1136_v52 }
  0x2f   : > { %v1332_v33 = vrot.slane %v1049_v19, %v1044_v17  ;;  %v353_v53 = vmul.f32 %v1067_v26, %v1101_v39  ;;  %v610_v34 = vsub.f32 %v594_v10, %v1216_v47  ;;  %v369_v9 = vmul.f32 %v1089_v35, %v1133_v51  ;;  %v1353_v47 = vld [vmem:[%s1005_s30 + $0x88] sm:$0x1] }
  0x30   : > { %v452_v14 = vadd.f32 %v448_v25, %v420_v62  ;;  %v547_v4 = vadd.f32 %v543_v27, %v515_v11  ;;  %v1341_v56 = vrot.slane %v1034_v13, %v1046_v18  ;;  %v1345_v62 = vrot.slane %v1049_v19, %v1046_v18  ;;  %1781 = vst [vmem:[#allocation54_spill] sm:$0xff] %v1353_v47  ;;  %v1787_v26 = vld [vmem:[#allocation35_spill] sm:$0xff] }
  0x31   : > { %1778 = vst [vmem:[#allocation51_spill] sm:$0xff] %v1332_v33  ;;  %v401_v17 = vmul.f32 %v1081_v32, %v1115_v45  ;;  %v417_v59 = vmul.f32 %v1092_v36, %v1160_v61  ;;  %v642_v27 = vadd.f32 %v1220_v5, %v610_v34  ;;  %v373_v11 = vsub.f32 %v353_v53, %v369_v9  ;;  %v1784_v36 = vld [vmem:[#allocation28_spill] sm:$0xff]  ;;  %v1785_v34 = vld [vmem:[#allocation45_spill] sm:$0xff] }
  0x32   : > { %v468_v25 = vsub.f32 %v452_v14, %v464_v48  ;;  %1779 = vst [vmem:[#allocation52_spill] sm:$0xff] %v1341_v56  ;;  %1780 = vst [vmem:[#allocation53_spill] sm:$0xff] %v1345_v62  ;;  %v563_v48 = vsub.f32 %v547_v4, %v559_v2  ;;  %v560_v14 = vmul.f32 %v1332_v33, %v1171_v1 }
  0x33   : > { %v1359_v18 = vrot.slane %v1034_v13, %v1058_v23  ;;  %v1363_v32 = vrot.slane %v1049_v19, %v1058_v23  ;;  %v449_v5 = vmul.f32 %v1095_v37, %v1784_v36  ;;  %v658_v35 = vsub.f32 %v642_v27, %v1785_v34 }
  0x34   : > { %v500_v10 = vadd.f32 %v496_v15, %v468_v25  ;;  %v595_v2 = vadd.f32 %v591_v20, %v563_v48  ;;  %v405_v53 = vadd.f32 %v401_v17, %v373_v11  ;;  %v735_v4 = vmul.f32 %v1210_v8, %v1353_v47  ;;  %v1786_v25 = vld [vmem:[#allocation29_spill] sm:$0xff]  ;;  %v1789_v20 = vld [vmem:[#allocation30_spill] sm:$0xff] }
  0x35   : > { %1782 = vst [vmem:[#allocation55_spill] sm:$0xff] %v1359_v18  ;;  %1783 = vst [vmem:[#allocation56_spill] sm:$0xff] %v1363_v32  ;;  %v592_v9 = vmul.f32 %v1341_v56, %v1786_v25  ;;  %v608_v57 = vmul.f32 %v1345_v62, %v1787_v26  ;;  %v465_v23 = vmul.f32 %v1098_v38, %v1788_v22  ;;  %v1790_v17 = vld [vmem:[#allocation42_spill] sm:$0xff]  ;;  %v1796_v38 = vld [vmem:[#allocation4_spill] sm:$0xff] }
  0x36   : > { %v516_v15 = vsub.f32 %v500_v10, %v512_v29  ;;  %v690_v0 = vadd.f32 %v1249_v60, %v658_v35  ;;  %v611_v37 = vsub.f32 %v595_v2, %v607_v12  ;;  %v421_v27 = vsub.f32 %v405_v53, %v417_v59  ;;  %v1791_v10 = vld [vmem:[#allocation14_spill] sm:$0xff]  ;;  %v1793_v12 = vld [vmem:[#allocation8_spill] sm:$0xff]  ;;  %v1795_v53 = vld [vmem:[#allocation3_spill] sm:$0xff] }
  0x37   : > { %v640_v29 = vmul.f32 %v1359_v18, %v1789_v20  ;;  %v656_v48 = vmul.f32 %v1363_v32, %v1790_v17  ;;  %v1383_v11 = vrot.slane %v1034_v13, %v1791_v10  ;;  %v497_v34 = vmul.f32 %v1109_v43, %v1202_v55  ;;  %v1794_v2 = vld [vmem:[#allocation2_spill] sm:$0xff]  ;;  %v1798_v17 = vld [vmem:[#allocation5_spill] sm:$0xff]  ;;  %v1799_v25 = vld [vmem:[#allocation47_spill] sm:$0xff] }
  0x38   : > { %v548_v36 = vadd.f32 %v544_v31, %v516_v15  ;;  %v706_v8 = vsub.f32 %v690_v0, %v1268_v28  ;;  %v643_v35 = vadd.f32 %v639_v49, %v611_v37  ;;  %v453_v59 = vadd.f32 %v449_v5, %v421_v27  ;;  %v1797_v13 = vld [vmem:[#allocation10_spill] sm:$0xff]  ;;  %v1802_v5 = vld [vmem:[#allocation7_spill] sm:$0xff] }
  0x39   : > { %1792 = vst [vmem:[#allocation45_spill] sm:$0xff] %v1383_v11  ;;  %v513_v31 = vmul.f32 %v1112_v44, %v1262_v16  ;;  %v374_v15 = vmul.f32 %v1794_v2, %v1793_v12  ;;  %v382_v20 = vmul.f32 %v1796_v38, %v1795_v53  ;;  %v422_v47 = vmul.f32 %v1798_v17, %v1797_v13 }
  0x3a   : > { %v564_v60 = vsub.f32 %v548_v36, %v560_v14  ;;  %v738_v43 = vadd.f32 %v1799_v25, %v706_v8  ;;  %v659_v28 = vsub.f32 %v643_v35, %v1314_v50  ;;  %v469_v36 = vsub.f32 %v453_v59, %v465_v23  ;;  %v1801_v8 = vld [vmem:[#allocation6_spill] sm:$0xff]  ;;  %v1803_v25 = vld [vmem:[#allocation48_spill] sm:$0xff]  ;;  %v1414_v23 = vld [vmem:[%s1019_s8 + $0x88] sm:$0x1] }
  0x3b   : > { %v1406_v49 = vrot.slane %v1049_v19, %v1791_v10  ;;  %v545_v0 = vmul.f32 %v1175_v3, %v1256_v42  ;;  %v386_v14 = vadd.f32 %v382_v20, %v374_v15  ;;  %v430_v50 = vmul.f32 %v1802_v5, %v1801_v8  ;;  %v1804_v59 = vld [vmem:[#allocation40_spill] sm:$0xff]  ;;  %v1806_v20 = vld [vmem:[#allocation9_spill] sm:$0xff] }
  0x3c   : > { %v596_v37 = vadd.f32 %v592_v9, %v564_v60  ;;  %v754_v9 = vsub.f32 %v738_v43, %v1803_v25  ;;  %v691_v27 = vadd.f32 %v1318_v58, %v659_v28  ;;  %v501_v60 = vadd.f32 %v497_v34, %v469_v36  ;;  %v1805_v19 = vld [vmem:[#allocation32_spill] sm:$0xff]  ;;  %v1427_v25 = vld [vmem:[%s994_s24 + $0x18] ss:$0 sm:$0xff]  ;;  %v1808_v28 = vld [vmem:[#allocation43_spill] sm:$0xff] }
  0x3d   : > { %1800 = vst [vmem:[#allocation38_spill] sm:$0xff] %v1406_v49  ;;  %v751_v44 = vmul.f32 %v1804_v59, %v1414_v23  ;;  %v688_v10 = vmul.f32 %v1383_v11, %v1805_v19  ;;  %v426_v55 = vadd.f32 %v422_v47, %v386_v14  ;;  %v470_v15 = vmul.f32 %v1806_v20, %v1104_v40  ;;  %v1809_v36 = vld [vmem:[#allocation12_spill] sm:$0xff] }
  0x3e   : > { %v612_v35 = vsub.f32 %v596_v37, %v608_v57  ;;  %775 = vst.msk [vmem:[%s1402_s11] sm:$0xff] %vm774_vm0, %v754_v9  ;;  %v707_v43 = vsub.f32 %v691_v27, %v1322_v21  ;;  %1807 = vst [vmem:[#allocation14_spill] sm:$0xff] %v1427_v25  ;;  %v517_v57 = vsub.f32 %v501_v60, %v513_v31  ;;  %v1810_v31 = vld [vmem:[#allocation41_spill] sm:$0xff] }
  0x3f   : > { %v561_v34 = vmul.f32 %v1332_v33, %v1287_v41  ;;  %v704_v37 = vmul.f32 %v1406_v49, %v1808_v28  ;;  %v434_v47 = vadd.f32 %v430_v50, %v426_v55  ;;  %v478_v14 = vmul.f32 %v1809_v36, %v1061_v24  ;;  %v1811_v55 = vld [vmem:[#allocation13_spill] sm:$0xff] }
  0x40   : > { %v644_v58 = vadd.f32 %v640_v29, %v612_v35  ;;  %v739_v3 = vadd.f32 %v735_v4, %v707_v43  ;;  %v549_v9 = vadd.f32 %v545_v0, %v517_v57  ;;  %v593_v21 = vmul.f32 %v1341_v56, %v1259_v7  ;;  %v1438_v29 = vld [vmem:[%s1000_s27 + $0x18] ss:$0 sm:$0xff] }
  0x41   : > { %v736_v27 = vmul.f32 %v1427_v25, %v1810_v31  ;;  %v609_v35 = vmul.f32 %v1345_v62, %v1290_v63  ;;  %v474_v60 = vadd.f32 %v470_v15, %v434_v47  ;;  %v518_v50 = vmul.f32 %v1811_v55, %v1118_v46  ;;  %v1813_v47 = vld [vmem:[#allocation44_spill] sm:$0xff] }
  0x42   : > { %v660_v59 = vsub.f32 %v644_v58, %v656_v48  ;;  %v755_v33 = vsub.f32 %v739_v3, %v751_v44  ;;  %v565_v48 = vsub.f32 %v549_v9, %v561_v34  ;;  %v375_v0 = vmul.f32 %v1794_v2, %v1133_v51  ;;  %v1812_v58 = vld [vmem:[#allocation16_spill] sm:$0xff] }
  0x43   : > { %v482_v43 = vadd.f32 %v478_v14, %v474_v60  ;;  %v526_v57 = vmul.f32 %v1812_v58, %v1078_v30  ;;  %v383_v56 = vmul.f32 %v1796_v38, %v1101_v39  ;;  %v423_v62 = vmul.f32 %v1798_v17, %v1160_v61 }
  0x44   : > { %v692_v4 = vadd.f32 %v688_v10, %v660_v59  ;;  %777 = vst.msk [vmem:[%s1402_s11 + $0x8] sm:$0x1] %vm776_vm1, %v755_v33  ;;  %v752_v44 = vmul.f32 %v1438_v29, %v1813_v47  ;;  %v597_v3 = vadd.f32 %v593_v21, %v565_v48  ;;  %v641_v2 = vmul.f32 %v1359_v18, %v1279_v54  ;;  %v1814_v10 = vld [vmem:[#allocation23_spill] sm:$0xff]  ;;  %v1815_v21 = vld [vmem:[#allocation24_spill] sm:$0xff] }
  0x45   : > { %v522_v59 = vadd.f32 %v518_v50, %v482_v43  ;;  %v566_v34 = vmul.f32 %v1814_v10, %v1171_v1  ;;  %v387_v14 = vadd.f32 %v383_v56, %v375_v0  ;;  %v431_v38 = vmul.f32 %v1802_v5, %v1115_v45  ;;  %v1816_v56 = vld [vmem:[#allocation49_spill] sm:$0xff]  ;;  %v1817_v5 = vld [vmem:[#allocation50_spill] sm:$0xff]  ;;  %v1827_v18 = vld [vmem:[#allocation27_spill] sm:$0xff] }
  0x46   : > { %v708_v15 = vsub.f32 %v692_v4, %v704_v37  ;;  %v613_v9 = vsub.f32 %v597_v3, %v609_v35  ;;  %v657_v33 = vmul.f32 %v1363_v32, %v1303_v6  ;;  %v574_v60 = vmul.f32 %v1815_v21, %v1136_v52 }
  0x47   : > { %v530_v37 = vadd.f32 %v526_v57, %v522_v59  ;;  %v427_v4 = vadd.f32 %v423_v62, %v387_v14  ;;  %v471_v50 = vmul.f32 %v1806_v20, %v1788_v22  ;;  %v689_v0 = vmul.f32 %v1383_v11, %v1816_v56  ;;  %v1819_v59 = vld [vmem:[#allocation28_spill] sm:$0xff]  ;;  %v1820_v20 = vld [vmem:[#allocation29_spill] sm:$0xff] }
  0x48   : > { %v740_v17 = vadd.f32 %v736_v27, %v708_v15  ;;  %v645_v43 = vadd.f32 %v641_v2, %v613_v9  ;;  %v705_v27 = vmul.f32 %v1406_v49, %v1817_v5  ;;  %v1818_v15 = vld [vmem:[#allocation25_spill] sm:$0xff]  ;;  %v479_v32 = vmul.f32 %v1809_v36, %v1819_v59 }
  0x49   : > { %v570_v35 = vadd.f32 %v566_v34, %v530_v37  ;;  %v614_v3 = vmul.f32 %v1818_v15, %v1787_v26  ;;  %v435_v57 = vadd.f32 %v431_v38, %v427_v4  ;;  %v519_v14 = vmul.f32 %v1811_v55, %v1262_v16  ;;  %v1823_v49 = vld [vmem:[#allocation17_spill] sm:$0xff]  ;;  %v1824_v4 = vld [vmem:[#allocation15_spill] sm:$0xff] }
  0x4a   : > { %v756_v48 = vsub.f32 %v740_v17, %v752_v44  ;;  %v661_v62 = vsub.f32 %v645_v43, %v657_v33  ;;  %v1821_v44 = vld [vmem:[#allocation26_spill] sm:$0xff]  ;;  %v1822_v17 = vld [vmem:[#allocation11_spill] sm:$0xff]  ;;  %v384_v38 = vmul.f32 %v1823_v49, %v1795_v53  ;;  %v424_v36 = vmul.f32 %v1824_v4, %v1797_v13  ;;  %v1828_v56 = vld [vmem:[#allocation37_spill] sm:$0xff] }
  0x4b   : > { %v622_v2 = vmul.f32 %v1821_v44, %v1820_v20  ;;  %v376_v9 = vmul.f32 %v1822_v17, %v1793_v12  ;;  %v578_v34 = vadd.f32 %v574_v60, %v570_v35  ;;  %v475_v37 = vadd.f32 %v471_v50, %v435_v57  ;;  %v1826_v43 = vld [vmem:[#allocation42_spill] sm:$0xff]  ;;  %v1831_v57 = vld [vmem:[#allocation33_spill] sm:$0xff] }
  0x4c   : > { %778 = vst.msk [vmem:[%s1402_s11 + $0x10] sm:$0xff] %vm774_vm0, %v756_v48  ;;  %v693_v11 = vadd.f32 %v689_v0, %v661_v62  ;;  %v1825_v48 = vld [vmem:[#allocation54_spill] sm:$0xff]  ;;  %v662_v20 = vmul.f32 %v1827_v18, %v1826_v43  ;;  %v527_v55 = vmul.f32 %v1812_v58, %v1828_v56  ;;  %v753_v13 = vmul.f32 %v1438_v29, %v1414_v23  ;;  %v1832_v58 = vld [vmem:[#allocation19_spill] sm:$0xff] }
  0x4d   : > { %v737_v33 = vmul.f32 %v1427_v25, %v1825_v48  ;;  %v618_v16 = vadd.f32 %v614_v3, %v578_v34  ;;  %v483_v12 = vadd.f32 %v479_v32, %v475_v37  ;;  %v388_v60 = vadd.f32 %v384_v38, %v376_v9  ;;  %v1829_v50 = vld [vmem:[#allocation18_spill] sm:$0xff]  ;;  %v1834_v38 = vld [vmem:[#allocation20_spill] sm:$0xff] }
  0x4e   : > { %v432_v35 = vmul.f32 %v1829_v50, %v1801_v8  ;;  %v709_v53 = vsub.f32 %v693_v11, %v705_v27  ;;  %v1830_v0 = vld [vmem:[#allocation30_spill] sm:$0xff]  ;;  %v567_v25 = vmul.f32 %v1814_v10, %v1287_v41  ;;  %v472_v32 = vmul.f32 %v1832_v58, %v1104_v40 }
  0x4f   : > { %v670_v62 = vmul.f32 %v1831_v57, %v1830_v0  ;;  %v626_v48 = vadd.f32 %v622_v2, %v618_v16  ;;  %v523_v43 = vadd.f32 %v519_v14, %v483_v12  ;;  %v428_v26 = vadd.f32 %v424_v36, %v388_v60  ;;  %v1833_v8 = vld [vmem:[#allocation34_spill] sm:$0xff]  ;;  %v1835_v2 = vld [vmem:[#allocation36_spill] sm:$0xff]  ;;  %v1836_v36 = vld [vmem:[#allocation21_spill] sm:$0xff] }
  0x50   : > { %v741_v3 = vadd.f32 %v737_v33, %v709_v53  ;;  %v710_v11 = vmul.f32 %v1833_v8, %v1808_v28  ;;  %v575_v27 = vmul.f32 %v1815_v21, %v1256_v42  ;;  %v480_v10 = vmul.f32 %v1834_v38, %v1061_v24  ;;  %v1837_v24 = vld [vmem:[#allocation39_spill] sm:$0xff] }
  0x51   : > { %v666_v9 = vadd.f32 %v662_v20, %v626_v48  ;;  %v531_v34 = vadd.f32 %v527_v55, %v523_v43  ;;  %v436_v37 = vadd.f32 %v432_v35, %v428_v26  ;;  %v718_v14 = vmul.f32 %v1835_v2, %v1805_v19  ;;  %v1838_v55 = vld [vmem:[#allocation22_spill] sm:$0xff] }
  0x52   : > { %v757_v16 = vsub.f32 %v741_v3, %v753_v13  ;;  %v615_v40 = vmul.f32 %v1818_v15, %v1290_v63  ;;  %v520_v33 = vmul.f32 %v1836_v36, %v1118_v46  ;;  %v377_v21 = vmul.f32 %v1822_v17, %v1133_v51  ;;  %v1839_v17 = vld [vmem:[#allocation40_spill] sm:$0xff] }
  0x53   : > { %v674_v12 = vadd.f32 %v670_v62, %v666_v9  ;;  %v571_v60 = vadd.f32 %v567_v25, %v531_v34  ;;  %v476_v53 = vadd.f32 %v472_v32, %v436_v37  ;;  %v758_v26 = vmul.f32 %v1837_v24, %v1813_v47  ;;  %v1841_v34 = vld [vmem:[#allocation51_spill] sm:$0xff] }
  0x54   : > { %779 = vst.msk [vmem:[%s1402_s11 + $0x18] sm:$0x1] %vm776_vm1, %v757_v16  ;;  %v623_v20 = vmul.f32 %v1821_v44, %v1259_v7  ;;  %v385_v15 = vmul.f32 %v1823_v49, %v1101_v39  ;;  %v425_v46 = vmul.f32 %v1824_v4, %v1160_v61  ;;  %v528_v51 = vmul.f32 %v1838_v55, %v1078_v30  ;;  %v1840_v4 = vld [vmem:[#allocation31_spill] sm:$0xff]  ;;  %v1843_v16 = vld [vmem:[#allocation52_spill] sm:$0xff] }
  0x55   : > { %v714_v48 = vadd.f32 %v710_v11, %v674_v12  ;;  %v579_v25 = vadd.f32 %v575_v27, %v571_v60  ;;  %v484_v43 = vadd.f32 %v480_v10, %v476_v53  ;;  %v766_v35 = vmul.f32 %v1839_v17, %v1810_v31  ;;  %v1842_v10 = vld [vmem:[#allocation35_spill] sm:$0xff]  ;;  %v1845_v60 = vld [vmem:[#allocation49_spill] sm:$0xff] }
  0x56   : > { %v663_v13 = vmul.f32 %v1827_v18, %v1303_v6  ;;  %v389_v44 = vadd.f32 %v385_v15, %v377_v21  ;;  %v433_v39 = vmul.f32 %v1829_v50, %v1115_v45  ;;  %v568_v32 = vmul.f32 %v1840_v4, %v1171_v1  ;;  %v1846_v21 = vld [vmem:[#allocation29_spill] sm:$0xff] }
  0x57   : > { %v722_v49 = vadd.f32 %v718_v14, %v714_v48  ;;  %v619_v62 = vadd.f32 %v615_v40, %v579_v25  ;;  %v524_v61 = vadd.f32 %v520_v33, %v484_v43  ;;  %v671_v30 = vmul.f32 %v1831_v57, %v1279_v54  ;;  %v1844_v40 = vld [vmem:[#allocation46_spill] sm:$0xff]  ;;  %v1849_v25 = vld [vmem:[#allocation55_spill] sm:$0xff] }
  0x58   : > { %v429_v3 = vadd.f32 %v425_v46, %v389_v44  ;;  %v473_v11 = vmul.f32 %v1832_v58, %v1788_v22  ;;  %v576_v37 = vmul.f32 %v1841_v34, %v1136_v52  ;;  %v711_v45 = vmul.f32 %v1833_v8, %v1817_v5 }
  0x59   : > { %v762_v27 = vadd.f32 %v758_v26, %v722_v49  ;;  %v627_v9 = vadd.f32 %v623_v20, %v619_v62  ;;  %v532_v18 = vadd.f32 %v528_v51, %v524_v61  ;;  %v481_v50 = vmul.f32 %v1834_v38, %v1819_v59  ;;  %v1847_v26 = vld [vmem:[#allocation53_spill] sm:$0xff] }
  0x5a   : > { %v437_v1 = vadd.f32 %v433_v39, %v429_v3  ;;  %v616_v14 = vmul.f32 %v1843_v16, %v1842_v10  ;;  %v521_v33 = vmul.f32 %v1836_v36, %v1844_v40  ;;  %v719_v8 = vmul.f32 %v1835_v2, %v1845_v60  ;;  %v1848_v36 = vld [vmem:[#allocation42_spill] sm:$0xff] }
  0x5b   : > { %v770_v22 = vadd.f32 %v766_v35, %v762_v27  ;;  %v667_v57 = vadd.f32 %v663_v13, %v627_v9  ;;  %v572_v58 = vadd.f32 %v568_v32, %v532_v18  ;;  %v624_v59 = vmul.f32 %v1847_v26, %v1846_v21  ;;  %v1850_v13 = vld [vmem:[#allocation54_spill] sm:$0xff]  ;;  %v1852_v32 = vld [vmem:[#allocation45_spill] sm:$0xff] }
  0x5c   : > { %v477_v52 = vadd.f32 %v473_v11, %v437_v1  ;;  %v529_v20 = vmul.f32 %v1838_v55, %v1828_v56  ;;  %v759_v46 = vmul.f32 %v1837_v24, %v1414_v23  ;;  %v664_v43 = vmul.f32 %v1849_v25, %v1848_v36  ;;  %v1851_v56 = vld [vmem:[#allocation56_spill] sm:$0xff]  ;;  %v1854_v18 = vld [vmem:[#allocation14_spill] sm:$0xff] }
  0x5d   : > { %780 = vst.msk [vmem:[%s1550_s14] sm:$0xff] %vm774_vm0, %v770_v22  ;;  %v675_v12 = vadd.f32 %v671_v30, %v667_v57  ;;  %v580_v53 = vadd.f32 %v576_v37, %v572_v58  ;;  %v569_v2 = vmul.f32 %v1840_v4, %v1287_v41  ;;  %v767_v44 = vmul.f32 %v1839_v17, %v1850_v13  ;;  %v1853_v17 = vld [vmem:[#allocation38_spill] sm:$0xff] }
  0x5e   : > { %v485_v38 = vadd.f32 %v481_v50, %v477_v52  ;;  %v672_v55 = vmul.f32 %v1851_v56, %v1830_v0  ;;  %v577_v24 = vmul.f32 %v1841_v34, %v1256_v42  ;;  %v712_v30 = vmul.f32 %v1852_v32, %v1808_v28 }
  0x5f   : > { %v715_v15 = vadd.f32 %v711_v45, %v675_v12  ;;  %v620_v48 = vadd.f32 %v616_v14, %v580_v53  ;;  %v617_v41 = vmul.f32 %v1843_v16, %v1290_v63  ;;  %v720_v27 = vmul.f32 %v1853_v17, %v1805_v19 }
  0x60   : > { %v525_v51 = vadd.f32 %v521_v33, %v485_v38  ;;  %v625_v0 = vmul.f32 %v1847_v26, %v1259_v7  ;;  %v760_v28 = vmul.f32 %v1854_v18, %v1813_v47  ;;  %v665_v63 = vmul.f32 %v1849_v25, %v1303_v6 }
  0x61   : > { %v723_v35 = vadd.f32 %v719_v8, %v715_v15  ;;  %v628_v39 = vadd.f32 %v624_v59, %v620_v48  ;;  %v768_v45 = vmul.f32 %v1438_v29, %v1810_v31  ;;  %v673_v7 = vmul.f32 %v1851_v56, %v1279_v54 }
  0x62   : > { %v533_v49 = vadd.f32 %v529_v20, %v525_v51  ;;  %v713_v22 = vmul.f32 %v1852_v32, %v1817_v5  ;;  %v721_v58 = vmul.f32 %v1853_v17, %v1845_v60  ;;  %v761_v31 = vmul.f32 %v1854_v18, %v1414_v23 }
  0x63   : > { %v763_v62 = vadd.f32 %v759_v46, %v723_v35  ;;  %v668_v61 = vadd.f32 %v664_v43, %v628_v39  ;;  %v769_v54 = vmul.f32 %v1438_v29, %v1850_v13 }
  0x64   : > { %v573_v3 = vadd.f32 %v569_v2, %v533_v49 }
  0x65   : > { %v771_v4 = vadd.f32 %v767_v44, %v763_v62  ;;  %v676_v11 = vadd.f32 %v672_v55, %v668_v61 }
  0x66   : > { %v581_v9 = vadd.f32 %v577_v24, %v573_v3 }
  0x67   : > { %781 = vst.msk [vmem:[%s1550_s14 + $0x8] sm:$0x1] %vm776_vm1, %v771_v4  ;;  %v716_v42 = vadd.f32 %v712_v30, %v676_v11 }
  0x68   : > { %v621_v34 = vadd.f32 %v617_v41, %v581_v9 }
  0x69   : > { %v724_v37 = vadd.f32 %v720_v27, %v716_v42 }
  0x6a   : > { %v629_v19 = vadd.f32 %v625_v0, %v621_v34 }
  0x6b   : > { %v764_v1 = vadd.f32 %v760_v28, %v724_v37 }
  0x6c   : > { %v669_v50 = vadd.f32 %v665_v63, %v629_v19 }
  0x6d   : > { %v772_v57 = vadd.f32 %v768_v45, %v764_v1 }
  0x6e   : > { %v677_v47 = vadd.f32 %v673_v7, %v669_v50 }
  0x6f   : > { %782 = vst.msk [vmem:[%s1550_s14 + $0x10] sm:$0xff] %vm774_vm0, %v772_v57 }
  0x70   : > { %v717_v6 = vadd.f32 %v713_v22, %v677_v47 }
  0x72   : > { %v725_v10 = vadd.f32 %v721_v58, %v717_v6 }
  0x74   : > { %v765_v16 = vadd.f32 %v761_v31, %v725_v10 }
  0x76   : > { %v773_v14 = vadd.f32 %v769_v54, %v765_v16 }
  0x78   : > { %783 = vst.msk [vmem:[%s1550_s14 + $0x18] sm:$0x1] %vm776_vm1, %v773_v14 }
  0x79 PF: > { %s16_s18 = sadd.s32 1, %s948_s18  }
  0x7a   : > { %p13_p4 = scmp.ge.s32.totalorder %s16_s18, 6  }
  0x7c   :  { %15 = sbr.rel (!%p13_p4) target bundleno = 1 (0x1), region = 87 }

// kernel: reverse.1
= control target key start
LH: loop header
LB: loop body
LE: loop exit
PB: predicated region body
PF: predicated region fallthrough
CT: control target
= control target key end

     0   :  { %s1304_s0 = inlined_call_operand.vmem [shape: f32[2,9,16,16,3], index: 0, kind: input, shape index: {}]   ;;  %s1305_s1 = inlined_call_operand.vmem [shape: f32[2,9,16,16,3], index: 1, kind: output, shape index: {}]  }
   0x1   :  { %v432_v0 = vld [vmem:[%s1304_s0 + $0x20] sm:$0xff]  ;;  %v433_v1 = vld [vmem:[%s1304_s0 + $0x1d0] sm:$0xff]  ;;  %v538_v54 = vld [vmem:[%s1304_s0 + $0x28] sm:$0xff] }
   0x2   :  { %v435_v2 = vld [vmem:[%s1304_s0 + $0x50] sm:$0xff]  ;;  %4 = vst [vmem:[%s1305_s1] sm:$0xff] %v432_v0  ;;  %434 = vst [vmem:[%s1305_s1 + $0x1b0] sm:$0xff] %v433_v1  ;;  %v437_v3 = vld [vmem:[%s1304_s0 + $0x200] sm:$0xff] }
   0x3   :  { %436 = vst [vmem:[%s1305_s1 + $0x30] sm:$0xff] %v435_v2  ;;  %v439_v4 = vld [vmem:[%s1304_s0 + $0x80] sm:$0xff]  ;;  %v441_v5 = vld [vmem:[%s1304_s0 + $0x230] sm:$0xff]  ;;  %438 = vst [vmem:[%s1305_s1 + $0x1e0] sm:$0xff] %v437_v3 }
   0x4   :  { %440 = vst [vmem:[%s1305_s1 + $0x60] sm:$0xff] %v439_v4  ;;  %442 = vst [vmem:[%s1305_s1 + $0x210] sm:$0xff] %v441_v5  ;;  %v443_v6 = vld [vmem:[%s1304_s0 + $0xb0] sm:$0xff]  ;;  %v445_v7 = vld [vmem:[%s1304_s0 + $0x260] sm:$0xff] }
   0x5   :  { %v447_v8 = vld [vmem:[%s1304_s0 + $0xe0] sm:$0xff]  ;;  %444 = vst [vmem:[%s1305_s1 + $0x90] sm:$0xff] %v443_v6  ;;  %446 = vst [vmem:[%s1305_s1 + $0x240] sm:$0xff] %v445_v7  ;;  %v449_v9 = vld [vmem:[%s1304_s0 + $0x290] sm:$0xff] }
   0x6   :  { %448 = vst [vmem:[%s1305_s1 + $0xc0] sm:$0xff] %v447_v8  ;;  %v451_v10 = vld [vmem:[%s1304_s0 + $0x110] sm:$0xff]  ;;  %v453_v11 = vld [vmem:[%s1304_s0 + $0x2c0] sm:$0xff]  ;;  %450 = vst [vmem:[%s1305_s1 + $0x270] sm:$0xff] %v449_v9 }
   0x7   :  { %452 = vst [vmem:[%s1305_s1 + $0xf0] sm:$0xff] %v451_v10  ;;  %454 = vst [vmem:[%s1305_s1 + $0x2a0] sm:$0xff] %v453_v11  ;;  %v455_v12 = vld [vmem:[%s1304_s0 + $0x140] sm:$0xff]  ;;  %v457_v13 = vld [vmem:[%s1304_s0 + $0x2f0] sm:$0xff] }
   0x8   :  { %v459_v14 = vld [vmem:[%s1304_s0 + $0x170] sm:$0xff]  ;;  %456 = vst [vmem:[%s1305_s1 + $0x120] sm:$0xff] %v455_v12  ;;  %458 = vst [vmem:[%s1305_s1 + $0x2d0] sm:$0xff] %v457_v13  ;;  %v461_v15 = vld [vmem:[%s1304_s0 + $0x320] sm:$0xff] }
   0x9   :  { %460 = vst [vmem:[%s1305_s1 + $0x150] sm:$0xff] %v459_v14  ;;  %v463_v16 = vld [vmem:[%s1304_s0 + $0x1a0] sm:$0xff]  ;;  %v465_v17 = vld [vmem:[%s1304_s0 + $0x350] sm:$0xff]  ;;  %462 = vst [vmem:[%s1305_s1 + $0x300] sm:$0xff] %v461_v15 }
   0xa   :  { %464 = vst [vmem:[%s1305_s1 + $0x180] sm:$0xff] %v463_v16  ;;  %466 = vst [vmem:[%s1305_s1 + $0x330] sm:$0xff] %v465_v17  ;;  %v467_v18 = vld [vmem:[%s1304_s0 + $0x10] sm:$0xff]  ;;  %v469_v19 = vld [vmem:[%s1304_s0 + $0x1c0] sm:$0xff] }
   0xb   :  { %v471_v20 = vld [vmem:[%s1304_s0 + $0x40] sm:$0xff]  ;;  %468 = vst [vmem:[%s1305_s1 + $0x10] sm:$0xff] %v467_v18  ;;  %470 = vst [vmem:[%s1305_s1 + $0x1c0] sm:$0xff] %v469_v19  ;;  %v473_v21 = vld [vmem:[%s1304_s0 + $0x1f0] sm:$0xff] }
   0xc   :  { %472 = vst [vmem:[%s1305_s1 + $0x40] sm:$0xff] %v471_v20  ;;  %v475_v22 = vld [vmem:[%s1304_s0 + $0x70] sm:$0xff]  ;;  %v477_v23 = vld [vmem:[%s1304_s0 + $0x220] sm:$0xff]  ;;  %474 = vst [vmem:[%s1305_s1 + $0x1f0] sm:$0xff] %v473_v21 }
   0xd   :  { %476 = vst [vmem:[%s1305_s1 + $0x70] sm:$0xff] %v475_v22  ;;  %478 = vst [vmem:[%s1305_s1 + $0x220] sm:$0xff] %v477_v23  ;;  %v479_v24 = vld [vmem:[%s1304_s0 + $0xa0] sm:$0xff]  ;;  %v481_v25 = vld [vmem:[%s1304_s0 + $0x250] sm:$0xff] }
   0xe   :  { %v483_v26 = vld [vmem:[%s1304_s0 + $0xd0] sm:$0xff]  ;;  %480 = vst [vmem:[%s1305_s1 + $0xa0] sm:$0xff] %v479_v24  ;;  %482 = vst [vmem:[%s1305_s1 + $0x250] sm:$0xff] %v481_v25  ;;  %v485_v27 = vld [vmem:[%s1304_s0 + $0x280] sm:$0xff] }
   0xf   :  { %484 = vst [vmem:[%s1305_s1 + $0xd0] sm:$0xff] %v483_v26  ;;  %v487_v28 = vld [vmem:[%s1304_s0 + $0x100] sm:$0xff]  ;;  %v489_v29 = vld [vmem:[%s1304_s0 + $0x2b0] sm:$0xff]  ;;  %486 = vst [vmem:[%s1305_s1 + $0x280] sm:$0xff] %v485_v27 }
  0x10   :  { %488 = vst [vmem:[%s1305_s1 + $0x100] sm:$0xff] %v487_v28  ;;  %490 = vst [vmem:[%s1305_s1 + $0x2b0] sm:$0xff] %v489_v29  ;;  %v491_v30 = vld [vmem:[%s1304_s0 + $0x130] sm:$0xff]  ;;  %v493_v31 = vld [vmem:[%s1304_s0 + $0x2e0] sm:$0xff] }
  0x11   :  { %v495_v32 = vld [vmem:[%s1304_s0 + $0x160] sm:$0xff]  ;;  %492 = vst [vmem:[%s1305_s1 + $0x130] sm:$0xff] %v491_v30  ;;  %494 = vst [vmem:[%s1305_s1 + $0x2e0] sm:$0xff] %v493_v31  ;;  %v497_v33 = vld [vmem:[%s1304_s0 + $0x310] sm:$0xff] }
  0x12   :  { %496 = vst [vmem:[%s1305_s1 + $0x160] sm:$0xff] %v495_v32  ;;  %v499_v34 = vld [vmem:[%s1304_s0 + $0x190] sm:$0xff]  ;;  %v501_v35 = vld [vmem:[%s1304_s0 + $0x340] sm:$0xff]  ;;  %498 = vst [vmem:[%s1305_s1 + $0x310] sm:$0xff] %v497_v33 }
  0x13   :  { %500 = vst [vmem:[%s1305_s1 + $0x190] sm:$0xff] %v499_v34  ;;  %502 = vst [vmem:[%s1305_s1 + $0x340] sm:$0xff] %v501_v35  ;;  %v145_v36 = vld [vmem:[%s1304_s0] sm:$0xff]  ;;  %v504_v37 = vld [vmem:[%s1304_s0 + $0x1b0] sm:$0xff] }
  0x14   :  { %v506_v38 = vld [vmem:[%s1304_s0 + $0x30] sm:$0xff]  ;;  %503 = vst [vmem:[%s1305_s1 + $0x20] sm:$0xff] %v145_v36  ;;  %505 = vst [vmem:[%s1305_s1 + $0x1d0] sm:$0xff] %v504_v37  ;;  %v508_v39 = vld [vmem:[%s1304_s0 + $0x1e0] sm:$0xff] }
  0x15   :  { %507 = vst [vmem:[%s1305_s1 + $0x50] sm:$0xff] %v506_v38  ;;  %v510_v40 = vld [vmem:[%s1304_s0 + $0x60] sm:$0xff]  ;;  %v512_v41 = vld [vmem:[%s1304_s0 + $0x210] sm:$0xff]  ;;  %509 = vst [vmem:[%s1305_s1 + $0x200] sm:$0xff] %v508_v39 }
  0x16   :  { %511 = vst [vmem:[%s1305_s1 + $0x80] sm:$0xff] %v510_v40  ;;  %513 = vst [vmem:[%s1305_s1 + $0x230] sm:$0xff] %v512_v41  ;;  %v514_v42 = vld [vmem:[%s1304_s0 + $0x90] sm:$0xff]  ;;  %v516_v43 = vld [vmem:[%s1304_s0 + $0x240] sm:$0xff] }
  0x17   :  { %v518_v44 = vld [vmem:[%s1304_s0 + $0xc0] sm:$0xff]  ;;  %515 = vst [vmem:[%s1305_s1 + $0xb0] sm:$0xff] %v514_v42  ;;  %517 = vst [vmem:[%s1305_s1 + $0x260] sm:$0xff] %v516_v43  ;;  %v520_v45 = vld [vmem:[%s1304_s0 + $0x270] sm:$0xff] }
  0x18   :  { %519 = vst [vmem:[%s1305_s1 + $0xe0] sm:$0xff] %v518_v44  ;;  %v522_v46 = vld [vmem:[%s1304_s0 + $0xf0] sm:$0xff]  ;;  %v524_v47 = vld [vmem:[%s1304_s0 + $0x2a0] sm:$0xff]  ;;  %521 = vst [vmem:[%s1305_s1 + $0x290] sm:$0xff] %v520_v45 }
  0x19   :  { %523 = vst [vmem:[%s1305_s1 + $0x110] sm:$0xff] %v522_v46  ;;  %525 = vst [vmem:[%s1305_s1 + $0x2c0] sm:$0xff] %v524_v47  ;;  %v526_v48 = vld [vmem:[%s1304_s0 + $0x120] sm:$0xff]  ;;  %v528_v49 = vld [vmem:[%s1304_s0 + $0x2d0] sm:$0xff] }
  0x1a   :  { %v530_v50 = vld [vmem:[%s1304_s0 + $0x150] sm:$0xff]  ;;  %527 = vst [vmem:[%s1305_s1 + $0x140] sm:$0xff] %v526_v48  ;;  %529 = vst [vmem:[%s1305_s1 + $0x2f0] sm:$0xff] %v528_v49  ;;  %v532_v51 = vld [vmem:[%s1304_s0 + $0x300] sm:$0xff] }
  0x1b   :  { %531 = vst [vmem:[%s1305_s1 + $0x170] sm:$0xff] %v530_v50  ;;  %v534_v52 = vld [vmem:[%s1304_s0 + $0x180] sm:$0xff]  ;;  %v536_v53 = vld [vmem:[%s1304_s0 + $0x330] sm:$0xff]  ;;  %533 = vst [vmem:[%s1305_s1 + $0x320] sm:$0xff] %v532_v51 }
  0x1c   :  { %535 = vst [vmem:[%s1305_s1 + $0x1a0] sm:$0xff] %v534_v52  ;;  %537 = vst [vmem:[%s1305_s1 + $0x350] sm:$0xff] %v536_v53  ;;  %v540_v55 = vld [vmem:[%s1304_s0 + $0x1d8] sm:$0xff]  ;;  %v544_v57 = vld [vmem:[%s1304_s0 + $0x208] sm:$0xff] }
  0x1d   :  { %v542_v56 = vld [vmem:[%s1304_s0 + $0x58] sm:$0xff]  ;;  %539 = vst [vmem:[%s1305_s1 + $0x8] sm:$0xff] %v538_v54  ;;  %541 = vst [vmem:[%s1305_s1 + $0x1b8] sm:$0xff] %v540_v55  ;;  %v546_v58 = vld [vmem:[%s1304_s0 + $0x88] sm:$0xff] }
  0x1e   :  { %543 = vst [vmem:[%s1305_s1 + $0x38] sm:$0xff] %v542_v56  ;;  %v548_v59 = vld [vmem:[%s1304_s0 + $0x238] sm:$0xff]  ;;  %545 = vst [vmem:[%s1305_s1 + $0x1e8] sm:$0xff] %v544_v57  ;;  %v552_v61 = vld [vmem:[%s1304_s0 + $0x268] sm:$0xff] }
  0x1f   :  { %547 = vst [vmem:[%s1305_s1 + $0x68] sm:$0xff] %v546_v58  ;;  %549 = vst [vmem:[%s1305_s1 + $0x218] sm:$0xff] %v548_v59  ;;  %v550_v60 = vld [vmem:[%s1304_s0 + $0xb8] sm:$0xff]  ;;  %v554_v62 = vld [vmem:[%s1304_s0 + $0xe8] sm:$0xff] }
  0x20   :  { %551 = vst [vmem:[%s1305_s1 + $0x98] sm:$0xff] %v550_v60  ;;  %553 = vst [vmem:[%s1305_s1 + $0x248] sm:$0xff] %v552_v61  ;;  %v556_v63 = vld [vmem:[%s1304_s0 + $0x298] sm:$0xff]  ;;  %v560_v1 = vld [vmem:[%s1304_s0 + $0x2c8] sm:$0xff] }
  0x21   :  { %555 = vst [vmem:[%s1305_s1 + $0xc8] sm:$0xff] %v554_v62  ;;  %v558_v0 = vld [vmem:[%s1304_s0 + $0x118] sm:$0xff]  ;;  %557 = vst [vmem:[%s1305_s1 + $0x278] sm:$0xff] %v556_v63  ;;  %v562_v2 = vld [vmem:[%s1304_s0 + $0x148] sm:$0xff] }
  0x22   :  { %559 = vst [vmem:[%s1305_s1 + $0xf8] sm:$0xff] %v558_v0  ;;  %561 = vst [vmem:[%s1305_s1 + $0x2a8] sm:$0xff] %v560_v1  ;;  %v564_v3 = vld [vmem:[%s1304_s0 + $0x2f8] sm:$0xff]  ;;  %v568_v5 = vld [vmem:[%s1304_s0 + $0x328] sm:$0xff] }
  0x23   :  { %v566_v4 = vld [vmem:[%s1304_s0 + $0x178] sm:$0xff]  ;;  %563 = vst [vmem:[%s1305_s1 + $0x128] sm:$0xff] %v562_v2  ;;  %565 = vst [vmem:[%s1305_s1 + $0x2d8] sm:$0xff] %v564_v3  ;;  %v570_v6 = vld [vmem:[%s1304_s0 + $0x1a8] sm:$0xff] }
  0x24   :  { %567 = vst [vmem:[%s1305_s1 + $0x158] sm:$0xff] %v566_v4  ;;  %v572_v7 = vld [vmem:[%s1304_s0 + $0x358] sm:$0xff]  ;;  %569 = vst [vmem:[%s1305_s1 + $0x308] sm:$0xff] %v568_v5  ;;  %v576_v9 = vld [vmem:[%s1304_s0 + $0x1c8] sm:$0xff] }
  0x25   :  { %571 = vst [vmem:[%s1305_s1 + $0x188] sm:$0xff] %v570_v6  ;;  %573 = vst [vmem:[%s1305_s1 + $0x338] sm:$0xff] %v572_v7  ;;  %v574_v8 = vld [vmem:[%s1304_s0 + $0x18] sm:$0xff]  ;;  %v578_v10 = vld [vmem:[%s1304_s0 + $0x48] sm:$0xff] }
  0x26   :  { %575 = vst [vmem:[%s1305_s1 + $0x18] sm:$0xff] %v574_v8  ;;  %577 = vst [vmem:[%s1305_s1 + $0x1c8] sm:$0xff] %v576_v9  ;;  %v580_v11 = vld [vmem:[%s1304_s0 + $0x1f8] sm:$0xff]  ;;  %v584_v13 = vld [vmem:[%s1304_s0 + $0x228] sm:$0xff] }
  0x27   :  { %579 = vst [vmem:[%s1305_s1 + $0x48] sm:$0xff] %v578_v10  ;;  %v582_v12 = vld [vmem:[%s1304_s0 + $0x78] sm:$0xff]  ;;  %581 = vst [vmem:[%s1305_s1 + $0x1f8] sm:$0xff] %v580_v11  ;;  %v586_v14 = vld [vmem:[%s1304_s0 + $0xa8] sm:$0xff] }
  0x28   :  { %583 = vst [vmem:[%s1305_s1 + $0x78] sm:$0xff] %v582_v12  ;;  %585 = vst [vmem:[%s1305_s1 + $0x228] sm:$0xff] %v584_v13  ;;  %v588_v15 = vld [vmem:[%s1304_s0 + $0x258] sm:$0xff]  ;;  %v592_v17 = vld [vmem:[%s1304_s0 + $0x288] sm:$0xff] }
  0x29   :  { %v590_v16 = vld [vmem:[%s1304_s0 + $0xd8] sm:$0xff]  ;;  %587 = vst [vmem:[%s1305_s1 + $0xa8] sm:$0xff] %v586_v14  ;;  %589 = vst [vmem:[%s1305_s1 + $0x258] sm:$0xff] %v588_v15  ;;  %v594_v18 = vld [vmem:[%s1304_s0 + $0x108] sm:$0xff] }
  0x2a   :  { %591 = vst [vmem:[%s1305_s1 + $0xd8] sm:$0xff] %v590_v16  ;;  %v596_v19 = vld [vmem:[%s1304_s0 + $0x2b8] sm:$0xff]  ;;  %593 = vst [vmem:[%s1305_s1 + $0x288] sm:$0xff] %v592_v17  ;;  %v600_v21 = vld [vmem:[%s1304_s0 + $0x2e8] sm:$0xff] }
  0x2b   :  { %595 = vst [vmem:[%s1305_s1 + $0x108] sm:$0xff] %v594_v18  ;;  %597 = vst [vmem:[%s1305_s1 + $0x2b8] sm:$0xff] %v596_v19  ;;  %v598_v20 = vld [vmem:[%s1304_s0 + $0x138] sm:$0xff]  ;;  %v602_v22 = vld [vmem:[%s1304_s0 + $0x168] sm:$0xff] }
  0x2c   :  { %599 = vst [vmem:[%s1305_s1 + $0x138] sm:$0xff] %v598_v20  ;;  %601 = vst [vmem:[%s1305_s1 + $0x2e8] sm:$0xff] %v600_v21  ;;  %v604_v23 = vld [vmem:[%s1304_s0 + $0x318] sm:$0xff]  ;;  %v608_v25 = vld [vmem:[%s1304_s0 + $0x348] sm:$0xff] }
  0x2d   :  { %603 = vst [vmem:[%s1305_s1 + $0x168] sm:$0xff] %v602_v22  ;;  %v606_v24 = vld [vmem:[%s1304_s0 + $0x198] sm:$0xff]  ;;  %605 = vst [vmem:[%s1305_s1 + $0x318] sm:$0xff] %v604_v23  ;;  %v610_v26 = vld [vmem:[%s1304_s0 + $0x8] sm:$0xff] }
  0x2e   :  { %607 = vst [vmem:[%s1305_s1 + $0x198] sm:$0xff] %v606_v24  ;;  %609 = vst [vmem:[%s1305_s1 + $0x348] sm:$0xff] %v608_v25  ;;  %v612_v27 = vld [vmem:[%s1304_s0 + $0x1b8] sm:$0xff]  ;;  %v616_v29 = vld [vmem:[%s1304_s0 + $0x1e8] sm:$0xff] }
  0x2f   :  { %v614_v28 = vld [vmem:[%s1304_s0 + $0x38] sm:$0xff]  ;;  %611 = vst [vmem:[%s1305_s1 + $0x28] sm:$0xff] %v610_v26  ;;  %613 = vst [vmem:[%s1305_s1 + $0x1d8] sm:$0xff] %v612_v27  ;;  %v618_v30 = vld [vmem:[%s1304_s0 + $0x68] sm:$0xff] }
  0x30   :  { %615 = vst [vmem:[%s1305_s1 + $0x58] sm:$0xff] %v614_v28  ;;  %v620_v31 = vld [vmem:[%s1304_s0 + $0x218] sm:$0xff]  ;;  %617 = vst [vmem:[%s1305_s1 + $0x208] sm:$0xff] %v616_v29  ;;  %v624_v33 = vld [vmem:[%s1304_s0 + $0x248] sm:$0xff] }
  0x31   :  { %619 = vst [vmem:[%s1305_s1 + $0x88] sm:$0xff] %v618_v30  ;;  %621 = vst [vmem:[%s1305_s1 + $0x238] sm:$0xff] %v620_v31  ;;  %v622_v32 = vld [vmem:[%s1304_s0 + $0x98] sm:$0xff]  ;;  %v626_v34 = vld [vmem:[%s1304_s0 + $0xc8] sm:$0xff] }
  0x32   :  { %623 = vst [vmem:[%s1305_s1 + $0xb8] sm:$0xff] %v622_v32  ;;  %625 = vst [vmem:[%s1305_s1 + $0x268] sm:$0xff] %v624_v33  ;;  %v628_v35 = vld [vmem:[%s1304_s0 + $0x278] sm:$0xff]  ;;  %v632_v37 = vld [vmem:[%s1304_s0 + $0x2a8] sm:$0xff] }
  0x33   :  { %627 = vst [vmem:[%s1305_s1 + $0xe8] sm:$0xff] %v626_v34  ;;  %v630_v36 = vld [vmem:[%s1304_s0 + $0xf8] sm:$0xff]  ;;  %629 = vst [vmem:[%s1305_s1 + $0x298] sm:$0xff] %v628_v35  ;;  %v634_v38 = vld [vmem:[%s1304_s0 + $0x128] sm:$0xff] }
  0x34   :  { %631 = vst [vmem:[%s1305_s1 + $0x118] sm:$0xff] %v630_v36  ;;  %633 = vst [vmem:[%s1305_s1 + $0x2c8] sm:$0xff] %v632_v37  ;;  %v636_v39 = vld [vmem:[%s1304_s0 + $0x2d8] sm:$0xff]  ;;  %v640_v41 = vld [vmem:[%s1304_s0 + $0x308] sm:$0xff] }
  0x35   :  { %v638_v40 = vld [vmem:[%s1304_s0 + $0x158] sm:$0xff]  ;;  %635 = vst [vmem:[%s1305_s1 + $0x148] sm:$0xff] %v634_v38  ;;  %637 = vst [vmem:[%s1305_s1 + $0x2f8] sm:$0xff] %v636_v39  ;;  %v642_v42 = vld [vmem:[%s1304_s0 + $0x188] sm:$0xff] }
  0x36   :  { %639 = vst [vmem:[%s1305_s1 + $0x178] sm:$0xff] %v638_v40  ;;  %v644_v43 = vld [vmem:[%s1304_s0 + $0x338] sm:$0xff]  ;;  %641 = vst [vmem:[%s1305_s1 + $0x328] sm:$0xff] %v640_v41 }
  0x37   :  { %643 = vst [vmem:[%s1305_s1 + $0x1a8] sm:$0xff] %v642_v42  ;;  %645 = vst [vmem:[%s1305_s1 + $0x358] sm:$0xff] %v644_v43 }

// kernel: sparse_kernel_ft_3d_forward.3
= control target key start
LH: loop header
LB: loop body
LE: loop exit
PB: predicated region body
PF: predicated region fallthrough
CT: control target
= control target key end

     0   :  { %s4139_s12 = smov 0   ;;  %s8249_s0 = inlined_call_operand.vmem [shape: f32[4096,9], index: 0, kind: input, shape index: {}]   ;;  %s8250_s1 = inlined_call_operand.vmem [shape: f32[9,128], index: 1, kind: input, shape index: {}]   ;;  %s8251_s2 = inlined_call_operand.vmem [shape: f32[1,128], index: 2, kind: input, shape index: {}]   ;;  %s8252_s3 = inlined_call_operand.vmem [shape: f32[4096,128], index: 3, kind: output, shape index: {}]  }
   0x1 LB: > { %s4051_s13 = sadd.s32 4294967295, %s4108_s12   ;;  %p4055_p0 = scmp.ge.s32.totalorder %s4108_s12, 1  ;;  %s4108_s12 = sphi %s4139_s12, %s13_s12  }
   0x2   : > { %p138_p1 = scmp.lt.s32.totalorder %s4108_s12, 9 }
   0x4   : > { %p139_p2 = pnand %p4055_p0, %p138_p1 }
   0x6   : > { %142 = sbr.rel (%p139_p2) target bundleno = 1354 (0x54a), region = 32 }
   0xd   : > { %s4056_s14 = sshll.u32 %s4051_s13, 6  ;;  %v4110_v0 = vmov 0  }
   0xe   : > { %4082 = vset.pattern.permute.xlu1 %v4110_v0  ;;  %4081 = vset.pattern.permute.xlu0 %v4110_v0  ;;  %p163_p3 = scmp.lt.s32.totalorder %s4056_s14, 511 }
  0x10   : > { %s9778_s14 = smov (!%p163_p3, %s4056_s14), 511 }
  0x11   : > { %s4057_s15 = sshll.u32 %s9778_s14, 3 }
  0x12   : > { %s4155_s18 = scalar_lea.vmem %s8249_s0, %s4057_s15  ;;  %s7507_s29 = scalar_lea.vmem %s8252_s3, %s4057_s15 }
  0x13   : > { %v176_v1 = vld [vmem:[%s4155_s18 + $0x10] sm:$0xff]  ;;  %v174_v2 = vld [vmem:[%s4155_s18] sm:$0xff]  ;;  %v177_v3 = vld [vmem:[%s4155_s18 + $0x18] sm:$0xff] }
  0x14   : > { %v4160_v4 = vmax.f32 %v176_v1, 0.0  ;;  %v4162_v5 = vmax.f32 %v174_v2, 0.0  ;;  %v175_v6 = vld [vmem:[%s4155_s18 + $0x8] sm:$0xff]  ;;  %v4167_v7 = vmax.f32 %v177_v3, 0.0  ;;  %v178_v10 = vld [vmem:[%s4155_s18 + $0x20] sm:$0xff]  ;;  %v181_v13 = vld [vmem:[%s4155_s18 + $0x38] sm:$0xff] }
  0x15   : > { %v4169_v8 = vmax.f32 %v175_v6, 0.0  ;;  %v179_v9 = vld [vmem:[%s4155_s18 + $0x28] sm:$0xff]  ;;  %v4177_v12 = vmax.f32 %v178_v10, 0.0  ;;  %v180_v14 = vld [vmem:[%s4155_s18 + $0x30] sm:$0xff]  ;;  %v4183_v15 = vmax.f32 %v181_v13, 0.0  ;;  %v182_v18 = vld [vmem:[%s4155_s18 + $0x40] sm:$0xff] }
  0x16   : > { %8384 = vst [vmem:[#allocation2_spill] sm:$0xff] %v4160_v4  ;;  %8385 = vst [vmem:[#allocation3_spill] sm:$0xff] %v4162_v5  ;;  %316 = vperm.xlu1 %4082, %v4160_v4   ;;  %306 = vperm.xlu0 %4081, %v4162_v5   ;;  %v4175_v11 = vmax.f32 %v179_v9, 0.0  ;;  %v4185_v16 = vmax.f32 %v180_v14, 0.0  ;;  %v183_v17 = vld [vmem:[%s4155_s18 + $0x48] sm:$0xff]  ;;  %v4193_v20 = vmax.f32 %v182_v18, 0.0 }
  0x17   : > { %8386 = vst [vmem:[#allocation4_spill] sm:$0xff] %v4167_v7  ;;  %8387 = vst [vmem:[#allocation5_spill] sm:$0xff] %v4169_v8  ;;  %v4191_v19 = vmax.f32 %v183_v17, 0.0  ;;  %v185_v21 = vld [vmem:[%s4155_s18 + $0x58] sm:$0xff]  ;;  %v184_v22 = vld [vmem:[%s4155_s18 + $0x50] sm:$0xff] }
  0x18   : > { %8388 = vst [vmem:[#allocation6_spill] sm:$0xff] %v4175_v11  ;;  %8389 = vst [vmem:[#allocation7_spill] sm:$0xff] %v4183_v15  ;;  %v4199_v23 = vmax.f32 %v185_v21, 0.0  ;;  %v4201_v24 = vmax.f32 %v184_v22, 0.0  ;;  %v187_v25 = vld [vmem:[%s4155_s18 + $0x68] sm:$0xff]  ;;  %v186_v26 = vld [vmem:[%s4155_s18 + $0x60] sm:$0xff] }
  0x19   : > { %8390 = vst [vmem:[#allocation8_spill] sm:$0xff] %v4191_v19  ;;  %v4207_v27 = vmax.f32 %v187_v25, 0.0  ;;  %v4209_v28 = vmax.f32 %v186_v26, 0.0  ;;  %v189_v29 = vld [vmem:[%s4155_s18 + $0x78] sm:$0xff]  ;;  %v188_v30 = vld [vmem:[%s4155_s18 + $0x70] sm:$0xff]  ;;  %v191_v33 = vld [vmem:[%s4155_s18 + $0x88] sm:$0xff] }
  0x1a   : > { %321 = vperm.xlu1 %4082, %v4167_v7   ;;  %311 = vperm.xlu0 %4081, %v4169_v8   ;;  %8391 = vst [vmem:[#allocation9_spill] sm:$0xff] %v4199_v23  ;;  %8392 = vst [vmem:[#allocation10_spill] sm:$0xff] %v4201_v24  ;;  %v4215_v31 = vmax.f32 %v189_v29, 0.0  ;;  %v4217_v32 = vmax.f32 %v188_v30, 0.0  ;;  %v190_v34 = vld [vmem:[%s4155_s18 + $0x80] sm:$0xff]  ;;  %v4223_v35 = vmax.f32 %v191_v33, 0.0 }
  0x1b   : > { %8393 = vst [vmem:[#allocation11_spill] sm:$0xff] %v4207_v27  ;;  %8394 = vst [vmem:[#allocation12_spill] sm:$0xff] %v4209_v28  ;;  %v4225_v36 = vmax.f32 %v190_v34, 0.0  ;;  %v193_v37 = vld [vmem:[%s4155_s18 + $0x98] sm:$0xff]  ;;  %v192_v38 = vld [vmem:[%s4155_s18 + $0x90] sm:$0xff] }
  0x1c   : > { %8395 = vst [vmem:[#allocation13_spill] sm:$0xff] %v4215_v31  ;;  %8396 = vst [vmem:[#allocation14_spill] sm:$0xff] %v4217_v32  ;;  %v4231_v39 = vmax.f32 %v193_v37, 0.0  ;;  %v4233_v40 = vmax.f32 %v192_v38, 0.0  ;;  %v195_v41 = vld [vmem:[%s4155_s18 + $0xa8] sm:$0xff]  ;;  %v194_v42 = vld [vmem:[%s4155_s18 + $0xa0] sm:$0xff] }
  0x1d   : > { %8397 = vst [vmem:[#allocation15_spill] sm:$0xff] %v4223_v35  ;;  %8398 = vst [vmem:[#allocation16_spill] sm:$0xff] %v4225_v36  ;;  %v4239_v43 = vmax.f32 %v195_v41, 0.0  ;;  %v4241_v44 = vmax.f32 %v194_v42, 0.0  ;;  %v197_v45 = vld [vmem:[%s4155_s18 + $0xb8] sm:$0xff]  ;;  %v196_v46 = vld [vmem:[%s4155_s18 + $0xb0] sm:$0xff] }
  0x1e   : > { %331 = vperm.xlu1 %4082, %v4175_v11   ;;  %326 = vperm.xlu0 %4081, %v4177_v12   ;;  %8399 = vst [vmem:[#allocation17_spill] sm:$0xff] %v4231_v39  ;;  %8400 = vst [vmem:[#allocation18_spill] sm:$0xff] %v4233_v40  ;;  %v4247_v47 = vmax.f32 %v197_v45, 0.0  ;;  %v4249_v48 = vmax.f32 %v196_v46, 0.0  ;;  %v199_v49 = vld [vmem:[%s4155_s18 + $0xc8] sm:$0xff]  ;;  %v198_v50 = vld [vmem:[%s4155_s18 + $0xc0] sm:$0xff] }
  0x1f   : > { %8401 = vst [vmem:[#allocation19_spill] sm:$0xff] %v4239_v43  ;;  %8402 = vst [vmem:[#allocation20_spill] sm:$0xff] %v4241_v44  ;;  %v4255_v51 = vmax.f32 %v199_v49, 0.0  ;;  %v4257_v52 = vmax.f32 %v198_v50, 0.0  ;;  %v201_v53 = vld [vmem:[%s4155_s18 + $0xd8] sm:$0xff]  ;;  %v200_v54 = vld [vmem:[%s4155_s18 + $0xd0] sm:$0xff] }
  0x20   : > { %8403 = vst [vmem:[#allocation21_spill] sm:$0xff] %v4247_v47  ;;  %8404 = vst [vmem:[#allocation22_spill] sm:$0xff] %v4249_v48  ;;  %v4263_v55 = vmax.f32 %v201_v53, 0.0  ;;  %v4265_v56 = vmax.f32 %v200_v54, 0.0  ;;  %v203_v57 = vld [vmem:[%s4155_s18 + $0xe8] sm:$0xff]  ;;  %v202_v58 = vld [vmem:[%s4155_s18 + $0xe0] sm:$0xff] }
  0x21   : > { %8405 = vst [vmem:[#allocation23_spill] sm:$0xff] %v4255_v51  ;;  %8406 = vst [vmem:[#allocation24_spill] sm:$0xff] %v4257_v52  ;;  %v4271_v59 = vmax.f32 %v203_v57, 0.0  ;;  %v4273_v60 = vmax.f32 %v202_v58, 0.0  ;;  %v205_v61 = vld [vmem:[%s4155_s18 + $0xf8] sm:$0xff]  ;;  %v204_v62 = vld [vmem:[%s4155_s18 + $0xf0] sm:$0xff] }
  0x22   : > { %341 = vperm.xlu1 %4082, %v4183_v15   ;;  %336 = vperm.xlu0 %4081, %v4185_v16   ;;  %8407 = vst [vmem:[#allocation25_spill] sm:$0xff] %v4263_v55  ;;  %8408 = vst [vmem:[#allocation26_spill] sm:$0xff] %v4265_v56  ;;  %v4279_v63 = vmax.f32 %v205_v61, 0.0  ;;  %v4281_v0 = vmax.f32 %v204_v62, 0.0  ;;  %v207_v1 = vld [vmem:[%s4155_s18 + $0x108] sm:$0xff]  ;;  %v206_v2 = vld [vmem:[%s4155_s18 + $0x100] sm:$0xff] }
  0x23   : > { %8409 = vst [vmem:[#allocation27_spill] sm:$0xff] %v4271_v59  ;;  %8410 = vst [vmem:[#allocation28_spill] sm:$0xff] %v4273_v60  ;;  %v4287_v3 = vmax.f32 %v207_v1, 0.0  ;;  %v4289_v6 = vmax.f32 %v206_v2, 0.0  ;;  %v209_v9 = vld [vmem:[%s4155_s18 + $0x118] sm:$0xff]  ;;  %v208_v10 = vld [vmem:[%s4155_s18 + $0x110] sm:$0xff] }
  0x24   : > { %8411 = vst [vmem:[#allocation29_spill] sm:$0xff] %v4279_v63  ;;  %8412 = vst [vmem:[#allocation30_spill] sm:$0xff] %v4281_v0  ;;  %v4295_v13 = vmax.f32 %v209_v9, 0.0  ;;  %v4297_v14 = vmax.f32 %v208_v10, 0.0  ;;  %v211_v17 = vld [vmem:[%s4155_s18 + $0x128] sm:$0xff]  ;;  %v210_v18 = vld [vmem:[%s4155_s18 + $0x120] sm:$0xff] }
  0x25   : > { %8413 = vst [vmem:[#allocation31_spill] sm:$0xff] %v4287_v3  ;;  %8414 = vst [vmem:[#allocation32_spill] sm:$0xff] %v4289_v6  ;;  %v4303_v21 = vmax.f32 %v211_v17, 0.0  ;;  %v4305_v22 = vmax.f32 %v210_v18, 0.0  ;;  %v213_v25 = vld [vmem:[%s4155_s18 + $0x138] sm:$0xff]  ;;  %v212_v26 = vld [vmem:[%s4155_s18 + $0x130] sm:$0xff] }
  0x26   : > { %351 = vperm.xlu1 %4082, %v4191_v19   ;;  %346 = vperm.xlu0 %4081, %v4193_v20   ;;  %8415 = vst [vmem:[#allocation33_spill] sm:$0xff] %v4295_v13  ;;  %8416 = vst [vmem:[#allocation34_spill] sm:$0xff] %v4297_v14  ;;  %v4311_v29 = vmax.f32 %v213_v25, 0.0  ;;  %v4313_v30 = vmax.f32 %v212_v26, 0.0  ;;  %v215_v33 = vld [vmem:[%s4155_s18 + $0x148] sm:$0xff]  ;;  %v214_v34 = vld [vmem:[%s4155_s18 + $0x140] sm:$0xff] }
  0x27   : > { %8417 = vst [vmem:[#allocation35_spill] sm:$0xff] %v4303_v21  ;;  %8418 = vst [vmem:[#allocation36_spill] sm:$0xff] %v4305_v22  ;;  %v4319_v37 = vmax.f32 %v215_v33, 0.0  ;;  %v4321_v38 = vmax.f32 %v214_v34, 0.0  ;;  %v217_v41 = vld [vmem:[%s4155_s18 + $0x158] sm:$0xff]  ;;  %v216_v42 = vld [vmem:[%s4155_s18 + $0x150] sm:$0xff] }
  0x28   : > { %8419 = vst [vmem:[#allocation37_spill] sm:$0xff] %v4311_v29  ;;  %8420 = vst [vmem:[#allocation38_spill] sm:$0xff] %v4313_v30  ;;  %v4327_v45 = vmax.f32 %v217_v41, 0.0  ;;  %v4329_v46 = vmax.f32 %v216_v42, 0.0  ;;  %v219_v49 = vld [vmem:[%s4155_s18 + $0x168] sm:$0xff]  ;;  %v218_v50 = vld [vmem:[%s4155_s18 + $0x160] sm:$0xff] }
  0x29   : > { %8421 = vst [vmem:[#allocation39_spill] sm:$0xff] %v4319_v37  ;;  %8422 = vst [vmem:[#allocation40_spill] sm:$0xff] %v4321_v38  ;;  %v4335_v53 = vmax.f32 %v219_v49, 0.0  ;;  %v4337_v54 = vmax.f32 %v218_v50, 0.0  ;;  %v221_v57 = vld [vmem:[%s4155_s18 + $0x178] sm:$0xff]  ;;  %v220_v58 = vld [vmem:[%s4155_s18 + $0x170] sm:$0xff] }
  0x2a   : > { %361 = vperm.xlu1 %4082, %v4199_v23   ;;  %356 = vperm.xlu0 %4081, %v4201_v24   ;;  %8423 = vst [vmem:[#allocation41_spill] sm:$0xff] %v4327_v45  ;;  %8424 = vst [vmem:[#allocation42_spill] sm:$0xff] %v4329_v46  ;;  %v4343_v61 = vmax.f32 %v221_v57, 0.0  ;;  %v4345_v62 = vmax.f32 %v220_v58, 0.0  ;;  %v223_v1 = vld [vmem:[%s4155_s18 + $0x188] sm:$0xff]  ;;  %v222_v2 = vld [vmem:[%s4155_s18 + $0x180] sm:$0xff] }
  0x2b   : > { %8425 = vst [vmem:[#allocation43_spill] sm:$0xff] %v4335_v53  ;;  %8426 = vst [vmem:[#allocation44_spill] sm:$0xff] %v4337_v54  ;;  %v4351_v9 = vmax.f32 %v223_v1, 0.0  ;;  %v4353_v10 = vmax.f32 %v222_v2, 0.0  ;;  %v225_v17 = vld [vmem:[%s4155_s18 + $0x198] sm:$0xff]  ;;  %v224_v18 = vld [vmem:[%s4155_s18 + $0x190] sm:$0xff] }
  0x2c   : > { %8427 = vst [vmem:[#allocation45_spill] sm:$0xff] %v4343_v61  ;;  %8428 = vst [vmem:[#allocation46_spill] sm:$0xff] %v4345_v62  ;;  %v4359_v25 = vmax.f32 %v225_v17, 0.0  ;;  %v4361_v26 = vmax.f32 %v224_v18, 0.0  ;;  %v227_v33 = vld [vmem:[%s4155_s18 + $0x1a8] sm:$0xff]  ;;  %v226_v34 = vld [vmem:[%s4155_s18 + $0x1a0] sm:$0xff] }
  0x2d   : > { %8429 = vst [vmem:[#allocation47_spill] sm:$0xff] %v4351_v9  ;;  %8430 = vst [vmem:[#allocation48_spill] sm:$0xff] %v4353_v10  ;;  %v4367_v41 = vmax.f32 %v227_v33, 0.0  ;;  %v4369_v42 = vmax.f32 %v226_v34, 0.0  ;;  %v229_v49 = vld [vmem:[%s4155_s18 + $0x1b8] sm:$0xff]  ;;  %v228_v50 = vld [vmem:[%s4155_s18 + $0x1b0] sm:$0xff] }
  0x2e   : > { %371 = vperm.xlu1 %4082, %v4207_v27   ;;  %366 = vperm.xlu0 %4081, %v4209_v28   ;;  %8431 = vst [vmem:[#allocation49_spill] sm:$0xff] %v4359_v25  ;;  %8432 = vst [vmem:[#allocation50_spill] sm:$0xff] %v4361_v26  ;;  %v4375_v57 = vmax.f32 %v229_v49, 0.0  ;;  %v4377_v58 = vmax.f32 %v228_v50, 0.0  ;;  %v231_v1 = vld [vmem:[%s4155_s18 + $0x1c8] sm:$0xff]  ;;  %v230_v2 = vld [vmem:[%s4155_s18 + $0x1c0] sm:$0xff] }
  0x2f   : > { %8433 = vst [vmem:[#allocation51_spill] sm:$0xff] %v4367_v41  ;;  %8434 = vst [vmem:[#allocation52_spill] sm:$0xff] %v4369_v42  ;;  %v4383_v17 = vmax.f32 %v231_v1, 0.0  ;;  %v4385_v18 = vmax.f32 %v230_v2, 0.0  ;;  %v233_v33 = vld [vmem:[%s4155_s18 + $0x1d8] sm:$0xff]  ;;  %v232_v34 = vld [vmem:[%s4155_s18 + $0x1d0] sm:$0xff] }
  0x30   : > { %8435 = vst [vmem:[#allocation53_spill] sm:$0xff] %v4375_v57  ;;  %8436 = vst [vmem:[#allocation54_spill] sm:$0xff] %v4377_v58  ;;  %v4391_v49 = vmax.f32 %v233_v33, 0.0  ;;  %v4393_v50 = vmax.f32 %v232_v34, 0.0 }
  0x31   : > { %8437 = vst [vmem:[#allocation55_spill] sm:$0xff] %v4383_v17  ;;  %8438 = vst [vmem:[#allocation56_spill] sm:$0xff] %v4385_v18 }
  0x32   : > { %381 = vperm.xlu1 %4082, %v4215_v31   ;;  %376 = vperm.xlu0 %4081, %v4217_v32   ;;  %8439 = vst [vmem:[#allocation57_spill] sm:$0xff] %v4391_v49  ;;  %8440 = vst [vmem:[#allocation58_spill] sm:$0xff] %v4393_v50 }
  0x36   : > { %391 = vperm.xlu1 %4082, %v4223_v35   ;;  %386 = vperm.xlu0 %4081, %v4225_v36  }
  0x3a   : > { %401 = vperm.xlu1 %4082, %v4231_v39   ;;  %396 = vperm.xlu0 %4081, %v4233_v40  }
  0x3e   : > { %411 = vperm.xlu1 %4082, %v4239_v43   ;;  %406 = vperm.xlu0 %4081, %v4241_v44  }
  0x42   : > { %421 = vperm.xlu1 %4082, %v4247_v47   ;;  %416 = vperm.xlu0 %4081, %v4249_v48  }
  0x46   : > { %431 = vperm.xlu1 %4082, %v4255_v51   ;;  %426 = vperm.xlu0 %4081, %v4257_v52  }
  0x4a   : > { %441 = vperm.xlu1 %4082, %v4263_v55   ;;  %436 = vperm.xlu0 %4081, %v4265_v56  }
  0x4e   : > { %451 = vperm.xlu1 %4082, %v4271_v59   ;;  %446 = vperm.xlu0 %4081, %v4273_v60  }
  0x52   : > { %461 = vperm.xlu1 %4082, %v4279_v63   ;;  %456 = vperm.xlu0 %4081, %v4281_v0  }
  0x56   : > { %471 = vperm.xlu1 %4082, %v4287_v3   ;;  %466 = vperm.xlu0 %4081, %v4289_v6  }
  0x5a   : > { %481 = vperm.xlu1 %4082, %v4295_v13   ;;  %476 = vperm.xlu0 %4081, %v4297_v14  }
  0x5e   : > { %491 = vperm.xlu1 %4082, %v4303_v21   ;;  %486 = vperm.xlu0 %4081, %v4305_v22  }
  0x62   : > { %501 = vperm.xlu1 %4082, %v4311_v29   ;;  %496 = vperm.xlu0 %4081, %v4313_v30  }
  0x66   : > { %511 = vperm.xlu1 %4082, %v4319_v37   ;;  %506 = vperm.xlu0 %4081, %v4321_v38  }
  0x6a   : > { %521 = vperm.xlu1 %4082, %v4327_v45   ;;  %516 = vperm.xlu0 %4081, %v4329_v46  }
  0x6e   : > { %531 = vperm.xlu1 %4082, %v4335_v53   ;;  %526 = vperm.xlu0 %4081, %v4337_v54  }
  0x72   : > { %541 = vperm.xlu1 %4082, %v4343_v61   ;;  %536 = vperm.xlu0 %4081, %v4345_v62  }
  0x76   : > { %551 = vperm.xlu1 %4082, %v4351_v9   ;;  %546 = vperm.xlu0 %4081, %v4353_v10  }
  0x7a   : > { %561 = vperm.xlu1 %4082, %v4359_v25   ;;  %556 = vperm.xlu0 %4081, %v4361_v26  }
  0x7e   : > { %571 = vperm.xlu1 %4082, %v4367_v41   ;;  %566 = vperm.xlu0 %4081, %v4369_v42   ;;  %v235_v41 = vld [vmem:[%s4155_s18 + $0x1e8] sm:$0xff]  ;;  %v236_v42 = vld [vmem:[%s4155_s18 + $0x1f0] sm:$0xff] }
  0x7f   : > { %v4399_v1 = vmax.f32 %v235_v41, 0.0  ;;  %v4409_v34 = vmax.f32 %v236_v42, 0.0 }
  0x81   : > { %8441 = vst [vmem:[#allocation59_spill] sm:$0xff] %v4399_v1  ;;  %8444 = vst [vmem:[#allocation62_spill] sm:$0xff] %v4409_v34 }
  0x82   : > { %581 = vperm.xlu1 %4082, %v4375_v57   ;;  %576 = vperm.xlu0 %4081, %v4377_v58   ;;  %v234_v57 = vld [vmem:[%s4155_s18 + $0x1e0] sm:$0xff]  ;;  %v237_v58 = vld [vmem:[%s4155_s18 + $0x1f8] sm:$0xff] }
  0x83   : > { %v4401_v2 = vmax.f32 %v234_v57, 0.0  ;;  %v4407_v33 = vmax.f32 %v237_v58, 0.0  ;;  %v4111_v57 = vmov 1  }
  0x85   : > { %8442 = vst [vmem:[#allocation60_spill] sm:$0xff] %v4401_v2  ;;  %8443 = vst [vmem:[#allocation61_spill] sm:$0xff] %v4407_v33 }
  0x86   : > { %591 = vperm.xlu1 %4082, %v4383_v17   ;;  %586 = vperm.xlu0 %4081, %v4385_v18  }
  0x8a   : > { %601 = vperm.xlu1 %4082, %v4391_v49   ;;  %596 = vperm.xlu0 %4081, %v4393_v50  }
  0x8e   : > { %611 = vperm.xlu1 %4082, %v4399_v1   ;;  %606 = vperm.xlu0 %4081, %v4401_v2  }
  0x92   : > { %621 = vperm.xlu1 %4082, %v4407_v33   ;;  %616 = vperm.xlu0 %4081, %v4409_v34  }
  0x95   : > { %v4413_v49 = vpop.permute.xlu1 %316  ;;  %v4415_v41 = vpop.permute.xlu0 %306 }
  0x96   : > { %8445 = vst [vmem:[#allocation63_spill] sm:$0xff] %v4413_v49  ;;  %8446 = vst [vmem:[#allocation64_spill] sm:$0xff] %v4415_v41  ;;  %4084 = vset.pattern.permute.xlu1 %v4111_v57  ;;  %4083 = vset.pattern.permute.xlu0 %v4111_v57 }
  0x97   : > { %761 = vperm.xlu1 %4084, %v4169_v8   ;;  %757 = vperm.xlu0 %4083, %v4162_v5  }
  0x99   : > { %v4419_v1 = vpop.permute.xlu1 %321  ;;  %v4421_v58 = vpop.permute.xlu0 %311 }
  0x9a   : > { %8447 = vst [vmem:[#allocation65_spill] sm:$0xff] %v4419_v1  ;;  %8448 = vst [vmem:[#allocation66_spill] sm:$0xff] %v4421_v58 }
  0x9b   : > { %765 = vperm.xlu1 %4084, %v4160_v4   ;;  %769 = vperm.xlu0 %4083, %v4167_v7  }
  0x9d   : > { %v4425_v42 = vpop.permute.xlu1 %331  ;;  %v4427_v49 = vpop.permute.xlu0 %326 }
  0x9e   : > { %8449 = vst [vmem:[#allocation67_spill] sm:$0xff] %v4425_v42  ;;  %8450 = vst [vmem:[#allocation68_spill] sm:$0xff] %v4427_v49 }
  0x9f   : > { %773 = vperm.xlu1 %4084, %v4177_v12   ;;  %777 = vperm.xlu0 %4083, %v4175_v11  }
  0xa1   : > { %v4431_v57 = vpop.permute.xlu1 %341  ;;  %v4433_v41 = vpop.permute.xlu0 %336 }
  0xa2   : > { %8451 = vst [vmem:[#allocation69_spill] sm:$0xff] %v4431_v57  ;;  %8452 = vst [vmem:[#allocation70_spill] sm:$0xff] %v4433_v41 }
  0xa3   : > { %781 = vperm.xlu1 %4084, %v4185_v16   ;;  %785 = vperm.xlu0 %4083, %v4183_v15  }
  0xa5   : > { %v4437_v58 = vpop.permute.xlu1 %351  ;;  %v4439_v1 = vpop.permute.xlu0 %346 }
  0xa6   : > { %8453 = vst [vmem:[#allocation71_spill] sm:$0xff] %v4437_v58  ;;  %8454 = vst [vmem:[#allocation72_spill] sm:$0xff] %v4439_v1 }
  0xa7   : > { %789 = vperm.xlu1 %4084, %v4193_v20   ;;  %793 = vperm.xlu0 %4083, %v4191_v19  }
  0xa9   : > { %v4443_v49 = vpop.permute.xlu1 %361  ;;  %v4445_v42 = vpop.permute.xlu0 %356 }
  0xaa   : > { %8455 = vst [vmem:[#allocation73_spill] sm:$0xff] %v4443_v49  ;;  %8456 = vst [vmem:[#allocation74_spill] sm:$0xff] %v4445_v42 }
  0xab   : > { %797 = vperm.xlu1 %4084, %v4201_v24   ;;  %801 = vperm.xlu0 %4083, %v4199_v23  }
  0xad   : > { %v4449_v41 = vpop.permute.xlu1 %371  ;;  %v4451_v57 = vpop.permute.xlu0 %366 }
  0xae   : > { %8457 = vst [vmem:[#allocation75_spill] sm:$0xff] %v4449_v41  ;;  %8458 = vst [vmem:[#allocation76_spill] sm:$0xff] %v4451_v57 }
  0xaf   : > { %805 = vperm.xlu1 %4084, %v4209_v28   ;;  %809 = vperm.xlu0 %4083, %v4207_v27  }
  0xb1   : > { %v4455_v1 = vpop.permute.xlu1 %381  ;;  %v4457_v58 = vpop.permute.xlu0 %376 }
  0xb2   : > { %8459 = vst [vmem:[#allocation77_spill] sm:$0xff] %v4455_v1  ;;  %8460 = vst [vmem:[#allocation78_spill] sm:$0xff] %v4457_v58 }
  0xb3   : > { %813 = vperm.xlu1 %4084, %v4217_v32   ;;  %817 = vperm.xlu0 %4083, %v4215_v31  }
  0xb5   : > { %v4461_v42 = vpop.permute.xlu1 %391  ;;  %v4463_v49 = vpop.permute.xlu0 %386 }
  0xb6   : > { %8461 = vst [vmem:[#allocation79_spill] sm:$0xff] %v4461_v42  ;;  %8462 = vst [vmem:[#allocation80_spill] sm:$0xff] %v4463_v49 }
  0xb7   : > { %821 = vperm.xlu1 %4084, %v4225_v36   ;;  %825 = vperm.xlu0 %4083, %v4223_v35  }
  0xb9   : > { %v4467_v57 = vpop.permute.xlu1 %401  ;;  %v4469_v41 = vpop.permute.xlu0 %396 }
  0xba   : > { %8463 = vst [vmem:[#allocation81_spill] sm:$0xff] %v4467_v57  ;;  %8464 = vst [vmem:[#allocation82_spill] sm:$0xff] %v4469_v41 }
  0xbb   : > { %829 = vperm.xlu1 %4084, %v4233_v40   ;;  %833 = vperm.xlu0 %4083, %v4231_v39  }
  0xbd   : > { %v4473_v58 = vpop.permute.xlu1 %411  ;;  %v4475_v1 = vpop.permute.xlu0 %406 }
  0xbe   : > { %8465 = vst [vmem:[#allocation83_spill] sm:$0xff] %v4473_v58  ;;  %8466 = vst [vmem:[#allocation84_spill] sm:$0xff] %v4475_v1 }
  0xbf   : > { %837 = vperm.xlu1 %4084, %v4241_v44   ;;  %841 = vperm.xlu0 %4083, %v4239_v43  }
  0xc1   : > { %v4479_v49 = vpop.permute.xlu1 %421  ;;  %v4481_v42 = vpop.permute.xlu0 %416 }
  0xc2   : > { %8467 = vst [vmem:[#allocation85_spill] sm:$0xff] %v4479_v49  ;;  %8468 = vst [vmem:[#allocation86_spill] sm:$0xff] %v4481_v42 }
  0xc3   : > { %845 = vperm.xlu1 %4084, %v4249_v48   ;;  %849 = vperm.xlu0 %4083, %v4247_v47  }
  0xc5   : > { %v4485_v41 = vpop.permute.xlu1 %431  ;;  %v4487_v57 = vpop.permute.xlu0 %426 }
  0xc6   : > { %8469 = vst [vmem:[#allocation87_spill] sm:$0xff] %v4485_v41  ;;  %8470 = vst [vmem:[#allocation88_spill] sm:$0xff] %v4487_v57 }
  0xc7   : > { %853 = vperm.xlu1 %4084, %v4257_v52   ;;  %857 = vperm.xlu0 %4083, %v4255_v51  }
  0xc9   : > { %v4491_v1 = vpop.permute.xlu1 %441  ;;  %v4493_v58 = vpop.permute.xlu0 %436 }
  0xca   : > { %8471 = vst [vmem:[#allocation89_spill] sm:$0xff] %v4491_v1  ;;  %8472 = vst [vmem:[#allocation90_spill] sm:$0xff] %v4493_v58 }
  0xcb   : > { %861 = vperm.xlu1 %4084, %v4265_v56   ;;  %865 = vperm.xlu0 %4083, %v4263_v55  }
  0xcd   : > { %v4497_v42 = vpop.permute.xlu1 %451  ;;  %v4499_v49 = vpop.permute.xlu0 %446 }
  0xce   : > { %8473 = vst [vmem:[#allocation91_spill] sm:$0xff] %v4497_v42  ;;  %8474 = vst [vmem:[#allocation92_spill] sm:$0xff] %v4499_v49 }
  0xcf   : > { %869 = vperm.xlu1 %4084, %v4273_v60   ;;  %873 = vperm.xlu0 %4083, %v4271_v59  }
  0xd1   : > { %v4503_v57 = vpop.permute.xlu1 %461  ;;  %v4505_v41 = vpop.permute.xlu0 %456 }
  0xd2   : > { %8475 = vst [vmem:[#allocation93_spill] sm:$0xff] %v4503_v57  ;;  %8476 = vst [vmem:[#allocation94_spill] sm:$0xff] %v4505_v41 }
  0xd3   : > { %877 = vperm.xlu1 %4084, %v4281_v0   ;;  %881 = vperm.xlu0 %4083, %v4279_v63  }
  0xd5   : > { %v4509_v58 = vpop.permute.xlu1 %471  ;;  %v4511_v1 = vpop.permute.xlu0 %466 }
  0xd6   : > { %8477 = vst [vmem:[#allocation95_spill] sm:$0xff] %v4509_v58  ;;  %8478 = vst [vmem:[#allocation96_spill] sm:$0xff] %v4511_v1 }
  0xd7   : > { %885 = vperm.xlu1 %4084, %v4289_v6   ;;  %889 = vperm.xlu0 %4083, %v4287_v3  }
  0xd9   : > { %v4515_v49 = vpop.permute.xlu1 %481  ;;  %v4517_v42 = vpop.permute.xlu0 %476 }
  0xda   : > { %8479 = vst [vmem:[#allocation97_spill] sm:$0xff] %v4515_v49  ;;  %8480 = vst [vmem:[#allocation98_spill] sm:$0xff] %v4517_v42 }
  0xdb   : > { %893 = vperm.xlu1 %4084, %v4297_v14   ;;  %897 = vperm.xlu0 %4083, %v4295_v13  }
  0xdd   : > { %v4521_v41 = vpop.permute.xlu1 %491  ;;  %v4523_v57 = vpop.permute.xlu0 %486 }
  0xde   : > { %8481 = vst [vmem:[#allocation99_spill] sm:$0xff] %v4521_v41  ;;  %8482 = vst [vmem:[#allocation100_spill] sm:$0xff] %v4523_v57 }
  0xdf   : > { %901 = vperm.xlu1 %4084, %v4305_v22   ;;  %905 = vperm.xlu0 %4083, %v4303_v21  }
  0xe1   : > { %v4527_v1 = vpop.permute.xlu1 %501  ;;  %v4529_v58 = vpop.permute.xlu0 %496 }
  0xe2   : > { %8483 = vst [vmem:[#allocation101_spill] sm:$0xff] %v4527_v1  ;;  %8484 = vst [vmem:[#allocation102_spill] sm:$0xff] %v4529_v58 }
  0xe3   : > { %909 = vperm.xlu1 %4084, %v4313_v30   ;;  %913 = vperm.xlu0 %4083, %v4311_v29  }
  0xe5   : > { %v4533_v42 = vpop.permute.xlu1 %511  ;;  %v4535_v49 = vpop.permute.xlu0 %506 }
  0xe6   : > { %8485 = vst [vmem:[#allocation103_spill] sm:$0xff] %v4533_v42  ;;  %8486 = vst [vmem:[#allocation104_spill] sm:$0xff] %v4535_v49 }
  0xe7   : > { %917 = vperm.xlu1 %4084, %v4321_v38   ;;  %921 = vperm.xlu0 %4083, %v4319_v37  }
  0xe9   : > { %v4539_v57 = vpop.permute.xlu1 %521  ;;  %v4541_v41 = vpop.permute.xlu0 %516 }
  0xea   : > { %8487 = vst [vmem:[#allocation105_spill] sm:$0xff] %v4539_v57  ;;  %8488 = vst [vmem:[#allocation106_spill] sm:$0xff] %v4541_v41 }
  0xeb   : > { %925 = vperm.xlu1 %4084, %v4329_v46   ;;  %929 = vperm.xlu0 %4083, %v4327_v45  }
  0xed   : > { %v4545_v58 = vpop.permute.xlu1 %531  ;;  %v4547_v1 = vpop.permute.xlu0 %526 }
  0xee   : > { %8489 = vst [vmem:[#allocation107_spill] sm:$0xff] %v4545_v58  ;;  %8490 = vst [vmem:[#allocation108_spill] sm:$0xff] %v4547_v1 }
  0xef   : > { %933 = vperm.xlu1 %4084, %v4337_v54   ;;  %937 = vperm.xlu0 %4083, %v4335_v53  }
  0xf1   : > { %v4551_v49 = vpop.permute.xlu1 %541  ;;  %v4553_v42 = vpop.permute.xlu0 %536 }
  0xf2   : > { %8491 = vst [vmem:[#allocation109_spill] sm:$0xff] %v4551_v49  ;;  %8492 = vst [vmem:[#allocation110_spill] sm:$0xff] %v4553_v42 }
  0xf3   : > { %941 = vperm.xlu1 %4084, %v4345_v62   ;;  %945 = vperm.xlu0 %4083, %v4343_v61   ;;  %v8499_v61 = vld [vmem:[#allocation52_spill] sm:$0xff] }
  0xf5   : > { %v4557_v41 = vpop.permute.xlu1 %551  ;;  %v4559_v57 = vpop.permute.xlu0 %546 }
  0xf6   : > { %8493 = vst [vmem:[#allocation111_spill] sm:$0xff] %v4557_v41  ;;  %8494 = vst [vmem:[#allocation112_spill] sm:$0xff] %v4559_v57  ;;  %v8500_v41 = vld [vmem:[#allocation51_spill] sm:$0xff] }
  0xf7   : > { %949 = vperm.xlu1 %4084, %v4353_v10   ;;  %953 = vperm.xlu0 %4083, %v4351_v9   ;;  %v8503_v9 = vld [vmem:[#allocation54_spill] sm:$0xff] }
  0xf9   : > { %v4563_v1 = vpop.permute.xlu1 %561  ;;  %v4565_v58 = vpop.permute.xlu0 %556 }
  0xfa   : > { %8495 = vst [vmem:[#allocation113_spill] sm:$0xff] %v4563_v1  ;;  %8496 = vst [vmem:[#allocation114_spill] sm:$0xff] %v4565_v58  ;;  %v8504_v1 = vld [vmem:[#allocation53_spill] sm:$0xff] }
  0xfb   : > { %957 = vperm.xlu1 %4084, %v4361_v26   ;;  %961 = vperm.xlu0 %4083, %v4359_v25  }
  0xfd   : > { %v4569_v42 = vpop.permute.xlu1 %571  ;;  %v4571_v49 = vpop.permute.xlu0 %566 }
  0xfe   : > { %8497 = vst [vmem:[#allocation115_spill] sm:$0xff] %v4569_v42  ;;  %8498 = vst [vmem:[#allocation116_spill] sm:$0xff] %v4571_v49 }
  0xff   : > { %965 = vperm.xlu1 %4084, %v8499_v61   ;;  %969 = vperm.xlu0 %4083, %v8500_v41  }
 0x101   : > { %v4575_v57 = vpop.permute.xlu1 %581  ;;  %v4577_v10 = vpop.permute.xlu0 %576 }
 0x102   : > { %8501 = vst [vmem:[#allocation117_spill] sm:$0xff] %v4575_v57  ;;  %8502 = vst [vmem:[#allocation118_spill] sm:$0xff] %v4577_v10  ;;  %v8509_v57 = vld [vmem:[#allocation57_spill] sm:$0xff] }
 0x103   : > { %973 = vperm.xlu1 %4084, %v8503_v9   ;;  %977 = vperm.xlu0 %4083, %v8504_v1  }
 0x105   : > { %v4581_v58 = vpop.permute.xlu1 %591  ;;  %v4583_v26 = vpop.permute.xlu0 %586 }
 0x106   : > { %8505 = vst [vmem:[#allocation119_spill] sm:$0xff] %v4581_v58  ;;  %8506 = vst [vmem:[#allocation120_spill] sm:$0xff] %v4583_v26  ;;  %v8512_v58 = vld [vmem:[#allocation59_spill] sm:$0xff] }
 0x107   : > { %981 = vperm.xlu1 %4084, %v4385_v18   ;;  %985 = vperm.xlu0 %4083, %v4383_v17  }
 0x109   : > { %v4587_v49 = vpop.permute.xlu1 %601  ;;  %v4589_v42 = vpop.permute.xlu0 %596 }
 0x10a   : > { %8507 = vst [vmem:[#allocation121_spill] sm:$0xff] %v4587_v49  ;;  %8508 = vst [vmem:[#allocation122_spill] sm:$0xff] %v4589_v42 }
 0x10b   : > { %989 = vperm.xlu1 %4084, %v4393_v50   ;;  %993 = vperm.xlu0 %4083, %v8509_v57   ;;  %v4112_v57 = vmov 2  }
 0x10d   : > { %v4593_v10 = vpop.permute.xlu1 %611  ;;  %v4595_v41 = vpop.permute.xlu0 %606 }
 0x10e   : > { %8510 = vst [vmem:[#allocation123_spill] sm:$0xff] %v4593_v10  ;;  %8511 = vst [vmem:[#allocation124_spill] sm:$0xff] %v4595_v41 }
 0x10f   : > { %997 = vperm.xlu1 %4084, %v4401_v2   ;;  %1001 = vperm.xlu0 %4083, %v8512_v58  }
 0x111   : > { %v4599_v26 = vpop.permute.xlu1 %621  ;;  %v4601_v1 = vpop.permute.xlu0 %616 }
 0x112   : > { %8513 = vst [vmem:[#allocation125_spill] sm:$0xff] %v4599_v26  ;;  %8514 = vst [vmem:[#allocation126_spill] sm:$0xff] %v4601_v1 }
 0x113   : > { %1005 = vperm.xlu1 %4084, %v4409_v34   ;;  %1009 = vperm.xlu0 %4083, %v4407_v33  }
 0x116   : > { %v4605_v42 = vpop.permute.xlu1 %761  ;;  %v4607_v49 = vpop.permute.xlu0 %757 }
 0x117   : > { %8515 = vst [vmem:[#allocation127_spill] sm:$0xff] %v4605_v42  ;;  %8516 = vst [vmem:[#allocation128_spill] sm:$0xff] %v4607_v49  ;;  %4085 = vset.pattern.permute.xlu1 %v4112_v57  ;;  %4086 = vset.pattern.permute.xlu0 %v4112_v57 }
 0x118   : > { %1145 = vperm.xlu1 %4085, %v4162_v5   ;;  %1149 = vperm.xlu0 %4086, %v4169_v8  }
 0x11a   : > { %v4611_v41 = vpop.permute.xlu1 %765  ;;  %v4613_v26 = vpop.permute.xlu0 %769 }
 0x11b   : > { %8517 = vst [vmem:[#allocation129_spill] sm:$0xff] %v4611_v41  ;;  %8518 = vst [vmem:[#allocation130_spill] sm:$0xff] %v4613_v26 }
 0x11c   : > { %1153 = vperm.xlu1 %4085, %v4160_v4   ;;  %1161 = vperm.xlu0 %4086, %v4177_v12  }
 0x11e   : > { %v4617_v1 = vpop.permute.xlu1 %773  ;;  %v4619_v10 = vpop.permute.xlu0 %777 }
 0x11f   : > { %8519 = vst [vmem:[#allocation131_spill] sm:$0xff] %v4617_v1  ;;  %8520 = vst [vmem:[#allocation132_spill] sm:$0xff] %v4619_v10 }
 0x120   : > { %1157 = vperm.xlu1 %4085, %v4167_v7   ;;  %1169 = vperm.xlu0 %4086, %v4185_v16  }
 0x122   : > { %v4623_v57 = vpop.permute.xlu1 %781  ;;  %v4625_v49 = vpop.permute.xlu0 %785 }
 0x123   : > { %8521 = vst [vmem:[#allocation133_spill] sm:$0xff] %v4623_v57  ;;  %8522 = vst [vmem:[#allocation134_spill] sm:$0xff] %v4625_v49 }
 0x124   : > { %1165 = vperm.xlu1 %4085, %v4175_v11   ;;  %1177 = vperm.xlu0 %4086, %v4193_v20  }
 0x126   : > { %v4629_v26 = vpop.permute.xlu1 %789  ;;  %v4631_v41 = vpop.permute.xlu0 %793 }
 0x127   : > { %8523 = vst [vmem:[#allocation135_spill] sm:$0xff] %v4629_v26  ;;  %8524 = vst [vmem:[#allocation136_spill] sm:$0xff] %v4631_v41 }
 0x128   : > { %1173 = vperm.xlu1 %4085, %v4183_v15   ;;  %1185 = vperm.xlu0 %4086, %v4201_v24  }
 0x12a   : > { %v4635_v10 = vpop.permute.xlu1 %797  ;;  %v4637_v1 = vpop.permute.xlu0 %801 }
 0x12b   : > { %8525 = vst [vmem:[#allocation137_spill] sm:$0xff] %v4635_v10  ;;  %8526 = vst [vmem:[#allocation138_spill] sm:$0xff] %v4637_v1 }
 0x12c   : > { %1181 = vperm.xlu1 %4085, %v4191_v19   ;;  %1193 = vperm.xlu0 %4086, %v4209_v28  }
 0x12e   : > { %v4641_v49 = vpop.permute.xlu1 %805  ;;  %v4643_v57 = vpop.permute.xlu0 %809 }
 0x12f   : > { %8527 = vst [vmem:[#allocation139_spill] sm:$0xff] %v4641_v49  ;;  %8528 = vst [vmem:[#allocation140_spill] sm:$0xff] %v4643_v57 }
 0x130   : > { %1189 = vperm.xlu1 %4085, %v4199_v23   ;;  %1201 = vperm.xlu0 %4086, %v4217_v32  }
 0x132   : > { %v4647_v41 = vpop.permute.xlu1 %813  ;;  %v4649_v26 = vpop.permute.xlu0 %817 }
 0x133   : > { %8529 = vst [vmem:[#allocation141_spill] sm:$0xff] %v4647_v41  ;;  %8530 = vst [vmem:[#allocation142_spill] sm:$0xff] %v4649_v26 }
 0x134   : > { %1197 = vperm.xlu1 %4085, %v4207_v27   ;;  %1209 = vperm.xlu0 %4086, %v4225_v36  }
 0x136   : > { %v4653_v1 = vpop.permute.xlu1 %821  ;;  %v4655_v10 = vpop.permute.xlu0 %825 }
 0x137   : > { %8531 = vst [vmem:[#allocation143_spill] sm:$0xff] %v4653_v1  ;;  %8532 = vst [vmem:[#allocation144_spill] sm:$0xff] %v4655_v10 }
 0x138   : > { %1205 = vperm.xlu1 %4085, %v4215_v31   ;;  %1217 = vperm.xlu0 %4086, %v4233_v40  }
 0x13a   : > { %v4659_v57 = vpop.permute.xlu1 %829  ;;  %v4661_v49 = vpop.permute.xlu0 %833 }
 0x13b   : > { %8533 = vst [vmem:[#allocation145_spill] sm:$0xff] %v4659_v57  ;;  %8534 = vst [vmem:[#allocation146_spill] sm:$0xff] %v4661_v49 }
 0x13c   : > { %1213 = vperm.xlu1 %4085, %v4223_v35   ;;  %1225 = vperm.xlu0 %4086, %v4241_v44  }
 0x13e   : > { %v4665_v26 = vpop.permute.xlu1 %837  ;;  %v4667_v41 = vpop.permute.xlu0 %841 }
 0x13f   : > { %8535 = vst [vmem:[#allocation147_spill] sm:$0xff] %v4665_v26  ;;  %8536 = vst [vmem:[#allocation148_spill] sm:$0xff] %v4667_v41 }
 0x140   : > { %1221 = vperm.xlu1 %4085, %v4231_v39   ;;  %1233 = vperm.xlu0 %4086, %v4249_v48  }
 0x142   : > { %v4671_v10 = vpop.permute.xlu1 %845  ;;  %v4673_v1 = vpop.permute.xlu0 %849 }
 0x143   : > { %8537 = vst [vmem:[#allocation149_spill] sm:$0xff] %v4671_v10  ;;  %8538 = vst [vmem:[#allocation150_spill] sm:$0xff] %v4673_v1 }
 0x144   : > { %1229 = vperm.xlu1 %4085, %v4239_v43   ;;  %1241 = vperm.xlu0 %4086, %v4257_v52  }
 0x146   : > { %v4677_v49 = vpop.permute.xlu1 %853  ;;  %v4679_v57 = vpop.permute.xlu0 %857 }
 0x147   : > { %8539 = vst [vmem:[#allocation151_spill] sm:$0xff] %v4677_v49  ;;  %8540 = vst [vmem:[#allocation152_spill] sm:$0xff] %v4679_v57 }
 0x148   : > { %1237 = vperm.xlu1 %4085, %v4247_v47   ;;  %1249 = vperm.xlu0 %4086, %v4265_v56  }
 0x14a   : > { %v4683_v41 = vpop.permute.xlu1 %861  ;;  %v4685_v26 = vpop.permute.xlu0 %865 }
 0x14b   : > { %8541 = vst [vmem:[#allocation153_spill] sm:$0xff] %v4683_v41  ;;  %8542 = vst [vmem:[#allocation154_spill] sm:$0xff] %v4685_v26 }
 0x14c   : > { %1245 = vperm.xlu1 %4085, %v4255_v51   ;;  %1257 = vperm.xlu0 %4086, %v4273_v60  }
 0x14e   : > { %v4689_v1 = vpop.permute.xlu1 %869  ;;  %v4691_v10 = vpop.permute.xlu0 %873 }
 0x14f   : > { %8543 = vst [vmem:[#allocation155_spill] sm:$0xff] %v4689_v1  ;;  %8544 = vst [vmem:[#allocation156_spill] sm:$0xff] %v4691_v10 }
 0x150   : > { %1253 = vperm.xlu1 %4085, %v4263_v55   ;;  %1265 = vperm.xlu0 %4086, %v4281_v0  }
 0x152   : > { %v4695_v57 = vpop.permute.xlu1 %877  ;;  %v4697_v49 = vpop.permute.xlu0 %881 }
 0x153   : > { %8545 = vst [vmem:[#allocation157_spill] sm:$0xff] %v4695_v57  ;;  %8546 = vst [vmem:[#allocation158_spill] sm:$0xff] %v4697_v49 }
 0x154   : > { %1261 = vperm.xlu1 %4085, %v4271_v59   ;;  %1273 = vperm.xlu0 %4086, %v4289_v6  }
 0x156   : > { %v4701_v26 = vpop.permute.xlu1 %885  ;;  %v4703_v41 = vpop.permute.xlu0 %889 }
 0x157   : > { %8547 = vst [vmem:[#allocation159_spill] sm:$0xff] %v4701_v26  ;;  %8548 = vst [vmem:[#allocation160_spill] sm:$0xff] %v4703_v41 }
 0x158   : > { %1269 = vperm.xlu1 %4085, %v4279_v63   ;;  %1281 = vperm.xlu0 %4086, %v4297_v14  }
 0x15a   : > { %v4707_v10 = vpop.permute.xlu1 %893  ;;  %v4709_v1 = vpop.permute.xlu0 %897 }
 0x15b   : > { %8549 = vst [vmem:[#allocation161_spill] sm:$0xff] %v4707_v10  ;;  %8550 = vst [vmem:[#allocation162_spill] sm:$0xff] %v4709_v1 }
 0x15c   : > { %1277 = vperm.xlu1 %4085, %v4287_v3   ;;  %1289 = vperm.xlu0 %4086, %v4305_v22  }
 0x15e   : > { %v4713_v49 = vpop.permute.xlu1 %901  ;;  %v4715_v57 = vpop.permute.xlu0 %905 }
 0x15f   : > { %8551 = vst [vmem:[#allocation163_spill] sm:$0xff] %v4713_v49  ;;  %8552 = vst [vmem:[#allocation164_spill] sm:$0xff] %v4715_v57 }
 0x160   : > { %1285 = vperm.xlu1 %4085, %v4295_v13   ;;  %1297 = vperm.xlu0 %4086, %v4313_v30  }
 0x162   : > { %v4719_v41 = vpop.permute.xlu1 %909  ;;  %v4721_v26 = vpop.permute.xlu0 %913 }
 0x163   : > { %8553 = vst [vmem:[#allocation165_spill] sm:$0xff] %v4719_v41  ;;  %8554 = vst [vmem:[#allocation166_spill] sm:$0xff] %v4721_v26 }
 0x164   : > { %1293 = vperm.xlu1 %4085, %v4303_v21   ;;  %1305 = vperm.xlu0 %4086, %v4321_v38  }
 0x166   : > { %v4725_v1 = vpop.permute.xlu1 %917  ;;  %v4727_v10 = vpop.permute.xlu0 %921 }
 0x167   : > { %8555 = vst [vmem:[#allocation167_spill] sm:$0xff] %v4725_v1  ;;  %8556 = vst [vmem:[#allocation168_spill] sm:$0xff] %v4727_v10 }
 0x168   : > { %1301 = vperm.xlu1 %4085, %v4311_v29   ;;  %1313 = vperm.xlu0 %4086, %v4329_v46  }
 0x16a   : > { %v4731_v57 = vpop.permute.xlu1 %925  ;;  %v4733_v49 = vpop.permute.xlu0 %929 }
 0x16b   : > { %8557 = vst [vmem:[#allocation169_spill] sm:$0xff] %v4731_v57  ;;  %8558 = vst [vmem:[#allocation170_spill] sm:$0xff] %v4733_v49  ;;  %v8563_v57 = vld [vmem:[#allocation48_spill] sm:$0xff] }
 0x16c   : > { %1309 = vperm.xlu1 %4085, %v4319_v37   ;;  %1321 = vperm.xlu0 %4086, %v4337_v54   ;;  %v8566_v54 = vld [vmem:[#allocation45_spill] sm:$0xff] }
 0x16e   : > { %v4737_v26 = vpop.permute.xlu1 %933  ;;  %v4739_v41 = vpop.permute.xlu0 %937 }
 0x16f   : > { %8559 = vst [vmem:[#allocation171_spill] sm:$0xff] %v4737_v26  ;;  %8560 = vst [vmem:[#allocation172_spill] sm:$0xff] %v4739_v41  ;;  %v8567_v26 = vld [vmem:[#allocation50_spill] sm:$0xff] }
 0x170   : > { %1317 = vperm.xlu1 %4085, %v4327_v45   ;;  %1329 = vperm.xlu0 %4086, %v4345_v62   ;;  %v8570_v62 = vld [vmem:[#allocation47_spill] sm:$0xff] }
 0x172   : > { %v4743_v10 = vpop.permute.xlu1 %941  ;;  %v4745_v1 = vpop.permute.xlu0 %945 }
 0x173   : > { %8561 = vst [vmem:[#allocation173_spill] sm:$0xff] %v4743_v10  ;;  %8562 = vst [vmem:[#allocation174_spill] sm:$0xff] %v4745_v1 }
 0x174   : > { %1325 = vperm.xlu1 %4085, %v4335_v53   ;;  %1337 = vperm.xlu0 %4086, %v8563_v57  }
 0x176   : > { %v4749_v49 = vpop.permute.xlu1 %949  ;;  %v4751_v42 = vpop.permute.xlu0 %953 }
 0x177   : > { %8564 = vst [vmem:[#allocation175_spill] sm:$0xff] %v4749_v49  ;;  %8565 = vst [vmem:[#allocation176_spill] sm:$0xff] %v4751_v42 }
 0x178   : > { %1333 = vperm.xlu1 %4085, %v8566_v54   ;;  %1345 = vperm.xlu0 %4086, %v8567_v26   ;;  %v8575_v26 = vld [vmem:[#allocation51_spill] sm:$0xff] }
 0x17a   : > { %v4755_v41 = vpop.permute.xlu1 %957  ;;  %v4757_v46 = vpop.permute.xlu0 %961 }
 0x17b   : > { %8568 = vst [vmem:[#allocation177_spill] sm:$0xff] %v4755_v41  ;;  %8569 = vst [vmem:[#allocation178_spill] sm:$0xff] %v4757_v46 }
 0x17c   : > { %1341 = vperm.xlu1 %4085, %v8570_v62   ;;  %1353 = vperm.xlu0 %4086, %v8499_v61   ;;  %v8578_v61 = vld [vmem:[#allocation53_spill] sm:$0xff] }
 0x17e   : > { %v4761_v1 = vpop.permute.xlu1 %965  ;;  %v4763_v10 = vpop.permute.xlu0 %969 }
 0x17f   : > { %8571 = vst [vmem:[#allocation179_spill] sm:$0xff] %v4761_v1  ;;  %8572 = vst [vmem:[#allocation180_spill] sm:$0xff] %v4763_v10 }
 0x180   : > { %1349 = vperm.xlu1 %4085, %v4359_v25   ;;  %1361 = vperm.xlu0 %4086, %v8503_v9  }
 0x182   : > { %v4767_v42 = vpop.permute.xlu1 %973  ;;  %v4769_v49 = vpop.permute.xlu0 %977 }
 0x183   : > { %8573 = vst [vmem:[#allocation181_spill] sm:$0xff] %v4767_v42  ;;  %8574 = vst [vmem:[#allocation182_spill] sm:$0xff] %v4769_v49 }
 0x184   : > { %1357 = vperm.xlu1 %4085, %v8575_v26   ;;  %1369 = vperm.xlu0 %4086, %v4385_v18   ;;  %v8583_v18 = vld [vmem:[#allocation57_spill] sm:$0xff] }
 0x186   : > { %v4773_v46 = vpop.permute.xlu1 %981  ;;  %v4775_v41 = vpop.permute.xlu0 %985 }
 0x187   : > { %8576 = vst [vmem:[#allocation183_spill] sm:$0xff] %v4773_v46  ;;  %8577 = vst [vmem:[#allocation184_spill] sm:$0xff] %v4775_v41 }
 0x188   : > { %1365 = vperm.xlu1 %4085, %v8578_v61   ;;  %1377 = vperm.xlu0 %4086, %v4393_v50  }
 0x18a   : > { %v4779_v10 = vpop.permute.xlu1 %989  ;;  %v4781_v1 = vpop.permute.xlu0 %993 }
 0x18b   : > { %8579 = vst [vmem:[#allocation185_spill] sm:$0xff] %v4779_v10  ;;  %8580 = vst [vmem:[#allocation186_spill] sm:$0xff] %v4781_v1  ;;  %v4113_v10 = vmov 3  }
 0x18c   : > { %1373 = vperm.xlu1 %4085, %v4383_v17   ;;  %1385 = vperm.xlu0 %4086, %v4401_v2  }
 0x18e   : > { %v4785_v49 = vpop.permute.xlu1 %997  ;;  %v4787_v42 = vpop.permute.xlu0 %1001 }
 0x18f   : > { %8581 = vst [vmem:[#allocation187_spill] sm:$0xff] %v4785_v49  ;;  %8582 = vst [vmem:[#allocation188_spill] sm:$0xff] %v4787_v42 }
 0x190   : > { %1381 = vperm.xlu1 %4085, %v8583_v18   ;;  %1393 = vperm.xlu0 %4086, %v4409_v34  }
 0x192   : > { %v4791_v41 = vpop.permute.xlu1 %1005  ;;  %v4793_v46 = vpop.permute.xlu0 %1009 }
 0x193   : > { %8584 = vst [vmem:[#allocation189_spill] sm:$0xff] %v4791_v41  ;;  %8585 = vst [vmem:[#allocation190_spill] sm:$0xff] %v4793_v46 }
 0x194   : > { %1389 = vperm.xlu1 %4085, %v8512_v58   ;;  %4087 = vset.pattern.permute.xlu0 %v4113_v10 }
 0x195   : > { %1533 = vperm.xlu0 %4087, %v4162_v5  }
 0x197   : > { %v4797_v1 = vpop.permute.xlu1 %1145  ;;  %v4799_v2 = vpop.permute.xlu0 %1149 }
 0x198   : > { %8586 = vst [vmem:[#allocation191_spill] sm:$0xff] %v4797_v1  ;;  %8587 = vst [vmem:[#allocation192_spill] sm:$0xff] %v4799_v2  ;;  %1397 = vperm.xlu1 %4085, %v4407_v33  }
 0x199   : > { %1545 = vperm.xlu0 %4087, %v4167_v7  }
 0x19b   : > { %v4803_v42 = vpop.permute.xlu1 %1153  ;;  %v4805_v49 = vpop.permute.xlu0 %1161 }
 0x19c   : > { %8588 = vst [vmem:[#allocation193_spill] sm:$0xff] %v4803_v42  ;;  %8589 = vst [vmem:[#allocation194_spill] sm:$0xff] %v4805_v49  ;;  %4088 = vset.pattern.permute.xlu1 %v4113_v10  ;;  %v8632_v42 = vld [vmem:[#allocation42_spill] sm:$0xff] }
 0x19d   : > { %1537 = vperm.xlu1 %4088, %v4169_v8   ;;  %1553 = vperm.xlu0 %4087, %v4175_v11  }
 0x19f   : > { %v4809_v46 = vpop.permute.xlu1 %1157  ;;  %v4811_v41 = vpop.permute.xlu0 %1169 }
 0x1a0   : > { %8590 = vst [vmem:[#allocation195_spill] sm:$0xff] %v4809_v46  ;;  %8591 = vst [vmem:[#allocation196_spill] sm:$0xff] %v4811_v41 }
 0x1a1   : > { %1541 = vperm.xlu1 %4088, %v4160_v4   ;;  %1561 = vperm.xlu0 %4087, %v4183_v15  }
 0x1a3   : > { %v4815_v2 = vpop.permute.xlu1 %1165  ;;  %v4817_v1 = vpop.permute.xlu0 %1177 }
 0x1a4   : > { %8592 = vst [vmem:[#allocation197_spill] sm:$0xff] %v4815_v2  ;;  %8593 = vst [vmem:[#allocation198_spill] sm:$0xff] %v4817_v1 }
 0x1a5   : > { %1549 = vperm.xlu1 %4088, %v4177_v12   ;;  %1569 = vperm.xlu0 %4087, %v4191_v19  }
 0x1a7   : > { %v4821_v10 = vpop.permute.xlu1 %1173  ;;  %v4823_v49 = vpop.permute.xlu0 %1185 }
 0x1a8   : > { %8594 = vst [vmem:[#allocation199_spill] sm:$0xff] %v4821_v10  ;;  %8595 = vst [vmem:[#allocation200_spill] sm:$0xff] %v4823_v49 }
 0x1a9   : > { %1557 = vperm.xlu1 %4088, %v4185_v16   ;;  %1577 = vperm.xlu0 %4087, %v4199_v23  }
 0x1ab   : > { %v4827_v41 = vpop.permute.xlu1 %1181  ;;  %v4829_v46 = vpop.permute.xlu0 %1193 }
 0x1ac   : > { %8596 = vst [vmem:[#allocation201_spill] sm:$0xff] %v4827_v41  ;;  %8597 = vst [vmem:[#allocation202_spill] sm:$0xff] %v4829_v46 }
 0x1ad   : > { %1565 = vperm.xlu1 %4088, %v4193_v20   ;;  %1585 = vperm.xlu0 %4087, %v4207_v27  }
 0x1af   : > { %v4833_v1 = vpop.permute.xlu1 %1189  ;;  %v4835_v2 = vpop.permute.xlu0 %1201 }
 0x1b0   : > { %8598 = vst [vmem:[#allocation203_spill] sm:$0xff] %v4833_v1  ;;  %8599 = vst [vmem:[#allocation204_spill] sm:$0xff] %v4835_v2 }
 0x1b1   : > { %1573 = vperm.xlu1 %4088, %v4201_v24   ;;  %1593 = vperm.xlu0 %4087, %v4215_v31  }
 0x1b3   : > { %v4839_v49 = vpop.permute.xlu1 %1197  ;;  %v4841_v10 = vpop.permute.xlu0 %1209 }
 0x1b4   : > { %8600 = vst [vmem:[#allocation205_spill] sm:$0xff] %v4839_v49  ;;  %8601 = vst [vmem:[#allocation206_spill] sm:$0xff] %v4841_v10 }
 0x1b5   : > { %1581 = vperm.xlu1 %4088, %v4209_v28   ;;  %1601 = vperm.xlu0 %4087, %v4223_v35  }
 0x1b7   : > { %v4845_v46 = vpop.permute.xlu1 %1205  ;;  %v4847_v41 = vpop.permute.xlu0 %1217 }
 0x1b8   : > { %8602 = vst [vmem:[#allocation207_spill] sm:$0xff] %v4845_v46  ;;  %8603 = vst [vmem:[#allocation208_spill] sm:$0xff] %v4847_v41 }
 0x1b9   : > { %1589 = vperm.xlu1 %4088, %v4217_v32   ;;  %1609 = vperm.xlu0 %4087, %v4231_v39  }
 0x1bb   : > { %v4851_v2 = vpop.permute.xlu1 %1213  ;;  %v4853_v1 = vpop.permute.xlu0 %1225 }
 0x1bc   : > { %8604 = vst [vmem:[#allocation209_spill] sm:$0xff] %v4851_v2  ;;  %8605 = vst [vmem:[#allocation210_spill] sm:$0xff] %v4853_v1 }
 0x1bd   : > { %1597 = vperm.xlu1 %4088, %v4225_v36   ;;  %1617 = vperm.xlu0 %4087, %v4239_v43  }
 0x1bf   : > { %v4857_v10 = vpop.permute.xlu1 %1221  ;;  %v4859_v49 = vpop.permute.xlu0 %1233 }
 0x1c0   : > { %8606 = vst [vmem:[#allocation211_spill] sm:$0xff] %v4857_v10  ;;  %8607 = vst [vmem:[#allocation212_spill] sm:$0xff] %v4859_v49 }
 0x1c1   : > { %1605 = vperm.xlu1 %4088, %v4233_v40   ;;  %1625 = vperm.xlu0 %4087, %v4247_v47  }
 0x1c3   : > { %v4863_v41 = vpop.permute.xlu1 %1229  ;;  %v4865_v46 = vpop.permute.xlu0 %1241 }
 0x1c4   : > { %8608 = vst [vmem:[#allocation213_spill] sm:$0xff] %v4863_v41  ;;  %8609 = vst [vmem:[#allocation214_spill] sm:$0xff] %v4865_v46 }
 0x1c5   : > { %1613 = vperm.xlu1 %4088, %v4241_v44   ;;  %1633 = vperm.xlu0 %4087, %v4255_v51  }
 0x1c7   : > { %v4869_v1 = vpop.permute.xlu1 %1237  ;;  %v4871_v2 = vpop.permute.xlu0 %1249 }
 0x1c8   : > { %8610 = vst [vmem:[#allocation215_spill] sm:$0xff] %v4869_v1  ;;  %8611 = vst [vmem:[#allocation216_spill] sm:$0xff] %v4871_v2 }
 0x1c9   : > { %1621 = vperm.xlu1 %4088, %v4249_v48   ;;  %1641 = vperm.xlu0 %4087, %v4263_v55  }
 0x1cb   : > { %v4875_v49 = vpop.permute.xlu1 %1245  ;;  %v4877_v10 = vpop.permute.xlu0 %1257 }
 0x1cc   : > { %8612 = vst [vmem:[#allocation217_spill] sm:$0xff] %v4875_v49  ;;  %8613 = vst [vmem:[#allocation218_spill] sm:$0xff] %v4877_v10 }
 0x1cd   : > { %1629 = vperm.xlu1 %4088, %v4257_v52   ;;  %1649 = vperm.xlu0 %4087, %v4271_v59  }
 0x1cf   : > { %v4881_v46 = vpop.permute.xlu1 %1253  ;;  %v4883_v41 = vpop.permute.xlu0 %1265 }
 0x1d0   : > { %8614 = vst [vmem:[#allocation219_spill] sm:$0xff] %v4881_v46  ;;  %8615 = vst [vmem:[#allocation220_spill] sm:$0xff] %v4883_v41 }
 0x1d1   : > { %1637 = vperm.xlu1 %4088, %v4265_v56   ;;  %1657 = vperm.xlu0 %4087, %v4279_v63  }
 0x1d3   : > { %v4887_v2 = vpop.permute.xlu1 %1261  ;;  %v4889_v1 = vpop.permute.xlu0 %1273 }
 0x1d4   : > { %8616 = vst [vmem:[#allocation221_spill] sm:$0xff] %v4887_v2  ;;  %8617 = vst [vmem:[#allocation222_spill] sm:$0xff] %v4889_v1 }
 0x1d5   : > { %1645 = vperm.xlu1 %4088, %v4273_v60   ;;  %1665 = vperm.xlu0 %4087, %v4287_v3  }
 0x1d7   : > { %v4893_v10 = vpop.permute.xlu1 %1269  ;;  %v4895_v49 = vpop.permute.xlu0 %1281 }
 0x1d8   : > { %8618 = vst [vmem:[#allocation223_spill] sm:$0xff] %v4893_v10  ;;  %8619 = vst [vmem:[#allocation224_spill] sm:$0xff] %v4895_v49 }
 0x1d9   : > { %1653 = vperm.xlu1 %4088, %v4281_v0   ;;  %1673 = vperm.xlu0 %4087, %v4295_v13  }
 0x1db   : > { %v4899_v41 = vpop.permute.xlu1 %1277  ;;  %v4901_v46 = vpop.permute.xlu0 %1289 }
 0x1dc   : > { %8620 = vst [vmem:[#allocation225_spill] sm:$0xff] %v4899_v41  ;;  %8621 = vst [vmem:[#allocation226_spill] sm:$0xff] %v4901_v46 }
 0x1dd   : > { %1661 = vperm.xlu1 %4088, %v4289_v6   ;;  %1681 = vperm.xlu0 %4087, %v4303_v21  }
 0x1df   : > { %v4905_v1 = vpop.permute.xlu1 %1285  ;;  %v4907_v2 = vpop.permute.xlu0 %1297 }
 0x1e0   : > { %8622 = vst [vmem:[#allocation227_spill] sm:$0xff] %v4905_v1  ;;  %8623 = vst [vmem:[#allocation228_spill] sm:$0xff] %v4907_v2 }
 0x1e1   : > { %1669 = vperm.xlu1 %4088, %v4297_v14   ;;  %1689 = vperm.xlu0 %4087, %v4311_v29  }
 0x1e3   : > { %v4911_v49 = vpop.permute.xlu1 %1293  ;;  %v4913_v10 = vpop.permute.xlu0 %1305 }
 0x1e4   : > { %8624 = vst [vmem:[#allocation229_spill] sm:$0xff] %v4911_v49  ;;  %8625 = vst [vmem:[#allocation230_spill] sm:$0xff] %v4913_v10 }
 0x1e5   : > { %1677 = vperm.xlu1 %4088, %v4305_v22   ;;  %1697 = vperm.xlu0 %4087, %v4319_v37  }
 0x1e7   : > { %v4917_v46 = vpop.permute.xlu1 %1301  ;;  %v4919_v41 = vpop.permute.xlu0 %1313 }
 0x1e8   : > { %8626 = vst [vmem:[#allocation231_spill] sm:$0xff] %v4917_v46  ;;  %8627 = vst [vmem:[#allocation232_spill] sm:$0xff] %v4919_v41 }
 0x1e9   : > { %1685 = vperm.xlu1 %4088, %v4313_v30   ;;  %1705 = vperm.xlu0 %4087, %v4327_v45   ;;  %v8635_v45 = vld [vmem:[#allocation44_spill] sm:$0xff] }
 0x1eb   : > { %v4923_v2 = vpop.permute.xlu1 %1309  ;;  %v4925_v1 = vpop.permute.xlu0 %1321 }
 0x1ec   : > { %8628 = vst [vmem:[#allocation233_spill] sm:$0xff] %v4923_v2  ;;  %8629 = vst [vmem:[#allocation234_spill] sm:$0xff] %v4925_v1 }
 0x1ed   : > { %1693 = vperm.xlu1 %4088, %v4321_v38   ;;  %1713 = vperm.xlu0 %4087, %v4335_v53   ;;  %v8638_v53 = vld [vmem:[#allocation46_spill] sm:$0xff] }
 0x1ef   : > { %v4929_v10 = vpop.permute.xlu1 %1317  ;;  %v4931_v49 = vpop.permute.xlu0 %1329 }
 0x1f0   : > { %8630 = vst [vmem:[#allocation235_spill] sm:$0xff] %v4929_v10  ;;  %8631 = vst [vmem:[#allocation236_spill] sm:$0xff] %v4931_v49 }
 0x1f1   : > { %1701 = vperm.xlu1 %4088, %v8632_v42   ;;  %1721 = vperm.xlu0 %4087, %v8566_v54  }
 0x1f3   : > { %v4935_v41 = vpop.permute.xlu1 %1325  ;;  %v4937_v46 = vpop.permute.xlu0 %1337 }
 0x1f4   : > { %8633 = vst [vmem:[#allocation237_spill] sm:$0xff] %v4935_v41  ;;  %8634 = vst [vmem:[#allocation238_spill] sm:$0xff] %v4937_v46 }
 0x1f5   : > { %1709 = vperm.xlu1 %4088, %v8635_v45   ;;  %1729 = vperm.xlu0 %4087, %v8570_v62   ;;  %v8643_v62 = vld [vmem:[#allocation50_spill] sm:$0xff] }
 0x1f7   : > { %v4941_v1 = vpop.permute.xlu1 %1333  ;;  %v4943_v2 = vpop.permute.xlu0 %1345 }
 0x1f8   : > { %8636 = vst [vmem:[#allocation239_spill] sm:$0xff] %v4941_v1  ;;  %8637 = vst [vmem:[#allocation240_spill] sm:$0xff] %v4943_v2 }
 0x1f9   : > { %1717 = vperm.xlu1 %4088, %v8638_v53   ;;  %1737 = vperm.xlu0 %4087, %v4359_v25   ;;  %v8646_v25 = vld [vmem:[#allocation52_spill] sm:$0xff] }
 0x1fb   : > { %v4947_v49 = vpop.permute.xlu1 %1341  ;;  %v4949_v10 = vpop.permute.xlu0 %1353 }
 0x1fc   : > { %8639 = vst [vmem:[#allocation241_spill] sm:$0xff] %v4947_v49  ;;  %8640 = vst [vmem:[#allocation242_spill] sm:$0xff] %v4949_v10 }
 0x1fd   : > { %1725 = vperm.xlu1 %4088, %v8563_v57   ;;  %1745 = vperm.xlu0 %4087, %v8575_v26  }
 0x1ff   : > { %v4953_v46 = vpop.permute.xlu1 %1349  ;;  %v4955_v41 = vpop.permute.xlu0 %1361 }
 0x200   : > { %8641 = vst [vmem:[#allocation243_spill] sm:$0xff] %v4953_v46  ;;  %8642 = vst [vmem:[#allocation244_spill] sm:$0xff] %v4955_v41 }
 0x201   : > { %1733 = vperm.xlu1 %4088, %v8643_v62   ;;  %1753 = vperm.xlu0 %4087, %v8578_v61   ;;  %v8651_v61 = vld [vmem:[#allocation56_spill] sm:$0xff] }
 0x203   : > { %v4959_v2 = vpop.permute.xlu1 %1357  ;;  %v4961_v1 = vpop.permute.xlu0 %1369 }
 0x204   : > { %8644 = vst [vmem:[#allocation245_spill] sm:$0xff] %v4959_v2  ;;  %8645 = vst [vmem:[#allocation246_spill] sm:$0xff] %v4961_v1 }
 0x205   : > { %1741 = vperm.xlu1 %4088, %v8646_v25   ;;  %1761 = vperm.xlu0 %4087, %v4383_v17  }
 0x207   : > { %v4965_v10 = vpop.permute.xlu1 %1365  ;;  %v4967_v49 = vpop.permute.xlu0 %1377 }
 0x208   : > { %8647 = vst [vmem:[#allocation247_spill] sm:$0xff] %v4965_v10  ;;  %8648 = vst [vmem:[#allocation248_spill] sm:$0xff] %v4967_v49 }
 0x209   : > { %1749 = vperm.xlu1 %4088, %v8503_v9   ;;  %1769 = vperm.xlu0 %4087, %v8583_v18   ;;  %v8656_v18 = vld [vmem:[#allocation60_spill] sm:$0xff] }
 0x20b   : > { %v4971_v41 = vpop.permute.xlu1 %1373  ;;  %v4973_v46 = vpop.permute.xlu0 %1385 }
 0x20c   : > { %8649 = vst [vmem:[#allocation249_spill] sm:$0xff] %v4971_v41  ;;  %8650 = vst [vmem:[#allocation250_spill] sm:$0xff] %v4973_v46  ;;  %v4114_v41 = vmov 4  }
 0x20d   : > { %1757 = vperm.xlu1 %4088, %v8651_v61   ;;  %1777 = vperm.xlu0 %4087, %v8512_v58  }
 0x20f   : > { %v4977_v1 = vpop.permute.xlu1 %1381  ;;  %v4979_v2 = vpop.permute.xlu0 %1393 }
 0x210   : > { %8652 = vst [vmem:[#allocation251_spill] sm:$0xff] %v4977_v1  ;;  %8653 = vst [vmem:[#allocation252_spill] sm:$0xff] %v4979_v2 }
 0x211   : > { %1765 = vperm.xlu1 %4088, %v4393_v50   ;;  %1785 = vperm.xlu0 %4087, %v4407_v33  }
 0x213   : > { %v4983_v10 = vpop.permute.xlu1 %1389 }
 0x214   : > { %8654 = vst [vmem:[#allocation253_spill] sm:$0xff] %v4983_v10  ;;  %v4985_v49 = vpop.permute.xlu0 %1533 }
 0x215   : > { %8655 = vst [vmem:[#allocation254_spill] sm:$0xff] %v4985_v49  ;;  %1773 = vperm.xlu1 %4088, %v8656_v18   ;;  %4090 = vset.pattern.permute.xlu0 %v4114_v41 }
 0x216   : > { %1925 = vperm.xlu0 %4090, %v4169_v8  }
 0x217   : > { %v4989_v46 = vpop.permute.xlu1 %1397 }
 0x218   : > { %8657 = vst [vmem:[#allocation255_spill] sm:$0xff] %v4989_v46  ;;  %v4991_v58 = vpop.permute.xlu0 %1545 }
 0x219   : > { %8658 = vst [vmem:[#allocation256_spill] sm:$0xff] %v4991_v58  ;;  %1781 = vperm.xlu1 %4088, %v4409_v34  }
 0x21a   : > { %1937 = vperm.xlu0 %4090, %v4177_v12  }
 0x21c   : > { %v4995_v1 = vpop.permute.xlu1 %1537  ;;  %v4997_v2 = vpop.permute.xlu0 %1553 }
 0x21d   : > { %8659 = vst [vmem:[#allocation257_spill] sm:$0xff] %v4995_v1  ;;  %8660 = vst [vmem:[#allocation258_spill] sm:$0xff] %v4997_v2  ;;  %4089 = vset.pattern.permute.xlu1 %v4114_v41  ;;  %v8705_v1 = vld [vmem:[#allocation41_spill] sm:$0xff] }
 0x21e   : > { %1921 = vperm.xlu1 %4089, %v4162_v5   ;;  %1945 = vperm.xlu0 %4090, %v4185_v16  }
 0x220   : > { %v5001_v10 = vpop.permute.xlu1 %1541  ;;  %v5003_v49 = vpop.permute.xlu0 %1561 }
 0x221   : > { %8661 = vst [vmem:[#allocation259_spill] sm:$0xff] %v5001_v10  ;;  %8662 = vst [vmem:[#allocation260_spill] sm:$0xff] %v5003_v49 }
 0x222   : > { %1929 = vperm.xlu1 %4089, %v4160_v4   ;;  %1953 = vperm.xlu0 %4090, %v4193_v20  }
 0x224   : > { %v5007_v46 = vpop.permute.xlu1 %1549  ;;  %v5009_v58 = vpop.permute.xlu0 %1569 }
 0x225   : > { %8663 = vst [vmem:[#allocation261_spill] sm:$0xff] %v5007_v46  ;;  %8664 = vst [vmem:[#allocation262_spill] sm:$0xff] %v5009_v58 }
 0x226   : > { %1933 = vperm.xlu1 %4089, %v4167_v7   ;;  %1961 = vperm.xlu0 %4090, %v4201_v24  }
 0x228   : > { %v5013_v41 = vpop.permute.xlu1 %1557  ;;  %v5015_v2 = vpop.permute.xlu0 %1577 }
 0x229   : > { %8665 = vst [vmem:[#allocation263_spill] sm:$0xff] %v5013_v41  ;;  %8666 = vst [vmem:[#allocation264_spill] sm:$0xff] %v5015_v2 }
 0x22a   : > { %1941 = vperm.xlu1 %4089, %v4175_v11   ;;  %1969 = vperm.xlu0 %4090, %v4209_v28  }
 0x22c   : > { %v5019_v49 = vpop.permute.xlu1 %1565  ;;  %v5021_v10 = vpop.permute.xlu0 %1585 }
 0x22d   : > { %8667 = vst [vmem:[#allocation265_spill] sm:$0xff] %v5019_v49  ;;  %8668 = vst [vmem:[#allocation266_spill] sm:$0xff] %v5021_v10 }
 0x22e   : > { %1949 = vperm.xlu1 %4089, %v4183_v15   ;;  %1977 = vperm.xlu0 %4090, %v4217_v32  }
 0x230   : > { %v5025_v58 = vpop.permute.xlu1 %1573  ;;  %v5027_v46 = vpop.permute.xlu0 %1593 }
 0x231   : > { %8669 = vst [vmem:[#allocation267_spill] sm:$0xff] %v5025_v58  ;;  %8670 = vst [vmem:[#allocation268_spill] sm:$0xff] %v5027_v46 }
 0x232   : > { %1957 = vperm.xlu1 %4089, %v4191_v19   ;;  %1985 = vperm.xlu0 %4090, %v4225_v36  }
 0x234   : > { %v5031_v2 = vpop.permute.xlu1 %1581  ;;  %v5033_v41 = vpop.permute.xlu0 %1601 }
 0x235   : > { %8671 = vst [vmem:[#allocation269_spill] sm:$0xff] %v5031_v2  ;;  %8672 = vst [vmem:[#allocation270_spill] sm:$0xff] %v5033_v41 }
 0x236   : > { %1965 = vperm.xlu1 %4089, %v4199_v23   ;;  %1993 = vperm.xlu0 %4090, %v4233_v40  }
 0x238   : > { %v5037_v10 = vpop.permute.xlu1 %1589  ;;  %v5039_v49 = vpop.permute.xlu0 %1609 }
 0x239   : > { %8673 = vst [vmem:[#allocation271_spill] sm:$0xff] %v5037_v10  ;;  %8674 = vst [vmem:[#allocation272_spill] sm:$0xff] %v5039_v49 }
 0x23a   : > { %1973 = vperm.xlu1 %4089, %v4207_v27   ;;  %2001 = vperm.xlu0 %4090, %v4241_v44  }
 0x23c   : > { %v5043_v46 = vpop.permute.xlu1 %1597  ;;  %v5045_v58 = vpop.permute.xlu0 %1617 }
 0x23d   : > { %8675 = vst [vmem:[#allocation273_spill] sm:$0xff] %v5043_v46  ;;  %8676 = vst [vmem:[#allocation274_spill] sm:$0xff] %v5045_v58 }
 0x23e   : > { %1981 = vperm.xlu1 %4089, %v4215_v31   ;;  %2009 = vperm.xlu0 %4090, %v4249_v48  }
 0x240   : > { %v5049_v41 = vpop.permute.xlu1 %1605  ;;  %v5051_v2 = vpop.permute.xlu0 %1625 }
 0x241   : > { %8677 = vst [vmem:[#allocation275_spill] sm:$0xff] %v5049_v41  ;;  %8678 = vst [vmem:[#allocation276_spill] sm:$0xff] %v5051_v2 }
 0x242   : > { %1989 = vperm.xlu1 %4089, %v4223_v35   ;;  %2017 = vperm.xlu0 %4090, %v4257_v52  }
 0x244   : > { %v5055_v49 = vpop.permute.xlu1 %1613  ;;  %v5057_v10 = vpop.permute.xlu0 %1633 }
 0x245   : > { %8679 = vst [vmem:[#allocation277_spill] sm:$0xff] %v5055_v49  ;;  %8680 = vst [vmem:[#allocation278_spill] sm:$0xff] %v5057_v10 }
 0x246   : > { %1997 = vperm.xlu1 %4089, %v4231_v39   ;;  %2025 = vperm.xlu0 %4090, %v4265_v56  }
 0x248   : > { %v5061_v58 = vpop.permute.xlu1 %1621  ;;  %v5063_v46 = vpop.permute.xlu0 %1641 }
 0x249   : > { %8681 = vst [vmem:[#allocation279_spill] sm:$0xff] %v5061_v58  ;;  %8682 = vst [vmem:[#allocation280_spill] sm:$0xff] %v5063_v46 }
 0x24a   : > { %2005 = vperm.xlu1 %4089, %v4239_v43   ;;  %2033 = vperm.xlu0 %4090, %v4273_v60  }
 0x24c   : > { %v5067_v2 = vpop.permute.xlu1 %1629  ;;  %v5069_v41 = vpop.permute.xlu0 %1649 }
 0x24d   : > { %8683 = vst [vmem:[#allocation281_spill] sm:$0xff] %v5067_v2  ;;  %8684 = vst [vmem:[#allocation282_spill] sm:$0xff] %v5069_v41 }
 0x24e   : > { %2013 = vperm.xlu1 %4089, %v4247_v47   ;;  %2041 = vperm.xlu0 %4090, %v4281_v0  }
 0x250   : > { %v5073_v10 = vpop.permute.xlu1 %1637  ;;  %v5075_v49 = vpop.permute.xlu0 %1657 }
 0x251   : > { %8685 = vst [vmem:[#allocation283_spill] sm:$0xff] %v5073_v10  ;;  %8686 = vst [vmem:[#allocation284_spill] sm:$0xff] %v5075_v49 }
 0x252   : > { %2021 = vperm.xlu1 %4089, %v4255_v51   ;;  %2049 = vperm.xlu0 %4090, %v4289_v6  }
 0x254   : > { %v5079_v46 = vpop.permute.xlu1 %1645  ;;  %v5081_v58 = vpop.permute.xlu0 %1665 }
 0x255   : > { %8687 = vst [vmem:[#allocation285_spill] sm:$0xff] %v5079_v46  ;;  %8688 = vst [vmem:[#allocation286_spill] sm:$0xff] %v5081_v58 }
 0x256   : > { %2029 = vperm.xlu1 %4089, %v4263_v55   ;;  %2057 = vperm.xlu0 %4090, %v4297_v14  }
 0x258   : > { %v5085_v41 = vpop.permute.xlu1 %1653  ;;  %v5087_v2 = vpop.permute.xlu0 %1673 }
 0x259   : > { %8689 = vst [vmem:[#allocation287_spill] sm:$0xff] %v5085_v41  ;;  %8690 = vst [vmem:[#allocation288_spill] sm:$0xff] %v5087_v2 }
 0x25a   : > { %2037 = vperm.xlu1 %4089, %v4271_v59   ;;  %2065 = vperm.xlu0 %4090, %v4305_v22  }
 0x25c   : > { %v5091_v49 = vpop.permute.xlu1 %1661  ;;  %v5093_v10 = vpop.permute.xlu0 %1681 }
 0x25d   : > { %8691 = vst [vmem:[#allocation289_spill] sm:$0xff] %v5091_v49  ;;  %8692 = vst [vmem:[#allocation290_spill] sm:$0xff] %v5093_v10 }
 0x25e   : > { %2045 = vperm.xlu1 %4089, %v4279_v63   ;;  %2073 = vperm.xlu0 %4090, %v4313_v30  }
 0x260   : > { %v5097_v58 = vpop.permute.xlu1 %1669  ;;  %v5099_v46 = vpop.permute.xlu0 %1689 }
 0x261   : > { %8693 = vst [vmem:[#allocation291_spill] sm:$0xff] %v5097_v58  ;;  %8694 = vst [vmem:[#allocation292_spill] sm:$0xff] %v5099_v46 }
 0x262   : > { %2053 = vperm.xlu1 %4089, %v4287_v3   ;;  %2081 = vperm.xlu0 %4090, %v4321_v38  }
 0x264   : > { %v5103_v2 = vpop.permute.xlu1 %1677  ;;  %v5105_v41 = vpop.permute.xlu0 %1697 }
 0x265   : > { %8695 = vst [vmem:[#allocation293_spill] sm:$0xff] %v5103_v2  ;;  %8696 = vst [vmem:[#allocation294_spill] sm:$0xff] %v5105_v41 }
 0x266   : > { %2061 = vperm.xlu1 %4089, %v4295_v13   ;;  %2089 = vperm.xlu0 %4090, %v8632_v42  }
 0x268   : > { %v5109_v10 = vpop.permute.xlu1 %1685  ;;  %v5111_v49 = vpop.permute.xlu0 %1705 }
 0x269   : > { %8697 = vst [vmem:[#allocation295_spill] sm:$0xff] %v5109_v10  ;;  %8698 = vst [vmem:[#allocation296_spill] sm:$0xff] %v5111_v49 }
 0x26a   : > { %2069 = vperm.xlu1 %4089, %v4303_v21   ;;  %2097 = vperm.xlu0 %4090, %v8635_v45  }
 0x26c   : > { %v5115_v46 = vpop.permute.xlu1 %1693  ;;  %v5117_v58 = vpop.permute.xlu0 %1713 }
 0x26d   : > { %8699 = vst [vmem:[#allocation297_spill] sm:$0xff] %v5115_v46  ;;  %8700 = vst [vmem:[#allocation298_spill] sm:$0xff] %v5117_v58 }
 0x26e   : > { %2077 = vperm.xlu1 %4089, %v4311_v29   ;;  %2105 = vperm.xlu0 %4090, %v8638_v53   ;;  %v8708_v53 = vld [vmem:[#allocation43_spill] sm:$0xff] }
 0x270   : > { %v5121_v41 = vpop.permute.xlu1 %1701  ;;  %v5123_v2 = vpop.permute.xlu0 %1721 }
 0x271   : > { %8701 = vst [vmem:[#allocation299_spill] sm:$0xff] %v5121_v41  ;;  %8702 = vst [vmem:[#allocation300_spill] sm:$0xff] %v5123_v2 }
 0x272   : > { %2085 = vperm.xlu1 %4089, %v4319_v37   ;;  %2113 = vperm.xlu0 %4090, %v8563_v57  }
 0x274   : > { %v5127_v49 = vpop.permute.xlu1 %1709  ;;  %v5129_v10 = vpop.permute.xlu0 %1729 }
 0x275   : > { %8703 = vst [vmem:[#allocation301_spill] sm:$0xff] %v5127_v49  ;;  %8704 = vst [vmem:[#allocation302_spill] sm:$0xff] %v5129_v10 }
 0x276   : > { %2093 = vperm.xlu1 %4089, %v8705_v1   ;;  %2121 = vperm.xlu0 %4090, %v8643_v62   ;;  %v8713_v62 = vld [vmem:[#allocation47_spill] sm:$0xff] }
 0x278   : > { %v5133_v58 = vpop.permute.xlu1 %1717  ;;  %v5135_v46 = vpop.permute.xlu0 %1737 }
 0x279   : > { %8706 = vst [vmem:[#allocation303_spill] sm:$0xff] %v5133_v58  ;;  %8707 = vst [vmem:[#allocation304_spill] sm:$0xff] %v5135_v46 }
 0x27a   : > { %2101 = vperm.xlu1 %4089, %v8708_v53   ;;  %2129 = vperm.xlu0 %4090, %v8646_v25   ;;  %v8716_v25 = vld [vmem:[#allocation49_spill] sm:$0xff] }
 0x27c   : > { %v5139_v2 = vpop.permute.xlu1 %1725  ;;  %v5141_v41 = vpop.permute.xlu0 %1745 }
 0x27d   : > { %8709 = vst [vmem:[#allocation305_spill] sm:$0xff] %v5139_v2  ;;  %8710 = vst [vmem:[#allocation306_spill] sm:$0xff] %v5141_v41 }
 0x27e   : > { %2109 = vperm.xlu1 %4089, %v8566_v54   ;;  %2137 = vperm.xlu0 %4090, %v8503_v9  }
 0x280   : > { %v5145_v10 = vpop.permute.xlu1 %1733  ;;  %v5147_v49 = vpop.permute.xlu0 %1753 }
 0x281   : > { %8711 = vst [vmem:[#allocation307_spill] sm:$0xff] %v5145_v10  ;;  %8712 = vst [vmem:[#allocation308_spill] sm:$0xff] %v5147_v49 }
 0x282   : > { %2117 = vperm.xlu1 %4089, %v8713_v62   ;;  %2145 = vperm.xlu0 %4090, %v8651_v61   ;;  %v8721_v61 = vld [vmem:[#allocation53_spill] sm:$0xff] }
 0x284   : > { %v5151_v46 = vpop.permute.xlu1 %1741  ;;  %v5153_v58 = vpop.permute.xlu0 %1761 }
 0x285   : > { %8714 = vst [vmem:[#allocation309_spill] sm:$0xff] %v5151_v46  ;;  %8715 = vst [vmem:[#allocation310_spill] sm:$0xff] %v5153_v58 }
 0x286   : > { %2125 = vperm.xlu1 %4089, %v8716_v25   ;;  %2153 = vperm.xlu0 %4090, %v4393_v50  }
 0x288   : > { %v5157_v41 = vpop.permute.xlu1 %1749  ;;  %v5159_v2 = vpop.permute.xlu0 %1769 }
 0x289   : > { %8717 = vst [vmem:[#allocation311_spill] sm:$0xff] %v5157_v41  ;;  %8718 = vst [vmem:[#allocation312_spill] sm:$0xff] %v5159_v2  ;;  %v4115_v41 = vmov 5  }
 0x28a   : > { %2133 = vperm.xlu1 %4089, %v8575_v26   ;;  %2161 = vperm.xlu0 %4090, %v8656_v18  }
 0x28c   : > { %v5163_v49 = vpop.permute.xlu1 %1757  ;;  %v5165_v10 = vpop.permute.xlu0 %1777 }
 0x28d   : > { %8719 = vst [vmem:[#allocation313_spill] sm:$0xff] %v5163_v49  ;;  %8720 = vst [vmem:[#allocation314_spill] sm:$0xff] %v5165_v10  ;;  %v8726_v49 = vld [vmem:[#allocation57_spill] sm:$0xff] }
 0x28e   : > { %2141 = vperm.xlu1 %4089, %v8721_v61   ;;  %2169 = vperm.xlu0 %4090, %v4409_v34  }
 0x290   : > { %v5169_v58 = vpop.permute.xlu1 %1765  ;;  %v5171_v46 = vpop.permute.xlu0 %1785 }
 0x291   : > { %8722 = vst [vmem:[#allocation315_spill] sm:$0xff] %v5169_v58  ;;  %8723 = vst [vmem:[#allocation316_spill] sm:$0xff] %v5171_v46  ;;  %v8729_v58 = vld [vmem:[#allocation59_spill] sm:$0xff] }
 0x292   : > { %2149 = vperm.xlu1 %4089, %v4383_v17   ;;  %4091 = vset.pattern.permute.xlu0 %v4115_v41 }
 0x293   : > { %2309 = vperm.xlu0 %4091, %v4162_v5  }
 0x294   : > { %v5175_v2 = vpop.permute.xlu1 %1773 }
 0x295   : > { %8724 = vst [vmem:[#allocation317_spill] sm:$0xff] %v5175_v2  ;;  %v5177_v18 = vpop.permute.xlu0 %1925 }
 0x296   : > { %8725 = vst [vmem:[#allocation318_spill] sm:$0xff] %v5177_v18  ;;  %2157 = vperm.xlu1 %4089, %v8726_v49  }
 0x297   : > { %2321 = vperm.xlu0 %4091, %v4167_v7  }
 0x298   : > { %v5181_v10 = vpop.permute.xlu1 %1781 }
 0x299   : > { %8727 = vst [vmem:[#allocation319_spill] sm:$0xff] %v5181_v10  ;;  %v5183_v34 = vpop.permute.xlu0 %1937 }
 0x29a   : > { %8728 = vst [vmem:[#allocation320_spill] sm:$0xff] %v5183_v34  ;;  %2165 = vperm.xlu1 %4089, %v8729_v58  }
 0x29b   : > { %2329 = vperm.xlu0 %4091, %v4175_v11  }
 0x29d   : > { %v5187_v46 = vpop.permute.xlu1 %1921  ;;  %v5189_v50 = vpop.permute.xlu0 %1945 }
 0x29e   : > { %8730 = vst [vmem:[#allocation321_spill] sm:$0xff] %v5187_v46  ;;  %8731 = vst [vmem:[#allocation322_spill] sm:$0xff] %v5189_v50  ;;  %2173 = vperm.xlu1 %4089, %v4407_v33  }
 0x29f   : > { %2337 = vperm.xlu0 %4091, %v4183_v15  }
 0x2a1   : > { %v5193_v18 = vpop.permute.xlu1 %1929  ;;  %v5195_v2 = vpop.permute.xlu0 %1953 }
 0x2a2   : > { %8732 = vst [vmem:[#allocation323_spill] sm:$0xff] %v5193_v18  ;;  %8733 = vst [vmem:[#allocation324_spill] sm:$0xff] %v5195_v2  ;;  %4092 = vset.pattern.permute.xlu1 %v4115_v41  ;;  %v8780_v18 = vld [vmem:[#allocation46_spill] sm:$0xff] }
 0x2a3   : > { %2313 = vperm.xlu1 %4092, %v4169_v8   ;;  %2345 = vperm.xlu0 %4091, %v4191_v19  }
 0x2a5   : > { %v5199_v34 = vpop.permute.xlu1 %1933  ;;  %v5201_v10 = vpop.permute.xlu0 %1961 }
 0x2a6   : > { %8734 = vst [vmem:[#allocation325_spill] sm:$0xff] %v5199_v34  ;;  %8735 = vst [vmem:[#allocation326_spill] sm:$0xff] %v5201_v10 }
 0x2a7   : > { %2317 = vperm.xlu1 %4092, %v4160_v4   ;;  %2353 = vperm.xlu0 %4091, %v4199_v23  }
 0x2a9   : > { %v5205_v50 = vpop.permute.xlu1 %1941  ;;  %v5207_v46 = vpop.permute.xlu0 %1969 }
 0x2aa   : > { %8736 = vst [vmem:[#allocation327_spill] sm:$0xff] %v5205_v50  ;;  %8737 = vst [vmem:[#allocation328_spill] sm:$0xff] %v5207_v46 }
 0x2ab   : > { %2325 = vperm.xlu1 %4092, %v4177_v12   ;;  %2361 = vperm.xlu0 %4091, %v4207_v27  }
 0x2ad   : > { %v5211_v41 = vpop.permute.xlu1 %1949  ;;  %v5213_v2 = vpop.permute.xlu0 %1977 }
 0x2ae   : > { %8738 = vst [vmem:[#allocation329_spill] sm:$0xff] %v5211_v41  ;;  %8739 = vst [vmem:[#allocation330_spill] sm:$0xff] %v5213_v2 }
 0x2af   : > { %2333 = vperm.xlu1 %4092, %v4185_v16   ;;  %2369 = vperm.xlu0 %4091, %v4215_v31  }
 0x2b1   : > { %v5217_v10 = vpop.permute.xlu1 %1957  ;;  %v5219_v34 = vpop.permute.xlu0 %1985 }
 0x2b2   : > { %8740 = vst [vmem:[#allocation331_spill] sm:$0xff] %v5217_v10  ;;  %8741 = vst [vmem:[#allocation332_spill] sm:$0xff] %v5219_v34 }
 0x2b3   : > { %2341 = vperm.xlu1 %4092, %v4193_v20   ;;  %2377 = vperm.xlu0 %4091, %v4223_v35  }
 0x2b5   : > { %v5223_v46 = vpop.permute.xlu1 %1965  ;;  %v5225_v50 = vpop.permute.xlu0 %1993 }
 0x2b6   : > { %8742 = vst [vmem:[#allocation333_spill] sm:$0xff] %v5223_v46  ;;  %8743 = vst [vmem:[#allocation334_spill] sm:$0xff] %v5225_v50 }
 0x2b7   : > { %2349 = vperm.xlu1 %4092, %v4201_v24   ;;  %2385 = vperm.xlu0 %4091, %v4231_v39  }
 0x2b9   : > { %v5229_v2 = vpop.permute.xlu1 %1973  ;;  %v5231_v41 = vpop.permute.xlu0 %2001 }
 0x2ba   : > { %8744 = vst [vmem:[#allocation335_spill] sm:$0xff] %v5229_v2  ;;  %8745 = vst [vmem:[#allocation336_spill] sm:$0xff] %v5231_v41 }
 0x2bb   : > { %2357 = vperm.xlu1 %4092, %v4209_v28   ;;  %2393 = vperm.xlu0 %4091, %v4239_v43  }
 0x2bd   : > { %v5235_v34 = vpop.permute.xlu1 %1981  ;;  %v5237_v10 = vpop.permute.xlu0 %2009 }
 0x2be   : > { %8746 = vst [vmem:[#allocation337_spill] sm:$0xff] %v5235_v34  ;;  %8747 = vst [vmem:[#allocation338_spill] sm:$0xff] %v5237_v10 }
 0x2bf   : > { %2365 = vperm.xlu1 %4092, %v4217_v32   ;;  %2401 = vperm.xlu0 %4091, %v4247_v47  }
 0x2c1   : > { %v5241_v50 = vpop.permute.xlu1 %1989  ;;  %v5243_v46 = vpop.permute.xlu0 %2017 }
 0x2c2   : > { %8748 = vst [vmem:[#allocation339_spill] sm:$0xff] %v5241_v50  ;;  %8749 = vst [vmem:[#allocation340_spill] sm:$0xff] %v5243_v46 }
 0x2c3   : > { %2373 = vperm.xlu1 %4092, %v4225_v36   ;;  %2409 = vperm.xlu0 %4091, %v4255_v51  }
 0x2c5   : > { %v5247_v41 = vpop.permute.xlu1 %1997  ;;  %v5249_v2 = vpop.permute.xlu0 %2025 }
 0x2c6   : > { %8750 = vst [vmem:[#allocation341_spill] sm:$0xff] %v5247_v41  ;;  %8751 = vst [vmem:[#allocation342_spill] sm:$0xff] %v5249_v2 }
 0x2c7   : > { %2381 = vperm.xlu1 %4092, %v4233_v40   ;;  %2417 = vperm.xlu0 %4091, %v4263_v55  }
 0x2c9   : > { %v5253_v10 = vpop.permute.xlu1 %2005  ;;  %v5255_v34 = vpop.permute.xlu0 %2033 }
 0x2ca   : > { %8752 = vst [vmem:[#allocation343_spill] sm:$0xff] %v5253_v10  ;;  %8753 = vst [vmem:[#allocation344_spill] sm:$0xff] %v5255_v34 }
 0x2cb   : > { %2389 = vperm.xlu1 %4092, %v4241_v44   ;;  %2425 = vperm.xlu0 %4091, %v4271_v59  }
 0x2cd   : > { %v5259_v46 = vpop.permute.xlu1 %2013  ;;  %v5261_v50 = vpop.permute.xlu0 %2041 }
 0x2ce   : > { %8754 = vst [vmem:[#allocation345_spill] sm:$0xff] %v5259_v46  ;;  %8755 = vst [vmem:[#allocation346_spill] sm:$0xff] %v5261_v50 }
 0x2cf   : > { %2397 = vperm.xlu1 %4092, %v4249_v48   ;;  %2433 = vperm.xlu0 %4091, %v4279_v63  }
 0x2d1   : > { %v5265_v2 = vpop.permute.xlu1 %2021  ;;  %v5267_v41 = vpop.permute.xlu0 %2049 }
 0x2d2   : > { %8756 = vst [vmem:[#allocation347_spill] sm:$0xff] %v5265_v2  ;;  %8757 = vst [vmem:[#allocation348_spill] sm:$0xff] %v5267_v41 }
 0x2d3   : > { %2405 = vperm.xlu1 %4092, %v4257_v52   ;;  %2441 = vperm.xlu0 %4091, %v4287_v3  }
 0x2d5   : > { %v5271_v34 = vpop.permute.xlu1 %2029  ;;  %v5273_v10 = vpop.permute.xlu0 %2057 }
 0x2d6   : > { %8758 = vst [vmem:[#allocation349_spill] sm:$0xff] %v5271_v34  ;;  %8759 = vst [vmem:[#allocation350_spill] sm:$0xff] %v5273_v10 }
 0x2d7   : > { %2413 = vperm.xlu1 %4092, %v4265_v56   ;;  %2449 = vperm.xlu0 %4091, %v4295_v13  }
 0x2d9   : > { %v5277_v50 = vpop.permute.xlu1 %2037  ;;  %v5279_v46 = vpop.permute.xlu0 %2065 }
 0x2da   : > { %8760 = vst [vmem:[#allocation351_spill] sm:$0xff] %v5277_v50  ;;  %8761 = vst [vmem:[#allocation352_spill] sm:$0xff] %v5279_v46 }
 0x2db   : > { %2421 = vperm.xlu1 %4092, %v4273_v60   ;;  %2457 = vperm.xlu0 %4091, %v4303_v21  }
 0x2dd   : > { %v5283_v41 = vpop.permute.xlu1 %2045  ;;  %v5285_v2 = vpop.permute.xlu0 %2073 }
 0x2de   : > { %8762 = vst [vmem:[#allocation353_spill] sm:$0xff] %v5283_v41  ;;  %8763 = vst [vmem:[#allocation354_spill] sm:$0xff] %v5285_v2 }
 0x2df   : > { %2429 = vperm.xlu1 %4092, %v4281_v0   ;;  %2465 = vperm.xlu0 %4091, %v4311_v29  }
 0x2e1   : > { %v5289_v10 = vpop.permute.xlu1 %2053  ;;  %v5291_v34 = vpop.permute.xlu0 %2081 }
 0x2e2   : > { %8764 = vst [vmem:[#allocation355_spill] sm:$0xff] %v5289_v10  ;;  %8765 = vst [vmem:[#allocation356_spill] sm:$0xff] %v5291_v34 }
 0x2e3   : > { %2437 = vperm.xlu1 %4092, %v4289_v6   ;;  %2473 = vperm.xlu0 %4091, %v4319_v37  }
 0x2e5   : > { %v5295_v46 = vpop.permute.xlu1 %2061  ;;  %v5297_v50 = vpop.permute.xlu0 %2089 }
 0x2e6   : > { %8766 = vst [vmem:[#allocation357_spill] sm:$0xff] %v5295_v46  ;;  %8767 = vst [vmem:[#allocation358_spill] sm:$0xff] %v5297_v50 }
 0x2e7   : > { %2445 = vperm.xlu1 %4092, %v4297_v14   ;;  %2481 = vperm.xlu0 %4091, %v8705_v1  }
 0x2e9   : > { %v5301_v2 = vpop.permute.xlu1 %2069  ;;  %v5303_v41 = vpop.permute.xlu0 %2097 }
 0x2ea   : > { %8768 = vst [vmem:[#allocation359_spill] sm:$0xff] %v5301_v2  ;;  %8769 = vst [vmem:[#allocation360_spill] sm:$0xff] %v5303_v41 }
 0x2eb   : > { %2453 = vperm.xlu1 %4092, %v4305_v22   ;;  %2489 = vperm.xlu0 %4091, %v8708_v53  }
 0x2ed   : > { %v5307_v34 = vpop.permute.xlu1 %2077  ;;  %v5309_v10 = vpop.permute.xlu0 %2105 }
 0x2ee   : > { %8770 = vst [vmem:[#allocation361_spill] sm:$0xff] %v5307_v34  ;;  %8771 = vst [vmem:[#allocation362_spill] sm:$0xff] %v5309_v10 }
 0x2ef   : > { %2461 = vperm.xlu1 %4092, %v4313_v30   ;;  %2497 = vperm.xlu0 %4091, %v8566_v54  }
 0x2f1   : > { %v5313_v50 = vpop.permute.xlu1 %2085  ;;  %v5315_v46 = vpop.permute.xlu0 %2113 }
 0x2f2   : > { %8772 = vst [vmem:[#allocation363_spill] sm:$0xff] %v5313_v50  ;;  %8773 = vst [vmem:[#allocation364_spill] sm:$0xff] %v5315_v46 }
 0x2f3   : > { %2469 = vperm.xlu1 %4092, %v4321_v38   ;;  %2505 = vperm.xlu0 %4091, %v8713_v62  }
 0x2f5   : > { %v5319_v41 = vpop.permute.xlu1 %2093  ;;  %v5321_v2 = vpop.permute.xlu0 %2121 }
 0x2f6   : > { %8774 = vst [vmem:[#allocation365_spill] sm:$0xff] %v5319_v41  ;;  %8775 = vst [vmem:[#allocation366_spill] sm:$0xff] %v5321_v2 }
 0x2f7   : > { %2477 = vperm.xlu1 %4092, %v8632_v42   ;;  %2513 = vperm.xlu0 %4091, %v8716_v25  }
 0x2f9   : > { %v5325_v10 = vpop.permute.xlu1 %2101  ;;  %v5327_v34 = vpop.permute.xlu0 %2129 }
 0x2fa   : > { %8776 = vst [vmem:[#allocation367_spill] sm:$0xff] %v5325_v10  ;;  %8777 = vst [vmem:[#allocation368_spill] sm:$0xff] %v5327_v34 }
 0x2fb   : > { %2485 = vperm.xlu1 %4092, %v8635_v45   ;;  %2521 = vperm.xlu0 %4091, %v8575_v26   ;;  %v8785_v26 = vld [vmem:[#allocation50_spill] sm:$0xff] }
 0x2fd   : > { %v5331_v46 = vpop.permute.xlu1 %2109  ;;  %v5333_v50 = vpop.permute.xlu0 %2137 }
 0x2fe   : > { %8778 = vst [vmem:[#allocation369_spill] sm:$0xff] %v5331_v46  ;;  %8779 = vst [vmem:[#allocation370_spill] sm:$0xff] %v5333_v50 }
 0x2ff   : > { %2493 = vperm.xlu1 %4092, %v8780_v18   ;;  %2529 = vperm.xlu0 %4091, %v8721_v61   ;;  %v8788_v61 = vld [vmem:[#allocation52_spill] sm:$0xff] }
 0x301   : > { %v5337_v2 = vpop.permute.xlu1 %2117  ;;  %v5339_v41 = vpop.permute.xlu0 %2145 }
 0x302   : > { %8781 = vst [vmem:[#allocation371_spill] sm:$0xff] %v5337_v2  ;;  %8782 = vst [vmem:[#allocation372_spill] sm:$0xff] %v5339_v41 }
 0x303   : > { %2501 = vperm.xlu1 %4092, %v8563_v57   ;;  %2537 = vperm.xlu0 %4091, %v4383_v17  }
 0x305   : > { %v5343_v34 = vpop.permute.xlu1 %2125  ;;  %v5345_v10 = vpop.permute.xlu0 %2153 }
 0x306   : > { %8783 = vst [vmem:[#allocation373_spill] sm:$0xff] %v5343_v34  ;;  %8784 = vst [vmem:[#allocation374_spill] sm:$0xff] %v5345_v10 }
 0x307   : > { %2509 = vperm.xlu1 %4092, %v8785_v26   ;;  %2545 = vperm.xlu0 %4091, %v8726_v49   ;;  %v8793_v49 = vld [vmem:[#allocation56_spill] sm:$0xff] }
 0x309   : > { %v5349_v50 = vpop.permute.xlu1 %2133  ;;  %v5351_v46 = vpop.permute.xlu0 %2161 }
 0x30a   : > { %8786 = vst [vmem:[#allocation375_spill] sm:$0xff] %v5349_v50  ;;  %8787 = vst [vmem:[#allocation376_spill] sm:$0xff] %v5351_v46  ;;  %v4116_v50 = vmov 6  }
 0x30b   : > { %2517 = vperm.xlu1 %4092, %v8788_v61   ;;  %2553 = vperm.xlu0 %4091, %v8729_v58  }
 0x30d   : > { %v5355_v41 = vpop.permute.xlu1 %2141  ;;  %v5357_v2 = vpop.permute.xlu0 %2169 }
 0x30e   : > { %8789 = vst [vmem:[#allocation377_spill] sm:$0xff] %v5355_v41  ;;  %8790 = vst [vmem:[#allocation378_spill] sm:$0xff] %v5357_v2  ;;  %v8796_v41 = vld [vmem:[#allocation58_spill] sm:$0xff] }
 0x30f   : > { %2525 = vperm.xlu1 %4092, %v8503_v9   ;;  %2561 = vperm.xlu0 %4091, %v4407_v33  }
 0x311   : > { %v5361_v34 = vpop.permute.xlu1 %2149 }
 0x312   : > { %8791 = vst [vmem:[#allocation379_spill] sm:$0xff] %v5361_v34  ;;  %v5363_v10 = vpop.permute.xlu0 %2309  ;;  %v8799_v34 = vld [vmem:[#allocation60_spill] sm:$0xff] }
 0x313   : > { %8792 = vst [vmem:[#allocation380_spill] sm:$0xff] %v5363_v10  ;;  %2533 = vperm.xlu1 %4092, %v8793_v49   ;;  %4094 = vset.pattern.permute.xlu0 %v4116_v50 }
 0x314   : > { %2701 = vperm.xlu0 %4094, %v4169_v8   ;;  %v8802_v8 = vld [vmem:[#allocation62_spill] sm:$0xff] }
 0x315   : > { %v5367_v46 = vpop.permute.xlu1 %2157 }
 0x316   : > { %8794 = vst [vmem:[#allocation381_spill] sm:$0xff] %v5367_v46  ;;  %v5369_v58 = vpop.permute.xlu0 %2321 }
 0x317   : > { %8795 = vst [vmem:[#allocation382_spill] sm:$0xff] %v5369_v58  ;;  %2541 = vperm.xlu1 %4092, %v8796_v41  }
 0x318   : > { %2713 = vperm.xlu0 %4094, %v4177_v12  }
 0x319   : > { %v5373_v2 = vpop.permute.xlu1 %2165 }
 0x31a   : > { %8797 = vst [vmem:[#allocation383_spill] sm:$0xff] %v5373_v2  ;;  %v5375_v33 = vpop.permute.xlu0 %2329 }
 0x31b   : > { %8798 = vst [vmem:[#allocation384_spill] sm:$0xff] %v5375_v33  ;;  %2549 = vperm.xlu1 %4092, %v8799_v34  }
 0x31c   : > { %2721 = vperm.xlu0 %4094, %v4185_v16  }
 0x31d   : > { %v5379_v10 = vpop.permute.xlu1 %2173 }
 0x31e   : > { %8800 = vst [vmem:[#allocation385_spill] sm:$0xff] %v5379_v10  ;;  %v5381_v17 = vpop.permute.xlu0 %2337 }
 0x31f   : > { %8801 = vst [vmem:[#allocation386_spill] sm:$0xff] %v5381_v17  ;;  %2557 = vperm.xlu1 %4092, %v8802_v8  }
 0x320   : > { %2729 = vperm.xlu0 %4094, %v4193_v20  }
 0x322   : > { %v5385_v46 = vpop.permute.xlu1 %2313  ;;  %v5387_v58 = vpop.permute.xlu0 %2345 }
 0x323   : > { %8803 = vst [vmem:[#allocation387_spill] sm:$0xff] %v5385_v46  ;;  %8804 = vst [vmem:[#allocation388_spill] sm:$0xff] %v5387_v58  ;;  %4093 = vset.pattern.permute.xlu1 %v4116_v50  ;;  %v8859_v46 = vld [vmem:[#allocation51_spill] sm:$0xff] }
 0x324   : > { %2697 = vperm.xlu1 %4093, %v4162_v5   ;;  %2737 = vperm.xlu0 %4094, %v4201_v24  }
 0x326   : > { %v5391_v2 = vpop.permute.xlu1 %2317  ;;  %v5393_v33 = vpop.permute.xlu0 %2353 }
 0x327   : > { %8805 = vst [vmem:[#allocation389_spill] sm:$0xff] %v5391_v2  ;;  %8806 = vst [vmem:[#allocation390_spill] sm:$0xff] %v5393_v33 }
 0x328   : > { %2705 = vperm.xlu1 %4093, %v4160_v4   ;;  %2745 = vperm.xlu0 %4094, %v4209_v28  }
 0x32a   : > { %v5397_v10 = vpop.permute.xlu1 %2325  ;;  %v5399_v17 = vpop.permute.xlu0 %2361 }
 0x32b   : > { %8807 = vst [vmem:[#allocation391_spill] sm:$0xff] %v5397_v10  ;;  %8808 = vst [vmem:[#allocation392_spill] sm:$0xff] %v5399_v17 }
 0x32c   : > { %2709 = vperm.xlu1 %4093, %v4167_v7   ;;  %2753 = vperm.xlu0 %4094, %v4217_v32  }
 0x32e   : > { %v5403_v50 = vpop.permute.xlu1 %2333  ;;  %v5405_v58 = vpop.permute.xlu0 %2369 }
 0x32f   : > { %8809 = vst [vmem:[#allocation393_spill] sm:$0xff] %v5403_v50  ;;  %8810 = vst [vmem:[#allocation394_spill] sm:$0xff] %v5405_v58 }
 0x330   : > { %2717 = vperm.xlu1 %4093, %v4175_v11   ;;  %2761 = vperm.xlu0 %4094, %v4225_v36  }
 0x332   : > { %v5409_v33 = vpop.permute.xlu1 %2341  ;;  %v5411_v2 = vpop.permute.xlu0 %2377 }
 0x333   : > { %8811 = vst [vmem:[#allocation395_spill] sm:$0xff] %v5409_v33  ;;  %8812 = vst [vmem:[#allocation396_spill] sm:$0xff] %v5411_v2 }
 0x334   : > { %2725 = vperm.xlu1 %4093, %v4183_v15   ;;  %2769 = vperm.xlu0 %4094, %v4233_v40  }
 0x336   : > { %v5415_v17 = vpop.permute.xlu1 %2349  ;;  %v5417_v10 = vpop.permute.xlu0 %2385 }
 0x337   : > { %8813 = vst [vmem:[#allocation397_spill] sm:$0xff] %v5415_v17  ;;  %8814 = vst [vmem:[#allocation398_spill] sm:$0xff] %v5417_v10 }
 0x338   : > { %2733 = vperm.xlu1 %4093, %v4191_v19   ;;  %2777 = vperm.xlu0 %4094, %v4241_v44  }
 0x33a   : > { %v5421_v58 = vpop.permute.xlu1 %2357  ;;  %v5423_v50 = vpop.permute.xlu0 %2393 }
 0x33b   : > { %8815 = vst [vmem:[#allocation399_spill] sm:$0xff] %v5421_v58  ;;  %8816 = vst [vmem:[#allocation400_spill] sm:$0xff] %v5423_v50 }
 0x33c   : > { %2741 = vperm.xlu1 %4093, %v4199_v23   ;;  %2785 = vperm.xlu0 %4094, %v4249_v48  }
 0x33e   : > { %v5427_v2 = vpop.permute.xlu1 %2365  ;;  %v5429_v33 = vpop.permute.xlu0 %2401 }
 0x33f   : > { %8817 = vst [vmem:[#allocation401_spill] sm:$0xff] %v5427_v2  ;;  %8818 = vst [vmem:[#allocation402_spill] sm:$0xff] %v5429_v33 }
 0x340   : > { %2749 = vperm.xlu1 %4093, %v4207_v27   ;;  %2793 = vperm.xlu0 %4094, %v4257_v52  }
 0x342   : > { %v5433_v10 = vpop.permute.xlu1 %2373  ;;  %v5435_v17 = vpop.permute.xlu0 %2409 }
 0x343   : > { %8819 = vst [vmem:[#allocation403_spill] sm:$0xff] %v5433_v10  ;;  %8820 = vst [vmem:[#allocation404_spill] sm:$0xff] %v5435_v17 }
 0x344   : > { %2757 = vperm.xlu1 %4093, %v4215_v31   ;;  %2801 = vperm.xlu0 %4094, %v4265_v56  }
 0x346   : > { %v5439_v50 = vpop.permute.xlu1 %2381  ;;  %v5441_v58 = vpop.permute.xlu0 %2417 }
 0x347   : > { %8821 = vst [vmem:[#allocation405_spill] sm:$0xff] %v5439_v50  ;;  %8822 = vst [vmem:[#allocation406_spill] sm:$0xff] %v5441_v58 }
 0x348   : > { %2765 = vperm.xlu1 %4093, %v4223_v35   ;;  %2809 = vperm.xlu0 %4094, %v4273_v60  }
 0x34a   : > { %v5445_v33 = vpop.permute.xlu1 %2389  ;;  %v5447_v2 = vpop.permute.xlu0 %2425 }
 0x34b   : > { %8823 = vst [vmem:[#allocation407_spill] sm:$0xff] %v5445_v33  ;;  %8824 = vst [vmem:[#allocation408_spill] sm:$0xff] %v5447_v2 }
 0x34c   : > { %2773 = vperm.xlu1 %4093, %v4231_v39   ;;  %2817 = vperm.xlu0 %4094, %v4281_v0  }
 0x34e   : > { %v5451_v17 = vpop.permute.xlu1 %2397  ;;  %v5453_v10 = vpop.permute.xlu0 %2433 }
 0x34f   : > { %8825 = vst [vmem:[#allocation409_spill] sm:$0xff] %v5451_v17  ;;  %8826 = vst [vmem:[#allocation410_spill] sm:$0xff] %v5453_v10 }
 0x350   : > { %2781 = vperm.xlu1 %4093, %v4239_v43   ;;  %2825 = vperm.xlu0 %4094, %v4289_v6  }
 0x352   : > { %v5457_v58 = vpop.permute.xlu1 %2405  ;;  %v5459_v50 = vpop.permute.xlu0 %2441 }
 0x353   : > { %8827 = vst [vmem:[#allocation411_spill] sm:$0xff] %v5457_v58  ;;  %8828 = vst [vmem:[#allocation412_spill] sm:$0xff] %v5459_v50 }
 0x354   : > { %2789 = vperm.xlu1 %4093, %v4247_v47   ;;  %2833 = vperm.xlu0 %4094, %v4297_v14  }
 0x356   : > { %v5463_v2 = vpop.permute.xlu1 %2413  ;;  %v5465_v33 = vpop.permute.xlu0 %2449 }
 0x357   : > { %8829 = vst [vmem:[#allocation413_spill] sm:$0xff] %v5463_v2  ;;  %8830 = vst [vmem:[#allocation414_spill] sm:$0xff] %v5465_v33 }
 0x358   : > { %2797 = vperm.xlu1 %4093, %v4255_v51   ;;  %2841 = vperm.xlu0 %4094, %v4305_v22  }
 0x35a   : > { %v5469_v10 = vpop.permute.xlu1 %2421  ;;  %v5471_v17 = vpop.permute.xlu0 %2457 }
 0x35b   : > { %8831 = vst [vmem:[#allocation415_spill] sm:$0xff] %v5469_v10  ;;  %8832 = vst [vmem:[#allocation416_spill] sm:$0xff] %v5471_v17 }
 0x35c   : > { %2805 = vperm.xlu1 %4093, %v4263_v55   ;;  %2849 = vperm.xlu0 %4094, %v4313_v30  }
 0x35e   : > { %v5475_v50 = vpop.permute.xlu1 %2429  ;;  %v5477_v58 = vpop.permute.xlu0 %2465 }
 0x35f   : > { %8833 = vst [vmem:[#allocation417_spill] sm:$0xff] %v5475_v50  ;;  %8834 = vst [vmem:[#allocation418_spill] sm:$0xff] %v5477_v58 }
 0x360   : > { %2813 = vperm.xlu1 %4093, %v4271_v59   ;;  %2857 = vperm.xlu0 %4094, %v4321_v38  }
 0x362   : > { %v5481_v33 = vpop.permute.xlu1 %2437  ;;  %v5483_v2 = vpop.permute.xlu0 %2473 }
 0x363   : > { %8835 = vst [vmem:[#allocation419_spill] sm:$0xff] %v5481_v33  ;;  %8836 = vst [vmem:[#allocation420_spill] sm:$0xff] %v5483_v2 }
 0x364   : > { %2821 = vperm.xlu1 %4093, %v4279_v63   ;;  %2865 = vperm.xlu0 %4094, %v8632_v42  }
 0x366   : > { %v5487_v17 = vpop.permute.xlu1 %2445  ;;  %v5489_v10 = vpop.permute.xlu0 %2481 }
 0x367   : > { %8837 = vst [vmem:[#allocation421_spill] sm:$0xff] %v5487_v17  ;;  %8838 = vst [vmem:[#allocation422_spill] sm:$0xff] %v5489_v10 }
 0x368   : > { %2829 = vperm.xlu1 %4093, %v4287_v3   ;;  %2873 = vperm.xlu0 %4094, %v8635_v45  }
 0x36a   : > { %v5493_v58 = vpop.permute.xlu1 %2453  ;;  %v5495_v50 = vpop.permute.xlu0 %2489 }
 0x36b   : > { %8839 = vst [vmem:[#allocation423_spill] sm:$0xff] %v5493_v58  ;;  %8840 = vst [vmem:[#allocation424_spill] sm:$0xff] %v5495_v50 }
 0x36c   : > { %2837 = vperm.xlu1 %4093, %v4295_v13   ;;  %2881 = vperm.xlu0 %4094, %v8780_v18  }
 0x36e   : > { %v5499_v2 = vpop.permute.xlu1 %2461  ;;  %v5501_v33 = vpop.permute.xlu0 %2497 }
 0x36f   : > { %8841 = vst [vmem:[#allocation425_spill] sm:$0xff] %v5499_v2  ;;  %8842 = vst [vmem:[#allocation426_spill] sm:$0xff] %v5501_v33 }
 0x370   : > { %2845 = vperm.xlu1 %4093, %v4303_v21   ;;  %2889 = vperm.xlu0 %4094, %v8563_v57  }
 0x372   : > { %v5505_v10 = vpop.permute.xlu1 %2469  ;;  %v5507_v17 = vpop.permute.xlu0 %2505 }
 0x373   : > { %8843 = vst [vmem:[#allocation427_spill] sm:$0xff] %v5505_v10  ;;  %8844 = vst [vmem:[#allocation428_spill] sm:$0xff] %v5507_v17 }
 0x374   : > { %2853 = vperm.xlu1 %4093, %v4311_v29   ;;  %2897 = vperm.xlu0 %4094, %v8785_v26  }
 0x376   : > { %v5511_v50 = vpop.permute.xlu1 %2477  ;;  %v5513_v58 = vpop.permute.xlu0 %2513 }
 0x377   : > { %8845 = vst [vmem:[#allocation429_spill] sm:$0xff] %v5511_v50  ;;  %8846 = vst [vmem:[#allocation430_spill] sm:$0xff] %v5513_v58 }
 0x378   : > { %2861 = vperm.xlu1 %4093, %v4319_v37   ;;  %2905 = vperm.xlu0 %4094, %v8788_v61  }
 0x37a   : > { %v5517_v33 = vpop.permute.xlu1 %2485  ;;  %v5519_v2 = vpop.permute.xlu0 %2521 }
 0x37b   : > { %8847 = vst [vmem:[#allocation431_spill] sm:$0xff] %v5517_v33  ;;  %8848 = vst [vmem:[#allocation432_spill] sm:$0xff] %v5519_v2 }
 0x37c   : > { %2869 = vperm.xlu1 %4093, %v8705_v1   ;;  %2913 = vperm.xlu0 %4094, %v8503_v9  }
 0x37e   : > { %v5523_v17 = vpop.permute.xlu1 %2493  ;;  %v5525_v10 = vpop.permute.xlu0 %2529 }
 0x37f   : > { %8849 = vst [vmem:[#allocation433_spill] sm:$0xff] %v5523_v17  ;;  %8850 = vst [vmem:[#allocation434_spill] sm:$0xff] %v5525_v10 }
 0x380   : > { %2877 = vperm.xlu1 %4093, %v8708_v53   ;;  %2921 = vperm.xlu0 %4094, %v8793_v49  }
 0x382   : > { %v5529_v58 = vpop.permute.xlu1 %2501  ;;  %v5531_v50 = vpop.permute.xlu0 %2537 }
 0x383   : > { %8851 = vst [vmem:[#allocation435_spill] sm:$0xff] %v5529_v58  ;;  %8852 = vst [vmem:[#allocation436_spill] sm:$0xff] %v5531_v50 }
 0x384   : > { %2885 = vperm.xlu1 %4093, %v8566_v54   ;;  %2929 = vperm.xlu0 %4094, %v8796_v41  }
 0x386   : > { %v5535_v2 = vpop.permute.xlu1 %2509  ;;  %v5537_v33 = vpop.permute.xlu0 %2545 }
 0x387   : > { %8853 = vst [vmem:[#allocation437_spill] sm:$0xff] %v5535_v2  ;;  %8854 = vst [vmem:[#allocation438_spill] sm:$0xff] %v5537_v33  ;;  %v4117_v2 = vmov 7  }
 0x388   : > { %2893 = vperm.xlu1 %4093, %v8713_v62   ;;  %2937 = vperm.xlu0 %4094, %v8799_v34  }
 0x38a   : > { %v5541_v10 = vpop.permute.xlu1 %2517  ;;  %v5543_v17 = vpop.permute.xlu0 %2553 }
 0x38b   : > { %8855 = vst [vmem:[#allocation439_spill] sm:$0xff] %v5541_v10  ;;  %8856 = vst [vmem:[#allocation440_spill] sm:$0xff] %v5543_v17  ;;  %v8862_v10 = vld [vmem:[#allocation53_spill] sm:$0xff] }
 0x38c   : > { %2901 = vperm.xlu1 %4093, %v8716_v25   ;;  %2945 = vperm.xlu0 %4094, %v8802_v8  }
 0x38e   : > { %v5547_v50 = vpop.permute.xlu1 %2525  ;;  %v5549_v58 = vpop.permute.xlu0 %2561 }
 0x38f   : > { %8857 = vst [vmem:[#allocation441_spill] sm:$0xff] %v5547_v50  ;;  %8858 = vst [vmem:[#allocation442_spill] sm:$0xff] %v5549_v58  ;;  %v8865_v50 = vld [vmem:[#allocation55_spill] sm:$0xff] }
 0x390   : > { %2909 = vperm.xlu1 %4093, %v8859_v46   ;;  %4095 = vset.pattern.permute.xlu0 %v4117_v2 }
 0x391   : > { %3085 = vperm.xlu0 %4095, %v4162_v5   ;;  %v8868_v5 = vld [vmem:[#allocation57_spill] sm:$0xff] }
 0x392   : > { %v5553_v33 = vpop.permute.xlu1 %2533 }
 0x393   : > { %8860 = vst [vmem:[#allocation443_spill] sm:$0xff] %v5553_v33  ;;  %v5555_v34 = vpop.permute.xlu0 %2701 }
 0x394   : > { %8861 = vst [vmem:[#allocation444_spill] sm:$0xff] %v5555_v34  ;;  %2917 = vperm.xlu1 %4093, %v8862_v10  }
 0x395   : > { %3097 = vperm.xlu0 %4095, %v4167_v7   ;;  %v8871_v7 = vld [vmem:[#allocation59_spill] sm:$0xff] }
 0x396   : > { %v5559_v17 = vpop.permute.xlu1 %2541 }
 0x397   : > { %8863 = vst [vmem:[#allocation445_spill] sm:$0xff] %v5559_v17  ;;  %v5561_v8 = vpop.permute.xlu0 %2713 }
 0x398   : > { %8864 = vst [vmem:[#allocation446_spill] sm:$0xff] %v5561_v8  ;;  %2925 = vperm.xlu1 %4093, %v8865_v50  }
 0x399   : > { %3105 = vperm.xlu0 %4095, %v4175_v11   ;;  %v8874_v11 = vld [vmem:[#allocation61_spill] sm:$0xff] }
 0x39a   : > { %v5565_v58 = vpop.permute.xlu1 %2549 }
 0x39b   : > { %8866 = vst [vmem:[#allocation447_spill] sm:$0xff] %v5565_v58  ;;  %v5567_v41 = vpop.permute.xlu0 %2721 }
 0x39c   : > { %8867 = vst [vmem:[#allocation448_spill] sm:$0xff] %v5567_v41  ;;  %2933 = vperm.xlu1 %4093, %v8868_v5  }
 0x39d   : > { %3113 = vperm.xlu0 %4095, %v4183_v15   ;;  %v8959_v15 = vld [vmem:[#allocation96_spill] sm:$0xff] }
 0x39e   : > { %v5571_v33 = vpop.permute.xlu1 %2557 }
 0x39f   : > { %8869 = vst [vmem:[#allocation449_spill] sm:$0xff] %v5571_v33  ;;  %v5573_v34 = vpop.permute.xlu0 %2729  ;;  %v8877_v33 = vld [vmem:[#allocation5_spill] sm:$0xff] }
 0x3a0   : > { %8870 = vst [vmem:[#allocation450_spill] sm:$0xff] %v5573_v34  ;;  %2941 = vperm.xlu1 %4093, %v8871_v7  }
 0x3a1   : > { %3121 = vperm.xlu0 %4095, %v4191_v19  }
 0x3a3   : > { %v5577_v17 = vpop.permute.xlu1 %2697  ;;  %v5579_v8 = vpop.permute.xlu0 %2737 }
 0x3a4   : > { %8872 = vst [vmem:[#allocation451_spill] sm:$0xff] %v5577_v17  ;;  %8873 = vst [vmem:[#allocation452_spill] sm:$0xff] %v5579_v8  ;;  %2949 = vperm.xlu1 %4093, %v8874_v11  }
 0x3a5   : > { %3129 = vperm.xlu0 %4095, %v4199_v23   ;;  %v8955_v23 = vld [vmem:[#allocation94_spill] sm:$0xff] }
 0x3a7   : > { %v5583_v58 = vpop.permute.xlu1 %2705  ;;  %v5585_v41 = vpop.permute.xlu0 %2745 }
 0x3a8   : > { %8875 = vst [vmem:[#allocation453_spill] sm:$0xff] %v5583_v58  ;;  %8876 = vst [vmem:[#allocation454_spill] sm:$0xff] %v5585_v41  ;;  %4096 = vset.pattern.permute.xlu1 %v4117_v2 }
 0x3a9   : > { %3089 = vperm.xlu1 %4096, %v8877_v33   ;;  %3137 = vperm.xlu0 %4095, %v4207_v27   ;;  %v8952_v27 = vld [vmem:[#allocation91_spill] sm:$0xff] }
 0x3ab   : > { %v5589_v34 = vpop.permute.xlu1 %2709  ;;  %v5591_v19 = vpop.permute.xlu0 %2753 }
 0x3ac   : > { %8878 = vst [vmem:[#allocation5_spill] sm:$0xff] %v5589_v34  ;;  %8879 = vst [vmem:[#allocation455_spill] sm:$0xff] %v5591_v19 }
 0x3ad   : > { %3093 = vperm.xlu1 %4096, %v4160_v4   ;;  %3145 = vperm.xlu0 %4095, %v4215_v31   ;;  %v8950_v31 = vld [vmem:[#allocation89_spill] sm:$0xff] }
 0x3ae   : > { %v8966_v4 = vld [vmem:[#allocation101_spill] sm:$0xff] }
 0x3af   : > { %v5595_v17 = vpop.permute.xlu1 %2717  ;;  %v5597_v8 = vpop.permute.xlu0 %2761 }
 0x3b0   : > { %8880 = vst [vmem:[#allocation456_spill] sm:$0xff] %v5595_v17  ;;  %8881 = vst [vmem:[#allocation457_spill] sm:$0xff] %v5597_v8 }
 0x3b1   : > { %3101 = vperm.xlu1 %4096, %v4177_v12   ;;  %3153 = vperm.xlu0 %4095, %v4223_v35   ;;  %v8947_v35 = vld [vmem:[#allocation86_spill] sm:$0xff] }
 0x3b3   : > { %v5601_v2 = vpop.permute.xlu1 %2725  ;;  %v5603_v58 = vpop.permute.xlu0 %2769 }
 0x3b4   : > { %8882 = vst [vmem:[#allocation458_spill] sm:$0xff] %v5601_v2  ;;  %8883 = vst [vmem:[#allocation459_spill] sm:$0xff] %v5603_v58 }
 0x3b5   : > { %3109 = vperm.xlu1 %4096, %v4185_v16   ;;  %3161 = vperm.xlu0 %4095, %v4231_v39   ;;  %v8944_v39 = vld [vmem:[#allocation83_spill] sm:$0xff] }
 0x3b7   : > { %v5607_v34 = vpop.permute.xlu1 %2733  ;;  %v5609_v19 = vpop.permute.xlu0 %2777 }
 0x3b8   : > { %8884 = vst [vmem:[#allocation460_spill] sm:$0xff] %v5607_v34  ;;  %8885 = vst [vmem:[#allocation461_spill] sm:$0xff] %v5609_v19 }
 0x3b9   : > { %3117 = vperm.xlu1 %4096, %v4193_v20   ;;  %3169 = vperm.xlu0 %4095, %v4239_v43   ;;  %v8942_v43 = vld [vmem:[#allocation81_spill] sm:$0xff] }
 0x3bb   : > { %v5613_v17 = vpop.permute.xlu1 %2741  ;;  %v5615_v8 = vpop.permute.xlu0 %2785 }
 0x3bc   : > { %8886 = vst [vmem:[#allocation462_spill] sm:$0xff] %v5613_v17  ;;  %8887 = vst [vmem:[#allocation463_spill] sm:$0xff] %v5615_v8 }
 0x3bd   : > { %3125 = vperm.xlu1 %4096, %v4201_v24   ;;  %3177 = vperm.xlu0 %4095, %v4247_v47   ;;  %v8974_v24 = vld [vmem:[#allocation105_spill] sm:$0xff] }
 0x3bf   : > { %v5619_v2 = vpop.permute.xlu1 %2749  ;;  %v5621_v58 = vpop.permute.xlu0 %2793 }
 0x3c0   : > { %8888 = vst [vmem:[#allocation464_spill] sm:$0xff] %v5619_v2  ;;  %8889 = vst [vmem:[#allocation465_spill] sm:$0xff] %v5621_v58 }
 0x3c1   : > { %3133 = vperm.xlu1 %4096, %v4209_v28   ;;  %3185 = vperm.xlu0 %4095, %v4255_v51   ;;  %v8937_v51 = vld [vmem:[#allocation78_spill] sm:$0xff]  ;;  %v8972_v28 = vld [vmem:[#allocation104_spill] sm:$0xff] }
 0x3c3   : > { %v5625_v34 = vpop.permute.xlu1 %2757  ;;  %v5627_v19 = vpop.permute.xlu0 %2801 }
 0x3c4   : > { %8890 = vst [vmem:[#allocation466_spill] sm:$0xff] %v5625_v34  ;;  %8891 = vst [vmem:[#allocation467_spill] sm:$0xff] %v5627_v19 }
 0x3c5   : > { %3141 = vperm.xlu1 %4096, %v4217_v32   ;;  %3193 = vperm.xlu0 %4095, %v4263_v55   ;;  %v8934_v55 = vld [vmem:[#allocation75_spill] sm:$0xff] }
 0x3c6   : > { %v8970_v32 = vld [vmem:[#allocation103_spill] sm:$0xff] }
 0x3c7   : > { %v5631_v17 = vpop.permute.xlu1 %2765  ;;  %v5633_v8 = vpop.permute.xlu0 %2809 }
 0x3c8   : > { %8892 = vst [vmem:[#allocation468_spill] sm:$0xff] %v5631_v17  ;;  %8893 = vst [vmem:[#allocation469_spill] sm:$0xff] %v5633_v8 }
 0x3c9   : > { %3149 = vperm.xlu1 %4096, %v4225_v36   ;;  %3201 = vperm.xlu0 %4095, %v4271_v59   ;;  %v8933_v59 = vld [vmem:[#allocation74_spill] sm:$0xff]  ;;  %v8962_v36 = vld [vmem:[#allocation99_spill] sm:$0xff] }
 0x3cb   : > { %v5637_v2 = vpop.permute.xlu1 %2773  ;;  %v5639_v58 = vpop.permute.xlu0 %2817 }
 0x3cc   : > { %8894 = vst [vmem:[#allocation470_spill] sm:$0xff] %v5637_v2  ;;  %8895 = vst [vmem:[#allocation471_spill] sm:$0xff] %v5639_v58 }
 0x3cd   : > { %3157 = vperm.xlu1 %4096, %v4233_v40   ;;  %3209 = vperm.xlu0 %4095, %v4279_v63   ;;  %v8932_v63 = vld [vmem:[#allocation73_spill] sm:$0xff]  ;;  %v8961_v40 = vld [vmem:[#allocation98_spill] sm:$0xff] }
 0x3cf   : > { %v5643_v34 = vpop.permute.xlu1 %2781  ;;  %v5645_v19 = vpop.permute.xlu0 %2825 }
 0x3d0   : > { %8896 = vst [vmem:[#allocation472_spill] sm:$0xff] %v5643_v34  ;;  %8897 = vst [vmem:[#allocation473_spill] sm:$0xff] %v5645_v19 }
 0x3d1   : > { %3165 = vperm.xlu1 %4096, %v4241_v44   ;;  %3217 = vperm.xlu0 %4095, %v4287_v3   ;;  %v8930_v3 = vld [vmem:[#allocation71_spill] sm:$0xff]  ;;  %v8960_v44 = vld [vmem:[#allocation97_spill] sm:$0xff] }
 0x3d3   : > { %v5649_v17 = vpop.permute.xlu1 %2789  ;;  %v5651_v8 = vpop.permute.xlu0 %2833 }
 0x3d4   : > { %8898 = vst [vmem:[#allocation474_spill] sm:$0xff] %v5649_v17  ;;  %8899 = vst [vmem:[#allocation475_spill] sm:$0xff] %v5651_v8 }
 0x3d5   : > { %3173 = vperm.xlu1 %4096, %v4249_v48   ;;  %3225 = vperm.xlu0 %4095, %v4295_v13   ;;  %v8928_v13 = vld [vmem:[#allocation69_spill] sm:$0xff]  ;;  %v8958_v48 = vld [vmem:[#allocation95_spill] sm:$0xff] }
 0x3d7   : > { %v5655_v2 = vpop.permute.xlu1 %2797  ;;  %v5657_v58 = vpop.permute.xlu0 %2841 }
 0x3d8   : > { %8900 = vst [vmem:[#allocation476_spill] sm:$0xff] %v5655_v2  ;;  %8901 = vst [vmem:[#allocation477_spill] sm:$0xff] %v5657_v58 }
 0x3d9   : > { %3181 = vperm.xlu1 %4096, %v4257_v52   ;;  %3233 = vperm.xlu0 %4095, %v4303_v21  }
 0x3db   : > { %v5661_v34 = vpop.permute.xlu1 %2805  ;;  %v5663_v19 = vpop.permute.xlu0 %2849 }
 0x3dc   : > { %8902 = vst [vmem:[#allocation478_spill] sm:$0xff] %v5661_v34  ;;  %8903 = vst [vmem:[#allocation479_spill] sm:$0xff] %v5663_v19 }
 0x3dd   : > { %3189 = vperm.xlu1 %4096, %v4265_v56   ;;  %3241 = vperm.xlu0 %4095, %v4311_v29   ;;  %v8954_v56 = vld [vmem:[#allocation93_spill] sm:$0xff] }
 0x3df   : > { %v5667_v17 = vpop.permute.xlu1 %2813  ;;  %v5669_v8 = vpop.permute.xlu0 %2857 }
 0x3e0   : > { %8904 = vst [vmem:[#allocation480_spill] sm:$0xff] %v5667_v17  ;;  %8905 = vst [vmem:[#allocation481_spill] sm:$0xff] %v5669_v8  ;;  %v624_v17 = vlaneseq }
 0x3e1   : > { %3197 = vperm.xlu1 %4096, %v4273_v60   ;;  %3249 = vperm.xlu0 %4095, %v4319_v37   ;;  %v8951_v60 = vld [vmem:[#allocation90_spill] sm:$0xff] }
 0x3e3   : > { %v5673_v2 = vpop.permute.xlu1 %2821  ;;  %v5675_v58 = vpop.permute.xlu0 %2865 }
 0x3e4   : > { %8906 = vst [vmem:[#allocation482_spill] sm:$0xff] %v5673_v2  ;;  %8907 = vst [vmem:[#allocation483_spill] sm:$0xff] %v5675_v58  ;;  %v5691_v2 = vshrl.u32 %v624_v17, 7 }
 0x3e5   : > { %3205 = vperm.xlu1 %4096, %v4281_v0   ;;  %3257 = vperm.xlu0 %4095, %v8705_v1   ;;  %v8949_v0 = vld [vmem:[#allocation88_spill] sm:$0xff] }
 0x3e6   : > { %8912 = vst [vmem:[#allocation488_spill] sm:$0xff] %v5691_v2 }
 0x3e7   : > { %v5679_v34 = vpop.permute.xlu1 %2829  ;;  %v5681_v19 = vpop.permute.xlu0 %2873 }
 0x3e8   : > { %8908 = vst [vmem:[#allocation484_spill] sm:$0xff] %v5679_v34  ;;  %8909 = vst [vmem:[#allocation485_spill] sm:$0xff] %v5681_v19  ;;  %v626_v19 = vsub.s32 0, %v5691_v2 }
 0x3e9   : > { %3213 = vperm.xlu1 %4096, %v4289_v6   ;;  %3265 = vperm.xlu0 %4095, %v8708_v53   ;;  %v8945_v6 = vld [vmem:[#allocation84_spill] sm:$0xff] }
 0x3eb   : > { %v5685_v8 = vpop.permute.xlu1 %2837  ;;  %v5687_v41 = vpop.permute.xlu0 %2881 }
 0x3ec   : > { %8910 = vst [vmem:[#allocation486_spill] sm:$0xff] %v5685_v8  ;;  %8911 = vst [vmem:[#allocation487_spill] sm:$0xff] %v5687_v41  ;;  %v5707_v41 = vld [vmem:[%s8250_s1] sm:$0xff] }
 0x3ed   : > { %3221 = vperm.xlu1 %4096, %v4297_v14   ;;  %3273 = vperm.xlu0 %4095, %v8566_v54   ;;  %v5712_v17 = vrot.slane %v5707_v41, %v626_v19  ;;  %v8920_v54 = vld [vmem:[#allocation64_spill] sm:$0xff]  ;;  %v8943_v14 = vld [vmem:[#allocation82_spill] sm:$0xff] }
 0x3ef   : > { %v5693_v58 = vpop.permute.xlu1 %2845  ;;  %v5695_v34 = vpop.permute.xlu0 %2889 }
 0x3f0   : > { %8913 = vst [vmem:[#allocation489_spill] sm:$0xff] %v5693_v58  ;;  %8914 = vst [vmem:[#allocation490_spill] sm:$0xff] %v5695_v34  ;;  %v1014_v58 = vsub.s32 1, %v5691_v2 }
 0x3f1   : > { %3229 = vperm.xlu1 %4096, %v4305_v22   ;;  %3281 = vperm.xlu0 %4095, %v8713_v62   ;;  %v8941_v22 = vld [vmem:[#allocation80_spill] sm:$0xff] }
 0x3f2   : > { %v5730_v19 = vrot.slane %v5707_v41, %v1014_v58 }
 0x3f3   : > { %v5700_v53 = vpop.permute.xlu1 %2853  ;;  %v5702_v8 = vpop.permute.xlu0 %2897 }
 0x3f4   : > { %8915 = vst [vmem:[#allocation491_spill] sm:$0xff] %v5700_v53  ;;  %8916 = vst [vmem:[#allocation492_spill] sm:$0xff] %v5702_v8  ;;  %v8919_v53 = vld [vmem:[#allocation63_spill] sm:$0xff] }
 0x3f5   : > { %3237 = vperm.xlu1 %4096, %v4313_v30   ;;  %3289 = vperm.xlu0 %4095, %v8716_v25   ;;  %v5723_v8 = vmul.f32 %v5712_v17, %v8919_v53  ;;  %v5727_v25 = vmul.f32 %v5712_v17, %v8920_v54  ;;  %8921 = vst [vmem:[#allocation63_spill] sm:$0xff] %v5730_v19  ;;  %v8926_v53 = vld [vmem:[#allocation67_spill] sm:$0xff]  ;;  %v8927_v54 = vld [vmem:[#allocation68_spill] sm:$0xff] }
 0x3f6   : > { %v5746_v21 = vmul.f32 %v5712_v17, %v8926_v53  ;;  %v5750_v58 = vmul.f32 %v5712_v17, %v8927_v54  ;;  %v8931_v53 = vld [vmem:[#allocation72_spill] sm:$0xff]  ;;  %v8938_v30 = vld [vmem:[#allocation79_spill] sm:$0xff] }
 0x3f7   : > { %v5715_v34 = vpop.permute.xlu1 %2861  ;;  %v5717_v62 = vpop.permute.xlu0 %2905  ;;  %v5768_v54 = vmul.f32 %v5712_v17, %v8931_v53 }
 0x3f8   : > { %8917 = vst [vmem:[#allocation493_spill] sm:$0xff] %v5715_v34  ;;  %8918 = vst [vmem:[#allocation494_spill] sm:$0xff] %v5717_v62  ;;  %v8924_v62 = vld [vmem:[#allocation65_spill] sm:$0xff] }
 0x3f9   : > { %3245 = vperm.xlu1 %4096, %v4321_v38   ;;  %3297 = vperm.xlu0 %4095, %v8859_v46   ;;  %v5738_v37 = vmul.f32 %v5712_v17, %v8924_v62  ;;  %v8925_v46 = vld [vmem:[#allocation66_spill] sm:$0xff]  ;;  %v8935_v38 = vld [vmem:[#allocation76_spill] sm:$0xff] }
 0x3fa   : > { %v5742_v29 = vmul.f32 %v5712_v17, %v8925_v46  ;;  %v5762_v46 = vmul.f32 %v5712_v17, %v8930_v3  ;;  %v5780_v3 = vmul.f32 %v5712_v17, %v8934_v55 }
 0x3fb   : > { %v5732_v1 = vpop.permute.xlu1 %2869  ;;  %v5734_v34 = vpop.permute.xlu0 %2913 }
 0x3fc   : > { %8922 = vst [vmem:[#allocation64_spill] sm:$0xff] %v5732_v1  ;;  %8923 = vst [vmem:[#allocation495_spill] sm:$0xff] %v5734_v34  ;;  %v5754_v1 = vmul.f32 %v5712_v17, %v8928_v13  ;;  %v8929_v34 = vld [vmem:[#allocation70_spill] sm:$0xff]  ;;  %v5772_v13 = vmul.f32 %v5712_v17, %v8932_v63  ;;  %v5792_v63 = vmul.f32 %v5712_v17, %v8937_v51 }
 0x3fd   : > { %v5758_v62 = vmul.f32 %v5712_v17, %v8929_v34  ;;  %3253 = vperm.xlu1 %4096, %v8632_v42   ;;  %3305 = vperm.xlu0 %4095, %v8862_v10   ;;  %v5776_v34 = vmul.f32 %v5712_v17, %v8933_v59  ;;  %v5784_v42 = vmul.f32 %v5712_v17, %v8935_v38  ;;  %v8936_v10 = vld [vmem:[#allocation77_spill] sm:$0xff] }
 0x3fe   : > { %v5788_v53 = vmul.f32 %v5712_v17, %v8936_v10  ;;  %v5796_v59 = vmul.f32 %v5712_v17, %v8938_v30  ;;  %v5804_v38 = vmul.f32 %v5712_v17, %v8941_v22  ;;  %v5808_v10 = vmul.f32 %v5712_v17, %v8942_v43 }
 0x3ff   : > { %v5798_v47 = vpop.permute.xlu1 %2877  ;;  %v5800_v55 = vpop.permute.xlu0 %2921  ;;  %v5812_v51 = vmul.f32 %v5712_v17, %v8943_v14  ;;  %v5816_v30 = vmul.f32 %v5712_v17, %v8944_v39  ;;  %v5828_v43 = vmul.f32 %v5712_v17, %v8947_v35  ;;  %v8948_v14 = vld [vmem:[#allocation87_spill] sm:$0xff]  ;;  %v5846_v35 = vmul.f32 %v5712_v17, %v8951_v60 }
 0x400   : > { %8939 = vst [vmem:[#allocation65_spill] sm:$0xff] %v5798_v47  ;;  %8940 = vst [vmem:[#allocation66_spill] sm:$0xff] %v5800_v55  ;;  %v5820_v47 = vmul.f32 %v5712_v17, %v8945_v6  ;;  %v8946_v55 = vld [vmem:[#allocation85_spill] sm:$0xff]  ;;  %v5834_v39 = vmul.f32 %v5712_v17, %v8948_v14  ;;  %v5838_v6 = vmul.f32 %v5712_v17, %v8949_v0 }
 0x401   : > { %v5824_v22 = vmul.f32 %v5712_v17, %v8946_v55  ;;  %3261 = vperm.xlu1 %4096, %v8635_v45   ;;  %3313 = vperm.xlu0 %4095, %v8865_v50   ;;  %v5842_v55 = vmul.f32 %v5712_v17, %v8950_v31  ;;  %v5850_v45 = vmul.f32 %v5712_v17, %v8952_v27  ;;  %v8953_v50 = vld [vmem:[#allocation92_spill] sm:$0xff] }
 0x402   : > { %v5854_v14 = vmul.f32 %v5712_v17, %v8953_v50  ;;  %v5858_v0 = vmul.f32 %v5712_v17, %v8954_v56  ;;  %v5862_v31 = vmul.f32 %v5712_v17, %v8955_v23  ;;  %v5870_v27 = vmul.f32 %v5712_v17, %v8958_v48 }
 0x403   : > { %v5864_v52 = vpop.permute.xlu1 %2885  ;;  %v5866_v60 = vpop.permute.xlu0 %2929  ;;  %v5874_v50 = vmul.f32 %v5712_v17, %v8959_v15  ;;  %v5878_v56 = vmul.f32 %v5712_v17, %v8960_v44  ;;  %v5882_v23 = vmul.f32 %v5712_v17, %v8961_v40  ;;  %v5894_v15 = vmul.f32 %v5712_v17, %v8966_v4  ;;  %v8968_v44 = vld [vmem:[#allocation102_spill] sm:$0xff] }
 0x404   : > { %8956 = vst [vmem:[#allocation67_spill] sm:$0xff] %v5864_v52  ;;  %8957 = vst [vmem:[#allocation68_spill] sm:$0xff] %v5866_v60  ;;  %v5886_v52 = vmul.f32 %v5712_v17, %v8962_v36  ;;  %v8964_v60 = vld [vmem:[#allocation100_spill] sm:$0xff]  ;;  %v5900_v40 = vmul.f32 %v5712_v17, %v8968_v44  ;;  %v5904_v36 = vmul.f32 %v5712_v17, %v8970_v32 }
 0x405   : > { %v5890_v48 = vmul.f32 %v5712_v17, %v8964_v60  ;;  %8967 = vst [vmem:[#allocation71_spill] sm:$0xff] %v5894_v15  ;;  %3269 = vperm.xlu1 %4096, %v8780_v18   ;;  %3321 = vperm.xlu0 %4095, %v8868_v5   ;;  %v5908_v60 = vmul.f32 %v5712_v17, %v8972_v28  ;;  %v8976_v15 = vld [vmem:[#allocation106_spill] sm:$0xff]  ;;  %v8978_v5 = vld [vmem:[#allocation107_spill] sm:$0xff] }
 0x406   : > { %8963 = vst [vmem:[#allocation69_spill] sm:$0xff] %v5886_v52  ;;  %8969 = vst [vmem:[#allocation72_spill] sm:$0xff] %v5900_v40  ;;  %v5912_v4 = vmul.f32 %v5712_v17, %v8974_v24  ;;  %v5916_v18 = vmul.f32 %v5712_v17, %v8976_v15  ;;  %v5920_v44 = vmul.f32 %v5712_v17, %v8978_v5  ;;  %v8980_v40 = vld [vmem:[#allocation108_spill] sm:$0xff]  ;;  %v9024_v52 = vld [vmem:[#allocation131_spill] sm:$0xff] }
 0x407   : > { %8965 = vst [vmem:[#allocation70_spill] sm:$0xff] %v5890_v48  ;;  %8971 = vst [vmem:[#allocation73_spill] sm:$0xff] %v5904_v36  ;;  %v5924_v32 = vmul.f32 %v5712_v17, %v8980_v40  ;;  %v8982_v36 = vld [vmem:[#allocation109_spill] sm:$0xff]  ;;  %v5932_v24 = vpop.permute.xlu0 %2937  ;;  %v9030_v48 = vld [vmem:[#allocation135_spill] sm:$0xff] }
 0x408   : > { %8973 = vst [vmem:[#allocation74_spill] sm:$0xff] %v5908_v60  ;;  %8975 = vst [vmem:[#allocation75_spill] sm:$0xff] %v5912_v4  ;;  %v5928_v28 = vmul.f32 %v5712_v17, %v8982_v36  ;;  %v5930_v60 = vpop.permute.xlu1 %2893  ;;  %v8986_v4 = vld [vmem:[#allocation110_spill] sm:$0xff] }
 0x409   : > { %8977 = vst [vmem:[#allocation76_spill] sm:$0xff] %v5916_v18  ;;  %8979 = vst [vmem:[#allocation77_spill] sm:$0xff] %v5920_v44  ;;  %v5936_v15 = vmul.f32 %v5712_v17, %v8986_v4  ;;  %v8988_v18 = vld [vmem:[#allocation111_spill] sm:$0xff]  ;;  %v8990_v44 = vld [vmem:[#allocation112_spill] sm:$0xff]  ;;  %3277 = vperm.xlu1 %4096, %v8563_v57   ;;  %3329 = vperm.xlu0 %4095, %v8871_v7  }
 0x40a   : > { %8981 = vst [vmem:[#allocation78_spill] sm:$0xff] %v5924_v32  ;;  %8983 = vst [vmem:[#allocation79_spill] sm:$0xff] %v5928_v28  ;;  %v5940_v5 = vmul.f32 %v5712_v17, %v8988_v18  ;;  %v5944_v40 = vmul.f32 %v5712_v17, %v8990_v44  ;;  %v8992_v32 = vld [vmem:[#allocation113_spill] sm:$0xff]  ;;  %v8994_v28 = vld [vmem:[#allocation114_spill] sm:$0xff] }
 0x40b   : > { %8984 = vst [vmem:[#allocation80_spill] sm:$0xff] %v5930_v60  ;;  %8985 = vst [vmem:[#allocation81_spill] sm:$0xff] %v5932_v24  ;;  %v5948_v36 = vmul.f32 %v5712_v17, %v8992_v32  ;;  %v5952_v60 = vmul.f32 %v5712_v17, %v8994_v28  ;;  %v8996_v24 = vld [vmem:[#allocation115_spill] sm:$0xff]  ;;  %v9000_v44 = vld [vmem:[#allocation117_spill] sm:$0xff] }
 0x40c   : > { %8987 = vst [vmem:[#allocation82_spill] sm:$0xff] %v5936_v15  ;;  %8989 = vst [vmem:[#allocation83_spill] sm:$0xff] %v5940_v5  ;;  %v5956_v4 = vmul.f32 %v5712_v17, %v8996_v24  ;;  %v8998_v15 = vld [vmem:[#allocation116_spill] sm:$0xff]  ;;  %v5966_v32 = vmul.f32 %v5712_v17, %v9000_v44  ;;  %v9010_v7 = vld [vmem:[#allocation122_spill] sm:$0xff]  ;;  %v5991_v5 = vpop.permute.xlu1 %2901 }
 0x40d   : > { %8991 = vst [vmem:[#allocation84_spill] sm:$0xff] %v5944_v40  ;;  %8993 = vst [vmem:[#allocation85_spill] sm:$0xff] %v5948_v36  ;;  %v5960_v18 = vmul.f32 %v5712_v17, %v8998_v15  ;;  %v9002_v36 = vld [vmem:[#allocation118_spill] sm:$0xff]  ;;  %v5986_v44 = vmul.f32 %v5712_v17, %v9010_v7  ;;  %3285 = vperm.xlu1 %4096, %v8785_v26   ;;  %3337 = vperm.xlu0 %4095, %v8874_v11  }
 0x40e   : > { %8995 = vst [vmem:[#allocation86_spill] sm:$0xff] %v5952_v60  ;;  %8997 = vst [vmem:[#allocation87_spill] sm:$0xff] %v5956_v4  ;;  %v5970_v28 = vmul.f32 %v5712_v17, %v9002_v36  ;;  %v9004_v60 = vld [vmem:[#allocation119_spill] sm:$0xff]  ;;  %v9006_v4 = vld [vmem:[#allocation120_spill] sm:$0xff]  ;;  %v1024_v26 = vmul.f32 %v5730_v19, %v9030_v48 }
 0x40f   : > { %8999 = vst [vmem:[#allocation88_spill] sm:$0xff] %v5960_v18  ;;  %9001 = vst [vmem:[#allocation89_spill] sm:$0xff] %v5966_v32  ;;  %v5974_v24 = vmul.f32 %v5712_v17, %v9004_v60  ;;  %v5978_v15 = vmul.f32 %v5712_v17, %v9006_v4  ;;  %v9008_v18 = vld [vmem:[#allocation121_spill] sm:$0xff]  ;;  %v9012_v32 = vld [vmem:[#allocation127_spill] sm:$0xff]  ;;  %v5993_v60 = vpop.permute.xlu0 %2945 }
 0x410   : > { %9003 = vst [vmem:[#allocation90_spill] sm:$0xff] %v5970_v28  ;;  %v5982_v57 = vmul.f32 %v5712_v17, %v9008_v18  ;;  %9011 = vst [vmem:[#allocation94_spill] sm:$0xff] %v5986_v44  ;;  %v1017_v36 = vmul.f32 %v5730_v19, %v9012_v32  ;;  %v1402_v28 = vsub.s32 2, %v5691_v2  ;;  %v9019_v44 = vld [vmem:[#allocation130_spill] sm:$0xff]  ;;  %v9020_v32 = vld [vmem:[#allocation124_spill] sm:$0xff] }
 0x411   : > { %9005 = vst [vmem:[#allocation91_spill] sm:$0xff] %v5974_v24  ;;  %9007 = vst [vmem:[#allocation92_spill] sm:$0xff] %v5978_v15  ;;  %v9015_v24 = vld [vmem:[#allocation123_spill] sm:$0xff]  ;;  %v9017_v15 = vld [vmem:[#allocation128_spill] sm:$0xff]  ;;  %v1019_v40 = vmul.f32 %v5730_v19, %v9019_v44  ;;  %v6007_v2 = vmul.f32 %v5712_v17, %v9020_v32  ;;  %3293 = vperm.xlu1 %4096, %v8788_v61  }
 0x412   : > { %9009 = vst [vmem:[#allocation93_spill] sm:$0xff] %v5982_v57  ;;  %9013 = vst [vmem:[#allocation95_spill] sm:$0xff] %v5991_v5  ;;  %v5997_v4 = vmul.f32 %v5712_v17, %v9015_v24  ;;  %v1016_v18 = vmul.f32 %v5730_v19, %v9017_v15  ;;  %v9018_v57 = vld [vmem:[#allocation129_spill] sm:$0xff]  ;;  %v1020_v24 = vmul.f32 %v5730_v19, %v9024_v52  ;;  %v9025_v15 = vld [vmem:[#allocation126_spill] sm:$0xff] }
 0x413   : > { %9014 = vst [vmem:[#allocation96_spill] sm:$0xff] %v5993_v60  ;;  %v1018_v7 = vmul.f32 %v5730_v19, %v9018_v57  ;;  %9021 = vst [vmem:[#allocation98_spill] sm:$0xff] %v6007_v2  ;;  %v9022_v5 = vld [vmem:[#allocation125_spill] sm:$0xff]  ;;  %v6019_v57 = vmul.f32 %v5712_v17, %v9025_v15  ;;  %v9026_v44 = vld [vmem:[#allocation132_spill] sm:$0xff]  ;;  %v6033_v11 = vrot.slane %v5707_v41, %v1402_v28 }
 0x414   : > { %9016 = vst [vmem:[#allocation97_spill] sm:$0xff] %v5997_v4  ;;  %v6011_v60 = vmul.f32 %v5712_v17, %v9022_v5  ;;  %v1021_v4 = vmul.f32 %v5730_v19, %v9026_v44  ;;  %v9027_v32 = vld [vmem:[#allocation133_spill] sm:$0xff]  ;;  %v6026_v5 = vadd.f32 %v1017_v36, %v5742_v29  ;;  %v6035_v17 = vpop.permute.xlu1 %2909  ;;  %v6038_v15 = vadd.f32 %v1016_v18, %v5727_v25  ;;  %v9033_v36 = vld [vmem:[#allocation136_spill] sm:$0xff]  ;;  %v9037_v18 = vld [vmem:[#allocation139_spill] sm:$0xff] }
 0x415   : > { %v1022_v2 = vmul.f32 %v5730_v19, %v9027_v32  ;;  %9031 = vst [vmem:[#allocation101_spill] sm:$0xff] %v6033_v11  ;;  %9032 = vst [vmem:[#allocation102_spill] sm:$0xff] %v6035_v17  ;;  %v6041_v44 = vadd.f32 %v1018_v7, %v5723_v8  ;;  %v6044_v29 = vadd.f32 %v1019_v40, %v5738_v37  ;;  %v6048_v32 = vpop.permute.xlu0 %3085  ;;  %v9035_v28 = vld [vmem:[#allocation137_spill] sm:$0xff]  ;;  %v8372_v8 = vmov 8   ;;  %v9038_v7 = vld [vmem:[#allocation140_spill] sm:$0xff]  ;;  %3301 = vperm.xlu1 %4096, %v8503_v9  }
 0x416   : > { %9023 = vst [vmem:[#allocation99_spill] sm:$0xff] %v6011_v60  ;;  %9028 = vst [vmem:[#allocation100_spill] sm:$0xff] %v6026_v5  ;;  %v9029_v60 = vld [vmem:[#allocation134_spill] sm:$0xff]  ;;  %v6051_v48 = vadd.f32 %v1020_v24, %v5750_v58  ;;  %v1026_v17 = vmul.f32 %v5730_v19, %v9035_v28  ;;  %4098 = vset.pattern.permute.xlu0 %v8372_v8  ;;  %v6060_v37 = vadd.f32 %v1021_v4, %v5746_v21  ;;  %v9039_v28 = vld [vmem:[#allocation141_spill] sm:$0xff] }
 0x417   : > { %v1023_v52 = vmul.f32 %v5730_v19, %v9029_v60  ;;  %v1025_v60 = vmul.f32 %v5730_v19, %v9033_v36  ;;  %9034 = vst [vmem:[#allocation103_spill] sm:$0xff] %v6048_v32  ;;  %v9036_v5 = vld [vmem:[#allocation138_spill] sm:$0xff]  ;;  %v6063_v40 = vadd.f32 %v1022_v2, %v5758_v62  ;;  %v1028_v58 = vmul.f32 %v5730_v19, %v9037_v18  ;;  %v9043_v8 = vld [vmem:[#allocation144_spill] sm:$0xff] }
 0x418   : > { %v1027_v25 = vmul.f32 %v5730_v19, %v9036_v5  ;;  %v1029_v24 = vmul.f32 %v5730_v19, %v9038_v7  ;;  %3477 = vperm.xlu0 %4098, %v8877_v33   ;;  %v6074_v36 = vadd.f32 %v1024_v26, %v5768_v54  ;;  %v1030_v21 = vmul.f32 %v5730_v19, %v9039_v28  ;;  %v9040_v4 = vld [vmem:[#allocation142_spill] sm:$0xff]  ;;  %v6080_v62 = vpop.permute.xlu1 %2917  ;;  %v9042_v7 = vld [vmem:[#allocation143_spill] sm:$0xff]  ;;  %v9096_v9 = vld [vmem:[#allocation176_spill] sm:$0xff] }
 0x419   : > { %v6071_v5 = vadd.f32 %v1023_v52, %v5754_v1  ;;  %v1031_v2 = vmul.f32 %v5730_v19, %v9040_v4  ;;  %9041 = vst [vmem:[#allocation104_spill] sm:$0xff] %v6080_v62  ;;  %v6083_v18 = vadd.f32 %v1025_v60, %v5762_v46  ;;  %v1032_v33 = vmul.f32 %v5730_v19, %v9042_v7  ;;  %v9044_v52 = vld [vmem:[#allocation145_spill] sm:$0xff]  ;;  %v6091_v54 = vpop.permute.xlu0 %3097  ;;  %v9046_v62 = vld [vmem:[#allocation146_spill] sm:$0xff]  ;;  %v9047_v60 = vld [vmem:[#allocation147_spill] sm:$0xff] }
 0x41a   : > { %v1033_v1 = vmul.f32 %v5730_v19, %v9043_v8  ;;  %v1034_v26 = vmul.f32 %v5730_v19, %v9044_v52  ;;  %9045 = vst [vmem:[#allocation105_spill] sm:$0xff] %v6091_v54  ;;  %v6094_v28 = vadd.f32 %v1026_v17, %v5776_v34  ;;  %v6097_v4 = vadd.f32 %v1027_v25, %v5772_v13  ;;  %v9048_v54 = vld [vmem:[#allocation148_spill] sm:$0xff]  ;;  %v9049_v17 = vld [vmem:[#allocation149_spill] sm:$0xff] }
 0x41b   : > { %v1035_v46 = vmul.f32 %v5730_v19, %v9046_v62  ;;  %v1036_v7 = vmul.f32 %v5730_v19, %v9047_v60  ;;  %v6105_v8 = vadd.f32 %v1028_v58, %v5784_v42  ;;  %v6108_v52 = vadd.f32 %v1029_v24, %v5780_v3  ;;  %v9050_v60 = vld [vmem:[#allocation150_spill] sm:$0xff]  ;;  %v9051_v58 = vld [vmem:[#allocation151_spill] sm:$0xff]  ;;  %3309 = vperm.xlu1 %4096, %v8793_v49  }
 0x41c   : > { %v1037_v34 = vmul.f32 %v5730_v19, %v9048_v54  ;;  %v1038_v13 = vmul.f32 %v5730_v19, %v9049_v17  ;;  %3489 = vperm.xlu0 %4098, %v4177_v12   ;;  %v6116_v25 = vadd.f32 %v1030_v21, %v5792_v63  ;;  %v6119_v62 = vadd.f32 %v1031_v2, %v5788_v53  ;;  %v6125_v24 = vpop.permute.xlu1 %2925  ;;  %v9053_v63 = vld [vmem:[#allocation152_spill] sm:$0xff] }
 0x41d   : > { %v1039_v42 = vmul.f32 %v5730_v19, %v9050_v60  ;;  %v1040_v3 = vmul.f32 %v5730_v19, %v9051_v58  ;;  %9052 = vst [vmem:[#allocation106_spill] sm:$0xff] %v6125_v24  ;;  %v6128_v54 = vadd.f32 %v1032_v33, %v5804_v38  ;;  %v6131_v17 = vadd.f32 %v1033_v1, %v5796_v59  ;;  %v6138_v21 = vpop.permute.xlu0 %3105  ;;  %v9055_v58 = vld [vmem:[#allocation153_spill] sm:$0xff]  ;;  %v9056_v33 = vld [vmem:[#allocation154_spill] sm:$0xff] }
 0x41e   : > { %v6134_v12 = vadd.f32 %v1034_v26, %v5812_v51  ;;  %v1041_v53 = vmul.f32 %v5730_v19, %v9053_v63  ;;  %9054 = vst [vmem:[#allocation107_spill] sm:$0xff] %v6138_v21  ;;  %v6141_v2 = vadd.f32 %v1035_v46, %v5808_v10  ;;  %v6144_v60 = vadd.f32 %v1036_v7, %v5820_v47  ;;  %v9057_v26 = vld [vmem:[#allocation155_spill] sm:$0xff]  ;;  %v9058_v46 = vld [vmem:[#allocation156_spill] sm:$0xff]  ;;  %v9068_v24 = vld [vmem:[#allocation58_spill] sm:$0xff] }
 0x41f   : > { %v1042_v38 = vmul.f32 %v5730_v19, %v9055_v58  ;;  %v1043_v59 = vmul.f32 %v5730_v19, %v9056_v33  ;;  %v6152_v51 = vadd.f32 %v1037_v34, %v5816_v30  ;;  %v6155_v1 = vadd.f32 %v1038_v13, %v5828_v43  ;;  %v9059_v58 = vld [vmem:[#allocation157_spill] sm:$0xff]  ;;  %v9060_v34 = vld [vmem:[#allocation158_spill] sm:$0xff]  ;;  %3317 = vperm.xlu1 %4096, %v9068_v24  }
 0x420   : > { %v1044_v10 = vmul.f32 %v5730_v19, %v9057_v26  ;;  %v1045_v47 = vmul.f32 %v5730_v19, %v9058_v46  ;;  %3497 = vperm.xlu0 %4098, %v4185_v16   ;;  %v6163_v7 = vadd.f32 %v1039_v42, %v5824_v22  ;;  %v6166_v63 = vadd.f32 %v1040_v3, %v5838_v6  ;;  %v6172_v13 = vpop.permute.xlu1 %2933  ;;  %v9062_v26 = vld [vmem:[#allocation159_spill] sm:$0xff]  ;;  %v9063_v46 = vld [vmem:[#allocation160_spill] sm:$0xff]  ;;  %v9064_v42 = vld [vmem:[#allocation161_spill] sm:$0xff] }
 0x421   : > { %v1046_v30 = vmul.f32 %v5730_v19, %v9059_v58  ;;  %v1047_v43 = vmul.f32 %v5730_v19, %v9060_v34  ;;  %9061 = vst [vmem:[#allocation108_spill] sm:$0xff] %v6172_v13  ;;  %v6175_v33 = vadd.f32 %v1041_v53, %v5834_v39  ;;  %v1048_v16 = vmul.f32 %v5730_v19, %v9062_v26  ;;  %v6183_v3 = vpop.permute.xlu0 %3113  ;;  %v9066_v13 = vld [vmem:[#allocation162_spill] sm:$0xff]  ;;  %v9067_v53 = vld [vmem:[#allocation163_spill] sm:$0xff] }
 0x422   : > { %v1049_v22 = vmul.f32 %v5730_v19, %v9063_v46  ;;  %v1050_v6 = vmul.f32 %v5730_v19, %v9064_v42  ;;  %9065 = vst [vmem:[#allocation109_spill] sm:$0xff] %v6183_v3  ;;  %v6186_v58 = vadd.f32 %v1042_v38, %v5846_v35  ;;  %v6189_v34 = vadd.f32 %v1043_v59, %v5842_v55  ;;  %v9069_v3 = vld [vmem:[#allocation164_spill] sm:$0xff]  ;;  %v9070_v38 = vld [vmem:[#allocation165_spill] sm:$0xff] }
 0x423   : > { %v1051_v39 = vmul.f32 %v5730_v19, %v9066_v13  ;;  %v1052_v26 = vmul.f32 %v5730_v19, %v9067_v53  ;;  %v6197_v46 = vadd.f32 %v1044_v10, %v5854_v14  ;;  %v6200_v42 = vadd.f32 %v1045_v47, %v5850_v45  ;;  %v9071_v53 = vld [vmem:[#allocation166_spill] sm:$0xff]  ;;  %v9072_v10 = vld [vmem:[#allocation167_spill] sm:$0xff] }
 0x424   : > { %v1053_v35 = vmul.f32 %v5730_v19, %v9069_v3  ;;  %v1054_v55 = vmul.f32 %v5730_v19, %v9070_v38  ;;  %3505 = vperm.xlu0 %4098, %v4193_v20   ;;  %v6208_v59 = vadd.f32 %v1046_v30, %v5862_v31  ;;  %v6211_v13 = vadd.f32 %v1047_v43, %v5858_v0  ;;  %v6217_v47 = vpop.permute.xlu1 %2941  ;;  %v9074_v31 = vld [vmem:[#allocation168_spill] sm:$0xff] }
 0x425   : > { %v1055_v14 = vmul.f32 %v5730_v19, %v9071_v53  ;;  %v1056_v45 = vmul.f32 %v5730_v19, %v9072_v10  ;;  %9073 = vst [vmem:[#allocation110_spill] sm:$0xff] %v6217_v47  ;;  %v6220_v3 = vadd.f32 %v1048_v16, %v5874_v50  ;;  %v6223_v38 = vadd.f32 %v1049_v22, %v5870_v27  ;;  %v6230_v30 = vpop.permute.xlu0 %3121  ;;  %v9076_v53 = vld [vmem:[#allocation70_spill] sm:$0xff]  ;;  %v9077_v47 = vld [vmem:[#allocation169_spill] sm:$0xff]  ;;  %v9079_v22 = vld [vmem:[#allocation60_spill] sm:$0xff] }
 0x426   : > { %v6226_v20 = vadd.f32 %v1050_v6, %v5882_v23  ;;  %v1057_v0 = vmul.f32 %v5730_v19, %v9074_v31  ;;  %9075 = vst [vmem:[#allocation111_spill] sm:$0xff] %v6230_v30  ;;  %v6233_v43 = vadd.f32 %v1051_v39, %v5878_v56  ;;  %v6236_v10 = vadd.f32 %v1052_v26, %v9076_v53  ;;  %v9078_v16 = vld [vmem:[#allocation170_spill] sm:$0xff]  ;;  %v9080_v23 = vld [vmem:[#allocation69_spill] sm:$0xff]  ;;  %v9082_v31 = vld [vmem:[#allocation72_spill] sm:$0xff] }
 0x427   : > { %v1058_v50 = vmul.f32 %v5730_v19, %v9077_v47  ;;  %v1059_v27 = vmul.f32 %v5730_v19, %v9078_v16  ;;  %3325 = vperm.xlu1 %4096, %v9079_v22   ;;  %v6244_v6 = vadd.f32 %v1053_v35, %v9080_v23  ;;  %v6247_v21 = vadd.f32 %v1054_v55, %v9082_v31  ;;  %v9083_v30 = vld [vmem:[#allocation171_spill] sm:$0xff]  ;;  %v9084_v39 = vld [vmem:[#allocation172_spill] sm:$0xff]  ;;  %v9085_v53 = vld [vmem:[#allocation10_spill] sm:$0xff] }
 0x428   : > { %v1060_v56 = vmul.f32 %v5730_v19, %v9083_v30  ;;  %v1061_v26 = vmul.f32 %v5730_v19, %v9084_v39  ;;  %3513 = vperm.xlu0 %4098, %v9085_v53   ;;  %v9086_v47 = vld [vmem:[#allocation71_spill] sm:$0xff]  ;;  %v9088_v16 = vld [vmem:[#allocation74_spill] sm:$0xff]  ;;  %v9090_v22 = vld [vmem:[#allocation173_spill] sm:$0xff]  ;;  %v6264_v31 = vpop.permute.xlu1 %2949 }
 0x429   : > { %9081 = vst [vmem:[#allocation112_spill] sm:$0xff] %v6244_v6  ;;  %v6255_v32 = vadd.f32 %v1055_v14, %v9086_v47  ;;  %v6258_v24 = vadd.f32 %v1056_v45, %v9088_v16  ;;  %v1062_v35 = vmul.f32 %v5730_v19, %v9090_v22  ;;  %v9091_v23 = vld [vmem:[#allocation174_spill] sm:$0xff]  ;;  %9092 = vst [vmem:[#allocation115_spill] sm:$0xff] %v6264_v31  ;;  %v9093_v30 = vld [vmem:[#allocation73_spill] sm:$0xff]  ;;  %v6275_v16 = vpop.permute.xlu0 %3129 }
 0x42a   : > { %v1063_v55 = vmul.f32 %v5730_v19, %v9091_v23  ;;  %v6267_v49 = vadd.f32 %v1057_v0, %v9093_v30  ;;  %v9095_v39 = vld [vmem:[#allocation175_spill] sm:$0xff]  ;;  %v1065_v14 = vmul.f32 %v5730_v19, %v9096_v9  ;;  %v9097_v47 = vld [vmem:[#allocation177_spill] sm:$0xff]  ;;  %9098 = vst [vmem:[#allocation117_spill] sm:$0xff] %v6275_v16  ;;  %v9099_v22 = vld [vmem:[#allocation76_spill] sm:$0xff] }
 0x42b   : > { %9087 = vst [vmem:[#allocation113_spill] sm:$0xff] %v6255_v32  ;;  %9089 = vst [vmem:[#allocation114_spill] sm:$0xff] %v6258_v24  ;;  %v1064_v53 = vmul.f32 %v5730_v19, %v9095_v39  ;;  %v1066_v45 = vmul.f32 %v5730_v19, %v9097_v47  ;;  %v6278_v61 = vadd.f32 %v1058_v50, %v9099_v22  ;;  %v9101_v23 = vld [vmem:[#allocation75_spill] sm:$0xff]  ;;  %v9103_v31 = vld [vmem:[#allocation178_spill] sm:$0xff] }
 0x42c   : > { %9094 = vst [vmem:[#allocation116_spill] sm:$0xff] %v6267_v49  ;;  %v6281_v32 = vadd.f32 %v1059_v27, %v9101_v23  ;;  %v1067_v0 = vmul.f32 %v5730_v19, %v9103_v31  ;;  %v9104_v30 = vld [vmem:[#allocation179_spill] sm:$0xff]  ;;  %v9105_v49 = vld [vmem:[#allocation62_spill] sm:$0xff]  ;;  %v9108_v47 = vld [vmem:[#allocation77_spill] sm:$0xff] }
 0x42d   : > { %9100 = vst [vmem:[#allocation118_spill] sm:$0xff] %v6278_v61  ;;  %v1068_v39 = vmul.f32 %v5730_v19, %v9104_v30  ;;  %3333 = vperm.xlu1 %4096, %v9105_v49   ;;  %v9106_v9 = vld [vmem:[#allocation78_spill] sm:$0xff]  ;;  %v6292_v6 = vadd.f32 %v1061_v26, %v9108_v47  ;;  %v9110_v16 = vld [vmem:[#allocation180_spill] sm:$0xff]  ;;  %v9111_v22 = vld [vmem:[#allocation181_spill] sm:$0xff] }
 0x42e   : > { %9102 = vst [vmem:[#allocation119_spill] sm:$0xff] %v6281_v32  ;;  %v6289_v24 = vadd.f32 %v1060_v56, %v9106_v9  ;;  %v1069_v50 = vmul.f32 %v5730_v19, %v9110_v16  ;;  %v1070_v27 = vmul.f32 %v5730_v19, %v9111_v22  ;;  %v9112_v23 = vld [vmem:[#allocation12_spill] sm:$0xff]  ;;  %v9113_v31 = vld [vmem:[#allocation82_spill] sm:$0xff]  ;;  %v9115_v30 = vld [vmem:[#allocation79_spill] sm:$0xff] }
 0x42f   : > { %9109 = vst [vmem:[#allocation121_spill] sm:$0xff] %v6292_v6  ;;  %3521 = vperm.xlu0 %4098, %v9112_v23   ;;  %v6300_v32 = vadd.f32 %v1062_v35, %v9113_v31  ;;  %v6303_v61 = vadd.f32 %v1063_v55, %v9115_v30  ;;  %v9117_v49 = vld [vmem:[#allocation182_spill] sm:$0xff]  ;;  %v9118_v9 = vld [vmem:[#allocation183_spill] sm:$0xff]  ;;  %v9119_v47 = vld [vmem:[#allocation84_spill] sm:$0xff]  ;;  %v6320_v55 = vpop.permute.xlu1 %3089  ;;  %v6322_v30 = vpop.permute.xlu0 %3137 }
 0x430   : > { %9107 = vst [vmem:[#allocation120_spill] sm:$0xff] %v6289_v24  ;;  %v1071_v56 = vmul.f32 %v5730_v19, %v9117_v49  ;;  %v1072_v26 = vmul.f32 %v5730_v19, %v9118_v9  ;;  %v6310_v6 = vadd.f32 %v1064_v53, %v9119_v47  ;;  %v9120_v16 = vld [vmem:[#allocation83_spill] sm:$0xff]  ;;  %v9122_v22 = vld [vmem:[#allocation86_spill] sm:$0xff]  ;;  %v9123_v35 = vld [vmem:[#allocation184_spill] sm:$0xff] }
 0x431   : > { %9114 = vst [vmem:[#allocation122_spill] sm:$0xff] %v6300_v32  ;;  %9116 = vst [vmem:[#allocation127_spill] sm:$0xff] %v6303_v61  ;;  %v6313_v24 = vadd.f32 %v1065_v14, %v9120_v16  ;;  %v6316_v23 = vadd.f32 %v1066_v45, %v9122_v22  ;;  %v1073_v31 = vmul.f32 %v5730_v19, %v9123_v35  ;;  %v9126_v49 = vld [vmem:[#allocation85_spill] sm:$0xff]  ;;  %v9128_v9 = vld [vmem:[#allocation88_spill] sm:$0xff]  ;;  %v9132_v16 = vmov 8  }
 0x432   : > { %9124 = vst [vmem:[#allocation128_spill] sm:$0xff] %v6320_v55  ;;  %9125 = vst [vmem:[#allocation129_spill] sm:$0xff] %v6322_v30  ;;  %v6325_v61 = vadd.f32 %v1067_v0, %v9126_v49  ;;  %v6328_v32 = vadd.f32 %v1068_v39, %v9128_v9  ;;  %v9130_v53 = vld [vmem:[#allocation185_spill] sm:$0xff]  ;;  %v9131_v47 = vld [vmem:[#allocation186_spill] sm:$0xff]  ;;  %4097 = vset.pattern.permute.xlu1 %v9132_v16 }
 0x433   : > { %9121 = vst [vmem:[#allocation123_spill] sm:$0xff] %v6313_v24  ;;  %v1074_v14 = vmul.f32 %v5730_v19, %v9130_v53  ;;  %v1075_v45 = vmul.f32 %v5730_v19, %v9131_v47  ;;  %v9133_v22 = vld [vmem:[#allocation87_spill] sm:$0xff]  ;;  %v9135_v55 = vld [vmem:[#allocation90_spill] sm:$0xff]  ;;  %v9138_v49 = vld [vmem:[#allocation488_spill] sm:$0xff] }
 0x434   : > { %9127 = vst [vmem:[#allocation130_spill] sm:$0xff] %v6325_v61  ;;  %9129 = vst [vmem:[#allocation124_spill] sm:$0xff] %v6328_v32  ;;  %v6336_v35 = vadd.f32 %v1069_v50, %v9133_v22  ;;  %v6339_v24 = vadd.f32 %v1070_v27, %v9135_v55  ;;  %v9137_v30 = vld [vmem:[#allocation187_spill] sm:$0xff]  ;;  %v1790_v39 = vsub.s32 3, %v9138_v49  ;;  %v9140_v61 = vld [vmem:[#allocation14_spill] sm:$0xff] }
 0x435   : > { %v1076_v0 = vmul.f32 %v5730_v19, %v9137_v30  ;;  %v9139_v9 = vld [vmem:[#allocation3_spill] sm:$0xff]  ;;  %3529 = vperm.xlu0 %4098, %v9140_v61   ;;  %v9141_v53 = vld [vmem:[#allocation89_spill] sm:$0xff]  ;;  %v9143_v47 = vld [vmem:[#allocation92_spill] sm:$0xff] }
 0x436   : > { %9134 = vst [vmem:[#allocation125_spill] sm:$0xff] %v6336_v35  ;;  %9136 = vst [vmem:[#allocation131_spill] sm:$0xff] %v6339_v24  ;;  %3473 = vperm.xlu1 %4097, %v9139_v9   ;;  %v6347_v32 = vadd.f32 %v1071_v56, %v9141_v53  ;;  %v6350_v16 = vadd.f32 %v1072_v26, %v9143_v47  ;;  %v9145_v50 = vld [vmem:[#allocation189_spill] sm:$0xff]  ;;  %v9146_v27 = vld [vmem:[#allocation191_spill] sm:$0xff]  ;;  %v6365_v26 = vpop.permute.xlu1 %3093  ;;  %v6367_v47 = vpop.permute.xlu0 %3145 }
 0x437   : > { %v1078_v22 = vmul.f32 %v5730_v19, %v9145_v50  ;;  %v1404_v55 = vmul.f32 %v6033_v11, %v9146_v27  ;;  %v9147_v35 = vld [vmem:[#allocation91_spill] sm:$0xff]  ;;  %v9149_v49 = vld [vmem:[#allocation192_spill] sm:$0xff]  ;;  %v9150_v24 = vld [vmem:[#allocation193_spill] sm:$0xff]  ;;  %9152 = vst [vmem:[#allocation134_spill] sm:$0xff] %v6365_v26 }
 0x438   : > { %9142 = vst [vmem:[#allocation126_spill] sm:$0xff] %v6347_v32  ;;  %9144 = vst [vmem:[#allocation132_spill] sm:$0xff] %v6350_v16  ;;  %v6357_v30 = vadd.f32 %v1073_v31, %v9147_v35  ;;  %v1405_v9 = vmul.f32 %v6033_v11, %v9149_v49  ;;  %v1406_v61 = vmul.f32 %v6033_v11, %v9150_v24  ;;  %v9151_v56 = vld [vmem:[#allocation194_spill] sm:$0xff]  ;;  %v9155_v27 = vld [vmem:[#allocation93_spill] sm:$0xff] }
 0x439   : > { %v1408_v53 = vmul.f32 %v6033_v11, %v9151_v56  ;;  %9153 = vst [vmem:[#allocation135_spill] sm:$0xff] %v6367_v47  ;;  %v9154_v50 = vld [vmem:[#allocation94_spill] sm:$0xff]  ;;  %v6373_v32 = vadd.f32 %v1075_v45, %v9155_v27  ;;  %v9157_v31 = vld [vmem:[#allocation195_spill] sm:$0xff]  ;;  %v9158_v49 = vld [vmem:[#allocation196_spill] sm:$0xff]  ;;  %v6385_v47 = vrot.slane %v5707_v41, %v1790_v39  ;;  %v6390_v45 = vadd.f32 %v1078_v22, %v6019_v57 }
 0x43a   : > { %9148 = vst [vmem:[#allocation133_spill] sm:$0xff] %v6357_v30  ;;  %v6370_v19 = vadd.f32 %v1074_v14, %v9154_v50  ;;  %v1407_v35 = vmul.f32 %v6033_v11, %v9157_v31  ;;  %v1410_v30 = vmul.f32 %v6033_v11, %v9158_v49  ;;  %v9159_v24 = vld [vmem:[#allocation98_spill] sm:$0xff]  ;;  %v9160_v56 = vld [vmem:[#allocation197_spill] sm:$0xff]  ;;  %v9163_v50 = vld [vmem:[#allocation16_spill] sm:$0xff]  ;;  %v6393_v27 = vadd.f32 %v1404_v55, %v6038_v15  ;;  %v6410_v15 = vpop.permute.xlu1 %3101  ;;  %v6412_v55 = vpop.permute.xlu0 %3153 }
 0x43b   : > { %9156 = vst [vmem:[#allocation136_spill] sm:$0xff] %v6373_v32  ;;  %v6380_v16 = vadd.f32 %v1076_v0, %v9159_v24  ;;  %v1409_v26 = vmul.f32 %v6033_v11, %v9160_v56  ;;  %9161 = vst [vmem:[#allocation137_spill] sm:$0xff] %v6385_v47  ;;  %v9162_v14 = vld [vmem:[#allocation2_spill] sm:$0xff]  ;;  %3537 = vperm.xlu0 %4098, %v9163_v50   ;;  %v9165_v49 = vld [vmem:[#allocation199_spill] sm:$0xff]  ;;  %v6403_v39 = vadd.f32 %v1406_v61, %v6041_v44 }
 0x43c   : > { %3481 = vperm.xlu1 %4097, %v9162_v14   ;;  %v9164_v31 = vld [vmem:[#allocation198_spill] sm:$0xff]  ;;  %v1411_v24 = vmul.f32 %v6033_v11, %v9165_v49  ;;  %v9166_v56 = vld [vmem:[#allocation100_spill] sm:$0xff]  ;;  %v6406_v14 = vadd.f32 %v1408_v53, %v6051_v48  ;;  %9168 = vst [vmem:[#allocation138_spill] sm:$0xff] %v6410_v15  ;;  %9169 = vst [vmem:[#allocation139_spill] sm:$0xff] %v6412_v55  ;;  %v6415_v50 = vadd.f32 %v1407_v35, %v6044_v29 }
 0x43d   : > { %v1412_v0 = vmul.f32 %v6033_v11, %v9164_v31  ;;  %v6400_v32 = vadd.f32 %v1405_v9, %v9166_v56  ;;  %v9167_v57 = vld [vmem:[#allocation200_spill] sm:$0xff]  ;;  %v6418_v31 = vadd.f32 %v1410_v30, %v6063_v40  ;;  %v9170_v9 = vld [vmem:[#allocation201_spill] sm:$0xff]  ;;  %v9171_v61 = vld [vmem:[#allocation202_spill] sm:$0xff]  ;;  %v6425_v53 = vadd.f32 %v1409_v26, %v6060_v37 }
 0x43e   : > { %v1414_v22 = vmul.f32 %v6033_v11, %v9167_v57  ;;  %v1413_v44 = vmul.f32 %v6033_v11, %v9170_v9  ;;  %v1416_v48 = vmul.f32 %v6033_v11, %v9171_v61  ;;  %v9172_v49 = vld [vmem:[#allocation203_spill] sm:$0xff]  ;;  %v9173_v57 = vld [vmem:[#allocation204_spill] sm:$0xff]  ;;  %v9175_v35 = vld [vmem:[#allocation18_spill] sm:$0xff]  ;;  %v6437_v30 = vadd.f32 %v1411_v24, %v6071_v5  ;;  %v6452_v5 = vpop.permute.xlu1 %3109  ;;  %v6454_v24 = vpop.permute.xlu0 %3161 }
 0x43f   : > { %v1415_v56 = vmul.f32 %v6033_v11, %v9172_v49  ;;  %v1418_v55 = vmul.f32 %v6033_v11, %v9173_v57  ;;  %v9174_v29 = vld [vmem:[#allocation4_spill] sm:$0xff]  ;;  %3545 = vperm.xlu0 %4098, %v9175_v35   ;;  %v6434_v40 = vadd.f32 %v1412_v0, %v6074_v36  ;;  %v9176_v9 = vld [vmem:[#allocation205_spill] sm:$0xff]  ;;  %v9177_v26 = vld [vmem:[#allocation206_spill] sm:$0xff]  ;;  %9182 = vst [vmem:[#allocation141_spill] sm:$0xff] %v6452_v5 }
 0x440   : > { %3485 = vperm.xlu1 %4097, %v9174_v29   ;;  %v1417_v37 = vmul.f32 %v6033_v11, %v9176_v9  ;;  %v1420_v61 = vmul.f32 %v6033_v11, %v9177_v26  ;;  %v6444_v49 = vadd.f32 %v1414_v22, %v6094_v28  ;;  %v9179_v57 = vld [vmem:[#allocation207_spill] sm:$0xff]  ;;  %v9180_v15 = vld [vmem:[#allocation208_spill] sm:$0xff]  ;;  %v9181_v36 = vld [vmem:[#allocation209_spill] sm:$0xff]  ;;  %9183 = vst [vmem:[#allocation142_spill] sm:$0xff] %v6454_v24 }
 0x441   : > { %v1419_v29 = vmul.f32 %v6033_v11, %v9179_v57  ;;  %v1422_v35 = vmul.f32 %v6033_v11, %v9180_v15  ;;  %v1421_v0 = vmul.f32 %v6033_v11, %v9181_v36  ;;  %v6457_v9 = vadd.f32 %v1413_v44, %v6083_v18  ;;  %v9184_v28 = vld [vmem:[#allocation210_spill] sm:$0xff]  ;;  %v9185_v57 = vld [vmem:[#allocation211_spill] sm:$0xff]  ;;  %v9186_v5 = vld [vmem:[#allocation212_spill] sm:$0xff] }
 0x442   : > { %9178 = vst [vmem:[#allocation140_spill] sm:$0xff] %v6444_v49  ;;  %v6460_v26 = vadd.f32 %v1416_v48, %v6105_v8  ;;  %v1424_v22 = vmul.f32 %v6033_v11, %v9184_v28  ;;  %v1423_v49 = vmul.f32 %v6033_v11, %v9185_v57  ;;  %v6467_v15 = vadd.f32 %v1415_v56, %v6097_v4  ;;  %v9187_v18 = vld [vmem:[#allocation6_spill] sm:$0xff]  ;;  %v9188_v44 = vld [vmem:[#allocation20_spill] sm:$0xff]  ;;  %v9189_v28 = vld [vmem:[#allocation213_spill] sm:$0xff] }
 0x443   : > { %v6470_v36 = vadd.f32 %v1418_v55, %v6116_v25  ;;  %v1426_v24 = vmul.f32 %v6033_v11, %v9186_v5  ;;  %3553 = vperm.xlu0 %4098, %v9188_v44   ;;  %v6477_v8 = vadd.f32 %v1417_v37, %v6108_v52  ;;  %v6480_v48 = vadd.f32 %v1420_v61, %v6128_v54  ;;  %v9190_v56 = vld [vmem:[#allocation214_spill] sm:$0xff]  ;;  %v9191_v52 = vld [vmem:[#allocation215_spill] sm:$0xff]  ;;  %v6497_v54 = vpop.permute.xlu1 %3117  ;;  %v6499_v61 = vpop.permute.xlu0 %3169 }
 0x444   : > { %3493 = vperm.xlu1 %4097, %v9187_v18   ;;  %v1425_v4 = vmul.f32 %v6033_v11, %v9189_v28  ;;  %v1428_v25 = vmul.f32 %v6033_v11, %v9190_v56  ;;  %v6487_v55 = vadd.f32 %v1419_v29, %v6119_v62  ;;  %v6490_v5 = vadd.f32 %v1422_v35, %v6134_v12  ;;  %v9194_v62 = vld [vmem:[#allocation216_spill] sm:$0xff]  ;;  %v9195_v29 = vld [vmem:[#allocation217_spill] sm:$0xff]  ;;  %v9197_v56 = vld [vmem:[#allocation219_spill] sm:$0xff] }
 0x445   : > { %v6493_v57 = vadd.f32 %v1421_v0, %v6131_v17  ;;  %v1427_v37 = vmul.f32 %v6033_v11, %v9191_v52  ;;  %9192 = vst [vmem:[#allocation143_spill] sm:$0xff] %v6497_v54  ;;  %9193 = vst [vmem:[#allocation144_spill] sm:$0xff] %v6499_v61  ;;  %v6502_v18 = vadd.f32 %v1424_v22, %v6144_v60  ;;  %v9196_v0 = vld [vmem:[#allocation218_spill] sm:$0xff]  ;;  %v9198_v60 = vld [vmem:[#allocation7_spill] sm:$0xff] }
 0x446   : > { %v6505_v44 = vadd.f32 %v1423_v49, %v6141_v2  ;;  %v1430_v12 = vmul.f32 %v6033_v11, %v9194_v62  ;;  %v1429_v17 = vmul.f32 %v6033_v11, %v9195_v29  ;;  %v6512_v35 = vadd.f32 %v1426_v24, %v6155_v1  ;;  %v9199_v22 = vld [vmem:[#allocation22_spill] sm:$0xff]  ;;  %v9200_v62 = vld [vmem:[#allocation220_spill] sm:$0xff]  ;;  %v9201_v24 = vld [vmem:[#allocation221_spill] sm:$0xff] }
 0x447   : > { %v1432_v28 = vmul.f32 %v6033_v11, %v9196_v0  ;;  %v1431_v52 = vmul.f32 %v6033_v11, %v9197_v56  ;;  %3561 = vperm.xlu0 %4098, %v9199_v22   ;;  %v6521_v2 = vadd.f32 %v1425_v4, %v6152_v51  ;;  %v6524_v49 = vadd.f32 %v1428_v25, %v6166_v63  ;;  %v9202_v56 = vld [vmem:[#allocation222_spill] sm:$0xff]  ;;  %v9203_v61 = vld [vmem:[#allocation223_spill] sm:$0xff]  ;;  %v9204_v51 = vld [vmem:[#allocation224_spill] sm:$0xff]  ;;  %v6539_v63 = vpop.permute.xlu1 %3125  ;;  %v6541_v25 = vpop.permute.xlu0 %3177 }
 0x448   : > { %3501 = vperm.xlu1 %4097, %v9198_v60   ;;  %v1434_v1 = vmul.f32 %v6033_v11, %v9200_v62  ;;  %v1433_v29 = vmul.f32 %v6033_v11, %v9201_v24  ;;  %v6531_v0 = vadd.f32 %v1427_v37, %v6163_v7  ;;  %v1436_v60 = vmul.f32 %v6033_v11, %v9202_v56  ;;  %v9207_v7 = vld [vmem:[#allocation225_spill] sm:$0xff]  ;;  %v9208_v56 = vld [vmem:[#allocation226_spill] sm:$0xff] }
 0x449   : > { %v1435_v22 = vmul.f32 %v6033_v11, %v9203_v61  ;;  %v1438_v4 = vmul.f32 %v6033_v11, %v9204_v51  ;;  %9205 = vst [vmem:[#allocation145_spill] sm:$0xff] %v6539_v63  ;;  %9206 = vst [vmem:[#allocation146_spill] sm:$0xff] %v6541_v25  ;;  %v6544_v62 = vadd.f32 %v1430_v12, %v6186_v58  ;;  %v9209_v63 = vld [vmem:[#allocation227_spill] sm:$0xff]  ;;  %v9210_v58 = vld [vmem:[#allocation8_spill] sm:$0xff] }
 0x44a   : > { %v6547_v24 = vadd.f32 %v1429_v17, %v6175_v33  ;;  %v1437_v37 = vmul.f32 %v6033_v11, %v9207_v7  ;;  %v1440_v54 = vmul.f32 %v6033_v11, %v9208_v56  ;;  %v6554_v61 = vadd.f32 %v1432_v28, %v6197_v46  ;;  %v9211_v12 = vld [vmem:[#allocation24_spill] sm:$0xff]  ;;  %v9213_v28 = vld [vmem:[#allocation229_spill] sm:$0xff] }
 0x44b   : > { %v6557_v51 = vadd.f32 %v1431_v52, %v6189_v34  ;;  %v1439_v25 = vmul.f32 %v6033_v11, %v9209_v63  ;;  %3569 = vperm.xlu0 %4098, %v9211_v12   ;;  %v6564_v33 = vadd.f32 %v1434_v1, %v6208_v59  ;;  %v6567_v17 = vadd.f32 %v1433_v29, %v6200_v42  ;;  %v9212_v7 = vld [vmem:[#allocation228_spill] sm:$0xff]  ;;  %v9216_v59 = vld [vmem:[#allocation230_spill] sm:$0xff]  ;;  %v6584_v42 = vpop.permute.xlu1 %3133  ;;  %v6586_v29 = vpop.permute.xlu0 %3185 }
 0x44c   : > { %3509 = vperm.xlu1 %4097, %v9210_v58   ;;  %v1442_v46 = vmul.f32 %v6033_v11, %v9212_v7  ;;  %v1441_v34 = vmul.f32 %v6033_v11, %v9213_v28  ;;  %v6574_v52 = vadd.f32 %v1436_v60, %v6220_v3  ;;  %v6577_v63 = vadd.f32 %v1435_v22, %v6211_v13  ;;  %v9220_v3 = vld [vmem:[#allocation231_spill] sm:$0xff]  ;;  %v9221_v60 = vld [vmem:[#allocation232_spill] sm:$0xff]  ;;  %v9223_v28 = vld [vmem:[#allocation234_spill] sm:$0xff] }
 0x44d   : > { %v6580_v56 = vadd.f32 %v1438_v4, %v6226_v20  ;;  %v1444_v1 = vmul.f32 %v6033_v11, %v9216_v59  ;;  %9217 = vst [vmem:[#allocation149_spill] sm:$0xff] %v6584_v42  ;;  %9218 = vst [vmem:[#allocation150_spill] sm:$0xff] %v6586_v29  ;;  %v6589_v58 = vadd.f32 %v1437_v37, %v6223_v38  ;;  %v9222_v4 = vld [vmem:[#allocation233_spill] sm:$0xff]  ;;  %v9225_v37 = vld [vmem:[#allocation26_spill] sm:$0xff] }
 0x44e   : > { %9214 = vst [vmem:[#allocation147_spill] sm:$0xff] %v6574_v52  ;;  %v6592_v12 = vadd.f32 %v1440_v54, %v6236_v10  ;;  %v1443_v13 = vmul.f32 %v6033_v11, %v9220_v3  ;;  %v1446_v20 = vmul.f32 %v6033_v11, %v9221_v60  ;;  %v6599_v22 = vadd.f32 %v1439_v25, %v6233_v43  ;;  %v9224_v38 = vld [vmem:[#allocation9_spill] sm:$0xff]  ;;  %v9227_v54 = vld [vmem:[#allocation112_spill] sm:$0xff]  ;;  %v9229_v60 = vld [vmem:[#allocation235_spill] sm:$0xff] }
 0x44f   : > { %9215 = vst [vmem:[#allocation148_spill] sm:$0xff] %v6580_v56  ;;  %v1445_v7 = vmul.f32 %v6033_v11, %v9222_v4  ;;  %v1448_v59 = vmul.f32 %v6033_v11, %v9223_v28  ;;  %3577 = vperm.xlu0 %4098, %v9225_v37   ;;  %v6608_v10 = vadd.f32 %v1442_v46, %v6247_v21  ;;  %v9230_v25 = vld [vmem:[#allocation236_spill] sm:$0xff]  ;;  %v9231_v4 = vld [vmem:[#allocation114_spill] sm:$0xff]  ;;  %v9233_v28 = vld [vmem:[#allocation237_spill] sm:$0xff] }
 0x450   : > { %9219 = vst [vmem:[#allocation151_spill] sm:$0xff] %v6592_v12  ;;  %3517 = vperm.xlu1 %4097, %v9224_v38   ;;  %v6611_v3 = vadd.f32 %v1441_v34, %v9227_v54  ;;  %v1447_v43 = vmul.f32 %v6033_v11, %v9229_v60  ;;  %v1450_v29 = vmul.f32 %v6033_v11, %v9230_v25  ;;  %v9234_v12 = vld [vmem:[#allocation238_spill] sm:$0xff]  ;;  %v9235_v21 = vld [vmem:[#allocation239_spill] sm:$0xff]  ;;  %v6626_v34 = vpop.permute.xlu1 %3141  ;;  %v6628_v54 = vpop.permute.xlu0 %3193  ;;  %v9238_v60 = vld [vmem:[#allocation113_spill] sm:$0xff] }
 0x451   : > { %9226 = vst [vmem:[#allocation152_spill] sm:$0xff] %v6608_v10  ;;  %v6618_v42 = vadd.f32 %v1444_v1, %v9231_v4  ;;  %v1449_v38 = vmul.f32 %v6033_v11, %v9233_v28  ;;  %v1452_v37 = vmul.f32 %v6033_v11, %v9234_v12  ;;  %v1451_v46 = vmul.f32 %v6033_v11, %v9235_v21  ;;  %v9239_v25 = vld [vmem:[#allocation118_spill] sm:$0xff]  ;;  %v9241_v1 = vld [vmem:[#allocation240_spill] sm:$0xff]  ;;  %v9242_v28 = vld [vmem:[#allocation241_spill] sm:$0xff] }
 0x452   : > { %9228 = vst [vmem:[#allocation153_spill] sm:$0xff] %v6611_v3  ;;  %9236 = vst [vmem:[#allocation155_spill] sm:$0xff] %v6626_v34  ;;  %v6631_v10 = vadd.f32 %v1443_v13, %v9238_v60  ;;  %v6634_v56 = vadd.f32 %v1446_v20, %v9239_v25  ;;  %v1454_v4 = vmul.f32 %v6033_v11, %v9241_v1  ;;  %v9243_v12 = vld [vmem:[#allocation116_spill] sm:$0xff]  ;;  %v9246_v34 = vld [vmem:[#allocation242_spill] sm:$0xff] }
 0x453   : > { %9232 = vst [vmem:[#allocation154_spill] sm:$0xff] %v6618_v42  ;;  %9237 = vst [vmem:[#allocation156_spill] sm:$0xff] %v6628_v54  ;;  %v1453_v42 = vmul.f32 %v6033_v11, %v9242_v28  ;;  %v6641_v3 = vadd.f32 %v1445_v7, %v9243_v12  ;;  %v9244_v21 = vld [vmem:[#allocation120_spill] sm:$0xff]  ;;  %v1456_v54 = vmul.f32 %v6033_v11, %v9246_v34  ;;  %v9247_v13 = vld [vmem:[#allocation11_spill] sm:$0xff] }
 0x454   : > { %9240 = vst [vmem:[#allocation157_spill] sm:$0xff] %v6634_v56  ;;  %v6644_v52 = vadd.f32 %v1448_v59, %v9244_v21  ;;  %3525 = vperm.xlu1 %4097, %v9247_v13   ;;  %v9248_v60 = vld [vmem:[#allocation28_spill] sm:$0xff]  ;;  %v9249_v20 = vld [vmem:[#allocation119_spill] sm:$0xff]  ;;  %v9250_v1 = vld [vmem:[#allocation122_spill] sm:$0xff]  ;;  %v6664_v34 = vadd.f32 %v1452_v37, %v6310_v6 }
 0x455   : > { %3585 = vperm.xlu0 %4098, %v9248_v60   ;;  %v6651_v25 = vadd.f32 %v1447_v43, %v9249_v20  ;;  %v6654_v56 = vadd.f32 %v1450_v29, %v9250_v1  ;;  %v9252_v28 = vld [vmem:[#allocation243_spill] sm:$0xff]  ;;  %v9253_v12 = vld [vmem:[#allocation244_spill] sm:$0xff]  ;;  %v9254_v21 = vld [vmem:[#allocation121_spill] sm:$0xff]  ;;  %v6671_v29 = vpop.permute.xlu1 %3149  ;;  %v6673_v1 = vpop.permute.xlu0 %3201 }
 0x456   : > { %9245 = vst [vmem:[#allocation158_spill] sm:$0xff] %v6644_v52  ;;  %v1455_v7 = vmul.f32 %v6033_v11, %v9252_v28  ;;  %v1458_v59 = vmul.f32 %v6033_v11, %v9253_v12  ;;  %v6661_v52 = vadd.f32 %v1449_v38, %v9254_v21  ;;  %9255 = vst [vmem:[#allocation160_spill] sm:$0xff] %v6664_v34  ;;  %v9256_v13 = vld [vmem:[#allocation127_spill] sm:$0xff]  ;;  %v9258_v43 = vld [vmem:[#allocation245_spill] sm:$0xff] }
 0x457   : > { %9251 = vst [vmem:[#allocation159_spill] sm:$0xff] %v6654_v56  ;;  %v6667_v60 = vadd.f32 %v1451_v46, %v9256_v13  ;;  %v1457_v20 = vmul.f32 %v6033_v11, %v9258_v43  ;;  %9259 = vst [vmem:[#allocation162_spill] sm:$0xff] %v6671_v29  ;;  %v6676_v28 = vadd.f32 %v1454_v4, %v6316_v23  ;;  %v9262_v12 = vld [vmem:[#allocation123_spill] sm:$0xff]  ;;  %v9264_v38 = vld [vmem:[#allocation246_spill] sm:$0xff] }
 0x458   : > { %9260 = vst [vmem:[#allocation163_spill] sm:$0xff] %v6673_v1  ;;  %v6679_v56 = vadd.f32 %v1453_v42, %v9262_v12  ;;  %v1460_v6 = vmul.f32 %v6033_v11, %v9264_v38  ;;  %v9265_v37 = vld [vmem:[#allocation248_spill] sm:$0xff]  ;;  %v9268_v43 = vld [vmem:[#allocation250_spill] sm:$0xff]  ;;  %v9270_v23 = vld [vmem:[#allocation13_spill] sm:$0xff] }
 0x459   : > { %9257 = vst [vmem:[#allocation161_spill] sm:$0xff] %v6667_v60  ;;  %9261 = vst [vmem:[#allocation164_spill] sm:$0xff] %v6676_v28  ;;  %v1462_v46 = vmul.f32 %v6033_v11, %v9265_v37  ;;  %v9266_v21 = vld [vmem:[#allocation124_spill] sm:$0xff]  ;;  %v1464_v29 = vmul.f32 %v6033_v11, %v9268_v43  ;;  %3533 = vperm.xlu1 %4097, %v9270_v23   ;;  %v9271_v4 = vld [vmem:[#allocation30_spill] sm:$0xff] }
 0x45a   : > { %9263 = vst [vmem:[#allocation165_spill] sm:$0xff] %v6679_v56  ;;  %v6686_v13 = vadd.f32 %v1456_v54, %v9266_v21  ;;  %v9269_v34 = vld [vmem:[#allocation252_spill] sm:$0xff]  ;;  %3593 = vperm.xlu0 %4098, %v9271_v4   ;;  %v9272_v42 = vld [vmem:[#allocation130_spill] sm:$0xff]  ;;  %v9273_v38 = vld [vmem:[#allocation131_spill] sm:$0xff] }
 0x45b   : > { %v1466_v1 = vmul.f32 %v6033_v11, %v9269_v34  ;;  %v6695_v12 = vadd.f32 %v1455_v7, %v9272_v42  ;;  %v6698_v28 = vadd.f32 %v1458_v59, %v9273_v38  ;;  %v9275_v37 = vld [vmem:[#allocation254_spill] sm:$0xff]  ;;  %v9276_v21 = vld [vmem:[#allocation488_spill] sm:$0xff]  ;;  %v9277_v56 = vld [vmem:[#allocation125_spill] sm:$0xff]  ;;  %v6712_v42 = vpop.permute.xlu1 %3157  ;;  %v6714_v59 = vpop.permute.xlu0 %3209 }
 0x45c   : > { %9267 = vst [vmem:[#allocation166_spill] sm:$0xff] %v6686_v13  ;;  %v1792_v54 = vmul.f32 %v6385_v47, %v9275_v37  ;;  %v2178_v13 = vsub.s32 4, %v9276_v21  ;;  %v6704_v43 = vadd.f32 %v1457_v20, %v9277_v56  ;;  %v9279_v60 = vld [vmem:[#allocation256_spill] sm:$0xff]  ;;  %v9280_v23 = vld [vmem:[#allocation257_spill] sm:$0xff]  ;;  %v9281_v11 = vld [vmem:[#allocation258_spill] sm:$0xff] }
 0x45d   : > { %9274 = vst [vmem:[#allocation167_spill] sm:$0xff] %v6698_v28  ;;  %v1795_v34 = vmul.f32 %v6385_v47, %v9279_v60  ;;  %v1793_v4 = vmul.f32 %v6385_v47, %v9280_v23  ;;  %v1797_v7 = vmul.f32 %v6385_v47, %v9281_v11  ;;  %9282 = vst [vmem:[#allocation70_spill] sm:$0xff] %v6712_v42  ;;  %v9284_v38 = vld [vmem:[#allocation132_spill] sm:$0xff]  ;;  %v9285_v56 = vld [vmem:[#allocation259_spill] sm:$0xff] }
 0x45e   : > { %9278 = vst [vmem:[#allocation168_spill] sm:$0xff] %v6704_v43  ;;  %9283 = vst [vmem:[#allocation169_spill] sm:$0xff] %v6714_v59  ;;  %v6717_v37 = vadd.f32 %v1460_v6, %v9284_v38  ;;  %v6720_v28 = vadd.f32 %v1462_v46, %v6370_v19  ;;  %v1794_v20 = vmul.f32 %v6385_v47, %v9285_v56  ;;  %v9286_v60 = vld [vmem:[#allocation260_spill] sm:$0xff]  ;;  %v9287_v42 = vld [vmem:[#allocation261_spill] sm:$0xff] }
 0x45f   : > { %v1799_v43 = vmul.f32 %v6385_v47, %v9286_v60  ;;  %v6727_v23 = vadd.f32 %v1464_v29, %v6380_v16  ;;  %v6730_v11 = vadd.f32 %v1466_v1, %v6390_v45  ;;  %v1796_v59 = vmul.f32 %v6385_v47, %v9287_v42  ;;  %v9288_v6 = vld [vmem:[#allocation15_spill] sm:$0xff]  ;;  %v9289_v38 = vld [vmem:[#allocation32_spill] sm:$0xff]  ;;  %v9290_v46 = vld [vmem:[#allocation262_spill] sm:$0xff] }
 0x460   : > { %3541 = vperm.xlu1 %4097, %v9288_v6   ;;  %3601 = vperm.xlu0 %4098, %v9289_v38   ;;  %v6737_v19 = vadd.f32 %v1792_v54, %v6393_v27  ;;  %v1801_v56 = vmul.f32 %v6385_v47, %v9290_v46  ;;  %v9291_v60 = vld [vmem:[#allocation263_spill] sm:$0xff]  ;;  %v6744_v29 = vrot.slane %v5707_v41, %v2178_v13  ;;  %v9293_v27 = vld [vmem:[#allocation264_spill] sm:$0xff]  ;;  %v6757_v6 = vpop.permute.xlu1 %3165  ;;  %v6759_v38 = vpop.permute.xlu0 %3217  ;;  %v9297_v13 = vld [vmem:[#allocation266_spill] sm:$0xff] }
 0x461   : > { %v1798_v16 = vmul.f32 %v6385_v47, %v9291_v60  ;;  %v6747_v45 = vadd.f32 %v1795_v34, %v6415_v50  ;;  %v6750_v1 = vadd.f32 %v1793_v4, %v6400_v32  ;;  %v6753_v42 = vadd.f32 %v1797_v7, %v6425_v53  ;;  %9294 = vst [vmem:[#allocation69_spill] sm:$0xff] %v6757_v6  ;;  %v9296_v50 = vld [vmem:[#allocation265_spill] sm:$0xff]  ;;  %v9298_v4 = vld [vmem:[#allocation267_spill] sm:$0xff]  ;;  %v9299_v60 = vld [vmem:[#allocation268_spill] sm:$0xff] }
 0x462   : > { %9292 = vst [vmem:[#allocation170_spill] sm:$0xff] %v6744_v29  ;;  %v1803_v54 = vmul.f32 %v6385_v47, %v9293_v27  ;;  %9295 = vst [vmem:[#allocation72_spill] sm:$0xff] %v6759_v38  ;;  %v6762_v46 = vadd.f32 %v1794_v20, %v6403_v39  ;;  %v6765_v41 = vadd.f32 %v1799_v43, %v6437_v30  ;;  %v9300_v39 = vld [vmem:[#allocation17_spill] sm:$0xff]  ;;  %v9301_v20 = vld [vmem:[#allocation34_spill] sm:$0xff] }
 0x463   : > { %v1800_v32 = vmul.f32 %v6385_v47, %v9296_v50  ;;  %v1805_v53 = vmul.f32 %v6385_v47, %v9297_v13  ;;  %v6772_v34 = vadd.f32 %v1796_v59, %v6406_v14  ;;  %v1802_v7 = vmul.f32 %v6385_v47, %v9298_v4  ;;  %v9302_v50 = vld [vmem:[#allocation269_spill] sm:$0xff]  ;;  %v9303_v59 = vld [vmem:[#allocation270_spill] sm:$0xff]  ;;  %v9306_v38 = vld [vmem:[#allocation272_spill] sm:$0xff] }
 0x464   : > { %v1807_v27 = vmul.f32 %v6385_v47, %v9299_v60  ;;  %3549 = vperm.xlu1 %4097, %v9300_v39   ;;  %3609 = vperm.xlu0 %4098, %v9301_v20   ;;  %v6781_v30 = vadd.f32 %v1801_v56, %v6457_v9  ;;  %v6784_v43 = vadd.f32 %v1798_v16, %v6418_v31  ;;  %v9305_v60 = vld [vmem:[#allocation271_spill] sm:$0xff]  ;;  %v9307_v9 = vld [vmem:[#allocation273_spill] sm:$0xff]  ;;  %v6799_v31 = vpop.permute.xlu1 %3173  ;;  %v6801_v16 = vpop.permute.xlu0 %3225 }
 0x465   : > { %v1804_v14 = vmul.f32 %v6385_v47, %v9302_v50  ;;  %v1809_v13 = vmul.f32 %v6385_v47, %v9303_v59  ;;  %v6791_v4 = vadd.f32 %v1803_v54, %v6467_v15  ;;  %v1806_v39 = vmul.f32 %v6385_v47, %v9305_v60  ;;  %9308 = vst [vmem:[#allocation172_spill] sm:$0xff] %v6799_v31  ;;  %v9310_v15 = vld [vmem:[#allocation274_spill] sm:$0xff]  ;;  %v9311_v60 = vld [vmem:[#allocation275_spill] sm:$0xff]  ;;  %v9313_v31 = vld [vmem:[#allocation276_spill] sm:$0xff] }
 0x466   : > { %v1811_v20 = vmul.f32 %v6385_v47, %v9306_v38  ;;  %v1808_v56 = vmul.f32 %v6385_v47, %v9307_v9  ;;  %9309 = vst [vmem:[#allocation10_spill] sm:$0xff] %v6801_v16  ;;  %v6804_v50 = vadd.f32 %v1800_v32, %v6434_v40  ;;  %v6807_v59 = vadd.f32 %v1805_v53, %v6477_v8  ;;  %v9312_v38 = vld [vmem:[#allocation140_spill] sm:$0xff]  ;;  %v9314_v40 = vld [vmem:[#allocation19_spill] sm:$0xff] }
 0x467   : > { %9304 = vst [vmem:[#allocation171_spill] sm:$0xff] %v6791_v4  ;;  %v1813_v54 = vmul.f32 %v6385_v47, %v9310_v15  ;;  %v1810_v6 = vmul.f32 %v6385_v47, %v9311_v60  ;;  %v6814_v4 = vadd.f32 %v1802_v7, %v9312_v38  ;;  %v6817_v9 = vadd.f32 %v1807_v27, %v6487_v55  ;;  %v9315_v32 = vld [vmem:[#allocation36_spill] sm:$0xff]  ;;  %v9316_v15 = vld [vmem:[#allocation277_spill] sm:$0xff]  ;;  %v9317_v60 = vld [vmem:[#allocation278_spill] sm:$0xff] }
 0x468   : > { %v1815_v16 = vmul.f32 %v6385_v47, %v9313_v31  ;;  %3557 = vperm.xlu1 %4097, %v9314_v40   ;;  %3617 = vperm.xlu0 %4098, %v9315_v32   ;;  %v6824_v8 = vadd.f32 %v1804_v14, %v6460_v26  ;;  %v6827_v53 = vadd.f32 %v1809_v13, %v6493_v57  ;;  %v9318_v26 = vld [vmem:[#allocation279_spill] sm:$0xff]  ;;  %v6844_v57 = vpop.permute.xlu1 %3181  ;;  %v6846_v13 = vpop.permute.xlu0 %3233 }
 0x469   : > { %v1812_v7 = vmul.f32 %v6385_v47, %v9316_v15  ;;  %v1817_v55 = vmul.f32 %v6385_v47, %v9317_v60  ;;  %v6834_v27 = vadd.f32 %v1806_v39, %v6470_v36  ;;  %v6837_v31 = vadd.f32 %v1811_v20, %v6505_v44  ;;  %9319 = vst [vmem:[#allocation71_spill] sm:$0xff] %v6844_v57  ;;  %v9321_v36 = vld [vmem:[#allocation280_spill] sm:$0xff]  ;;  %v9322_v39 = vld [vmem:[#allocation281_spill] sm:$0xff]  ;;  %v9324_v60 = vld [vmem:[#allocation283_spill] sm:$0xff] }
 0x46a   : > { %v6840_v38 = vadd.f32 %v1808_v56, %v6480_v48  ;;  %v1814_v14 = vmul.f32 %v6385_v47, %v9318_v26  ;;  %9320 = vst [vmem:[#allocation74_spill] sm:$0xff] %v6846_v13  ;;  %v6849_v40 = vadd.f32 %v1813_v54, %v6521_v2  ;;  %v6852_v32 = vadd.f32 %v1810_v6, %v6490_v5  ;;  %v9323_v56 = vld [vmem:[#allocation282_spill] sm:$0xff]  ;;  %v9325_v2 = vld [vmem:[#allocation21_spill] sm:$0xff]  ;;  %v9330_v13 = vld [vmem:[#allocation287_spill] sm:$0xff] }
 0x46b   : > { %v1819_v44 = vmul.f32 %v6385_v47, %v9321_v36  ;;  %v1816_v48 = vmul.f32 %v6385_v47, %v9322_v39  ;;  %v6859_v20 = vadd.f32 %v1815_v16, %v6531_v0  ;;  %v1821_v15 = vmul.f32 %v6385_v47, %v9323_v56  ;;  %v9326_v54 = vld [vmem:[#allocation38_spill] sm:$0xff]  ;;  %v9327_v36 = vld [vmem:[#allocation284_spill] sm:$0xff]  ;;  %v9328_v16 = vld [vmem:[#allocation285_spill] sm:$0xff] }
 0x46c   : > { %v1818_v26 = vmul.f32 %v6385_v47, %v9324_v60  ;;  %3565 = vperm.xlu1 %4097, %v9325_v2   ;;  %3625 = vperm.xlu0 %4098, %v9326_v54   ;;  %v6868_v5 = vadd.f32 %v1812_v7, %v6502_v18  ;;  %v6871_v6 = vadd.f32 %v1817_v55, %v6547_v24  ;;  %v9329_v60 = vld [vmem:[#allocation286_spill] sm:$0xff]  ;;  %v9331_v18 = vld [vmem:[#allocation288_spill] sm:$0xff]  ;;  %v6886_v24 = vpop.permute.xlu1 %3189  ;;  %v6888_v55 = vpop.permute.xlu0 %3241 }
 0x46d   : > { %v1823_v0 = vmul.f32 %v6385_v47, %v9327_v36  ;;  %v1820_v39 = vmul.f32 %v6385_v47, %v9328_v16  ;;  %v6878_v56 = vadd.f32 %v1814_v14, %v6512_v35  ;;  %v1825_v2 = vmul.f32 %v6385_v47, %v9329_v60  ;;  %9332 = vst [vmem:[#allocation173_spill] sm:$0xff] %v6886_v24  ;;  %v9334_v35 = vld [vmem:[#allocation289_spill] sm:$0xff]  ;;  %v9335_v60 = vld [vmem:[#allocation290_spill] sm:$0xff]  ;;  %v9336_v24 = vld [vmem:[#allocation291_spill] sm:$0xff] }
 0x46e   : > { %v1822_v54 = vmul.f32 %v6385_v47, %v9330_v13  ;;  %v1827_v7 = vmul.f32 %v6385_v47, %v9331_v18  ;;  %9333 = vst [vmem:[#allocation174_spill] sm:$0xff] %v6888_v55  ;;  %v6891_v36 = vadd.f32 %v1819_v44, %v6557_v51  ;;  %v6894_v16 = vadd.f32 %v1816_v48, %v6524_v49  ;;  %v9337_v51 = vld [vmem:[#allocation23_spill] sm:$0xff]  ;;  %v9338_v44 = vld [vmem:[#allocation40_spill] sm:$0xff] }
 0x46f   : > { %v1824_v14 = vmul.f32 %v6385_v47, %v9334_v35  ;;  %v1829_v57 = vmul.f32 %v6385_v47, %v9335_v60  ;;  %v6901_v13 = vadd.f32 %v1821_v15, %v6567_v17  ;;  %v6904_v18 = vadd.f32 %v1818_v26, %v6544_v62  ;;  %v9340_v35 = vld [vmem:[#allocation292_spill] sm:$0xff]  ;;  %v9341_v15 = vld [vmem:[#allocation293_spill] sm:$0xff] }
 0x470   : > { %v1826_v55 = vmul.f32 %v6385_v47, %v9336_v24  ;;  %3573 = vperm.xlu1 %4097, %v9337_v51   ;;  %3633 = vperm.xlu0 %4098, %v9338_v44   ;;  %v6911_v49 = vadd.f32 %v1823_v0, %v6577_v63  ;;  %v6914_v48 = vadd.f32 %v1820_v39, %v6554_v61  ;;  %v9344_v63 = vld [vmem:[#allocation294_spill] sm:$0xff]  ;;  %v6931_v61 = vpop.permute.xlu1 %3197  ;;  %v6933_v39 = vpop.permute.xlu0 %3249  ;;  %v9347_v51 = vld [vmem:[#allocation147_spill] sm:$0xff] }
 0x471   : > { %v1831_v17 = vmul.f32 %v6385_v47, %v9340_v35  ;;  %v1828_v62 = vmul.f32 %v6385_v47, %v9341_v15  ;;  %v6921_v26 = vadd.f32 %v1825_v2, %v6589_v58  ;;  %v6924_v24 = vadd.f32 %v1822_v54, %v6564_v33  ;;  %9345 = vst [vmem:[#allocation177_spill] sm:$0xff] %v6931_v61  ;;  %v9348_v35 = vld [vmem:[#allocation153_spill] sm:$0xff]  ;;  %v9350_v58 = vld [vmem:[#allocation295_spill] sm:$0xff]  ;;  %v9351_v2 = vld [vmem:[#allocation296_spill] sm:$0xff] }
 0x472   : > { %9339 = vst [vmem:[#allocation73_spill] sm:$0xff] %v6911_v49  ;;  %v6927_v60 = vadd.f32 %v1827_v7, %v6599_v22  ;;  %v1833_v0 = vmul.f32 %v6385_v47, %v9344_v63  ;;  %9346 = vst [vmem:[#allocation76_spill] sm:$0xff] %v6933_v39  ;;  %v6936_v44 = vadd.f32 %v1824_v14, %v9347_v51  ;;  %v9352_v54 = vld [vmem:[#allocation148_spill] sm:$0xff]  ;;  %v9353_v63 = vld [vmem:[#allocation297_spill] sm:$0xff] }
 0x473   : > { %9342 = vst [vmem:[#allocation175_spill] sm:$0xff] %v6921_v26  ;;  %v6939_v15 = vadd.f32 %v1829_v57, %v9348_v35  ;;  %v1830_v33 = vmul.f32 %v6385_v47, %v9350_v58  ;;  %v1835_v22 = vmul.f32 %v6385_v47, %v9351_v2  ;;  %v6946_v7 = vadd.f32 %v1826_v55, %v9352_v54  ;;  %v9355_v14 = vld [vmem:[#allocation25_spill] sm:$0xff]  ;;  %v9356_v51 = vld [vmem:[#allocation42_spill] sm:$0xff]  ;;  %v9358_v35 = vld [vmem:[#allocation151_spill] sm:$0xff] }
 0x474   : > { %9343 = vst [vmem:[#allocation176_spill] sm:$0xff] %v6927_v60  ;;  %v1832_v61 = vmul.f32 %v6385_v47, %v9353_v63  ;;  %v9354_v60 = vld [vmem:[#allocation298_spill] sm:$0xff]  ;;  %3581 = vperm.xlu1 %4097, %v9355_v14   ;;  %3641 = vperm.xlu0 %4098, %v9356_v51   ;;  %v6955_v57 = vadd.f32 %v1831_v17, %v6631_v10  ;;  %v9359_v2 = vld [vmem:[#allocation299_spill] sm:$0xff]  ;;  %v9360_v54 = vld [vmem:[#allocation300_spill] sm:$0xff] }
 0x475   : > { %9349 = vst [vmem:[#allocation75_spill] sm:$0xff] %v6939_v15  ;;  %v1837_v39 = vmul.f32 %v6385_v47, %v9354_v60  ;;  %v6958_v58 = vadd.f32 %v1828_v62, %v9358_v35  ;;  %v1834_v55 = vmul.f32 %v6385_v47, %v9359_v2  ;;  %v1839_v15 = vmul.f32 %v6385_v47, %v9360_v54  ;;  %v9362_v60 = vld [vmem:[#allocation301_spill] sm:$0xff]  ;;  %v9363_v26 = vld [vmem:[#allocation302_spill] sm:$0xff]  ;;  %v9364_v10 = vld [vmem:[#allocation303_spill] sm:$0xff]  ;;  %v6973_v62 = vpop.permute.xlu1 %3205  ;;  %v6975_v35 = vpop.permute.xlu0 %3257 }
 0x476   : > { %9357 = vst [vmem:[#allocation178_spill] sm:$0xff] %v6955_v57  ;;  %v6965_v63 = vadd.f32 %v1833_v0, %v6641_v3  ;;  %v1836_v14 = vmul.f32 %v6385_v47, %v9362_v60  ;;  %v1841_v51 = vmul.f32 %v6385_v47, %v9363_v26  ;;  %v1838_v17 = vmul.f32 %v6385_v47, %v9364_v10  ;;  %v9367_v2 = vld [vmem:[#allocation152_spill] sm:$0xff]  ;;  %v9370_v60 = vld [vmem:[#allocation305_spill] sm:$0xff]  ;;  %v9371_v26 = vld [vmem:[#allocation154_spill] sm:$0xff] }
 0x477   : > { %9365 = vst [vmem:[#allocation78_spill] sm:$0xff] %v6973_v62  ;;  %9366 = vst [vmem:[#allocation77_spill] sm:$0xff] %v6975_v35  ;;  %v6978_v57 = vadd.f32 %v1830_v33, %v9367_v2  ;;  %v6981_v54 = vadd.f32 %v1835_v22, %v6651_v25  ;;  %v9369_v3 = vld [vmem:[#allocation304_spill] sm:$0xff]  ;;  %v6988_v49 = vadd.f32 %v1832_v61, %v9371_v26  ;;  %v9374_v62 = vld [vmem:[#allocation307_spill] sm:$0xff] }
 0x478   : > { %9361 = vst [vmem:[#allocation179_spill] sm:$0xff] %v6965_v63  ;;  %v1843_v0 = vmul.f32 %v6385_v47, %v9369_v3  ;;  %v1840_v63 = vmul.f32 %v6385_v47, %v9370_v60  ;;  %v6991_v10 = vadd.f32 %v1837_v39, %v6661_v52  ;;  %v1842_v35 = vmul.f32 %v6385_v47, %v9374_v62  ;;  %v9375_v33 = vld [vmem:[#allocation27_spill] sm:$0xff]  ;;  %v9376_v2 = vld [vmem:[#allocation44_spill] sm:$0xff]  ;;  %v9377_v25 = vld [vmem:[#allocation157_spill] sm:$0xff] }
 0x479   : > { %9368 = vst [vmem:[#allocation180_spill] sm:$0xff] %v6981_v54  ;;  %9372 = vst [vmem:[#allocation181_spill] sm:$0xff] %v6988_v49  ;;  %3589 = vperm.xlu1 %4097, %v9375_v33   ;;  %3649 = vperm.xlu0 %4098, %v9376_v2   ;;  %v6998_v22 = vadd.f32 %v1834_v55, %v9377_v25  ;;  %v9378_v3 = vld [vmem:[#allocation161_spill] sm:$0xff]  ;;  %v9381_v26 = vld [vmem:[#allocation311_spill] sm:$0xff] }
 0x47a   : > { %9373 = vst [vmem:[#allocation12_spill] sm:$0xff] %v6991_v10  ;;  %v7001_v54 = vadd.f32 %v1839_v15, %v9378_v3  ;;  %v9380_v60 = vld [vmem:[#allocation309_spill] sm:$0xff]  ;;  %v1846_v52 = vmul.f32 %v6385_v47, %v9381_v26  ;;  %v9382_v39 = vld [vmem:[#allocation158_spill] sm:$0xff]  ;;  %v9385_v33 = vld [vmem:[#allocation159_spill] sm:$0xff]  ;;  %v7018_v15 = vpop.permute.xlu1 %3213  ;;  %v7020_v3 = vpop.permute.xlu0 %3265 }
 0x47b   : > { %v1844_v61 = vmul.f32 %v6385_v47, %v9380_v60  ;;  %v7008_v10 = vadd.f32 %v1836_v14, %v9382_v39  ;;  %v9383_v62 = vld [vmem:[#allocation165_spill] sm:$0xff]  ;;  %v7014_v2 = vadd.f32 %v1838_v17, %v9385_v33  ;;  %9387 = vst [vmem:[#allocation182_spill] sm:$0xff] %v7018_v15  ;;  %9388 = vst [vmem:[#allocation183_spill] sm:$0xff] %v7020_v3  ;;  %v9390_v26 = vld [vmem:[#allocation160_spill] sm:$0xff]  ;;  %v2566_v39 = vsub.s32 5, %v9276_v21 }
 0x47c   : > { %9379 = vst [vmem:[#allocation82_spill] sm:$0xff] %v7001_v54  ;;  %v7011_v49 = vadd.f32 %v1841_v51, %v9383_v62  ;;  %v9386_v55 = vld [vmem:[#allocation313_spill] sm:$0xff]  ;;  %v7023_v60 = vadd.f32 %v1843_v0, %v6695_v12  ;;  %v7026_v54 = vadd.f32 %v1840_v63, %v9390_v26  ;;  %v9392_v14 = vld [vmem:[#allocation315_spill] sm:$0xff]  ;;  %v9393_v17 = vld [vmem:[#allocation164_spill] sm:$0xff] }
 0x47d   : > { %v1848_v25 = vmul.f32 %v6385_v47, %v9386_v55  ;;  %v1850_v51 = vmul.f32 %v6385_v47, %v9392_v14  ;;  %v7032_v62 = vadd.f32 %v1842_v35, %v9393_v17  ;;  %v9395_v33 = vld [vmem:[#allocation317_spill] sm:$0xff]  ;;  %v9396_v15 = vld [vmem:[#allocation318_spill] sm:$0xff]  ;;  %v9400_v26 = vld [vmem:[#allocation167_spill] sm:$0xff] }
 0x47e   : > { %9384 = vst [vmem:[#allocation79_spill] sm:$0xff] %v7011_v49  ;;  %9389 = vst [vmem:[#allocation84_spill] sm:$0xff] %v7023_v60  ;;  %v1852_v55 = vmul.f32 %v6385_v47, %v9395_v33  ;;  %v2181_v3 = vmul.f32 %v6744_v29, %v9396_v15  ;;  %v9397_v49 = vld [vmem:[#allocation29_spill] sm:$0xff]  ;;  %v9398_v12 = vld [vmem:[#allocation46_spill] sm:$0xff]  ;;  %v7044_v14 = vadd.f32 %v1846_v52, %v9400_v26  ;;  %v7059_v52 = vpop.permute.xlu1 %3221  ;;  %v7061_v26 = vpop.permute.xlu0 %3273 }
 0x47f   : > { %9391 = vst [vmem:[#allocation83_spill] sm:$0xff] %v7026_v54  ;;  %9394 = vst [vmem:[#allocation86_spill] sm:$0xff] %v7032_v62  ;;  %3597 = vperm.xlu1 %4097, %v9397_v49   ;;  %3657 = vperm.xlu0 %4098, %v9398_v12   ;;  %v9399_v63 = vld [vmem:[#allocation166_spill] sm:$0xff]  ;;  %v9401_v60 = vld [vmem:[#allocation319_spill] sm:$0xff]  ;;  %v7051_v33 = vadd.f32 %v1848_v25, %v6717_v37 }
 0x480   : > { %v7041_v0 = vadd.f32 %v1844_v61, %v9399_v63  ;;  %v1854_v35 = vmul.f32 %v6385_v47, %v9401_v60  ;;  %v9402_v17 = vld [vmem:[#allocation320_spill] sm:$0xff]  ;;  %v9403_v15 = vld [vmem:[#allocation321_spill] sm:$0xff]  ;;  %v9404_v54 = vld [vmem:[#allocation322_spill] sm:$0xff]  ;;  %9406 = vst [vmem:[#allocation184_spill] sm:$0xff] %v7059_v52  ;;  %v7064_v60 = vadd.f32 %v1850_v51, %v6720_v28  ;;  %v7082_v28 = vadd.f32 %v2181_v3, %v6750_v1 }
 0x481   : > { %v2184_v62 = vmul.f32 %v6744_v29, %v9402_v17  ;;  %v2180_v49 = vmul.f32 %v6744_v29, %v9403_v15  ;;  %v2186_v12 = vmul.f32 %v6744_v29, %v9404_v54  ;;  %v9405_v61 = vld [vmem:[#allocation323_spill] sm:$0xff]  ;;  %9407 = vst [vmem:[#allocation85_spill] sm:$0xff] %v7061_v26  ;;  %v9409_v17 = vld [vmem:[#allocation324_spill] sm:$0xff]  ;;  %v9410_v25 = vld [vmem:[#allocation325_spill] sm:$0xff] }
 0x482   : > { %v2182_v63 = vmul.f32 %v6744_v29, %v9405_v61  ;;  %9408 = vst [vmem:[#allocation88_spill] sm:$0xff] %v7064_v60  ;;  %v2188_v37 = vmul.f32 %v6744_v29, %v9409_v17  ;;  %v2183_v47 = vmul.f32 %v6744_v29, %v9410_v25  ;;  %v7073_v54 = vld [vmem:[%s8250_s1] sm:$0xff]  ;;  %v7079_v61 = vadd.f32 %v1852_v55, %v6727_v23  ;;  %v9412_v26 = vld [vmem:[#allocation31_spill] sm:$0xff]  ;;  %v9413_v25 = vld [vmem:[#allocation48_spill] sm:$0xff] }
 0x483   : > { %v7076_v15 = vrot.slane %v7073_v54, %v2566_v39  ;;  %v9411_v51 = vld [vmem:[#allocation326_spill] sm:$0xff]  ;;  %3605 = vperm.xlu1 %4097, %v9412_v26   ;;  %3665 = vperm.xlu0 %4098, %v9413_v25   ;;  %v7089_v52 = vadd.f32 %v1854_v35, %v6730_v11  ;;  %v7092_v60 = vadd.f32 %v2184_v62, %v6772_v34  ;;  %v9414_v39 = vld [vmem:[#allocation327_spill] sm:$0xff]  ;;  %v9415_v55 = vld [vmem:[#allocation328_spill] sm:$0xff]  ;;  %v7109_v34 = vpop.permute.xlu1 %3229  ;;  %v7111_v62 = vpop.permute.xlu0 %3281 }
 0x484   : > { %v2190_v17 = vmul.f32 %v6744_v29, %v9411_v51  ;;  %v2185_v23 = vmul.f32 %v6744_v29, %v9414_v39  ;;  %v2192_v1 = vmul.f32 %v6744_v29, %v9415_v55  ;;  %v7099_v3 = vadd.f32 %v2180_v49, %v6737_v19  ;;  %v9416_v11 = vld [vmem:[#allocation329_spill] sm:$0xff]  ;;  %9417 = vst [vmem:[#allocation185_spill] sm:$0xff] %v7109_v34  ;;  %v9419_v19 = vld [vmem:[#allocation330_spill] sm:$0xff]  ;;  %v9420_v49 = vld [vmem:[#allocation331_spill] sm:$0xff] }
 0x485   : > { %v7102_v51 = vadd.f32 %v2186_v12, %v6784_v43  ;;  %v7105_v26 = vadd.f32 %v2182_v63, %v6762_v46  ;;  %v2187_v35 = vmul.f32 %v6744_v29, %v9416_v11  ;;  %9418 = vst [vmem:[#allocation186_spill] sm:$0xff] %v7111_v62  ;;  %v7114_v25 = vadd.f32 %v2188_v37, %v6804_v50  ;;  %v9422_v63 = vld [vmem:[#allocation332_spill] sm:$0xff]  ;;  %v9423_v11 = vld [vmem:[#allocation333_spill] sm:$0xff]  ;;  %v9425_v37 = vld [vmem:[#allocation50_spill] sm:$0xff] }
 0x486   : > { %v7117_v39 = vadd.f32 %v2183_v47, %v6747_v45  ;;  %v2194_v43 = vmul.f32 %v6744_v29, %v9419_v19  ;;  %v2189_v46 = vmul.f32 %v6744_v29, %v9420_v49  ;;  %v7124_v12 = vadd.f32 %v2190_v17, %v6814_v4  ;;  %v9424_v50 = vld [vmem:[#allocation33_spill] sm:$0xff]  ;;  %v9427_v19 = vld [vmem:[#allocation334_spill] sm:$0xff]  ;;  %v9428_v17 = vld [vmem:[#allocation335_spill] sm:$0xff] }
 0x487   : > { %v2196_v55 = vmul.f32 %v6744_v29, %v9422_v63  ;;  %v2191_v62 = vmul.f32 %v6744_v29, %v9423_v11  ;;  %3613 = vperm.xlu1 %4097, %v9424_v50   ;;  %3673 = vperm.xlu0 %4098, %v9425_v37   ;;  %v7133_v47 = vadd.f32 %v2185_v23, %v6753_v42  ;;  %v9429_v11 = vld [vmem:[#allocation336_spill] sm:$0xff]  ;;  %v9430_v34 = vld [vmem:[#allocation337_spill] sm:$0xff]  ;;  %v9431_v42 = vld [vmem:[#allocation338_spill] sm:$0xff] }
 0x488   : > { %9421 = vst [vmem:[#allocation87_spill] sm:$0xff] %v7124_v12  ;;  %v7136_v45 = vadd.f32 %v2192_v1, %v6824_v8  ;;  %v2198_v4 = vmul.f32 %v6744_v29, %v9427_v19  ;;  %v2193_v49 = vmul.f32 %v6744_v29, %v9428_v17  ;;  %v7143_v63 = vadd.f32 %v2187_v35, %v6765_v41  ;;  %v7151_v8 = vpop.permute.xlu1 %3237  ;;  %v7153_v1 = vpop.permute.xlu0 %3289  ;;  %v9434_v41 = vld [vmem:[#allocation339_spill] sm:$0xff] }
 0x489   : > { %v2200_v50 = vmul.f32 %v6744_v29, %v9429_v11  ;;  %v2195_v37 = vmul.f32 %v6744_v29, %v9430_v34  ;;  %v2202_v23 = vmul.f32 %v6744_v29, %v9431_v42  ;;  %9432 = vst [vmem:[#allocation187_spill] sm:$0xff] %v7151_v8  ;;  %9433 = vst [vmem:[#allocation3_spill] sm:$0xff] %v7153_v1  ;;  %v9435_v11 = vld [vmem:[#allocation340_spill] sm:$0xff]  ;;  %v9436_v42 = vld [vmem:[#allocation171_spill] sm:$0xff] }
 0x48a   : > { %9426 = vst [vmem:[#allocation90_spill] sm:$0xff] %v7136_v45  ;;  %v7156_v19 = vadd.f32 %v2194_v43, %v6834_v27  ;;  %v7159_v17 = vadd.f32 %v2189_v46, %v6781_v30  ;;  %v2197_v35 = vmul.f32 %v6744_v29, %v9434_v41  ;;  %v2204_v45 = vmul.f32 %v6744_v29, %v9435_v11  ;;  %v9437_v8 = vld [vmem:[#allocation341_spill] sm:$0xff]  ;;  %v9438_v27 = vld [vmem:[#allocation35_spill] sm:$0xff]  ;;  %v9439_v43 = vld [vmem:[#allocation52_spill] sm:$0xff] }
 0x48b   : > { %v7166_v34 = vadd.f32 %v2196_v55, %v6840_v38  ;;  %v7169_v12 = vadd.f32 %v2191_v62, %v9436_v42  ;;  %v2199_v1 = vmul.f32 %v6744_v29, %v9437_v8  ;;  %3621 = vperm.xlu1 %4097, %v9438_v27   ;;  %3681 = vperm.xlu0 %4098, %v9439_v43   ;;  %v9440_v41 = vld [vmem:[#allocation342_spill] sm:$0xff]  ;;  %v9441_v55 = vld [vmem:[#allocation343_spill] sm:$0xff] }
 0x48c   : > { %v7176_v30 = vadd.f32 %v2198_v4, %v6852_v32  ;;  %v7179_v46 = vadd.f32 %v2193_v49, %v6807_v59  ;;  %v2206_v38 = vmul.f32 %v6744_v29, %v9440_v41  ;;  %v2201_v62 = vmul.f32 %v6744_v29, %v9441_v55  ;;  %v9442_v32 = vld [vmem:[#allocation344_spill] sm:$0xff]  ;;  %v7196_v59 = vpop.permute.xlu1 %3245  ;;  %v7198_v49 = vpop.permute.xlu0 %3297 }
 0x48d   : > { %v7186_v11 = vadd.f32 %v2200_v50, %v6868_v5  ;;  %v7189_v8 = vadd.f32 %v2195_v37, %v6817_v9  ;;  %v7192_v42 = vadd.f32 %v2202_v23, %v6878_v56  ;;  %v2208_v4 = vmul.f32 %v6744_v29, %v9442_v32  ;;  %9443 = vst [vmem:[#allocation14_spill] sm:$0xff] %v7196_v59  ;;  %v9445_v5 = vld [vmem:[#allocation345_spill] sm:$0xff]  ;;  %v9446_v50 = vld [vmem:[#allocation346_spill] sm:$0xff]  ;;  %v9447_v23 = vld [vmem:[#allocation347_spill] sm:$0xff] }
 0x48e   : > { %9444 = vst [vmem:[#allocation89_spill] sm:$0xff] %v7198_v49  ;;  %v7201_v27 = vadd.f32 %v2197_v35, %v6827_v53  ;;  %v7204_v43 = vadd.f32 %v2204_v45, %v6894_v16  ;;  %v2203_v9 = vmul.f32 %v6744_v29, %v9445_v5  ;;  %v2210_v56 = vmul.f32 %v6744_v29, %v9446_v50  ;;  %v9448_v55 = vld [vmem:[#allocation348_spill] sm:$0xff]  ;;  %v9449_v53 = vld [vmem:[#allocation37_spill] sm:$0xff]  ;;  %v9450_v35 = vld [vmem:[#allocation54_spill] sm:$0xff] }
 0x48f   : > { %v7211_v37 = vadd.f32 %v2199_v1, %v6837_v31  ;;  %v2205_v41 = vmul.f32 %v6744_v29, %v9447_v23  ;;  %v2212_v32 = vmul.f32 %v6744_v29, %v9448_v55  ;;  %3629 = vperm.xlu1 %4097, %v9449_v53   ;;  %3689 = vperm.xlu0 %4098, %v9450_v35   ;;  %v9451_v5 = vld [vmem:[#allocation349_spill] sm:$0xff]  ;;  %v9452_v1 = vld [vmem:[#allocation350_spill] sm:$0xff]  ;;  %v9453_v55 = vld [vmem:[#allocation351_spill] sm:$0xff] }
 0x490   : > { %v7220_v16 = vadd.f32 %v2206_v38, %v6904_v18  ;;  %v7223_v45 = vadd.f32 %v2201_v62, %v6849_v40  ;;  %v2207_v31 = vmul.f32 %v6744_v29, %v9451_v5  ;;  %v2214_v50 = vmul.f32 %v6744_v29, %v9452_v1  ;;  %v9454_v49 = vld [vmem:[#allocation352_spill] sm:$0xff]  ;;  %v9455_v18 = vld [vmem:[#allocation353_spill] sm:$0xff]  ;;  %v7238_v40 = vpop.permute.xlu1 %3253  ;;  %v7240_v62 = vpop.permute.xlu0 %3305 }
 0x491   : > { %v7230_v23 = vadd.f32 %v2208_v4, %v6914_v48  ;;  %v2209_v53 = vmul.f32 %v6744_v29, %v9453_v55  ;;  %v2216_v35 = vmul.f32 %v6744_v29, %v9454_v49  ;;  %v2211_v38 = vmul.f32 %v6744_v29, %v9455_v18  ;;  %9456 = vst [vmem:[#allocation92_spill] sm:$0xff] %v7238_v40  ;;  %v9459_v48 = vld [vmem:[#allocation354_spill] sm:$0xff]  ;;  %v9460_v55 = vld [vmem:[#allocation355_spill] sm:$0xff]  ;;  %v9462_v40 = vld [vmem:[#allocation356_spill] sm:$0xff] }
 0x492   : > { %9457 = vst [vmem:[#allocation189_spill] sm:$0xff] %v7240_v62  ;;  %v7243_v5 = vadd.f32 %v2203_v9, %v6859_v20  ;;  %v7246_v1 = vadd.f32 %v2210_v56, %v6924_v24  ;;  %v2218_v4 = vmul.f32 %v6744_v29, %v9459_v48  ;;  %v2213_v59 = vmul.f32 %v6744_v29, %v9460_v55  ;;  %v9463_v20 = vld [vmem:[#allocation39_spill] sm:$0xff]  ;;  %v9464_v9 = vld [vmem:[#allocation56_spill] sm:$0xff]  ;;  %v9466_v48 = vld [vmem:[#allocation357_spill] sm:$0xff] }
 0x493   : > { %v7253_v49 = vadd.f32 %v2205_v41, %v6871_v6  ;;  %v7256_v18 = vadd.f32 %v2212_v32, %v6936_v44  ;;  %v2220_v62 = vmul.f32 %v6744_v29, %v9462_v40  ;;  %3637 = vperm.xlu1 %4097, %v9463_v20   ;;  %3697 = vperm.xlu0 %4098, %v9464_v9   ;;  %v9467_v41 = vld [vmem:[#allocation358_spill] sm:$0xff]  ;;  %v9469_v55 = vld [vmem:[#allocation73_spill] sm:$0xff] }
 0x494   : > { %9458 = vst [vmem:[#allocation191_spill] sm:$0xff] %v7246_v1  ;;  %v7263_v24 = vadd.f32 %v2207_v31, %v6891_v36  ;;  %v7266_v56 = vadd.f32 %v2214_v50, %v6946_v7  ;;  %v2215_v6 = vmul.f32 %v6744_v29, %v9466_v48  ;;  %v2222_v44 = vmul.f32 %v6744_v29, %v9467_v41  ;;  %v9470_v36 = vld [vmem:[#allocation359_spill] sm:$0xff]  ;;  %v7283_v7 = vpop.permute.xlu1 %3261  ;;  %v7285_v50 = vpop.permute.xlu0 %3313 }
 0x495   : > { %9461 = vst [vmem:[#allocation91_spill] sm:$0xff] %v7256_v18  ;;  %v7273_v32 = vadd.f32 %v2209_v53, %v6901_v13  ;;  %v7276_v40 = vadd.f32 %v2216_v35, %v6958_v58  ;;  %v7279_v20 = vadd.f32 %v2211_v38, %v9469_v55  ;;  %v2217_v31 = vmul.f32 %v6744_v29, %v9470_v36  ;;  %v9474_v48 = vld [vmem:[#allocation175_spill] sm:$0xff]  ;;  %v9475_v13 = vld [vmem:[#allocation360_spill] sm:$0xff]  ;;  %v9476_v53 = vld [vmem:[#allocation361_spill] sm:$0xff] }
 0x496   : > { %9465 = vst [vmem:[#allocation192_spill] sm:$0xff] %v7266_v56  ;;  %9471 = vst [vmem:[#allocation194_spill] sm:$0xff] %v7283_v7  ;;  %v7288_v9 = vadd.f32 %v2218_v4, %v6978_v57  ;;  %v7291_v41 = vadd.f32 %v2213_v59, %v9474_v48  ;;  %v2224_v58 = vmul.f32 %v6744_v29, %v9475_v13  ;;  %v9477_v38 = vld [vmem:[#allocation181_spill] sm:$0xff]  ;;  %v9479_v36 = vld [vmem:[#allocation362_spill] sm:$0xff] }
 0x497   : > { %9468 = vst [vmem:[#allocation193_spill] sm:$0xff] %v7276_v40  ;;  %9472 = vst [vmem:[#allocation94_spill] sm:$0xff] %v7285_v50  ;;  %v2219_v35 = vmul.f32 %v6744_v29, %v9476_v53  ;;  %v7298_v55 = vadd.f32 %v2220_v62, %v9477_v38  ;;  %v2226_v7 = vmul.f32 %v6744_v29, %v9479_v36  ;;  %v9480_v40 = vld [vmem:[#allocation363_spill] sm:$0xff]  ;;  %v9481_v57 = vld [vmem:[#allocation41_spill] sm:$0xff] }
 0x498   : > { %9473 = vst [vmem:[#allocation93_spill] sm:$0xff] %v7288_v9  ;;  %v2221_v50 = vmul.f32 %v6744_v29, %v9480_v40  ;;  %3645 = vperm.xlu1 %4097, %v9481_v57   ;;  %v9482_v4 = vld [vmem:[#allocation58_spill] sm:$0xff]  ;;  %v9483_v59 = vld [vmem:[#allocation176_spill] sm:$0xff]  ;;  %v7310_v13 = vadd.f32 %v2222_v44, %v6998_v22  ;;  %v9486_v38 = vld [vmem:[#allocation365_spill] sm:$0xff]  ;;  %v7326_v22 = vpop.permute.xlu0 %3321  ;;  %v7329_v44 = vadd.f32 %v2224_v58, %v7008_v10 }
 0x499   : > { %9478 = vst [vmem:[#allocation195_spill] sm:$0xff] %v7298_v55  ;;  %3705 = vperm.xlu0 %4098, %v9482_v4   ;;  %v7307_v48 = vadd.f32 %v2215_v6, %v9483_v59  ;;  %v9485_v53 = vld [vmem:[#allocation364_spill] sm:$0xff]  ;;  %v2223_v55 = vmul.f32 %v6744_v29, %v9486_v38  ;;  %v9487_v36 = vld [vmem:[#allocation75_spill] sm:$0xff]  ;;  %v9488_v40 = vld [vmem:[#allocation366_spill] sm:$0xff]  ;;  %v2954_v6 = vsub.s32 6, %v9276_v21  ;;  %v7324_v59 = vpop.permute.xlu1 %3269 }
 0x49a   : > { %9484 = vst [vmem:[#allocation196_spill] sm:$0xff] %v7310_v13  ;;  %v2228_v62 = vmul.f32 %v6744_v29, %v9485_v53  ;;  %v7317_v9 = vadd.f32 %v2217_v31, %v9487_v36  ;;  %v2230_v57 = vmul.f32 %v6744_v29, %v9488_v40  ;;  %v9489_v56 = vld [vmem:[#allocation367_spill] sm:$0xff]  ;;  %9490 = vst [vmem:[#allocation98_spill] sm:$0xff] %v7324_v59  ;;  %v9493_v53 = vld [vmem:[#allocation178_spill] sm:$0xff] }
 0x49b   : > { %v2225_v4 = vmul.f32 %v6744_v29, %v9489_v56  ;;  %9491 = vst [vmem:[#allocation197_spill] sm:$0xff] %v7326_v22  ;;  %9492 = vst [vmem:[#allocation2_spill] sm:$0xff] %v7329_v44  ;;  %v7332_v38 = vadd.f32 %v2219_v35, %v9493_v53  ;;  %v9494_v31 = vld [vmem:[#allocation368_spill] sm:$0xff]  ;;  %v9495_v13 = vld [vmem:[#allocation369_spill] sm:$0xff]  ;;  %v7339_v56 = vadd.f32 %v2226_v7, %v7014_v2 }
 0x49c   : > { %v2232_v36 = vmul.f32 %v6744_v29, %v9494_v31  ;;  %v2227_v40 = vmul.f32 %v6744_v29, %v9495_v13  ;;  %v9497_v18 = vld [vmem:[#allocation179_spill] sm:$0xff]  ;;  %v9499_v59 = vld [vmem:[#allocation370_spill] sm:$0xff]  ;;  %v9501_v58 = vld [vmem:[#allocation60_spill] sm:$0xff] }
 0x49d   : > { %9496 = vst [vmem:[#allocation16_spill] sm:$0xff] %v7339_v56  ;;  %v7342_v1 = vadd.f32 %v2221_v50, %v9497_v18  ;;  %v2234_v22 = vmul.f32 %v6744_v29, %v9499_v59  ;;  %v9500_v10 = vld [vmem:[#allocation43_spill] sm:$0xff]  ;;  %3713 = vperm.xlu0 %4098, %v9501_v58   ;;  %v9503_v31 = vld [vmem:[#allocation180_spill] sm:$0xff]  ;;  %v9506_v50 = vld [vmem:[#allocation86_spill] sm:$0xff]  ;;  %v7368_v58 = vpop.permute.xlu1 %3277 }
 0x49e   : > { %3653 = vperm.xlu1 %4097, %v9500_v10   ;;  %v9502_v35 = vld [vmem:[#allocation83_spill] sm:$0xff]  ;;  %v7352_v44 = vadd.f32 %v2223_v55, %v9503_v31  ;;  %v9505_v7 = vld [vmem:[#allocation372_spill] sm:$0xff]  ;;  %v7359_v56 = vadd.f32 %v2230_v57, %v9506_v50  ;;  %v7365_v10 = vrot.slane %v7073_v54, %v2954_v6  ;;  %v7370_v55 = vpop.permute.xlu0 %3329  ;;  %v9511_v31 = vld [vmem:[#allocation82_spill] sm:$0xff] }
 0x49f   : > { %9498 = vst [vmem:[#allocation198_spill] sm:$0xff] %v7342_v1  ;;  %v7349_v53 = vadd.f32 %v2228_v62, %v9502_v35  ;;  %v9504_v13 = vld [vmem:[#allocation371_spill] sm:$0xff]  ;;  %v2236_v18 = vmul.f32 %v6744_v29, %v9505_v7  ;;  %v9508_v59 = vld [vmem:[#allocation12_spill] sm:$0xff]  ;;  %v3342_v62 = vsub.s32 7, %v9276_v21  ;;  %9509 = vst [vmem:[#allocation100_spill] sm:$0xff] %v7370_v55  ;;  %v7373_v35 = vadd.f32 %v2232_v36, %v7041_v0 }
 0x4a0   : > { %v2229_v2 = vmul.f32 %v6744_v29, %v9504_v13  ;;  %9507 = vst [vmem:[#allocation199_spill] sm:$0xff] %v7359_v56  ;;  %v7362_v1 = vadd.f32 %v2225_v4, %v9508_v59  ;;  %v7376_v13 = vadd.f32 %v2227_v40, %v9511_v31  ;;  %v9512_v57 = vld [vmem:[#allocation374_spill] sm:$0xff]  ;;  %v9513_v4 = vld [vmem:[#allocation376_spill] sm:$0xff]  ;;  %v7383_v6 = vadd.f32 %v2234_v22, %v7044_v14  ;;  %v9516_v56 = vld [vmem:[#allocation387_spill] sm:$0xff] }
 0x4a1   : > { %9510 = vst [vmem:[#allocation200_spill] sm:$0xff] %v7373_v35  ;;  %v2238_v7 = vmul.f32 %v6744_v29, %v9512_v57  ;;  %v2240_v50 = vmul.f32 %v6744_v29, %v9513_v4  ;;  %v9515_v21 = vld [vmem:[#allocation378_spill] sm:$0xff]  ;;  %v2569_v55 = vmul.f32 %v7076_v15, %v9516_v56  ;;  %v9517_v0 = vld [vmem:[#allocation45_spill] sm:$0xff]  ;;  %v9519_v40 = vld [vmem:[#allocation79_spill] sm:$0xff]  ;;  %v7395_v57 = vadd.f32 %v2236_v18, %v7051_v33  ;;  %v7410_v33 = vpop.permute.xlu1 %3285 }
 0x4a2   : > { %9514 = vst [vmem:[#allocation201_spill] sm:$0xff] %v7383_v6  ;;  %v2242_v59 = vmul.f32 %v6744_v29, %v9515_v21  ;;  %3661 = vperm.xlu1 %4097, %v9517_v0   ;;  %v9518_v36 = vld [vmem:[#allocation62_spill] sm:$0xff]  ;;  %v7392_v31 = vadd.f32 %v2229_v2, %v9519_v40  ;;  %v9522_v4 = vld [vmem:[#allocation380_spill] sm:$0xff]  ;;  %v7408_v2 = vrot.slane %v7073_v54, %v3342_v62  ;;  %9527 = vst [vmem:[#allocation204_spill] sm:$0xff] %v7410_v33  ;;  %v7412_v18 = vpop.permute.xlu0 %3337 }
 0x4a3   : > { %3721 = vperm.xlu0 %4098, %v9518_v36   ;;  %9521 = vst [vmem:[#allocation203_spill] sm:$0xff] %v7395_v57  ;;  %v2568_v14 = vmul.f32 %v7076_v15, %v9522_v4  ;;  %v9523_v22 = vld [vmem:[#allocation382_spill] sm:$0xff]  ;;  %v9524_v21 = vld [vmem:[#allocation384_spill] sm:$0xff]  ;;  %9528 = vst [vmem:[#allocation4_spill] sm:$0xff] %v7412_v18  ;;  %v2633_v54 = vadd.f32 %v2569_v55, %v7082_v28 }
 0x4a4   : > { %9520 = vst [vmem:[#allocation202_spill] sm:$0xff] %v7392_v31  ;;  %v2571_v6 = vmul.f32 %v7076_v15, %v9523_v22  ;;  %v2573_v29 = vmul.f32 %v7076_v15, %v9524_v21  ;;  %v9525_v56 = vld [vmem:[#allocation386_spill] sm:$0xff]  ;;  %v9526_v35 = vld [vmem:[#allocation444_spill] sm:$0xff]  ;;  %v7418_v22 = vadd.f32 %v2240_v50, %v7079_v61  ;;  %v9535_v62 = vld [vmem:[#allocation391_spill] sm:$0xff] }
 0x4a5   : > { %v2575_v0 = vmul.f32 %v7076_v15, %v9525_v56  ;;  %v2957_v36 = vmul.f32 %v7365_v10, %v9526_v35  ;;  %v9529_v40 = vld [vmem:[#allocation88_spill] sm:$0xff]  ;;  %v9533_v56 = vld [vmem:[#allocation389_spill] sm:$0xff]  ;;  %v7425_v35 = vadd.f32 %v2242_v59, %v7089_v52  ;;  %v2572_v18 = vmul.f32 %v7076_v15, %v9535_v62  ;;  %v7446_v55 = vld [vmem:[%s8250_s1 + $0x8] ss:$0 sm:$0xff] }
 0x4a6   : > { %v7415_v4 = vadd.f32 %v2238_v7, %v9529_v40  ;;  %9531 = vst [vmem:[#allocation205_spill] sm:$0xff] %v7418_v22  ;;  %v9532_v21 = vld [vmem:[#allocation388_spill] sm:$0xff]  ;;  %v2570_v57 = vmul.f32 %v7076_v15, %v9533_v56  ;;  %v9537_v40 = vld [vmem:[#allocation47_spill] sm:$0xff]  ;;  %v7434_v61 = vadd.f32 %v2568_v14, %v7099_v3  ;;  %v7437_v50 = vadd.f32 %v2571_v6, %v7117_v39  ;;  %v9540_v39 = vld [vmem:[#allocation446_spill] sm:$0xff]  ;;  %v7456_v56 = vpop.permute.xlu1 %3293 }
 0x4a7   : > { %v2577_v31 = vmul.f32 %v7076_v15, %v9532_v21  ;;  %9534 = vst [vmem:[#allocation206_spill] sm:$0xff] %v7425_v35  ;;  %v9536_v33 = vld [vmem:[#allocation128_spill] sm:$0xff]  ;;  %3669 = vperm.xlu1 %4097, %v9537_v40   ;;  %v9538_v21 = vld [vmem:[#allocation390_spill] sm:$0xff]  ;;  %v7452_v3 = vadd.f32 %v2575_v0, %v7143_v63  ;;  %v3021_v14 = vadd.f32 %v2957_v36, %v2633_v54  ;;  %9541 = vst [vmem:[#allocation207_spill] sm:$0xff] %v7456_v56  ;;  %v3478_v63 = vpop.permute.xlu0 %3477 }
 0x4a8   : > { %9530 = vst [vmem:[#allocation18_spill] sm:$0xff] %v7415_v4  ;;  %v3345_v7 = vmul.f32 %v7408_v2, %v9536_v33  ;;  %v2579_v52 = vmul.f32 %v7076_v15, %v9538_v21  ;;  %v9539_v59 = vld [vmem:[#allocation392_spill] sm:$0xff]  ;;  %v7449_v33 = vadd.f32 %v2573_v29, %v7133_v47  ;;  %v2960_v6 = vmul.f32 %v7365_v10, %v9540_v39  ;;  %v9542_v21 = vld [vmem:[#allocation393_spill] sm:$0xff]  ;;  %v9543_v29 = vld [vmem:[#allocation394_spill] sm:$0xff] }
 0x4a9   : > { %v2581_v28 = vmul.f32 %v7076_v15, %v9539_v59  ;;  %v7459_v62 = vadd.f32 %v2577_v31, %v7159_v17  ;;  %v7462_v40 = vadd.f32 %v2570_v57, %v7105_v26  ;;  %v2574_v59 = vmul.f32 %v7076_v15, %v9542_v21  ;;  %v9544_v54 = vld [vmem:[#allocation138_spill] sm:$0xff]  ;;  %v9545_v17 = vld [vmem:[#allocation49_spill] sm:$0xff]  ;;  %v9546_v57 = vld [vmem:[#allocation395_spill] sm:$0xff] }
 0x4aa   : > { %v2583_v47 = vmul.f32 %v7076_v15, %v9543_v29  ;;  %v2636_v0 = vadd.f32 %v2572_v18, %v7092_v60  ;;  %v3409_v36 = vadd.f32 %v3345_v7, %v3021_v14  ;;  %v3348_v39 = vmul.f32 %v7408_v2, %v9544_v54  ;;  %v9547_v29 = vld [vmem:[#allocation396_spill] sm:$0xff]  ;;  %v7486_v18 = vld [vmem:[%s8251_s2] ss:$0 sm:$0xff]  ;;  %v9548_v7 = vld [vmem:[#allocation397_spill] sm:$0xff] }
 0x4ab   : > { %v3733_v35 = vmul.f32 %v7446_v55, %v3478_v63  ;;  %3677 = vperm.xlu1 %4097, %v9545_v17   ;;  %v7474_v26 = vadd.f32 %v2579_v52, %v7169_v12  ;;  %v7477_v31 = vadd.f32 %v2581_v28, %v7179_v46  ;;  %v2576_v21 = vmul.f32 %v7076_v15, %v9546_v57  ;;  %v9549_v12 = vld [vmem:[#allocation448_spill] sm:$0xff]  ;;  %v7492_v28 = vpop.permute.xlu1 %3301  ;;  %v9551_v57 = vld [vmem:[#allocation398_spill] sm:$0xff]  ;;  %v9552_v22 = vld [vmem:[#allocation399_spill] sm:$0xff] }
 0x4ac   : > { %v2585_v60 = vmul.f32 %v7076_v15, %v9547_v29  ;;  %v2578_v14 = vmul.f32 %v7076_v15, %v9548_v7  ;;  %v3024_v63 = vadd.f32 %v2960_v6, %v2636_v0  ;;  %v2962_v52 = vmul.f32 %v7365_v10, %v9549_v12  ;;  %9550 = vst [vmem:[#allocation208_spill] sm:$0xff] %v7492_v28  ;;  %v9553_v0 = vld [vmem:[#allocation141_spill] sm:$0xff]  ;;  %v9555_v7 = vld [vmem:[#allocation400_spill] sm:$0xff]  ;;  %v9558_v56 = vld [vmem:[#allocation450_spill] sm:$0xff] }
 0x4ad   : > { %v3797_v46 = vadd.f32 %v3733_v35, %v3409_v36  ;;  %v2638_v54 = vadd.f32 %v2574_v59, %v7102_v51  ;;  %v7496_v17 = vadd.f32 %v2583_v47, %v7189_v8  ;;  %v2587_v29 = vmul.f32 %v7076_v15, %v9551_v57  ;;  %v3490_v35 = vpop.permute.xlu0 %3489  ;;  %v9554_v47 = vld [vmem:[#allocation51_spill] sm:$0xff]  ;;  %v9556_v57 = vld [vmem:[#allocation401_spill] sm:$0xff] }
 0x4ae   : > { %v2580_v4 = vmul.f32 %v7076_v15, %v9552_v22  ;;  %v3412_v6 = vadd.f32 %v3348_v39, %v3024_v63  ;;  %v3350_v51 = vmul.f32 %v7408_v2, %v9553_v0  ;;  %v3736_v59 = vmul.f32 %v7446_v55, %v3490_v35  ;;  %v9557_v63 = vld [vmem:[#allocation87_spill] sm:$0xff] }
 0x4af   : > { %v3868_v8 = vadd.f32 %v7486_v18, %v3797_v46  ;;  %3685 = vperm.xlu1 %4097, %v9554_v47   ;;  %v2640_v22 = vadd.f32 %v2576_v21, %v7114_v25  ;;  %v7516_v36 = vadd.f32 %v2585_v60, %v7201_v27  ;;  %v2589_v12 = vmul.f32 %v7076_v15, %v9555_v7  ;;  %v7526_v47 = vpop.permute.xlu1 %3309  ;;  %v9559_v27 = vld [vmem:[#allocation90_spill] sm:$0xff] }
 0x4b0   : > { %v2582_v39 = vmul.f32 %v7076_v15, %v9556_v57  ;;  %v2642_v28 = vadd.f32 %v2578_v14, %v9557_v63  ;;  %v3026_v0 = vadd.f32 %v2962_v52, %v2638_v54  ;;  %v2964_v46 = vmul.f32 %v7365_v10, %v9558_v56  ;;  %v9560_v60 = vld [vmem:[#allocation402_spill] sm:$0xff]  ;;  %v9561_v57 = vld [vmem:[#allocation403_spill] sm:$0xff] }
 0x4b1   : > { %3932 = vst [vmem:[%s7507_s29 + $0x8] sm:$0xff] %v3868_v8  ;;  %v3800_v35 = vadd.f32 %v3736_v59, %v3412_v6  ;;  %v7529_v25 = vadd.f32 %v2587_v29, %v7211_v37  ;;  %v2644_v21 = vadd.f32 %v2580_v4, %v9559_v27  ;;  %v2591_v7 = vmul.f32 %v7076_v15, %v9560_v60  ;;  %v3498_v52 = vpop.permute.xlu0 %3497  ;;  %v9562_v63 = vld [vmem:[#allocation143_spill] sm:$0xff]  ;;  %v9563_v37 = vld [vmem:[#allocation53_spill] sm:$0xff]  ;;  %v9564_v59 = vld [vmem:[#allocation404_spill] sm:$0xff] }
 0x4b2   : > { %v2584_v14 = vmul.f32 %v7076_v15, %v9561_v57  ;;  %v3414_v54 = vadd.f32 %v3350_v51, %v3026_v0  ;;  %v3352_v56 = vmul.f32 %v7408_v2, %v9562_v63  ;;  %v3738_v8 = vmul.f32 %v7446_v55, %v3498_v52  ;;  %v9565_v60 = vld [vmem:[#allocation405_spill] sm:$0xff]  ;;  %v9566_v0 = vld [vmem:[#allocation406_spill] sm:$0xff]  ;;  %v9567_v63 = vld [vmem:[#allocation452_spill] sm:$0xff] }
 0x4b3   : > { %v3871_v6 = vadd.f32 %v7486_v18, %v3800_v35  ;;  %3693 = vperm.xlu1 %4097, %v9563_v37   ;;  %v7542_v4 = vadd.f32 %v2589_v12, %v7223_v45  ;;  %v7545_v29 = vadd.f32 %v2582_v39, %v7156_v19  ;;  %v2593_v27 = vmul.f32 %v7076_v15, %v9564_v59  ;;  %v7556_v45 = vpop.permute.xlu1 %3317  ;;  %v9568_v39 = vld [vmem:[#allocation407_spill] sm:$0xff] }
 0x4b4   : > { %v2586_v51 = vmul.f32 %v7076_v15, %v9565_v60  ;;  %v2595_v57 = vmul.f32 %v7076_v15, %v9566_v0  ;;  %v3028_v35 = vadd.f32 %v2964_v46, %v2640_v22  ;;  %v2966_v52 = vmul.f32 %v7365_v10, %v9567_v63  ;;  %v9569_v60 = vld [vmem:[#allocation408_spill] sm:$0xff]  ;;  %v9570_v63 = vld [vmem:[#allocation145_spill] sm:$0xff] }
 0x4b5   : > { %3935 = vst [vmem:[%s7507_s29 + $0x20] sm:$0xff] %v3871_v6  ;;  %v3802_v37 = vadd.f32 %v3738_v8, %v3414_v54  ;;  %v7559_v19 = vadd.f32 %v2591_v7, %v7243_v5  ;;  %v7562_v12 = vadd.f32 %v2584_v14, %v7166_v34  ;;  %v2588_v59 = vmul.f32 %v7076_v15, %v9568_v39  ;;  %v3506_v46 = vpop.permute.xlu0 %3505  ;;  %v9571_v7 = vld [vmem:[#allocation55_spill] sm:$0xff]  ;;  %v9572_v8 = vld [vmem:[#allocation409_spill] sm:$0xff] }
 0x4b6   : > { %v2597_v22 = vmul.f32 %v7076_v15, %v9569_v60  ;;  %v3416_v0 = vadd.f32 %v3352_v56, %v3028_v35  ;;  %v3354_v54 = vmul.f32 %v7408_v2, %v9570_v63  ;;  %v3740_v5 = vmul.f32 %v7446_v55, %v3506_v46  ;;  %v9573_v60 = vld [vmem:[#allocation410_spill] sm:$0xff] }
 0x4b7   : > { %v3873_v6 = vadd.f32 %v7486_v18, %v3802_v37  ;;  %3701 = vperm.xlu1 %4097, %v9571_v7   ;;  %v7574_v34 = vadd.f32 %v2593_v27, %v7253_v49  ;;  %v7577_v14 = vadd.f32 %v2586_v51, %v7176_v30  ;;  %v2590_v39 = vmul.f32 %v7076_v15, %v9572_v8  ;;  %v9574_v63 = vld [vmem:[#allocation454_spill] sm:$0xff]  ;;  %v7589_v49 = vpop.permute.xlu1 %3325  ;;  %v9575_v51 = vld [vmem:[#allocation411_spill] sm:$0xff] }
 0x4b8   : > { %v2599_v56 = vmul.f32 %v7076_v15, %v9573_v60  ;;  %v7584_v35 = vadd.f32 %v2595_v57, %v7263_v24  ;;  %v3030_v37 = vadd.f32 %v2966_v52, %v2642_v28  ;;  %v2968_v46 = vmul.f32 %v7365_v10, %v9574_v63  ;;  %v9576_v24 = vld [vmem:[#allocation412_spill] sm:$0xff]  ;;  %v9577_v60 = vld [vmem:[#allocation149_spill] sm:$0xff] }
 0x4b9   : > { %3937 = vst [vmem:[%s7507_s29 + $0x30] sm:$0xff] %v3873_v6  ;;  %v3804_v7 = vadd.f32 %v3740_v5, %v3416_v0  ;;  %v7592_v30 = vadd.f32 %v2588_v59, %v7186_v11  ;;  %v7595_v27 = vadd.f32 %v2597_v22, %v7273_v32  ;;  %v2592_v8 = vmul.f32 %v7076_v15, %v9575_v51  ;;  %v3514_v57 = vpop.permute.xlu0 %3513  ;;  %v9578_v59 = vld [vmem:[#allocation57_spill] sm:$0xff]  ;;  %v9580_v51 = vld [vmem:[#allocation451_spill] sm:$0xff] }
 0x4ba   : > { %v2601_v28 = vmul.f32 %v7076_v15, %v9576_v24  ;;  %v3418_v52 = vadd.f32 %v3354_v54, %v3030_v37  ;;  %v3356_v0 = vmul.f32 %v7408_v2, %v9577_v60  ;;  %v3742_v11 = vmul.f32 %v7446_v55, %v3514_v57  ;;  %v9579_v5 = vld [vmem:[#allocation413_spill] sm:$0xff]  ;;  %v9581_v37 = vld [vmem:[#allocation414_spill] sm:$0xff]  ;;  %v9582_v60 = vld [vmem:[#allocation455_spill] sm:$0xff] }
 0x4bb   : > { %v3875_v6 = vadd.f32 %v7486_v18, %v3804_v7  ;;  %3709 = vperm.xlu1 %4097, %v9578_v59   ;;  %v7607_v32 = vadd.f32 %v2590_v39, %v7192_v42  ;;  %v7610_v22 = vadd.f32 %v2599_v56, %v7279_v20  ;;  %v2594_v63 = vmul.f32 %v7076_v15, %v9579_v5  ;;  %v7621_v42 = vpop.permute.xlu1 %3333  ;;  %v9584_v56 = vld [vmem:[#allocation415_spill] sm:$0xff] }
 0x4bc   : > { %v2956_v54 = vmul.f32 %v7365_v10, %v9580_v51  ;;  %v2603_v24 = vmul.f32 %v7076_v15, %v9581_v37  ;;  %v3032_v7 = vadd.f32 %v2968_v46, %v2644_v21  ;;  %v2970_v57 = vmul.f32 %v7365_v10, %v9582_v60  ;;  %9583 = vst [vmem:[#allocation209_spill] sm:$0xff] %v7621_v42  ;;  %v9585_v51 = vld [vmem:[#allocation103_spill] sm:$0xff] }
 0x4bd   : > { %3939 = vst [vmem:[%s7507_s29 + $0x40] sm:$0xff] %v3875_v6  ;;  %v3806_v59 = vadd.f32 %v3742_v11, %v3418_v52  ;;  %v7624_v20 = vadd.f32 %v2592_v8, %v7204_v43  ;;  %v7627_v39 = vadd.f32 %v2601_v28, %v7291_v41  ;;  %v2596_v5 = vmul.f32 %v7076_v15, %v9584_v56  ;;  %v3522_v46 = vpop.permute.xlu0 %3521  ;;  %v9586_v60 = vld [vmem:[#allocation155_spill] sm:$0xff]  ;;  %v9588_v11 = vld [vmem:[#allocation453_spill] sm:$0xff] }
 0x4be   : > { %v3344_v21 = vmul.f32 %v7408_v2, %v9585_v51  ;;  %v3420_v37 = vadd.f32 %v3356_v0, %v3032_v7  ;;  %v3358_v52 = vmul.f32 %v7408_v2, %v9586_v60  ;;  %v3744_v43 = vmul.f32 %v7446_v55, %v3522_v46  ;;  %v9587_v8 = vld [vmem:[#allocation59_spill] sm:$0xff]  ;;  %v9589_v51 = vld [vmem:[#allocation457_spill] sm:$0xff]  ;;  %v9590_v60 = vld [vmem:[#allocation416_spill] sm:$0xff] }
 0x4bf   : > { %v3877_v6 = vadd.f32 %v7486_v18, %v3806_v59  ;;  %3717 = vperm.xlu1 %4097, %v9587_v8   ;;  %v7639_v41 = vadd.f32 %v2594_v63, %v7220_v16  ;;  %v3020_v28 = vadd.f32 %v2956_v54, %v7434_v61  ;;  %v2958_v56 = vmul.f32 %v7365_v10, %v9588_v11  ;;  %v9591_v63 = vld [vmem:[#allocation134_spill] sm:$0xff] }
 0x4c0   : > { %v2972_v0 = vmul.f32 %v7365_v10, %v9589_v51  ;;  %v7647_v7 = vadd.f32 %v2603_v24, %v7307_v48  ;;  %v2605_v59 = vmul.f32 %v7076_v15, %v9590_v60  ;;  %v3034_v46 = vadd.f32 %v2970_v57, %v7545_v29  ;;  %v9592_v11 = vld [vmem:[#allocation162_spill] sm:$0xff]  ;;  %v3474_v48 = vpop.permute.xlu1 %3473 }
 0x4c1   : > { %3941 = vst [vmem:[%s7507_s29 + $0x50] sm:$0xff] %v3877_v6  ;;  %v3808_v8 = vadd.f32 %v3744_v43, %v3420_v37  ;;  %v7654_v16 = vadd.f32 %v2596_v5, %v7230_v23  ;;  %v3408_v61 = vadd.f32 %v3344_v21, %v3020_v28  ;;  %v3346_v54 = vmul.f32 %v7408_v2, %v9591_v63  ;;  %v3530_v24 = vpop.permute.xlu0 %3529  ;;  %v9593_v37 = vld [vmem:[#allocation61_spill] sm:$0xff]  ;;  %v9595_v43 = vld [vmem:[#allocation459_spill] sm:$0xff] }
 0x4c2   : > { %v3360_v51 = vmul.f32 %v7408_v2, %v9592_v11  ;;  %v3422_v42 = vadd.f32 %v3358_v52, %v3034_v46  ;;  %v3732_v29 = vmul.f32 %v7446_v55, %v3474_v48  ;;  %v3746_v57 = vmul.f32 %v7446_v55, %v3530_v24  ;;  %v9594_v5 = vld [vmem:[#allocation5_spill] sm:$0xff] }
 0x4c3   : > { %v3879_v60 = vadd.f32 %v7486_v18, %v3808_v8  ;;  %3725 = vperm.xlu1 %4097, %v9593_v37   ;;  %v3022_v23 = vadd.f32 %v2958_v56, %v7462_v40  ;;  %v2959_v21 = vmul.f32 %v7365_v10, %v9594_v5  ;;  %v3036_v6 = vadd.f32 %v2972_v0, %v7562_v12  ;;  %v9596_v46 = vld [vmem:[#allocation417_spill] sm:$0xff]  ;;  %v9598_v12 = vld [vmem:[#allocation70_spill] sm:$0xff] }
 0x4c4   : > { %v2974_v28 = vmul.f32 %v7365_v10, %v9595_v43  ;;  %v7671_v52 = vadd.f32 %v2605_v59, %v7317_v9  ;;  %v2598_v8 = vmul.f32 %v7076_v15, %v9596_v46  ;;  %v3796_v63 = vadd.f32 %v3732_v29, %v3408_v61  ;;  %v9597_v48 = vld [vmem:[#allocation105_spill] sm:$0xff]  ;;  %v3482_v37 = vpop.permute.xlu1 %3481  ;;  %v9599_v29 = vld [vmem:[#allocation456_spill] sm:$0xff]  ;;  %v9602_v46 = vld [vmem:[#allocation418_spill] sm:$0xff] }
 0x4c5   : > { %3943 = vst [vmem:[%s7507_s29 + $0x60] sm:$0xff] %v3879_v60  ;;  %v3810_v11 = vadd.f32 %v3746_v57, %v3422_v42  ;;  %v3347_v40 = vmul.f32 %v7408_v2, %v9597_v48  ;;  %v3410_v56 = vadd.f32 %v3346_v54, %v3022_v23  ;;  %v3424_v24 = vadd.f32 %v3360_v51, %v3036_v6  ;;  %v3538_v5 = vpop.permute.xlu0 %3537  ;;  %v9600_v57 = vld [vmem:[#allocation461_spill] sm:$0xff]  ;;  %v9601_v6 = vld [vmem:[#allocation191_spill] sm:$0xff] }
 0x4c6   : > { %v3362_v0 = vmul.f32 %v7408_v2, %v9598_v12  ;;  %v3867_v9 = vadd.f32 %v7486_v18, %v3796_v63  ;;  %v3734_v60 = vmul.f32 %v7446_v55, %v3482_v37  ;;  %v3748_v42 = vmul.f32 %v7446_v55, %v3538_v5 }
 0x4c7   : > { %v3881_v59 = vadd.f32 %v7486_v18, %v3810_v11  ;;  %v3023_v61 = vadd.f32 %v2959_v21, %v7437_v50  ;;  %v2961_v54 = vmul.f32 %v7365_v10, %v9599_v29  ;;  %v3038_v51 = vadd.f32 %v2974_v28, %v7577_v14  ;;  %v9603_v50 = vld [vmem:[#allocation107_spill] sm:$0xff]  ;;  %v9604_v28 = vld [vmem:[#allocation69_spill] sm:$0xff] }
 0x4c8   : > { %v2976_v23 = vmul.f32 %v7365_v10, %v9600_v57  ;;  %v7691_v43 = vadd.f32 %v2598_v8, %v9601_v6  ;;  %v2607_v63 = vmul.f32 %v7076_v15, %v9602_v46  ;;  %3931 = vst [vmem:[%s7507_s29] sm:$0xff] %v3867_v9  ;;  %v3798_v11 = vadd.f32 %v3734_v60, %v3410_v56  ;;  %v3486_v5 = vpop.permute.xlu1 %3485  ;;  %v9606_v60 = vld [vmem:[#allocation463_spill] sm:$0xff] }
 0x4c9   : > { %3945 = vst [vmem:[%s7507_s29 + $0x70] sm:$0xff] %v3881_v59  ;;  %v3812_v48 = vadd.f32 %v3748_v42, %v3424_v24  ;;  %v3411_v12 = vadd.f32 %v3347_v40, %v3023_v61  ;;  %v3349_v21 = vmul.f32 %v7408_v2, %v9603_v50  ;;  %v3426_v14 = vadd.f32 %v3362_v0, %v3038_v51  ;;  %v3546_v8 = vpop.permute.xlu0 %3545  ;;  %v9605_v24 = vld [vmem:[#allocation458_spill] sm:$0xff]  ;;  %v9607_v51 = vld [vmem:[#allocation419_spill] sm:$0xff] }
 0x4ca   : > { %v3364_v37 = vmul.f32 %v7408_v2, %v9604_v28  ;;  %v3869_v29 = vadd.f32 %v7486_v18, %v3798_v11  ;;  %v3735_v9 = vmul.f32 %v7446_v55, %v3486_v5  ;;  %v3750_v56 = vmul.f32 %v7446_v55, %v3546_v8 }
 0x4cb   : > { %v3883_v57 = vadd.f32 %v7486_v18, %v3812_v48  ;;  %v3025_v40 = vadd.f32 %v2961_v54, %v7449_v33  ;;  %v2963_v59 = vmul.f32 %v7365_v10, %v9605_v24  ;;  %v3040_v0 = vadd.f32 %v2976_v23, %v7592_v30  ;;  %v9608_v33 = vld [vmem:[#allocation109_spill] sm:$0xff]  ;;  %v9609_v23 = vld [vmem:[#allocation172_spill] sm:$0xff] }
 0x4cc   : > { %v2978_v42 = vmul.f32 %v7365_v10, %v9606_v60  ;;  %v7712_v61 = vadd.f32 %v2607_v63, %v7332_v38  ;;  %v2600_v6 = vmul.f32 %v7076_v15, %v9607_v51  ;;  %3933 = vst [vmem:[%s7507_s29 + $0x10] sm:$0xff] %v3869_v29  ;;  %v3799_v46 = vadd.f32 %v3735_v9, %v3411_v12  ;;  %v3494_v28 = vpop.permute.xlu1 %3493  ;;  %v9613_v24 = vld [vmem:[#allocation420_spill] sm:$0xff] }
 0x4cd   : > { %3947 = vst [vmem:[%s7507_s29 + $0x80] sm:$0xff] %v3883_v57  ;;  %v3814_v11 = vadd.f32 %v3750_v56, %v3426_v14  ;;  %v3413_v48 = vadd.f32 %v3349_v21, %v3025_v40  ;;  %v3351_v54 = vmul.f32 %v7408_v2, %v9608_v33  ;;  %v3428_v30 = vadd.f32 %v3364_v37, %v3040_v0  ;;  %v3554_v38 = vpop.permute.xlu0 %3553  ;;  %v9610_v14 = vld [vmem:[#allocation460_spill] sm:$0xff]  ;;  %v9611_v57 = vld [vmem:[#allocation465_spill] sm:$0xff]  ;;  %v9612_v56 = vld [vmem:[#allocation91_spill] sm:$0xff] }
 0x4ce   : > { %v3366_v50 = vmul.f32 %v7408_v2, %v9609_v23  ;;  %v3870_v63 = vadd.f32 %v7486_v18, %v3799_v46  ;;  %v3737_v8 = vmul.f32 %v7446_v55, %v3494_v28  ;;  %v3752_v12 = vmul.f32 %v7446_v55, %v3554_v38 }
 0x4cf   : > { %v3885_v5 = vadd.f32 %v7486_v18, %v3814_v11  ;;  %v3027_v21 = vadd.f32 %v2963_v59, %v7452_v3  ;;  %v2965_v29 = vmul.f32 %v7365_v10, %v9610_v14  ;;  %v3042_v37 = vadd.f32 %v2978_v42, %v7607_v32  ;;  %v9614_v3 = vld [vmem:[#allocation111_spill] sm:$0xff]  ;;  %v9619_v14 = vld [vmem:[#allocation421_spill] sm:$0xff] }
 0x4d0   : > { %v2980_v9 = vmul.f32 %v7365_v10, %v9611_v57  ;;  %v7733_v40 = vadd.f32 %v2600_v6, %v9612_v56  ;;  %v2609_v0 = vmul.f32 %v7076_v15, %v9613_v24  ;;  %3934 = vst [vmem:[%s7507_s29 + $0x18] sm:$0xff] %v3870_v63  ;;  %v3801_v60 = vadd.f32 %v3737_v8, %v3413_v48  ;;  %v9615_v42 = vld [vmem:[#allocation71_spill] sm:$0xff]  ;;  %v3502_v33 = vpop.permute.xlu1 %3501 }
 0x4d1   : > { %3949 = vst [vmem:[%s7507_s29 + $0x90] sm:$0xff] %v3885_v5  ;;  %v3816_v51 = vadd.f32 %v3752_v12, %v3428_v30  ;;  %v3415_v46 = vadd.f32 %v3351_v54, %v3027_v21  ;;  %v3353_v59 = vmul.f32 %v7408_v2, %v9614_v3  ;;  %v3430_v32 = vadd.f32 %v3366_v50, %v3042_v37  ;;  %v3562_v6 = vpop.permute.xlu0 %3561  ;;  %v9616_v30 = vld [vmem:[#allocation462_spill] sm:$0xff]  ;;  %v9617_v5 = vld [vmem:[#allocation467_spill] sm:$0xff] }
 0x4d2   : > { %v3368_v11 = vmul.f32 %v7408_v2, %v9615_v42  ;;  %v3872_v23 = vadd.f32 %v7486_v18, %v3801_v60  ;;  %v3739_v38 = vmul.f32 %v7446_v55, %v3502_v33  ;;  %v3754_v48 = vmul.f32 %v7446_v55, %v3562_v6  ;;  %v9618_v12 = vld [vmem:[#allocation198_spill] sm:$0xff] }
 0x4d3   : > { %v3887_v28 = vadd.f32 %v7486_v18, %v3816_v51  ;;  %v3029_v54 = vadd.f32 %v2965_v29, %v7459_v62  ;;  %v2967_v63 = vmul.f32 %v7365_v10, %v9616_v30  ;;  %v3044_v50 = vadd.f32 %v2980_v9, %v7624_v20  ;;  %v9620_v62 = vld [vmem:[#allocation117_spill] sm:$0xff] }
 0x4d4   : > { %v2982_v8 = vmul.f32 %v7365_v10, %v9617_v5  ;;  %v7754_v21 = vadd.f32 %v2609_v0, %v9618_v12  ;;  %v2602_v37 = vmul.f32 %v7076_v15, %v9619_v14  ;;  %3936 = vst [vmem:[%s7507_s29 + $0x28] sm:$0xff] %v3872_v23  ;;  %v3803_v57 = vadd.f32 %v3739_v38, %v3415_v46  ;;  %v9621_v9 = vld [vmem:[#allocation173_spill] sm:$0xff]  ;;  %v3510_v51 = vpop.permute.xlu1 %3509  ;;  %v9624_v38 = vld [vmem:[#allocation192_spill] sm:$0xff] }
 0x4d5   : > { %3951 = vst [vmem:[%s7507_s29 + $0xa0] sm:$0xff] %v3887_v28  ;;  %v3818_v56 = vadd.f32 %v3754_v48, %v3430_v32  ;;  %v3417_v24 = vadd.f32 %v3353_v59, %v3029_v54  ;;  %v3355_v29 = vmul.f32 %v7408_v2, %v9620_v62  ;;  %v3432_v20 = vadd.f32 %v3368_v11, %v3044_v50  ;;  %v3570_v0 = vpop.permute.xlu0 %3569  ;;  %v9622_v32 = vld [vmem:[#allocation464_spill] sm:$0xff]  ;;  %v9623_v23 = vld [vmem:[#allocation469_spill] sm:$0xff]  ;;  %v9625_v54 = vld [vmem:[#allocation422_spill] sm:$0xff] }
 0x4d6   : > { %v3370_v60 = vmul.f32 %v7408_v2, %v9621_v9  ;;  %v3874_v3 = vadd.f32 %v7486_v18, %v3803_v57  ;;  %v3741_v33 = vmul.f32 %v7446_v55, %v3510_v51  ;;  %v3756_v46 = vmul.f32 %v7446_v55, %v3570_v0  ;;  %v9629_v0 = vld [vmem:[#allocation471_spill] sm:$0xff] }
 0x4d7   : > { %v3889_v42 = vadd.f32 %v7486_v18, %v3818_v56  ;;  %v3031_v59 = vadd.f32 %v2967_v63, %v7474_v26  ;;  %v2969_v6 = vmul.f32 %v7365_v10, %v9622_v32  ;;  %v3046_v11 = vadd.f32 %v2982_v8, %v7639_v41  ;;  %v9626_v26 = vld [vmem:[#allocation129_spill] sm:$0xff] }
 0x4d8   : > { %v2984_v28 = vmul.f32 %v7365_v10, %v9623_v23  ;;  %v7775_v48 = vadd.f32 %v2602_v37, %v9624_v38  ;;  %v2611_v30 = vmul.f32 %v7076_v15, %v9625_v54  ;;  %3938 = vst [vmem:[%s7507_s29 + $0x38] sm:$0xff] %v3874_v3  ;;  %v3805_v50 = vadd.f32 %v3741_v33, %v3417_v24  ;;  %v9627_v8 = vld [vmem:[#allocation177_spill] sm:$0xff]  ;;  %v3518_v57 = vpop.permute.xlu1 %3517  ;;  %v9630_v33 = vld [vmem:[#allocation423_spill] sm:$0xff]  ;;  %v9632_v23 = vld [vmem:[#allocation78_spill] sm:$0xff] }
 0x4d9   : > { %3953 = vst [vmem:[%s7507_s29 + $0xb0] sm:$0xff] %v3889_v42  ;;  %v3820_v5 = vadd.f32 %v3756_v46, %v3432_v20  ;;  %v3419_v12 = vadd.f32 %v3355_v29, %v3031_v59  ;;  %v3357_v63 = vmul.f32 %v7408_v2, %v9626_v26  ;;  %v3434_v41 = vadd.f32 %v3370_v60, %v3046_v11  ;;  %v3578_v37 = vpop.permute.xlu0 %3577  ;;  %v9628_v20 = vld [vmem:[#allocation466_spill] sm:$0xff]  ;;  %v9633_v26 = vld [vmem:[#allocation468_spill] sm:$0xff] }
 0x4da   : > { %v3372_v14 = vmul.f32 %v7408_v2, %v9627_v8  ;;  %v3876_v56 = vadd.f32 %v7486_v18, %v3805_v50  ;;  %v3743_v9 = vmul.f32 %v7446_v55, %v3518_v57  ;;  %v3758_v24 = vmul.f32 %v7446_v55, %v3578_v37  ;;  %v9634_v8 = vld [vmem:[#allocation473_spill] sm:$0xff] }
 0x4db   : > { %v3891_v62 = vadd.f32 %v7486_v18, %v3820_v5  ;;  %v3033_v29 = vadd.f32 %v2969_v6, %v7477_v31  ;;  %v2971_v51 = vmul.f32 %v7365_v10, %v9628_v20  ;;  %v3048_v60 = vadd.f32 %v2984_v28, %v7654_v16  ;;  %v9631_v31 = vld [vmem:[#allocation135_spill] sm:$0xff]  ;;  %v9635_v57 = vld [vmem:[#allocation193_spill] sm:$0xff] }
 0x4dc   : > { %v2986_v3 = vmul.f32 %v7365_v10, %v9629_v0  ;;  %v7796_v42 = vadd.f32 %v2611_v30, %v7352_v44  ;;  %v2604_v46 = vmul.f32 %v7076_v15, %v9630_v33  ;;  %3940 = vst [vmem:[%s7507_s29 + $0x48] sm:$0xff] %v3876_v56  ;;  %v3807_v59 = vadd.f32 %v3743_v9, %v3419_v12  ;;  %v3526_v38 = vpop.permute.xlu1 %3525  ;;  %v9636_v56 = vld [vmem:[#allocation424_spill] sm:$0xff]  ;;  %v9637_v20 = vld [vmem:[#allocation139_spill] sm:$0xff] }
 0x4dd   : > { %3955 = vst [vmem:[%s7507_s29 + $0xc0] sm:$0xff] %v3891_v62  ;;  %v3822_v32 = vadd.f32 %v3758_v24, %v3434_v41  ;;  %v3421_v11 = vadd.f32 %v3357_v63, %v3033_v29  ;;  %v3359_v6 = vmul.f32 %v7408_v2, %v9631_v31  ;;  %v3436_v16 = vadd.f32 %v3372_v14, %v3048_v60  ;;  %v3586_v44 = vpop.permute.xlu0 %3585  ;;  %v9639_v31 = vld [vmem:[#allocation470_spill] sm:$0xff] }
 0x4de   : > { %v3374_v28 = vmul.f32 %v7408_v2, %v9632_v23  ;;  %v3878_v54 = vadd.f32 %v7486_v18, %v3807_v59  ;;  %v3745_v50 = vmul.f32 %v7446_v55, %v3526_v38  ;;  %v3760_v5 = vmul.f32 %v7446_v55, %v3586_v44  ;;  %v9640_v23 = vld [vmem:[#allocation475_spill] sm:$0xff]  ;;  %v9641_v44 = vld [vmem:[#allocation425_spill] sm:$0xff] }
 0x4df   : > { %v3893_v30 = vadd.f32 %v7486_v18, %v3822_v32  ;;  %v3035_v12 = vadd.f32 %v2971_v51, %v7496_v17  ;;  %v2973_v63 = vmul.f32 %v7365_v10, %v9633_v26  ;;  %v3050_v41 = vadd.f32 %v2986_v3, %v7691_v43  ;;  %v9638_v43 = vld [vmem:[#allocation182_spill] sm:$0xff]  ;;  %v9643_v26 = vld [vmem:[#allocation184_spill] sm:$0xff] }
 0x4e0   : > { %v2988_v14 = vmul.f32 %v7365_v10, %v9634_v8  ;;  %v2668_v37 = vadd.f32 %v2604_v46, %v9635_v57  ;;  %v2613_v62 = vmul.f32 %v7076_v15, %v9636_v56  ;;  %3942 = vst [vmem:[%s7507_s29 + $0x58] sm:$0xff] %v3878_v54  ;;  %v3809_v9 = vadd.f32 %v3745_v50, %v3421_v11  ;;  %v3534_v0 = vpop.permute.xlu1 %3533 }
 0x4e1   : > { %3957 = vst [vmem:[%s7507_s29 + $0xd0] sm:$0xff] %v3893_v30  ;;  %v3824_v24 = vadd.f32 %v3760_v5, %v3436_v16  ;;  %v3423_v29 = vadd.f32 %v3359_v6, %v3035_v12  ;;  %v3361_v17 = vmul.f32 %v7408_v2, %v9637_v20  ;;  %v3438_v51 = vadd.f32 %v3374_v28, %v3050_v41  ;;  %v3594_v3 = vpop.permute.xlu0 %3593  ;;  %v9645_v20 = vld [vmem:[#allocation477_spill] sm:$0xff] }
 0x4e2   : > { %v3376_v60 = vmul.f32 %v7408_v2, %v9638_v43  ;;  %v3880_v33 = vadd.f32 %v7486_v18, %v3809_v9  ;;  %v3747_v59 = vmul.f32 %v7446_v55, %v3534_v0  ;;  %v3762_v32 = vmul.f32 %v7446_v55, %v3594_v3  ;;  %v9644_v9 = vld [vmem:[#allocation472_spill] sm:$0xff] }
 0x4e3   : > { %v3895_v46 = vadd.f32 %v7486_v18, %v3824_v24  ;;  %v3037_v11 = vadd.f32 %v2973_v63, %v7516_v36  ;;  %v2975_v6 = vmul.f32 %v7365_v10, %v9639_v31  ;;  %v3052_v16 = vadd.f32 %v2988_v14, %v7733_v40  ;;  %v9642_v36 = vld [vmem:[#allocation142_spill] sm:$0xff] }
 0x4e4   : > { %v2990_v28 = vmul.f32 %v7365_v10, %v9640_v23  ;;  %v7836_v38 = vadd.f32 %v2613_v62, %v7362_v1  ;;  %v2606_v54 = vmul.f32 %v7076_v15, %v9641_v44  ;;  %3944 = vst [vmem:[%s7507_s29 + $0x68] sm:$0xff] %v3880_v33  ;;  %v3811_v30 = vadd.f32 %v3747_v59, %v3423_v29  ;;  %v3542_v41 = vpop.permute.xlu1 %3541  ;;  %v9648_v59 = vld [vmem:[#allocation144_spill] sm:$0xff] }
 0x4e5   : > { %3959 = vst [vmem:[%s7507_s29 + $0xe0] sm:$0xff] %v3895_v46  ;;  %v3826_v50 = vadd.f32 %v3762_v32, %v3438_v51  ;;  %v3425_v5 = vadd.f32 %v3361_v17, %v3037_v11  ;;  %v3363_v12 = vmul.f32 %v7408_v2, %v9642_v36  ;;  %v3440_v40 = vadd.f32 %v3376_v60, %v3052_v16  ;;  %v3602_v1 = vpop.permute.xlu0 %3601  ;;  %v9646_v51 = vld [vmem:[#allocation93_spill] sm:$0xff]  ;;  %v9647_v60 = vld [vmem:[#allocation426_spill] sm:$0xff]  ;;  %v9651_v36 = vld [vmem:[#allocation479_spill] sm:$0xff] }
 0x4e6   : > { %v3378_v63 = vmul.f32 %v7408_v2, %v9643_v26  ;;  %v3882_v8 = vadd.f32 %v7486_v18, %v3811_v30  ;;  %v3749_v57 = vmul.f32 %v7446_v55, %v3542_v41  ;;  %v3764_v56 = vmul.f32 %v7446_v55, %v3602_v1  ;;  %v9650_v30 = vld [vmem:[#allocation474_spill] sm:$0xff]  ;;  %v9652_v26 = vld [vmem:[#allocation427_spill] sm:$0xff] }
 0x4e7   : > { %v3897_v14 = vadd.f32 %v7486_v18, %v3826_v50  ;;  %v3039_v62 = vadd.f32 %v2975_v6, %v7529_v25  ;;  %v2977_v24 = vmul.f32 %v7365_v10, %v9644_v9  ;;  %v3054_v29 = vadd.f32 %v2990_v28, %v7775_v48  ;;  %v9649_v48 = vld [vmem:[#allocation185_spill] sm:$0xff] }
 0x4e8   : > { %v2992_v17 = vmul.f32 %v7365_v10, %v9645_v20  ;;  %v2670_v43 = vadd.f32 %v2606_v54, %v9646_v51  ;;  %v2615_v0 = vmul.f32 %v7076_v15, %v9647_v60  ;;  %3946 = vst [vmem:[%s7507_s29 + $0x78] sm:$0xff] %v3882_v8  ;;  %v3813_v3 = vadd.f32 %v3749_v57, %v3425_v5  ;;  %v3550_v31 = vpop.permute.xlu1 %3549  ;;  %v9654_v57 = vld [vmem:[#allocation187_spill] sm:$0xff]  ;;  %v9655_v51 = vld [vmem:[#allocation476_spill] sm:$0xff] }
 0x4e9   : > { %3961 = vst [vmem:[%s7507_s29 + $0xf0] sm:$0xff] %v3897_v14  ;;  %v3828_v33 = vadd.f32 %v3764_v56, %v3440_v40  ;;  %v3427_v46 = vadd.f32 %v3363_v12, %v3039_v62  ;;  %v3365_v25 = vmul.f32 %v7408_v2, %v9648_v59  ;;  %v3442_v32 = vadd.f32 %v3378_v63, %v3054_v29  ;;  %v3610_v6 = vpop.permute.xlu0 %3609  ;;  %v9653_v14 = vld [vmem:[#allocation146_spill] sm:$0xff] }
 0x4ea   : > { %v3380_v11 = vmul.f32 %v7408_v2, %v9649_v48  ;;  %v3884_v16 = vadd.f32 %v7486_v18, %v3813_v3  ;;  %v3751_v28 = vmul.f32 %v7446_v55, %v3550_v31  ;;  %v3766_v44 = vmul.f32 %v7446_v55, %v3610_v6  ;;  %v9656_v3 = vld [vmem:[#allocation481_spill] sm:$0xff]  ;;  %v9659_v6 = vld [vmem:[#allocation150_spill] sm:$0xff] }
 0x4eb   : > { %v3899_v23 = vadd.f32 %v7486_v18, %v3828_v33  ;;  %v3041_v54 = vadd.f32 %v2977_v24, %v7542_v4  ;;  %v2979_v50 = vmul.f32 %v7365_v10, %v9650_v30  ;;  %v3056_v5 = vadd.f32 %v2992_v17, %v2668_v37 }
 0x4ec   : > { %v2994_v12 = vmul.f32 %v7365_v10, %v9651_v36  ;;  %v7875_v40 = vadd.f32 %v2615_v0, %v7376_v13  ;;  %v2608_v63 = vmul.f32 %v7076_v15, %v9652_v26  ;;  %3948 = vst [vmem:[%s7507_s29 + $0x88] sm:$0xff] %v3884_v16  ;;  %v3815_v41 = vadd.f32 %v3751_v28, %v3427_v46  ;;  %v3558_v62 = vpop.permute.xlu1 %3557  ;;  %v9657_v46 = vld [vmem:[#allocation195_spill] sm:$0xff] }
 0x4ed   : > { %3963 = vst [vmem:[%s7507_s29 + $0x100] sm:$0xff] %v3899_v23  ;;  %v3830_v1 = vadd.f32 %v3766_v44, %v3442_v32  ;;  %v3429_v8 = vadd.f32 %v3365_v25, %v3041_v54  ;;  %v3367_v4 = vmul.f32 %v7408_v2, %v9653_v14  ;;  %v3444_v37 = vadd.f32 %v3380_v11, %v3056_v5  ;;  %v3618_v13 = vpop.permute.xlu0 %3617  ;;  %v9658_v25 = vld [vmem:[#allocation429_spill] sm:$0xff] }
 0x4ee   : > { %v3382_v56 = vmul.f32 %v7408_v2, %v9654_v57  ;;  %v3886_v9 = vadd.f32 %v7486_v18, %v3815_v41  ;;  %v3753_v29 = vmul.f32 %v7446_v55, %v3558_v62  ;;  %v3768_v20 = vmul.f32 %v7446_v55, %v3618_v13  ;;  %v9662_v41 = vld [vmem:[#allocation483_spill] sm:$0xff]  ;;  %v9665_v13 = vld [vmem:[#allocation156_spill] sm:$0xff] }
 0x4ef   : > { %v3901_v24 = vadd.f32 %v7486_v18, %v3830_v1  ;;  %v3043_v17 = vadd.f32 %v2979_v50, %v7559_v19  ;;  %v2981_v60 = vmul.f32 %v7365_v10, %v9655_v51  ;;  %v3058_v0 = vadd.f32 %v2994_v12, %v2670_v43  ;;  %v9660_v43 = vld [vmem:[#allocation14_spill] sm:$0xff] }
 0x4f0   : > { %v2996_v33 = vmul.f32 %v7365_v10, %v9656_v3  ;;  %v2672_v59 = vadd.f32 %v2608_v63, %v9657_v46  ;;  %v2610_v32 = vmul.f32 %v7076_v15, %v9658_v25  ;;  %3950 = vst [vmem:[%s7507_s29 + $0x98] sm:$0xff] %v3886_v9  ;;  %v3817_v48 = vadd.f32 %v3753_v29, %v3429_v8  ;;  %v3566_v28 = vpop.permute.xlu1 %3565  ;;  %v9661_v12 = vld [vmem:[#allocation478_spill] sm:$0xff]  ;;  %v9663_v8 = vld [vmem:[#allocation196_spill] sm:$0xff] }
 0x4f1   : > { %3965 = vst [vmem:[%s7507_s29 + $0x110] sm:$0xff] %v3901_v24  ;;  %v3832_v11 = vadd.f32 %v3768_v20, %v3444_v37  ;;  %v3431_v31 = vadd.f32 %v3367_v4, %v3043_v17  ;;  %v3369_v19 = vmul.f32 %v7408_v2, %v9659_v6  ;;  %v3446_v16 = vadd.f32 %v3382_v56, %v3058_v0  ;;  %v3626_v44 = vpop.permute.xlu0 %3625  ;;  %v9664_v4 = vld [vmem:[#allocation431_spill] sm:$0xff]  ;;  %v9666_v24 = vld [vmem:[#allocation92_spill] sm:$0xff]  ;;  %v9670_v6 = vld [vmem:[#allocation433_spill] sm:$0xff] }
 0x4f2   : > { %v3384_v23 = vmul.f32 %v7408_v2, %v9660_v43  ;;  %v3888_v54 = vadd.f32 %v7486_v18, %v3817_v48  ;;  %v3755_v50 = vmul.f32 %v7446_v55, %v3566_v28  ;;  %v3770_v5 = vmul.f32 %v7446_v55, %v3626_v44  ;;  %v9667_v46 = vld [vmem:[#allocation480_spill] sm:$0xff]  ;;  %v9671_v28 = vld [vmem:[#allocation163_spill] sm:$0xff] }
 0x4f3   : > { %v3903_v30 = vadd.f32 %v7486_v18, %v3832_v11  ;;  %v3045_v36 = vadd.f32 %v2981_v60, %v7574_v34  ;;  %v2983_v26 = vmul.f32 %v7365_v10, %v9661_v12  ;;  %v3060_v63 = vadd.f32 %v2996_v33, %v2672_v59  ;;  %v9669_v11 = vld [vmem:[#allocation2_spill] sm:$0xff] }
 0x4f4   : > { %v2998_v1 = vmul.f32 %v7365_v10, %v9662_v41  ;;  %v2674_v14 = vadd.f32 %v2610_v32, %v9663_v8  ;;  %v2612_v37 = vmul.f32 %v7076_v15, %v9664_v4  ;;  %3952 = vst [vmem:[%s7507_s29 + $0xa8] sm:$0xff] %v3888_v54  ;;  %v3819_v57 = vadd.f32 %v3755_v50, %v3431_v31  ;;  %v3574_v20 = vpop.permute.xlu1 %3573  ;;  %v9668_v32 = vld [vmem:[#allocation485_spill] sm:$0xff]  ;;  %v9672_v54 = vld [vmem:[#allocation194_spill] sm:$0xff]  ;;  %v9674_v4 = vld [vmem:[#allocation487_spill] sm:$0xff] }
 0x4f5   : > { %3967 = vst [vmem:[%s7507_s29 + $0x120] sm:$0xff] %v3903_v30  ;;  %v3834_v56 = vadd.f32 %v3770_v5, %v3446_v16  ;;  %v3433_v62 = vadd.f32 %v3369_v19, %v3045_v36  ;;  %v3371_v34 = vmul.f32 %v7408_v2, %v9665_v13  ;;  %v3448_v9 = vadd.f32 %v3384_v23, %v3060_v63  ;;  %v3634_v17 = vpop.permute.xlu0 %3633 }
 0x4f6   : > { %v3386_v29 = vmul.f32 %v7408_v2, %v9666_v24  ;;  %v3890_v51 = vadd.f32 %v7486_v18, %v3819_v57  ;;  %v3757_v0 = vmul.f32 %v7446_v55, %v3574_v20  ;;  %v3772_v3 = vmul.f32 %v7446_v55, %v3634_v17  ;;  %v9675_v57 = vld [vmem:[#allocation16_spill] sm:$0xff]  ;;  %v9678_v17 = vld [vmem:[#allocation98_spill] sm:$0xff] }
 0x4f7   : > { %v3905_v60 = vadd.f32 %v7486_v18, %v3834_v56  ;;  %v3047_v33 = vadd.f32 %v2983_v26, %v7584_v35  ;;  %v2985_v59 = vmul.f32 %v7365_v10, %v9667_v46  ;;  %v3062_v25 = vadd.f32 %v2998_v1, %v2674_v14  ;;  %v9673_v1 = vld [vmem:[#allocation482_spill] sm:$0xff] }
 0x4f8   : > { %v3000_v48 = vmul.f32 %v7365_v10, %v9668_v32  ;;  %v2676_v31 = vadd.f32 %v2612_v37, %v9669_v11  ;;  %v2614_v19 = vmul.f32 %v7076_v15, %v9670_v6  ;;  %3954 = vst [vmem:[%s7507_s29 + $0xb8] sm:$0xff] %v3890_v51  ;;  %v3821_v16 = vadd.f32 %v3757_v0, %v3433_v62  ;;  %v3582_v50 = vpop.permute.xlu1 %3581  ;;  %v9676_v62 = vld [vmem:[#allocation435_spill] sm:$0xff]  ;;  %v9679_v32 = vld [vmem:[#allocation484_spill] sm:$0xff] }
 0x4f9   : > { %3969 = vst [vmem:[%s7507_s29 + $0x130] sm:$0xff] %v3905_v60  ;;  %v3836_v43 = vadd.f32 %v3772_v3, %v3448_v9  ;;  %v3435_v23 = vadd.f32 %v3371_v34, %v3047_v33  ;;  %v3373_v35 = vmul.f32 %v7408_v2, %v9671_v28  ;;  %v3450_v44 = vadd.f32 %v3386_v29, %v3062_v25  ;;  %v3642_v5 = vpop.permute.xlu0 %3641  ;;  %v9677_v29 = vld [vmem:[#allocation169_spill] sm:$0xff] }
 0x4fa   : > { %v3388_v30 = vmul.f32 %v7408_v2, %v9672_v54  ;;  %v3892_v36 = vadd.f32 %v7486_v18, %v3821_v16  ;;  %v3759_v26 = vmul.f32 %v7446_v55, %v3582_v50  ;;  %v3774_v63 = vmul.f32 %v7446_v55, %v3642_v5  ;;  %v9681_v16 = vld [vmem:[#allocation437_spill] sm:$0xff] }
 0x4fb   : > { %v3907_v12 = vadd.f32 %v7486_v18, %v3836_v43  ;;  %v3049_v41 = vadd.f32 %v2985_v59, %v7595_v27  ;;  %v2987_v8 = vmul.f32 %v7365_v10, %v9673_v1  ;;  %v3064_v14 = vadd.f32 %v3000_v48, %v2676_v31  ;;  %v9680_v31 = vld [vmem:[#allocation490_spill] sm:$0xff] }
 0x4fc   : > { %v3002_v37 = vmul.f32 %v7365_v10, %v9674_v4  ;;  %v2678_v56 = vadd.f32 %v2614_v19, %v9675_v57  ;;  %v2616_v13 = vmul.f32 %v7076_v15, %v9676_v62  ;;  %3956 = vst [vmem:[%s7507_s29 + $0xc8] sm:$0xff] %v3892_v36  ;;  %v3823_v34 = vadd.f32 %v3759_v26, %v3435_v23  ;;  %v3590_v60 = vpop.permute.xlu1 %3589  ;;  %v9686_v57 = vld [vmem:[#allocation439_spill] sm:$0xff] }
 0x4fd   : > { %3971 = vst [vmem:[%s7507_s29 + $0x140] sm:$0xff] %v3907_v12  ;;  %v3838_v9 = vadd.f32 %v3774_v63, %v3450_v44  ;;  %v3437_v24 = vadd.f32 %v3373_v35, %v3049_v41  ;;  %v3375_v27 = vmul.f32 %v7408_v2, %v9677_v29  ;;  %v3452_v20 = vadd.f32 %v3388_v30, %v3064_v14  ;;  %v3650_v0 = vpop.permute.xlu0 %3649  ;;  %v9682_v44 = vld [vmem:[#allocation72_spill] sm:$0xff]  ;;  %v9683_v41 = vld [vmem:[#allocation486_spill] sm:$0xff] }
 0x4fe   : > { %v3390_v51 = vmul.f32 %v7408_v2, %v9678_v17  ;;  %v3894_v3 = vadd.f32 %v7486_v18, %v3823_v34  ;;  %v3761_v46 = vmul.f32 %v7446_v55, %v3590_v60  ;;  %v3776_v59 = vmul.f32 %v7446_v55, %v3650_v0  ;;  %v9684_v14 = vld [vmem:[#allocation492_spill] sm:$0xff] }
 0x4ff   : > { %v3909_v33 = vadd.f32 %v7486_v18, %v3838_v9  ;;  %v3051_v25 = vadd.f32 %v2987_v8, %v7610_v22  ;;  %v2989_v48 = vmul.f32 %v7365_v10, %v9679_v32  ;;  %v3066_v11 = vadd.f32 %v3002_v37, %v2678_v56  ;;  %v9687_v9 = vld [vmem:[#allocation10_spill] sm:$0xff]  ;;  %v9688_v29 = vld [vmem:[#allocation204_spill] sm:$0xff] }
 0x500   : > { %v3004_v6 = vmul.f32 %v7365_v10, %v9680_v31  ;;  %v2680_v19 = vadd.f32 %v2616_v13, %v7349_v53  ;;  %v2618_v43 = vmul.f32 %v7076_v15, %v9681_v16  ;;  %3958 = vst [vmem:[%s7507_s29 + $0xd8] sm:$0xff] %v3894_v3  ;;  %v3825_v23 = vadd.f32 %v3761_v46, %v3437_v24  ;;  %v3598_v50 = vpop.permute.xlu1 %3597  ;;  %v9689_v46 = vld [vmem:[#allocation489_spill] sm:$0xff]  ;;  %v9690_v32 = vld [vmem:[#allocation494_spill] sm:$0xff] }
 0x501   : > { %3973 = vst [vmem:[%s7507_s29 + $0x150] sm:$0xff] %v3909_v33  ;;  %v3840_v28 = vadd.f32 %v3776_v59, %v3452_v20  ;;  %v3439_v35 = vadd.f32 %v3375_v27, %v3051_v25  ;;  %v3377_v22 = vmul.f32 %v7408_v2, %v9682_v44  ;;  %v3454_v54 = vadd.f32 %v3390_v51, %v3066_v11  ;;  %v3658_v5 = vpop.permute.xlu0 %3657  ;;  %v9691_v11 = vld [vmem:[#allocation200_spill] sm:$0xff]  ;;  %v9694_v44 = vld [vmem:[#allocation207_spill] sm:$0xff] }
 0x502   : > { %v3392_v30 = vmul.f32 %v7408_v2, %v7368_v58  ;;  %v3896_v53 = vadd.f32 %v7486_v18, %v3825_v23  ;;  %v3763_v12 = vmul.f32 %v7446_v55, %v3598_v50  ;;  %v3778_v26 = vmul.f32 %v7446_v55, %v3658_v5  ;;  %v9685_v58 = vld [vmem:[#allocation199_spill] sm:$0xff] }
 0x503   : > { %v3911_v36 = vadd.f32 %v7486_v18, %v3840_v28  ;;  %v3053_v63 = vadd.f32 %v2989_v48, %v7627_v39  ;;  %v2991_v1 = vmul.f32 %v7365_v10, %v9683_v41  ;;  %v3068_v8 = vadd.f32 %v3004_v6, %v2680_v19  ;;  %v9692_v6 = vld [vmem:[#allocation441_spill] sm:$0xff]  ;;  %v9693_v28 = vld [vmem:[#allocation74_spill] sm:$0xff] }
 0x504   : > { %v3006_v4 = vmul.f32 %v7365_v10, %v9684_v14  ;;  %v2682_v37 = vadd.f32 %v2618_v43, %v9685_v58  ;;  %v2620_v56 = vmul.f32 %v7076_v15, %v9686_v57  ;;  %3960 = vst [vmem:[%s7507_s29 + $0xe8] sm:$0xff] %v3896_v53  ;;  %v3827_v62 = vadd.f32 %v3763_v12, %v3439_v35  ;;  %v3606_v20 = vpop.permute.xlu1 %3605  ;;  %v9697_v14 = vld [vmem:[#allocation201_spill] sm:$0xff]  ;;  %v9698_v58 = vld [vmem:[#allocation443_spill] sm:$0xff] }
 0x505   : > { %3975 = vst [vmem:[%s7507_s29 + $0x160] sm:$0xff] %v3911_v36  ;;  %v3842_v13 = vadd.f32 %v3778_v26, %v3454_v54  ;;  %v3441_v34 = vadd.f32 %v3377_v22, %v3053_v63  ;;  %v3379_v39 = vmul.f32 %v7408_v2, %v9687_v9  ;;  %v3456_v24 = vadd.f32 %v3392_v30, %v3068_v8  ;;  %v3666_v17 = vpop.permute.xlu0 %3665  ;;  %v9695_v26 = vld [vmem:[#allocation491_spill] sm:$0xff] }
 0x506   : > { %v3394_v27 = vmul.f32 %v7408_v2, %v9688_v29  ;;  %v3898_v51 = vadd.f32 %v7486_v18, %v3827_v62  ;;  %v3765_v0 = vmul.f32 %v7446_v55, %v3606_v20  ;;  %v3780_v3 = vmul.f32 %v7446_v55, %v3666_v17  ;;  %v8034_v20 = vld [vmem:[%s8250_s1 + $0x8] ss:$0 sm:$0xff] }
 0x507   : > { %v3913_v60 = vadd.f32 %v7486_v18, %v3842_v13  ;;  %v3055_v33 = vadd.f32 %v2991_v1, %v7647_v7  ;;  %v2993_v59 = vmul.f32 %v7365_v10, %v9689_v46  ;;  %v3070_v25 = vadd.f32 %v3006_v4, %v2682_v37  ;;  %v9696_v1 = vld [vmem:[#allocation495_spill] sm:$0xff]  ;;  %v9702_v46 = vld [vmem:[#allocation66_spill] sm:$0xff] }
 0x508   : > { %v3008_v48 = vmul.f32 %v7365_v10, %v9690_v32  ;;  %v2684_v31 = vadd.f32 %v2620_v56, %v9691_v11  ;;  %v2622_v19 = vmul.f32 %v7076_v15, %v9692_v6  ;;  %3962 = vst [vmem:[%s7507_s29 + $0xf8] sm:$0xff] %v3898_v51  ;;  %v3829_v16 = vadd.f32 %v3765_v0, %v3441_v34  ;;  %v3614_v54 = vpop.permute.xlu1 %3613  ;;  %v9700_v34 = vld [vmem:[#allocation208_spill] sm:$0xff]  ;;  %v9701_v0 = vld [vmem:[#allocation493_spill] sm:$0xff] }
 0x509   : > { %3977 = vst [vmem:[%s7507_s29 + $0x170] sm:$0xff] %v3913_v60  ;;  %v3844_v43 = vadd.f32 %v3780_v3, %v3456_v24  ;;  %v3443_v23 = vadd.f32 %v3379_v39, %v3055_v33  ;;  %v3381_v7 = vmul.f32 %v7408_v2, %v9693_v28  ;;  %v3458_v35 = vadd.f32 %v3394_v27, %v3070_v25  ;;  %v3674_v30 = vpop.permute.xlu0 %3673  ;;  %v9703_v25 = vld [vmem:[#allocation203_spill] sm:$0xff]  ;;  %v9704_v32 = vld [vmem:[#allocation445_spill] sm:$0xff] }
 0x50a   : > { %v3396_v22 = vmul.f32 %v7408_v2, %v9694_v44  ;;  %v3900_v50 = vadd.f32 %v7486_v18, %v3829_v16  ;;  %v3767_v53 = vmul.f32 %v7446_v55, %v3614_v54  ;;  %v3782_v36 = vmul.f32 %v7446_v55, %v3674_v30  ;;  %v9699_v55 = vld [vmem:[#allocation174_spill] sm:$0xff] }
 0x50b   : > { %v3915_v5 = vadd.f32 %v7486_v18, %v3844_v43  ;;  %v3057_v12 = vadd.f32 %v2993_v59, %v7671_v52  ;;  %v2995_v63 = vmul.f32 %v7365_v10, %v9695_v26  ;;  %v3072_v41 = vadd.f32 %v3008_v48, %v2684_v31 }
 0x50c   : > { %v3010_v8 = vmul.f32 %v7365_v10, %v9696_v1  ;;  %v2686_v4 = vadd.f32 %v2622_v19, %v9697_v14  ;;  %v2624_v37 = vmul.f32 %v7076_v15, %v9698_v58  ;;  %3964 = vst [vmem:[%s7507_s29 + $0x108] sm:$0xff] %v3900_v50  ;;  %v3831_v57 = vadd.f32 %v3767_v53, %v3443_v23  ;;  %v3622_v39 = vpop.permute.xlu1 %3621  ;;  %v9705_v19 = vld [vmem:[#allocation76_spill] sm:$0xff] }
 0x50d   : > { %3979 = vst [vmem:[%s7507_s29 + $0x180] sm:$0xff] %v3915_v5  ;;  %v3846_v56 = vadd.f32 %v3782_v36, %v3458_v35  ;;  %v3445_v62 = vadd.f32 %v3381_v7, %v3057_v12  ;;  %v3383_v52 = vmul.f32 %v7408_v2, %v9699_v55  ;;  %v3460_v13 = vadd.f32 %v3396_v22, %v3072_v41  ;;  %v3682_v24 = vpop.permute.xlu0 %3681  ;;  %v8055_v7 = vld [vmem:[%s8251_s2] ss:$0 sm:$0xff]  ;;  %v9706_v50 = vld [vmem:[#allocation64_spill] sm:$0xff] }
 0x50e   : > { %v3398_v9 = vmul.f32 %v7408_v2, %v9700_v34  ;;  %v3902_v29 = vadd.f32 %v7486_v18, %v3831_v57  ;;  %v3769_v17 = vmul.f32 %v8034_v20, %v3622_v39  ;;  %v3784_v51 = vmul.f32 %v8034_v20, %v3682_v24  ;;  %v9707_v53 = vld [vmem:[#allocation68_spill] sm:$0xff]  ;;  %v9708_v12 = vld [vmem:[#allocation18_spill] sm:$0xff] }
 0x50f   : > { %v3917_v27 = vadd.f32 %v7486_v18, %v3846_v56  ;;  %v3059_v60 = vadd.f32 %v2995_v63, %v7712_v61  ;;  %v2997_v3 = vmul.f32 %v7365_v10, %v9701_v0  ;;  %v3074_v33 = vadd.f32 %v3010_v8, %v2686_v4  ;;  %v9709_v63 = vld [vmem:[#allocation447_spill] sm:$0xff]  ;;  %v9710_v4 = vld [vmem:[#allocation77_spill] sm:$0xff] }
 0x510   : > { %v3012_v59 = vmul.f32 %v7365_v10, %v9702_v46  ;;  %v2688_v18 = vadd.f32 %v2624_v37, %v9703_v25  ;;  %v2626_v48 = vmul.f32 %v7076_v15, %v9704_v32  ;;  %3966 = vst [vmem:[%s7507_s29 + $0x118] sm:$0xff] %v3902_v29  ;;  %v3833_v11 = vadd.f32 %v3769_v17, %v3445_v62  ;;  %v3630_v23 = vpop.permute.xlu1 %3629  ;;  %v9712_v29 = vld [vmem:[#allocation81_spill] sm:$0xff]  ;;  %v9715_v46 = vld [vmem:[#allocation183_spill] sm:$0xff] }
 0x511   : > { %3981 = vst [vmem:[%s7507_s29 + $0x190] sm:$0xff] %v3917_v27  ;;  %v3848_v31 = vadd.f32 %v3784_v51, %v3460_v13  ;;  %v3447_v6 = vadd.f32 %v3383_v52, %v3059_v60  ;;  %v3385_v61 = vmul.f32 %v7408_v2, %v9705_v19  ;;  %v3462_v16 = vadd.f32 %v3398_v9, %v3074_v33  ;;  %v3690_v28 = vpop.permute.xlu0 %3689  ;;  %v9711_v9 = vld [vmem:[#allocation65_spill] sm:$0xff] }
 0x512   : > { %v3400_v43 = vmul.f32 %v7408_v2, %v7526_v47  ;;  %v3904_v35 = vadd.f32 %v8055_v7, %v3833_v11  ;;  %v3771_v22 = vmul.f32 %v8034_v20, %v3630_v23  ;;  %v3786_v54 = vmul.f32 %v8034_v20, %v3690_v28  ;;  %v9714_v51 = vld [vmem:[#allocation449_spill] sm:$0xff]  ;;  %v9717_v23 = vld [vmem:[#allocation96_spill] sm:$0xff] }
 0x513   : > { %v3919_v44 = vadd.f32 %v8055_v7, %v3848_v31  ;;  %v3061_v30 = vadd.f32 %v2997_v3, %v7754_v21  ;;  %v2999_v47 = vmul.f32 %v7365_v10, %v9706_v50  ;;  %v3076_v5 = vadd.f32 %v3012_v59, %v2688_v18 }
 0x514   : > { %v3014_v36 = vmul.f32 %v7365_v10, %v9707_v53  ;;  %v2690_v26 = vadd.f32 %v2626_v48, %v9708_v12  ;;  %v2628_v41 = vmul.f32 %v7076_v15, %v9709_v63  ;;  %3968 = vst [vmem:[%s7507_s29 + $0x128] sm:$0xff] %v3904_v35  ;;  %v3835_v1 = vadd.f32 %v3771_v22, %v3447_v6  ;;  %v3638_v57 = vpop.permute.xlu1 %3637  ;;  %v9721_v53 = vld [vmem:[#allocation209_spill] sm:$0xff] }
 0x515   : > { %3983 = vst [vmem:[%s7507_s29 + $0x1a0] sm:$0xff] %v3919_v44  ;;  %v3850_v8 = vadd.f32 %v3786_v54, %v3462_v16  ;;  %v3449_v14 = vadd.f32 %v3385_v61, %v3061_v30  ;;  %v3387_v21 = vmul.f32 %v7408_v2, %v9710_v4  ;;  %v3464_v58 = vadd.f32 %v3400_v43, %v3076_v5  ;;  %v3698_v56 = vpop.permute.xlu0 %3697  ;;  %v9716_v61 = vld [vmem:[#allocation67_spill] sm:$0xff]  ;;  %v9719_v44 = vld [vmem:[#allocation206_spill] sm:$0xff] }
 0x516   : > { %v3402_v37 = vmul.f32 %v7408_v2, %v7556_v45  ;;  %v3906_v62 = vadd.f32 %v8055_v7, %v3835_v1  ;;  %v3773_v52 = vmul.f32 %v8034_v20, %v3638_v57  ;;  %v3788_v13 = vmul.f32 %v8034_v20, %v3698_v56  ;;  %v9713_v45 = vld [vmem:[#allocation205_spill] sm:$0xff]  ;;  %v9723_v4 = vld [vmem:[#allocation170_spill] sm:$0xff] }
 0x517   : > { %v3921_v55 = vadd.f32 %v8055_v7, %v3850_v8  ;;  %v3063_v34 = vadd.f32 %v2999_v47, %v7796_v42  ;;  %v3001_v39 = vmul.f32 %v7365_v10, %v9711_v9  ;;  %v3078_v24 = vadd.f32 %v3014_v36, %v2690_v26  ;;  %v9720_v47 = vld [vmem:[#allocation85_spill] sm:$0xff] }
 0x518   : > { %v3016_v27 = vmul.f32 %v7365_v10, %v9712_v29  ;;  %v2692_v17 = vadd.f32 %v2628_v41, %v9713_v45  ;;  %v2630_v60 = vmul.f32 %v7076_v15, %v9714_v51  ;;  %3970 = vst [vmem:[%s7507_s29 + $0x138] sm:$0xff] %v3906_v62  ;;  %v3837_v0 = vadd.f32 %v3773_v52, %v3449_v14  ;;  %v3646_v18 = vpop.permute.xlu1 %3645  ;;  %v9722_v14 = vld [vmem:[#allocation373_spill] sm:$0xff]  ;;  %v9725_v62 = vld [vmem:[#allocation306_spill] sm:$0xff] }
 0x519   : > { %3985 = vst [vmem:[%s7507_s29 + $0x1b0] sm:$0xff] %v3921_v55  ;;  %v3852_v3 = vadd.f32 %v3788_v13, %v3464_v58  ;;  %v3451_v33 = vadd.f32 %v3387_v21, %v3063_v34  ;;  %v3389_v42 = vmul.f32 %v7408_v2, %v9715_v46  ;;  %v3466_v59 = vadd.f32 %v3402_v37, %v3078_v24  ;;  %v3706_v32 = vpop.permute.xlu0 %3705  ;;  %v9724_v37 = vld [vmem:[#allocation80_spill] sm:$0xff]  ;;  %v9726_v55 = vld [vmem:[#allocation137_spill] sm:$0xff]  ;;  %v9727_v13 = vld [vmem:[#allocation202_spill] sm:$0xff] }
 0x51a   : > { %v3404_v25 = vmul.f32 %v7408_v2, %v7589_v49  ;;  %v3908_v48 = vadd.f32 %v8055_v7, %v3837_v0  ;;  %v3775_v31 = vmul.f32 %v8034_v20, %v3646_v18  ;;  %v3790_v6 = vmul.f32 %v8034_v20, %v3706_v32  ;;  %v9718_v49 = vld [vmem:[#allocation428_spill] sm:$0xff]  ;;  %v9728_v24 = vld [vmem:[#allocation430_spill] sm:$0xff] }
 0x51b   : > { %v3923_v11 = vadd.f32 %v8055_v7, %v3852_v3  ;;  %v3065_v19 = vadd.f32 %v3001_v39, %v7836_v38  ;;  %v3003_v16 = vmul.f32 %v7365_v10, %v9716_v61  ;;  %v3080_v43 = vadd.f32 %v3016_v27, %v2692_v17  ;;  %v9729_v45 = vld [vmem:[#allocation186_spill] sm:$0xff]  ;;  %v9732_v18 = vld [vmem:[#allocation84_spill] sm:$0xff]  ;;  %v9735_v61 = vld [vmem:[#allocation95_spill] sm:$0xff] }
 0x51c   : > { %v3018_v28 = vmul.f32 %v7365_v10, %v9717_v23  ;;  %v2617_v35 = vmul.f32 %v7076_v15, %v9718_v49  ;;  %v2694_v22 = vadd.f32 %v2630_v60, %v9719_v44  ;;  %3972 = vst [vmem:[%s7507_s29 + $0x148] sm:$0xff] %v3908_v48  ;;  %v3839_v54 = vadd.f32 %v3775_v31, %v3451_v33  ;;  %v9733_v48 = vld [vmem:[#allocation375_spill] sm:$0xff]  ;;  %v9737_v44 = vld [vmem:[#allocation432_spill] sm:$0xff] }
 0x51d   : > { %3987 = vst [vmem:[%s7507_s29 + $0x1c0] sm:$0xff] %v3923_v11  ;;  %v3854_v30 = vadd.f32 %v3790_v6, %v3466_v59  ;;  %v3453_v50 = vadd.f32 %v3389_v42, %v3065_v19  ;;  %v3391_v38 = vmul.f32 %v7408_v2, %v9720_v47  ;;  %v3468_v5 = vadd.f32 %v3404_v25, %v3080_v43  ;;  %v3654_v12 = vpop.permute.xlu1 %3653  ;;  %v3714_v26 = vpop.permute.xlu0 %3713  ;;  %v9730_v42 = vld [vmem:[#allocation247_spill] sm:$0xff]  ;;  %v9731_v59 = vld [vmem:[#allocation101_spill] sm:$0xff]  ;;  %v9734_v6 = vld [vmem:[#allocation168_spill] sm:$0xff] }
 0x51e   : > { %v3406_v36 = vmul.f32 %v7408_v2, %v9721_v53  ;;  %v3910_v63 = vadd.f32 %v8055_v7, %v3839_v54  ;;  %v3777_v1 = vmul.f32 %v8034_v20, %v3654_v12  ;;  %v3792_v8 = vmul.f32 %v8034_v20, %v3714_v26  ;;  %v9740_v26 = vld [vmem:[#allocation249_spill] sm:$0xff] }
 0x51f   : > { %v3925_v41 = vadd.f32 %v8055_v7, %v3854_v30  ;;  %v2231_v21 = vmul.f32 %v9723_v4, %v9722_v14  ;;  %v3067_v58 = vadd.f32 %v3003_v16, %v7875_v40  ;;  %v3005_v57 = vmul.f32 %v7365_v10, %v9724_v37  ;;  %v9742_v14 = vld [vmem:[#allocation188_spill] sm:$0xff] }
 0x520   : > { %v3082_v56 = vadd.f32 %v3018_v28, %v2694_v22  ;;  %v1845_v52 = vmul.f32 %v9726_v55, %v9725_v62  ;;  %v2681_v34 = vadd.f32 %v2617_v35, %v9727_v13  ;;  %3974 = vst [vmem:[%s7507_s29 + $0x158] sm:$0xff] %v3910_v63  ;;  %v3841_v9 = vadd.f32 %v3777_v1, %v3453_v50  ;;  %v9736_v28 = vld [vmem:[#allocation308_spill] sm:$0xff]  ;;  %v9738_v50 = vld [vmem:[#allocation3_spill] sm:$0xff]  ;;  %v9741_v1 = vld [vmem:[#allocation377_spill] sm:$0xff] }
 0x521   : > { %3989 = vst [vmem:[%s7507_s29 + $0x1d0] sm:$0xff] %v3925_v41  ;;  %v3856_v39 = vadd.f32 %v3792_v8, %v3468_v5  ;;  %v2619_v29 = vmul.f32 %v7076_v15, %v9728_v24  ;;  %v3455_v27 = vadd.f32 %v3391_v38, %v3067_v58  ;;  %v3393_v40 = vmul.f32 %v7408_v2, %v9729_v45  ;;  %v3662_v51 = vpop.permute.xlu1 %3661  ;;  %v9745_v13 = vld [vmem:[#allocation310_spill] sm:$0xff]  ;;  %v9747_v45 = vld [vmem:[#allocation89_spill] sm:$0xff] }
 0x522   : > { %v3470_v17 = vadd.f32 %v3406_v36, %v3082_v56  ;;  %v3722_v60 = vpop.permute.xlu0 %3721  ;;  %v3912_v0 = vadd.f32 %v8055_v7, %v3841_v9  ;;  %v3779_v33 = vmul.f32 %v8034_v20, %v3662_v51  ;;  %v1459_v25 = vmul.f32 %v9731_v59, %v9730_v42  ;;  %v9739_v36 = vld [vmem:[#allocation126_spill] sm:$0xff]  ;;  %v9750_v42 = vld [vmem:[#allocation379_spill] sm:$0xff] }
 0x523   : > { %v3927_v3 = vadd.f32 %v8055_v7, %v3856_v39  ;;  %v3794_v46 = vmul.f32 %v8034_v20, %v3722_v60  ;;  %v2295_v32 = vadd.f32 %v2231_v21, %v9732_v18  ;;  %v2233_v11 = vmul.f32 %v9723_v4, %v9733_v48  ;;  %v9743_v21 = vld [vmem:[#allocation63_spill] sm:$0xff]  ;;  %v9746_v39 = vld [vmem:[#allocation434_spill] sm:$0xff]  ;;  %v9748_v60 = vld [vmem:[#allocation133_spill] sm:$0xff] }
 0x524   : > { %v3069_v31 = vadd.f32 %v3005_v57, %v2681_v34  ;;  %v1909_v19 = vadd.f32 %v1845_v52, %v9734_v6  ;;  %v3007_v16 = vmul.f32 %v7365_v10, %v9735_v61  ;;  %3976 = vst [vmem:[%s7507_s29 + $0x168] sm:$0xff] %v3912_v0  ;;  %v3843_v43 = vadd.f32 %v3779_v33, %v3455_v27  ;;  %v9744_v57 = vld [vmem:[#allocation102_spill] sm:$0xff]  ;;  %v9751_v18 = vld [vmem:[#allocation97_spill] sm:$0xff]  ;;  %v9753_v61 = vld [vmem:[#allocation312_spill] sm:$0xff] }
 0x525   : > { %3991 = vst [vmem:[%s7507_s29 + $0x1e0] sm:$0xff] %v3927_v3  ;;  %v3858_v23 = vadd.f32 %v3794_v46, %v3470_v17  ;;  %v1847_v49 = vmul.f32 %v9726_v55, %v9736_v28  ;;  %v2683_v35 = vadd.f32 %v2619_v29, %v2295_v32  ;;  %v2621_v22 = vmul.f32 %v7076_v15, %v9737_v44  ;;  %v9749_v3 = vld [vmem:[#allocation251_spill] sm:$0xff]  ;;  %v9755_v44 = vld [vmem:[#allocation189_spill] sm:$0xff] }
 0x526   : > { %v3457_v54 = vadd.f32 %v3393_v40, %v3069_v31  ;;  %v3670_v30 = vpop.permute.xlu1 %3669  ;;  %v3395_v47 = vmul.f32 %v7408_v2, %v9738_v50  ;;  %v3914_v38 = vadd.f32 %v8055_v7, %v3843_v43  ;;  %v1523_v12 = vadd.f32 %v1459_v25, %v9739_v36  ;;  %v9756_v50 = vld [vmem:[#allocation136_spill] sm:$0xff]  ;;  %v9758_v36 = vld [vmem:[#allocation381_spill] sm:$0xff] }
 0x527   : > { %v3929_v5 = vadd.f32 %v8055_v7, %v3858_v23  ;;  %v3781_v53 = vmul.f32 %v8034_v20, %v3670_v30  ;;  %v1461_v63 = vmul.f32 %v9731_v59, %v9740_v26  ;;  %v2297_v41 = vadd.f32 %v2233_v11, %v1909_v19  ;;  %v9752_v11 = vld [vmem:[#allocation104_spill] sm:$0xff]  ;;  %v9759_v26 = vld [vmem:[#allocation190_spill] sm:$0xff] }
 0x528   : > { %v2235_v8 = vmul.f32 %v9723_v4, %v9741_v1  ;;  %v1077_v58 = vmul.f32 %v9743_v21, %v9742_v14  ;;  %v3071_v37 = vadd.f32 %v3007_v16, %v2683_v35  ;;  %v3009_v56 = vmul.f32 %v7365_v10, %v9744_v57  ;;  %3978 = vst [vmem:[%s7507_s29 + $0x178] sm:$0xff] %v3914_v38  ;;  %v9754_v23 = vld [vmem:[#allocation436_spill] sm:$0xff]  ;;  %v9757_v38 = vld [vmem:[#allocation253_spill] sm:$0xff]  ;;  %v9760_v1 = vld [vmem:[#allocation106_spill] sm:$0xff] }
 0x529   : > { %3993 = vst [vmem:[%s7507_s29 + $0x1f0] sm:$0xff] %v3929_v5  ;;  %v3845_v62 = vadd.f32 %v3781_v53, %v3457_v54  ;;  %v1911_v52 = vadd.f32 %v1847_v49, %v1523_v12  ;;  %v1849_v34 = vmul.f32 %v9726_v55, %v9745_v13  ;;  %v2685_v9 = vadd.f32 %v2621_v22, %v2297_v41 }
 0x52a   : > { %v2623_v24 = vmul.f32 %v7076_v15, %v9746_v39  ;;  %v3678_v29 = vpop.permute.xlu1 %3677  ;;  %v3459_v27 = vadd.f32 %v3395_v47, %v3071_v37  ;;  %v3397_v40 = vmul.f32 %v7408_v2, %v9747_v45  ;;  %v1525_v0 = vadd.f32 %v1461_v63, %v9748_v60  ;;  %v9761_v37 = vld [vmem:[#allocation314_spill] sm:$0xff]  ;;  %v9766_v60 = vld [vmem:[#allocation99_spill] sm:$0xff] }
 0x52b   : > { %v3916_v17 = vadd.f32 %v8055_v7, %v3845_v62  ;;  %v3783_v51 = vmul.f32 %v8034_v20, %v3678_v29  ;;  %v1463_v33 = vmul.f32 %v9731_v59, %v9749_v3  ;;  %v2299_v46 = vadd.f32 %v2235_v8, %v1911_v52  ;;  %v9762_v62 = vld [vmem:[#allocation438_spill] sm:$0xff] }
 0x52c   : > { %v2237_v25 = vmul.f32 %v9723_v4, %v9750_v42  ;;  %v1141_v32 = vadd.f32 %v1077_v58, %v9751_v18  ;;  %v3073_v48 = vadd.f32 %v3009_v56, %v2685_v9  ;;  %v3011_v31 = vmul.f32 %v7365_v10, %v9752_v11  ;;  %v9763_v9 = vld [vmem:[#allocation94_spill] sm:$0xff]  ;;  %v9768_v18 = vld [vmem:[#allocation316_spill] sm:$0xff] }
 0x52d   : > { %3980 = vst [vmem:[%s7507_s29 + $0x188] sm:$0xff] %v3916_v17  ;;  %v3847_v6 = vadd.f32 %v3783_v51, %v3459_v27  ;;  %v1913_v19 = vadd.f32 %v1849_v34, %v1525_v0  ;;  %v1851_v16 = vmul.f32 %v9726_v55, %v9753_v61  ;;  %v2687_v43 = vadd.f32 %v2623_v24, %v2299_v46  ;;  %v9764_v27 = vld [vmem:[#allocation255_spill] sm:$0xff]  ;;  %v9769_v11 = vld [vmem:[#allocation440_spill] sm:$0xff] }
 0x52e   : > { %v2625_v28 = vmul.f32 %v7076_v15, %v9754_v23  ;;  %v3686_v49 = vpop.permute.xlu1 %3685  ;;  %v3461_v35 = vadd.f32 %v3397_v40, %v3073_v48  ;;  %v3399_v22 = vmul.f32 %v7408_v2, %v9755_v44  ;;  %v1527_v47 = vadd.f32 %v1463_v33, %v9756_v50  ;;  %v9765_v17 = vld [vmem:[#allocation383_spill] sm:$0xff]  ;;  %v9767_v33 = vld [vmem:[#allocation108_spill] sm:$0xff]  ;;  %v9772_v44 = vld [vmem:[#allocation110_spill] sm:$0xff] }
 0x52f   : > { %v3918_v54 = vadd.f32 %v8055_v7, %v3847_v6  ;;  %v3785_v30 = vmul.f32 %v8034_v20, %v3686_v49  ;;  %v1465_v5 = vmul.f32 %v9731_v59, %v9757_v38  ;;  %v2301_v53 = vadd.f32 %v2237_v25, %v1913_v19  ;;  %v9770_v19 = vld [vmem:[#allocation197_spill] sm:$0xff] }
 0x530   : > { %v2239_v12 = vmul.f32 %v9723_v4, %v9758_v36  ;;  %v1079_v63 = vmul.f32 %v9743_v21, %v9759_v26  ;;  %v3075_v41 = vadd.f32 %v3011_v31, %v2687_v43  ;;  %v3013_v8 = vmul.f32 %v7365_v10, %v9760_v1  ;;  %v9771_v49 = vld [vmem:[#allocation385_spill] sm:$0xff]  ;;  %v9774_v36 = vld [vmem:[#allocation100_spill] sm:$0xff]  ;;  %v9775_v1 = vld [vmem:[#allocation115_spill] sm:$0xff] }
 0x531   : > { %3982 = vst [vmem:[%s7507_s29 + $0x198] sm:$0xff] %v3918_v54  ;;  %v3849_v14 = vadd.f32 %v3785_v30, %v3461_v35  ;;  %v1915_v58 = vadd.f32 %v1851_v16, %v1527_v47  ;;  %v1853_v57 = vmul.f32 %v9726_v55, %v9761_v37  ;;  %v2689_v56 = vadd.f32 %v2625_v28, %v2301_v53  ;;  %v9773_v47 = vld [vmem:[#allocation442_spill] sm:$0xff] }
 0x532   : > { %v2627_v52 = vmul.f32 %v7076_v15, %v9762_v62  ;;  %v3694_v13 = vpop.permute.xlu1 %3693  ;;  %v3463_v34 = vadd.f32 %v3399_v22, %v3075_v41  ;;  %v3401_v21 = vmul.f32 %v7408_v2, %v9763_v9  ;;  %v1529_v29 = vadd.f32 %v1465_v5, %v1141_v32 }
 0x533   : > { %v3920_v39 = vadd.f32 %v8055_v7, %v3849_v14  ;;  %v3787_v24 = vmul.f32 %v8034_v20, %v3694_v13  ;;  %v1467_v45 = vmul.f32 %v9731_v59, %v9764_v27  ;;  %v2303_v40 = vadd.f32 %v2239_v12, %v1915_v58 }
 0x534   : > { %v2241_v51 = vmul.f32 %v9723_v4, %v9765_v17  ;;  %v1143_v0 = vadd.f32 %v1079_v63, %v9766_v60  ;;  %v3077_v3 = vadd.f32 %v3013_v8, %v2689_v56  ;;  %v3015_v46 = vmul.f32 %v7365_v10, %v9767_v33 }
 0x535   : > { %3984 = vst [vmem:[%s7507_s29 + $0x1a8] sm:$0xff] %v3920_v39  ;;  %v3851_v42 = vadd.f32 %v3787_v24, %v3463_v34  ;;  %v1917_v25 = vadd.f32 %v1853_v57, %v1529_v29  ;;  %v1855_v32 = vmul.f32 %v9726_v55, %v9768_v18  ;;  %v2691_v48 = vadd.f32 %v2627_v52, %v2303_v40  ;;  %v9776_v57 = vld [vmem:[#allocation4_spill] sm:$0xff] }
 0x536   : > { %v2629_v59 = vmul.f32 %v7076_v15, %v9769_v11  ;;  %v3702_v31 = vpop.permute.xlu1 %3701  ;;  %v3465_v6 = vadd.f32 %v3401_v21, %v3077_v3  ;;  %v3403_v61 = vmul.f32 %v7408_v2, %v9770_v19  ;;  %v1531_v23 = vadd.f32 %v1467_v45, %v1143_v0 }
 0x537   : > { %v3922_v16 = vadd.f32 %v8055_v7, %v3851_v42  ;;  %v3789_v43 = vmul.f32 %v8034_v20, %v3702_v31  ;;  %v2305_v28 = vadd.f32 %v2241_v51, %v1917_v25  ;;  %v2243_v35 = vmul.f32 %v9723_v4, %v9771_v49 }
 0x538   : > { %v3079_v55 = vadd.f32 %v3015_v46, %v2691_v48  ;;  %v3017_v22 = vmul.f32 %v7365_v10, %v9772_v44  ;;  %v1919_v30 = vadd.f32 %v1855_v32, %v1531_v23  ;;  %v2631_v38 = vmul.f32 %v7076_v15, %v9773_v47 }
 0x539   : > { %3986 = vst [vmem:[%s7507_s29 + $0x1b8] sm:$0xff] %v3922_v16  ;;  %v3853_v54 = vadd.f32 %v3789_v43, %v3465_v6  ;;  %v2693_v50 = vadd.f32 %v2629_v59, %v2305_v28  ;;  %v3405_v12 = vmul.f32 %v7408_v2, %v9774_v36  ;;  %v3019_v8 = vmul.f32 %v7365_v10, %v9775_v1 }
 0x53a   : > { %v3710_v5 = vpop.permute.xlu1 %3709  ;;  %v3467_v53 = vadd.f32 %v3403_v61, %v3079_v55  ;;  %v2307_v63 = vadd.f32 %v2243_v35, %v1919_v30  ;;  %v3407_v56 = vmul.f32 %v7408_v2, %v9776_v57 }
 0x53b   : > { %v3924_v4 = vadd.f32 %v8055_v7, %v3853_v54  ;;  %v3791_v26 = vmul.f32 %v8034_v20, %v3710_v5  ;;  %v3081_v41 = vadd.f32 %v3017_v22, %v2693_v50 }
 0x53c   : > { %v2695_v58 = vadd.f32 %v2631_v38, %v2307_v63 }
 0x53d   : > { %3988 = vst [vmem:[%s7507_s29 + $0x1c8] sm:$0xff] %v3924_v4  ;;  %v3855_v14 = vadd.f32 %v3791_v26, %v3467_v53  ;;  %v3469_v37 = vadd.f32 %v3405_v12, %v3081_v41 }
 0x53e   : > { %v3718_v15 = vpop.permute.xlu1 %3717  ;;  %v3083_v13 = vadd.f32 %v3019_v8, %v2695_v58 }
 0x53f   : > { %v3926_v62 = vadd.f32 %v8055_v7, %v3855_v14  ;;  %v3793_v52 = vmul.f32 %v8034_v20, %v3718_v15 }
 0x540   : > { %v3471_v21 = vadd.f32 %v3407_v56, %v3083_v13 }
 0x541   : > { %3990 = vst [vmem:[%s7507_s29 + $0x1d8] sm:$0xff] %v3926_v62  ;;  %v3857_v34 = vadd.f32 %v3793_v52, %v3469_v37 }
 0x542   : > { %v3726_v9 = vpop.permute.xlu1 %3725 }
 0x543   : > { %v3928_v10 = vadd.f32 %v8055_v7, %v3857_v34  ;;  %v3795_v39 = vmul.f32 %v8034_v20, %v3726_v9 }
 0x545   : > { %3992 = vst [vmem:[%s7507_s29 + $0x1e8] sm:$0xff] %v3928_v10  ;;  %v3859_v24 = vadd.f32 %v3795_v39, %v3471_v21 }
 0x547   : > { %v3930_v29 = vadd.f32 %v8055_v7, %v3859_v24 }
 0x549   : > { %3994 = vst [vmem:[%s7507_s29 + $0x1f8] sm:$0xff] %v3930_v29 }
 0x54a PF: > { %s13_s12 = sadd.s32 1, %s4108_s12  }
 0x54b   : > { %p10_p4 = scmp.ge.s32.totalorder %s13_s12, 10  }
 0x54d   :  { %12 = sbr.rel (!%p10_p4) target bundleno = 1 (0x1), region = 62 }

</bundles_post_ra>
